<compile_context>
chip_gen: v7x
topology: tpu7x:2x2x1
jax: 0.10.0
libtpu: 0.0.40
codegen_flags: <defaults>
</compile_context>

<pallas_src>
import functools

import jax
import jax.numpy as jnp
from jax import lax
from jax.experimental import pallas as pl
from jax.experimental.pallas import tpu as pltpu


def _round_up(x, m):
    return (x + m - 1) // m * m


def _largest_divisor_leq(n, cap):
    for d in range(min(n, cap), 0, -1):
        if n % d == 0:
            return d
    return 1


def _vmem_capacity_bytes():
    try:
        cap = int(pltpu.get_tpu_info().vmem_capacity_bytes)
        if cap > 0:
            return cap
    except Exception:
        pass
    return 64 * 1024 * 1024  # conservative default (v7x per-TensorCore VMEM)


def lstm_fc_kernel(x_ref, wih_ref, whh_ref, b_ref, h0_ref, c0_ref,
                   fcw_ref, fcb_ref,
                   out_ref, hn_ref, cn_ref,
                   h_sc, c_sc, xw_sc, hseq_sc,
                   *, seq_len, masked, batch_major_out):
    """One (batch_block, time_block) tile of fused LSTM + output Linear.

    x_ref:   (Tt, Bb, Ep)   embedded inputs (compute dtype)
    wih_ref: (Ep, 4*Hp)     input->gate weights (transposed, gate order i,f,o,g)
    whh_ref: (Hp, 4*Hp)     hidden->gate weights (transposed, gate order i,f,o,g)
    b_ref:   (1, 4*Hp)      combined bias b_ih + b_hh (f32)
    h0/c0:   (Bb, Hp)       initial state (f32)
    fcw_ref: (Hp, Op), fcb_ref: (1, Op)
    out_ref: (Bb, Tt, Op) if batch_major_out else (Tt, Bb, Op)
    hn/cn:   (Bb, Hp)       final state (written only on the last time block)
    """
    Tt, Bb, Ep = x_ref.shape
    Hp = h0_ref.shape[1]
    Op = out_ref.shape[-1]

    # (re)initialise the recurrent state at the first time block of a batch block
    @pl.when(pl.program_id(1) == 0)
    def _():
        h_sc[...] = h0_ref[...]
        c_sc[...] = c0_ref[...]

    # ---- time-invariant input projection, hoisted out of the recurrence ----
    x2d = x_ref[...].reshape(Tt * Bb, Ep)
    xw = jnp.dot(x2d, wih_ref[...], preferred_element_type=jnp.float32)
    xw_sc[...] = (xw + b_ref[...]).reshape(Tt, Bb, 4 * Hp)

    whh = whh_ref[...]                      # loop-invariant weight load
    t_base = pl.program_id(1) * Tt          # global time offset of this tile

    def step(t, carry):
        h, c = carry
        gates = xw_sc[t] + jnp.dot(h.astype(whh.dtype), whh,
                                   preferred_element_type=jnp.float32)
        # gate order (i, f, o, g): three sigmoid gates as one contiguous EUP slab
        sig = jax.nn.sigmoid(gates[:, :3 * Hp])
        i_g = sig[:, 0 * Hp:1 * Hp]
        f_g = sig[:, 1 * Hp:2 * Hp]
        o_g = sig[:, 2 * Hp:3 * Hp]
        g_g = jnp.tanh(gates[:, 3 * Hp:4 * Hp])
        c_new = f_g * c + i_g * g_g
        h_new = o_g * jnp.tanh(c_new)
        if masked:  # static: only when T was padded up to a multiple of Tt
            valid = (t_base + t) < seq_len
            h_new = jnp.where(valid, h_new, h)
            c_new = jnp.where(valid, c_new, c)
        hseq_sc[t] = h_new.astype(hseq_sc.dtype)   # lane-dense (Bb, Hp) store
        return (h_new, c_new)

    # adaptive unroll: don't blow the vreg file when the per-step gates are large
    gate_bytes = Bb * 4 * Hp * 4
    if gate_bytes > 128 * 1024:
        unroll = 1
    elif gate_bytes > 64 * 1024:
        unroll = 2
    else:
        unroll = Tt if Tt <= 8 else 4

    h_fin, c_fin = lax.fori_loop(0, Tt, step, (h_sc[...], c_sc[...]),
                                 unroll=unroll)
    h_sc[...] = h_fin
    c_sc[...] = c_fin

    # ---- batched output projection, hoisted out of the recurrence ----
    fcw = fcw_ref[...]
    hseq = hseq_sc[...].reshape(Tt * Bb, Hp).astype(fcw.dtype)
    y = jnp.dot(hseq, fcw, preferred_element_type=jnp.float32) + fcb_ref[...]
    y = y.reshape(Tt, Bb, Op)
    if batch_major_out:
        # leading-dim swap in VMEM (lane dim preserved) -> no HBM transpose later
        out_ref[...] = pltpu.einshape("tbo->bto", y).astype(out_ref.dtype)
    else:
        out_ref[...] = y.astype(out_ref.dtype)

    # final state only needs to reach HBM once per batch block
    @pl.when(pl.program_id(1) == pl.num_programs(1) - 1)
    def _():
        hn_ref[...] = h_fin
        cn_ref[...] = c_fin


def _pack_gates(w, H, Hp, axis):
    """Repack the PyTorch (i,f,g,o) gate axis into (i,f,o,g), each padded to Hp."""
    order = (0, 1, 3, 2)  # i, f, o, g  (sigmoid gates contiguous, tanh last)
    parts = []
    for k in order:
        g = lax.slice_in_dim(w, k * H, (k + 1) * H, axis=axis)
        pad = [(0, 0)] * w.ndim
        pad[axis] = (0, Hp - H)
        parts.append(jnp.pad(g, pad))
    return jnp.concatenate(parts, axis=axis)


def _const_spec(shape, single_buffer):
    """BlockSpec for a grid-invariant (weight) input; single-buffered if possible."""
    imap = lambda bi, ti: (0, 0)
    if single_buffer and hasattr(pl, "Buffered"):
        return pl.BlockSpec(shape, imap, pipeline_mode=pl.Buffered(1))
    return pl.BlockSpec(shape, imap)


def _choose_tiles(T, Bp, Ep, Hp, Op, cb, budget):
    """Pick (Bb, Tt, Tp) from an explicit VMEM budget (bytes)."""
    # prefer a large Bb (M dim of the serial h@W_hh matmul), up to 256
    Bb = 16 * _largest_divisor_leq(Bp // 16, 256 // 16)
    if Bp // Bb == 1 and Bp >= 256:
        # large batch on one block: split so the "parallel" axis can use both cores
        Bb = 16 * _largest_divisor_leq(Bp // 16, max(1, (Bp // 16) // 2))
    while True:
        fixed = (Ep * 4 * Hp + Hp * 4 * Hp + Hp * Op) * cb        # weights (x1 buf)
        fixed += 8 * 4 * Hp * 4 + 8 * Op * 4                      # biases (padded rows)
        fixed += 4 * 2 * Bb * Hp * 4                              # h0/c0 in + hn/cn out
        fixed += 2 * Bb * Hp * 4                                  # h_sc, c_sc
        per_t = (2 * Bb * Ep * cb                                 # x tile (double buf)
                 + 2 * Bb * Op * 4                                # out tile f32 (double buf)
                 + Bb * 4 * Hp * 4                                # xw_sc (f32)
                 + Bb * Hp * cb)                                  # hseq_sc (compute dtype)
        tt_max = (budget - fixed) // per_t
        if tt_max >= 1 or Bb <= 16:
            break
        Bb = 16 * _largest_divisor_leq(Bp // 16, max(1, (Bb // 16) // 2))
    tt_max = max(int(tt_max), 1)
    if tt_max >= T:
        Tt = T
    else:
        # when T gets padded, Tt must be a multiple of 8 (second-minor dim of the
        # batch-major output block); cap for pipelining granularity
        Tt = max(8, min(256, (tt_max // 8) * 8))
    Tp = _round_up(T, Tt)
    return Bb, Tt, Tp


def make_params(vocab_size, embedding_dim, hidden_size, output_size, seed=0):
    ks = jax.random.split(jax.random.PRNGKey(seed), 7)
    E, H, O, V = embedding_dim, hidden_size, output_size, vocab_size
    scale = 0.1
    emb = scale * jax.random.normal(ks[0], (V, E), jnp.float32)
    emb = emb.at[0].set(0.0)  # padding_idx=0 -> zero row (as in nn.Embedding)
    return dict(
        embedding=emb,
        w_ih=scale * jax.random.normal(ks[1], (4 * H, E), jnp.float32),
        w_hh=scale * jax.random.normal(ks[2], (4 * H, H), jnp.float32),
        b_ih=scale * jax.random.normal(ks[3], (4 * H,), jnp.float32),
        b_hh=scale * jax.random.normal(ks[4], (4 * H,), jnp.float32),
        fc_w=scale * jax.random.normal(ks[5], (O, H), jnp.float32),
        fc_b=scale * jax.random.normal(ks[6], (O,), jnp.float32),
    )


def model_forward(ids, params, h_0=None, c_0=None,
                  compute_dtype=jnp.bfloat16, time_tile=None):
    """Equivalent of Model.forward with rnn_type='LSTM', bidirection=False.

    ids: (B, T) int32.  Returns (out, (h_n, c_n)), out (B, T, O), h_n/c_n (1, B, H).
    `compute_dtype` casts only the matmul operands (weights, x, hseq); state and
    gate math stay f32 (accumulation via preferred_element_type=f32).
    """
    B, T = ids.shape
    emb = params["embedding"]
    E = emb.shape[1]
    H = params["w_hh"].shape[1]
    O = params["fc_w"].shape[0]

    # padded, tile-aligned sizes
    Ep = _round_up(E, 128)
    Hp = _round_up(H, 128)
    Op = _round_up(O, 128)
    Bp = _round_up(B, 16)

    # VMEM-budget-driven tiling
    cb = jnp.dtype(compute_dtype).itemsize
    cap = _vmem_capacity_bytes()
    budget = int(cap * 0.60)
    vmem_limit = int(cap * 0.85)
    Bb, Tt, Tp = _choose_tiles(T, Bp, Ep, Hp, Op, cb, budget)
    if time_tile is not None:            # explicit override (used by tests)
        Tt = int(time_tile)
        Tp = _round_up(T, Tt)
    nb, nt = Bp // Bb, Tp // Tt
    masked = (Tp != T)

    # ---- pack / pad parameters (gate order i,f,o,g; lane-aligned slabs) ----
    wih_t = _pack_gates(params["w_ih"].T, H, Hp, axis=1)                # (E, 4Hp)
    wih_t = jnp.pad(wih_t, ((0, Ep - E), (0, 0))).astype(compute_dtype)
    whh_t = _pack_gates(params["w_hh"].T, H, Hp, axis=1)                # (H, 4Hp)
    whh_t = jnp.pad(whh_t, ((0, Hp - H), (0, 0))).astype(compute_dtype)
    bias = _pack_gates((params["b_ih"] + params["b_hh"])[None, :], H, Hp, axis=1)
    bias = bias.astype(jnp.float32)                                     # (1, 4Hp)
    fcw_t = jnp.pad(params["fc_w"].T, ((0, Hp - H), (0, Op - O))).astype(compute_dtype)
    fcb = jnp.pad(params["fc_b"], (0, Op - O))[None, :].astype(jnp.float32)

    # initial state: accept PyTorch-style (1, B, H) or plain (B, H)
    if h_0 is not None and h_0.ndim == 3:
        h_0 = h_0[0]
    if c_0 is not None and c_0.ndim == 3:
        c_0 = c_0[0]
    h0 = jnp.zeros((B, H), jnp.float32) if h_0 is None else h_0.astype(jnp.float32)
    c0 = jnp.zeros((B, H), jnp.float32) if c_0 is None else c_0.astype(jnp.float32)
    h0 = jnp.pad(h0, ((0, Bp - B), (0, Hp - H)))
    c0 = jnp.pad(c0, ((0, Bp - B), (0, Hp - H)))

    # embedding gather straight into time-major layout, padded to (Tp, Bp, Ep)
    # TODO(synk): optionally fuse this gather into the kernel (VMEM-resident table)
    # on 128 MiB-VMEM chips to avoid materializing x in HBM.
    emb_p = jnp.pad(emb, ((0, 0), (0, Ep - E)))
    x_tmaj = jnp.take(emb_p, ids.T, axis=0)
    x_tmaj = jnp.pad(x_tmaj, ((0, Tp - T), (0, Bp - B), (0, 0))).astype(compute_dtype)

    def build(batch_major_out, single_buffer_weights):
        kernel = functools.partial(lstm_fc_kernel, seq_len=T, masked=masked,
                                   batch_major_out=batch_major_out)
        in_specs = [
            pl.BlockSpec((Tt, Bb, Ep), lambda bi, ti: (ti, bi, 0)),      # x tile
            _const_spec((Ep, 4 * Hp), single_buffer_weights),            # W_ih^T
            _const_spec((Hp, 4 * Hp), single_buffer_weights),            # W_hh^T
            _const_spec((1, 4 * Hp), single_buffer_weights),             # bias
            pl.BlockSpec((Bb, Hp), lambda bi, ti: (bi, 0)),              # h0
            pl.BlockSpec((Bb, Hp), lambda bi, ti: (bi, 0)),              # c0
            _const_spec((Hp, Op), single_buffer_weights),                # fc W^T
            _const_spec((1, Op), single_buffer_weights),                 # fc b
        ]
        if batch_major_out:
            out_shape0 = jax.ShapeDtypeStruct((Bp, Tp, Op), jnp.float32)
            out_spec0 = pl.BlockSpec((Bb, Tt, Op), lambda bi, ti: (bi, ti, 0))
        else:
            out_shape0 = jax.ShapeDtypeStruct((Tp, Bp, Op), jnp.float32)
            out_spec0 = pl.BlockSpec((Tt, Bb, Op), lambda bi, ti: (ti, bi, 0))
        return pl.pallas_call(
            kernel,
            out_shape=(
                out_shape0,
                jax.ShapeDtypeStruct((Bp, Hp), jnp.float32),
                jax.ShapeDtypeStruct((Bp, Hp), jnp.float32),
            ),
            grid_spec=pltpu.PrefetchScalarGridSpec(
                num_scalar_prefetch=0,
                grid=(nb, nt),
                in_specs=in_specs,
                out_specs=(
                    out_spec0,
                    pl.BlockSpec((Bb, Hp), lambda bi, ti: (bi, 0)),
                    pl.BlockSpec((Bb, Hp), lambda bi, ti: (bi, 0)),
                ),
                scratch_shapes=[
                    pltpu.VMEM((Bb, Hp), jnp.float32),              # h state
                    pltpu.VMEM((Bb, Hp), jnp.float32),              # c state
                    pltpu.VMEM((Tt, Bb, 4 * Hp), jnp.float32),      # x @ W_ih (+b)
                    pltpu.VMEM((Tt, Bb, Hp), compute_dtype),        # h sequence
                ],
            ),
            compiler_params=pltpu.CompilerParams(
                dimension_semantics=("parallel", "arbitrary"),
                vmem_limit_bytes=vmem_limit,
            ),
        )

    args = (x_tmaj, wih_t, whh_t, bias, h0, c0, fcw_t, fcb)
    # preferred config -> progressively more conservative fallbacks
    configs = [(True, True), (True, False), (False, False)]
    res = None
    last_err = None
    batch_major = True
    for batch_major, single_buf in configs:
        try:
            res = build(batch_major, single_buf)(*args)
            break
        except Exception as e:            # fall back if an optional feature is missing
            last_err = e
            res = None
    if res is None:
        raise last_err
    out_raw, h_n, c_n = res

    if batch_major:
        out = out_raw[:B, :T, :O]
    else:
        out = jnp.transpose(out_raw[:T, :B, :O], (1, 0, 2))
    return out, (h_n[:B, :H][None], c_n[:B, :H][None])


def reference_forward(ids, params, h_0=None, c_0=None):
    """Pure-JAX reference (same math, unpadded, PyTorch gate order) for validation."""
    B, T = ids.shape
    H = params["w_hh"].shape[1]
    x = jnp.take(params["embedding"], ids, axis=0)
    wih_t = params["w_ih"].T
    whh_t = params["w_hh"].T
    b = params["b_ih"] + params["b_hh"]
    h = jnp.zeros((B, H), jnp.float32) if h_0 is None else h_0
    c = jnp.zeros((B, H), jnp.float32) if c_0 is None else c_0

    def step(carry, x_t):
        h, c = carry
        gates = x_t @ wih_t + h @ whh_t + b
        i = jax.nn.sigmoid(gates[:, 0 * H:1 * H])
        f = jax.nn.sigmoid(gates[:, 1 * H:2 * H])
        g = jnp.tanh(gates[:, 2 * H:3 * H])
        o = jax.nn.sigmoid(gates[:, 3 * H:4 * H])
        c_new = f * c + i * g
        h_new = o * jnp.tanh(c_new)
        return (h_new, c_new), h_new

    (h_n, c_n), hs = lax.scan(step, (h, c), jnp.transpose(x, (1, 0, 2)))
    out = jnp.transpose(hs, (1, 0, 2)) @ params["fc_w"].T + params["fc_b"]
    return out, (h_n[None], c_n[None])


if __name__ == "__main__":
    vocab_size, embedding_dim, hidden_size, output_size = 20, 32, 32, 8
    B, T = 2, 8

    params = make_params(vocab_size, embedding_dim, hidden_size, output_size)
    ids = jax.random.randint(jax.random.PRNGKey(0), (B, T), 0, vocab_size,
                             dtype=jnp.int32)

    # f32 path: tight check against the reference
    out, (h_n, c_n) = model_forward(ids, params, compute_dtype=jnp.float32)
    jax.block_until_ready((out, h_n, c_n))
    ref_out, (ref_h, ref_c) = reference_forward(ids, params)
    assert out.shape == (B, T, output_size)
    assert h_n.shape == (1, B, hidden_size) and c_n.shape == (1, B, hidden_size)
    assert jnp.allclose(out, ref_out, atol=1e-5, rtol=1e-5)
    assert jnp.allclose(h_n, ref_h, atol=1e-5, rtol=1e-5)
    assert jnp.allclose(c_n, ref_c, atol=1e-5, rtol=1e-5)

    # time-padded / masked path: T not a multiple of the time tile
    T2 = 12
    ids2 = jax.random.randint(jax.random.PRNGKey(1), (B, T2), 0, vocab_size,
                              dtype=jnp.int32)
    out2, (h2, c2) = model_forward(ids2, params, compute_dtype=jnp.float32,
                                   time_tile=8)
    jax.block_until_ready((out2, h2, c2))
    r_out2, (r_h2, r_c2) = reference_forward(ids2, params)
    assert jnp.allclose(out2, r_out2, atol=1e-5, rtol=1e-5)
    assert jnp.allclose(h2, r_h2, atol=1e-5, rtol=1e-5)
    assert jnp.allclose(c2, r_c2, atol=1e-5, rtol=1e-5)

    # default bf16 MXU-operand path (state / gate math stays f32): loose check
    out_bf, (h_bf, c_bf) = model_forward(ids, params)
    jax.block_until_ready((out_bf, h_bf, c_bf))
    assert jnp.allclose(out_bf, ref_out, atol=5e-2, rtol=5e-2)
    assert jnp.allclose(h_bf, ref_h, atol=5e-2, rtol=5e-2)

    print("KERNEL_OK")
</pallas_src>

<mosaic_0001>
module attributes {stable_mosaic.version = 11 : i64} {
  func.func @lstm_fc_kernel(%arg0: i32, %arg1: i32, %arg2: memref<8x16x128xf32, #tpu.memory_space<vmem>>, %arg3: memref<128x512xf32, #tpu.memory_space<vmem>>, %arg4: memref<128x512xf32, #tpu.memory_space<vmem>>, %arg5: memref<1x512xf32, #tpu.memory_space<vmem>>, %arg6: memref<16x128xf32, #tpu.memory_space<vmem>>, %arg7: memref<16x128xf32, #tpu.memory_space<vmem>>, %arg8: memref<128x128xf32, #tpu.memory_space<vmem>>, %arg9: memref<1x128xf32, #tpu.memory_space<vmem>>, %arg10: memref<16x8x128xf32, #tpu.memory_space<vmem>>, %arg11: memref<16x128xf32, #tpu.memory_space<vmem>>, %arg12: memref<16x128xf32, #tpu.memory_space<vmem>>, %arg13: memref<16x128xf32, #tpu.memory_space<vmem>>, %arg14: memref<16x128xf32, #tpu.memory_space<vmem>>, %arg15: memref<8x16x512xf32, #tpu.memory_space<vmem>>, %arg16: memref<8x16x128xf32, #tpu.memory_space<vmem>>) attributes {dimension_semantics = [#tpu.dimension_semantics<parallel>, #tpu.dimension_semantics<arbitrary>], iteration_bounds = array<i64: 1, 1>, scalar_prefetch = 0 : i64, scratch_operands = 4 : i64, tpu.core_type = #tpu.core_type<tc>, window_params = [{transform_indices = @transform_0, window_bounds = array<i64: 8, 16, 128>}, {pipeline_mode = #tpu.pipeline_mode<synchronous>, transform_indices = @transform_1, window_bounds = array<i64: 128, 512>}, {pipeline_mode = #tpu.pipeline_mode<synchronous>, transform_indices = @transform_2, window_bounds = array<i64: 128, 512>}, {pipeline_mode = #tpu.pipeline_mode<synchronous>, transform_indices = @transform_3, window_bounds = array<i64: 1, 512>}, {transform_indices = @transform_4, window_bounds = array<i64: 16, 128>}, {transform_indices = @transform_5, window_bounds = array<i64: 16, 128>}, {pipeline_mode = #tpu.pipeline_mode<synchronous>, transform_indices = @transform_6, window_bounds = array<i64: 128, 128>}, {pipeline_mode = #tpu.pipeline_mode<synchronous>, transform_indices = @transform_7, window_bounds = array<i64: 1, 128>}, {transform_indices = @transform_8, window_bounds = array<i64: 16, 8, 128>}, {transform_indices = @transform_9, window_bounds = array<i64: 16, 128>}, {transform_indices = @transform_10, window_bounds = array<i64: 16, 128>}]} {
    %c0_i32 = arith.constant 0 : i32
    %0 = arith.cmpi eq, %arg1, %c0_i32 : i32
    %1 = arith.extui %0 : i1 to i32
    %c0_i32_0 = arith.constant 0 : i32
    %2 = arith.cmpi ne, %1, %c0_i32_0 : i32
    scf.if %2 {
      %c0_82 = arith.constant 0 : index
      %c0_83 = arith.constant 0 : index
      %230 = vector.load %arg6[%c0_82, %c0_83] : memref<16x128xf32, #tpu.memory_space<vmem>>, vector<16x128xf32>
      %c0_84 = arith.constant 0 : index
      %c0_85 = arith.constant 0 : index
      %231 = vector.load %arg13[%c0_84, %c0_85] : memref<16x128xf32, #tpu.memory_space<vmem>>, vector<16x128xf32>
      tpu.vector_store %arg13[%c0_84, %c0_85], %230 {strides = array<i32>} : memref<16x128xf32, #tpu.memory_space<vmem>>, vector<16x128xf32>,
      %c0_86 = arith.constant 0 : index
      %c0_87 = arith.constant 0 : index
      %232 = vector.load %arg7[%c0_86, %c0_87] : memref<16x128xf32, #tpu.memory_space<vmem>>, vector<16x128xf32>
      %c0_88 = arith.constant 0 : index
      %c0_89 = arith.constant 0 : index
      %233 = vector.load %arg14[%c0_88, %c0_89] : memref<16x128xf32, #tpu.memory_space<vmem>>, vector<16x128xf32>
      tpu.vector_store %arg14[%c0_88, %c0_89], %232 {strides = array<i32>} : memref<16x128xf32, #tpu.memory_space<vmem>>, vector<16x128xf32>,
    } else {
    }
    %c0 = arith.constant 0 : index
    %c0_1 = arith.constant 0 : index
    %c0_2 = arith.constant 0 : index
    %3 = vector.load %arg2[%c0, %c0_1, %c0_2] : memref<8x16x128xf32, #tpu.memory_space<vmem>>, vector<8x16x128xf32>
    %4 = vector.shape_cast %3 : vector<8x16x128xf32> to vector<128x128xf32>
    %c0_3 = arith.constant 0 : index
    %c0_4 = arith.constant 0 : index
    %5 = vector.load %arg3[%c0_3, %c0_4] : memref<128x512xf32, #tpu.memory_space<vmem>>, vector<128x512xf32>
    %cst = arith.constant dense<0.000000e+00> : vector<128x512xf32>
    %6 = tpu.matmul %4, %5, %cst {dimension_numbers = #tpu.dot_dimension_numbers<[1], [0], [0], [1], [0, 0, 1, 1], [], []>} : vector<128x128xf32>, vector<128x512xf32>, vector<128x512xf32> -> vector<128x512xf32>
    %c0_5 = arith.constant 0 : index
    %c0_6 = arith.constant 0 : index
    %7 = vector.load %arg5[%c0_5, %c0_6] : memref<1x512xf32, #tpu.memory_space<vmem>>, vector<1x512xf32>
    %8 = vector.broadcast %7 : vector<1x512xf32> to vector<128x512xf32>
    %9 = arith.addf %6, %8 : vector<128x512xf32>
    %10 = vector.shape_cast %9 : vector<128x512xf32> to vector<8x16x512xf32>
    %c0_7 = arith.constant 0 : index
    %c0_8 = arith.constant 0 : index
    %c0_9 = arith.constant 0 : index
    %11 = vector.load %arg15[%c0_7, %c0_8, %c0_9] : memref<8x16x512xf32, #tpu.memory_space<vmem>>, vector<8x16x512xf32>
    tpu.vector_store %arg15[%c0_7, %c0_8, %c0_9], %10 {strides = array<i32>} : memref<8x16x512xf32, #tpu.memory_space<vmem>>, vector<8x16x512xf32>,
    %c0_10 = arith.constant 0 : index
    %c0_11 = arith.constant 0 : index
    %12 = vector.load %arg4[%c0_10, %c0_11] : memref<128x512xf32, #tpu.memory_space<vmem>>, vector<128x512xf32>
    %c0_12 = arith.constant 0 : index
    %c0_13 = arith.constant 0 : index
    %13 = vector.load %arg13[%c0_12, %c0_13] : memref<16x128xf32, #tpu.memory_space<vmem>>, vector<16x128xf32>
    %c0_14 = arith.constant 0 : index
    %c0_15 = arith.constant 0 : index
    %14 = vector.load %arg14[%c0_14, %c0_15] : memref<16x128xf32, #tpu.memory_space<vmem>>, vector<16x128xf32>
    %c0_i32_16 = arith.constant 0 : i32
    %15 = arith.index_cast %c0_i32_16 : i32 to index
    %c0_17 = arith.constant 0 : index
    %c0_18 = arith.constant 0 : index
    %16 = vector.load %arg15[%15, %c0_17, %c0_18] : memref<8x16x512xf32, #tpu.memory_space<vmem>>, vector<1x16x512xf32>
    %17 = vector.shape_cast %16 : vector<1x16x512xf32> to vector<16x512xf32>
    %cst_19 = arith.constant dense<0.000000e+00> : vector<16x512xf32>
    %18 = tpu.matmul %13, %12, %cst_19 {dimension_numbers = #tpu.dot_dimension_numbers<[1], [0], [0], [1], [0, 0, 1, 1], [], []>} : vector<16x128xf32>, vector<128x512xf32>, vector<16x512xf32> -> vector<16x512xf32>
    %19 = arith.addf %17, %18 : vector<16x512xf32>
    %20 = vector.extract_strided_slice %19 {offsets = [0, 0], sizes = [16, 384], strides = [1, 1]} : vector<16x512xf32> to vector<16x384xf32>
    %21 = arith.negf %20 : vector<16x384xf32>
    %22 = math.exp %21 : vector<16x384xf32>
    %cst_20 = arith.constant 1.000000e+00 : f32
    %23 = vector.broadcast %cst_20 : f32 to vector<16x384xf32>
    %24 = arith.addf %23, %22 : vector<16x384xf32>
    %25 = arith.divf %23, %24 : vector<16x384xf32>
    %26 = vector.extract_strided_slice %25 {offsets = [0, 0], sizes = [16, 128], strides = [1, 1]} : vector<16x384xf32> to vector<16x128xf32>
    %27 = vector.extract_strided_slice %25 {offsets = [0, 128], sizes = [16, 128], strides = [1, 1]} : vector<16x384xf32> to vector<16x128xf32>
    %28 = vector.extract_strided_slice %25 {offsets = [0, 256], sizes = [16, 128], strides = [1, 1]} : vector<16x384xf32> to vector<16x128xf32>
    %29 = vector.extract_strided_slice %19 {offsets = [0, 384], sizes = [16, 128], strides = [1, 1]} : vector<16x512xf32> to vector<16x128xf32>
    %30 = math.tanh %29 : vector<16x128xf32>
    %31 = arith.mulf %27, %14 : vector<16x128xf32>
    %32 = arith.mulf %26, %30 : vector<16x128xf32>
    %33 = arith.addf %31, %32 : vector<16x128xf32>
    %34 = math.tanh %33 : vector<16x128xf32>
    %35 = arith.mulf %28, %34 : vector<16x128xf32>
    %36 = arith.index_cast %c0_i32_16 : i32 to index
    %c0_21 = arith.constant 0 : index
    %c0_22 = arith.constant 0 : index
    %37 = vector.load %arg16[%36, %c0_21, %c0_22] : memref<8x16x128xf32, #tpu.memory_space<vmem>>, vector<1x16x128xf32>
    %38 = vector.shape_cast %37 : vector<1x16x128xf32> to vector<16x128xf32>
    %39 = vector.shape_cast %35 : vector<16x128xf32> to vector<1x16x128xf32>
    tpu.vector_store %arg16[%36, %c0_21, %c0_22], %39 {strides = array<i32>} : memref<8x16x128xf32, #tpu.memory_space<vmem>>, vector<1x16x128xf32>,
    %c1_i32 = arith.constant 1 : i32
    %40 = arith.index_cast %c1_i32 : i32 to index
    %c0_23 = arith.constant 0 : index
    %c0_24 = arith.constant 0 : index
    %41 = vector.load %arg15[%40, %c0_23, %c0_24] : memref<8x16x512xf32, #tpu.memory_space<vmem>>, vector<1x16x512xf32>
    %42 = vector.shape_cast %41 : vector<1x16x512xf32> to vector<16x512xf32>
    %cst_25 = arith.constant dense<0.000000e+00> : vector<16x512xf32>
    %43 = tpu.matmul %35, %12, %cst_25 {dimension_numbers = #tpu.dot_dimension_numbers<[1], [0], [0], [1], [0, 0, 1, 1], [], []>} : vector<16x128xf32>, vector<128x512xf32>, vector<16x512xf32> -> vector<16x512xf32>
    %44 = arith.addf %42, %43 : vector<16x512xf32>
    %45 = vector.extract_strided_slice %44 {offsets = [0, 0], sizes = [16, 384], strides = [1, 1]} : vector<16x512xf32> to vector<16x384xf32>
    %46 = arith.negf %45 : vector<16x384xf32>
    %47 = math.exp %46 : vector<16x384xf32>
    %cst_26 = arith.constant 1.000000e+00 : f32
    %48 = vector.broadcast %cst_26 : f32 to vector<16x384xf32>
    %49 = arith.addf %48, %47 : vector<16x384xf32>
    %50 = arith.divf %48, %49 : vector<16x384xf32>
    %51 = vector.extract_strided_slice %50 {offsets = [0, 0], sizes = [16, 128], strides = [1, 1]} : vector<16x384xf32> to vector<16x128xf32>
    %52 = vector.extract_strided_slice %50 {offsets = [0, 128], sizes = [16, 128], strides = [1, 1]} : vector<16x384xf32> to vector<16x128xf32>
    %53 = vector.extract_strided_slice %50 {offsets = [0, 256], sizes = [16, 128], strides = [1, 1]} : vector<16x384xf32> to vector<16x128xf32>
    %54 = vector.extract_strided_slice %44 {offsets = [0, 384], sizes = [16, 128], strides = [1, 1]} : vector<16x512xf32> to vector<16x128xf32>
    %55 = math.tanh %54 : vector<16x128xf32>
    %56 = arith.mulf %52, %33 : vector<16x128xf32>
    %57 = arith.mulf %51, %55 : vector<16x128xf32>
    %58 = arith.addf %56, %57 : vector<16x128xf32>
    %59 = math.tanh %58 : vector<16x128xf32>
    %60 = arith.mulf %53, %59 : vector<16x128xf32>
    %61 = arith.index_cast %c1_i32 : i32 to index
    %c0_27 = arith.constant 0 : index
    %c0_28 = arith.constant 0 : index
    %62 = vector.load %arg16[%61, %c0_27, %c0_28] : memref<8x16x128xf32, #tpu.memory_space<vmem>>, vector<1x16x128xf32>
    %63 = vector.shape_cast %62 : vector<1x16x128xf32> to vector<16x128xf32>
    %64 = vector.shape_cast %60 : vector<16x128xf32> to vector<1x16x128xf32>
    tpu.vector_store %arg16[%61, %c0_27, %c0_28], %64 {strides = array<i32>} : memref<8x16x128xf32, #tpu.memory_space<vmem>>, vector<1x16x128xf32>,
    %c2_i32 = arith.constant 2 : i32
    %65 = arith.index_cast %c2_i32 : i32 to index
    %c0_29 = arith.constant 0 : index
    %c0_30 = arith.constant 0 : index
    %66 = vector.load %arg15[%65, %c0_29, %c0_30] : memref<8x16x512xf32, #tpu.memory_space<vmem>>, vector<1x16x512xf32>
    %67 = vector.shape_cast %66 : vector<1x16x512xf32> to vector<16x512xf32>
    %cst_31 = arith.constant dense<0.000000e+00> : vector<16x512xf32>
    %68 = tpu.matmul %60, %12, %cst_31 {dimension_numbers = #tpu.dot_dimension_numbers<[1], [0], [0], [1], [0, 0, 1, 1], [], []>} : vector<16x128xf32>, vector<128x512xf32>, vector<16x512xf32> -> vector<16x512xf32>
    %69 = arith.addf %67, %68 : vector<16x512xf32>
    %70 = vector.extract_strided_slice %69 {offsets = [0, 0], sizes = [16, 384], strides = [1, 1]} : vector<16x512xf32> to vector<16x384xf32>
    %71 = arith.negf %70 : vector<16x384xf32>
    %72 = math.exp %71 : vector<16x384xf32>
    %cst_32 = arith.constant 1.000000e+00 : f32
    %73 = vector.broadcast %cst_32 : f32 to vector<16x384xf32>
    %74 = arith.addf %73, %72 : vector<16x384xf32>
    %75 = arith.divf %73, %74 : vector<16x384xf32>
    %76 = vector.extract_strided_slice %75 {offsets = [0, 0], sizes = [16, 128], strides = [1, 1]} : vector<16x384xf32> to vector<16x128xf32>
    %77 = vector.extract_strided_slice %75 {offsets = [0, 128], sizes = [16, 128], strides = [1, 1]} : vector<16x384xf32> to vector<16x128xf32>
    %78 = vector.extract_strided_slice %75 {offsets = [0, 256], sizes = [16, 128], strides = [1, 1]} : vector<16x384xf32> to vector<16x128xf32>
    %79 = vector.extract_strided_slice %69 {offsets = [0, 384], sizes = [16, 128], strides = [1, 1]} : vector<16x512xf32> to vector<16x128xf32>
    %80 = math.tanh %79 : vector<16x128xf32>
    %81 = arith.mulf %77, %58 : vector<16x128xf32>
    %82 = arith.mulf %76, %80 : vector<16x128xf32>
    %83 = arith.addf %81, %82 : vector<16x128xf32>
    %84 = math.tanh %83 : vector<16x128xf32>
    %85 = arith.mulf %78, %84 : vector<16x128xf32>
    %86 = arith.index_cast %c2_i32 : i32 to index
    %c0_33 = arith.constant 0 : index
    %c0_34 = arith.constant 0 : index
    %87 = vector.load %arg16[%86, %c0_33, %c0_34] : memref<8x16x128xf32, #tpu.memory_space<vmem>>, vector<1x16x128xf32>
    %88 = vector.shape_cast %87 : vector<1x16x128xf32> to vector<16x128xf32>
    %89 = vector.shape_cast %85 : vector<16x128xf32> to vector<1x16x128xf32>
    tpu.vector_store %arg16[%86, %c0_33, %c0_34], %89 {strides = array<i32>} : memref<8x16x128xf32, #tpu.memory_space<vmem>>, vector<1x16x128xf32>,
    %c3_i32 = arith.constant 3 : i32
    %90 = arith.index_cast %c3_i32 : i32 to index
    %c0_35 = arith.constant 0 : index
    %c0_36 = arith.constant 0 : index
    %91 = vector.load %arg15[%90, %c0_35, %c0_36] : memref<8x16x512xf32, #tpu.memory_space<vmem>>, vector<1x16x512xf32>
    %92 = vector.shape_cast %91 : vector<1x16x512xf32> to vector<16x512xf32>
    %cst_37 = arith.constant dense<0.000000e+00> : vector<16x512xf32>
    %93 = tpu.matmul %85, %12, %cst_37 {dimension_numbers = #tpu.dot_dimension_numbers<[1], [0], [0], [1], [0, 0, 1, 1], [], []>} : vector<16x128xf32>, vector<128x512xf32>, vector<16x512xf32> -> vector<16x512xf32>
    %94 = arith.addf %92, %93 : vector<16x512xf32>
    %95 = vector.extract_strided_slice %94 {offsets = [0, 0], sizes = [16, 384], strides = [1, 1]} : vector<16x512xf32> to vector<16x384xf32>
    %96 = arith.negf %95 : vector<16x384xf32>
    %97 = math.exp %96 : vector<16x384xf32>
    %cst_38 = arith.constant 1.000000e+00 : f32
    %98 = vector.broadcast %cst_38 : f32 to vector<16x384xf32>
    %99 = arith.addf %98, %97 : vector<16x384xf32>
    %100 = arith.divf %98, %99 : vector<16x384xf32>
    %101 = vector.extract_strided_slice %100 {offsets = [0, 0], sizes = [16, 128], strides = [1, 1]} : vector<16x384xf32> to vector<16x128xf32>
    %102 = vector.extract_strided_slice %100 {offsets = [0, 128], sizes = [16, 128], strides = [1, 1]} : vector<16x384xf32> to vector<16x128xf32>
    %103 = vector.extract_strided_slice %100 {offsets = [0, 256], sizes = [16, 128], strides = [1, 1]} : vector<16x384xf32> to vector<16x128xf32>
    %104 = vector.extract_strided_slice %94 {offsets = [0, 384], sizes = [16, 128], strides = [1, 1]} : vector<16x512xf32> to vector<16x128xf32>
    %105 = math.tanh %104 : vector<16x128xf32>
    %106 = arith.mulf %102, %83 : vector<16x128xf32>
    %107 = arith.mulf %101, %105 : vector<16x128xf32>
    %108 = arith.addf %106, %107 : vector<16x128xf32>
    %109 = math.tanh %108 : vector<16x128xf32>
    %110 = arith.mulf %103, %109 : vector<16x128xf32>
    %111 = arith.index_cast %c3_i32 : i32 to index
    %c0_39 = arith.constant 0 : index
    %c0_40 = arith.constant 0 : index
    %112 = vector.load %arg16[%111, %c0_39, %c0_40] : memref<8x16x128xf32, #tpu.memory_space<vmem>>, vector<1x16x128xf32>
    %113 = vector.shape_cast %112 : vector<1x16x128xf32> to vector<16x128xf32>
    %114 = vector.shape_cast %110 : vector<16x128xf32> to vector<1x16x128xf32>
    tpu.vector_store %arg16[%111, %c0_39, %c0_40], %114 {strides = array<i32>} : memref<8x16x128xf32, #tpu.memory_space<vmem>>, vector<1x16x128xf32>,
    %c4_i32 = arith.constant 4 : i32
    %115 = arith.index_cast %c4_i32 : i32 to index
    %c0_41 = arith.constant 0 : index
    %c0_42 = arith.constant 0 : index
    %116 = vector.load %arg15[%115, %c0_41, %c0_42] : memref<8x16x512xf32, #tpu.memory_space<vmem>>, vector<1x16x512xf32>
    %117 = vector.shape_cast %116 : vector<1x16x512xf32> to vector<16x512xf32>
    %cst_43 = arith.constant dense<0.000000e+00> : vector<16x512xf32>
    %118 = tpu.matmul %110, %12, %cst_43 {dimension_numbers = #tpu.dot_dimension_numbers<[1], [0], [0], [1], [0, 0, 1, 1], [], []>} : vector<16x128xf32>, vector<128x512xf32>, vector<16x512xf32> -> vector<16x512xf32>
    %119 = arith.addf %117, %118 : vector<16x512xf32>
    %120 = vector.extract_strided_slice %119 {offsets = [0, 0], sizes = [16, 384], strides = [1, 1]} : vector<16x512xf32> to vector<16x384xf32>
    %121 = arith.negf %120 : vector<16x384xf32>
    %122 = math.exp %121 : vector<16x384xf32>
    %cst_44 = arith.constant 1.000000e+00 : f32
    %123 = vector.broadcast %cst_44 : f32 to vector<16x384xf32>
    %124 = arith.addf %123, %122 : vector<16x384xf32>
    %125 = arith.divf %123, %124 : vector<16x384xf32>
    %126 = vector.extract_strided_slice %125 {offsets = [0, 0], sizes = [16, 128], strides = [1, 1]} : vector<16x384xf32> to vector<16x128xf32>
    %127 = vector.extract_strided_slice %125 {offsets = [0, 128], sizes = [16, 128], strides = [1, 1]} : vector<16x384xf32> to vector<16x128xf32>
    %128 = vector.extract_strided_slice %125 {offsets = [0, 256], sizes = [16, 128], strides = [1, 1]} : vector<16x384xf32> to vector<16x128xf32>
    %129 = vector.extract_strided_slice %119 {offsets = [0, 384], sizes = [16, 128], strides = [1, 1]} : vector<16x512xf32> to vector<16x128xf32>
    %130 = math.tanh %129 : vector<16x128xf32>
    %131 = arith.mulf %127, %108 : vector<16x128xf32>
    %132 = arith.mulf %126, %130 : vector<16x128xf32>
    %133 = arith.addf %131, %132 : vector<16x128xf32>
    %134 = math.tanh %133 : vector<16x128xf32>
    %135 = arith.mulf %128, %134 : vector<16x128xf32>
    %136 = arith.index_cast %c4_i32 : i32 to index
    %c0_45 = arith.constant 0 : index
    %c0_46 = arith.constant 0 : index
    %137 = vector.load %arg16[%136, %c0_45, %c0_46] : memref<8x16x128xf32, #tpu.memory_space<vmem>>, vector<1x16x128xf32>
    %138 = vector.shape_cast %137 : vector<1x16x128xf32> to vector<16x128xf32>
    %139 = vector.shape_cast %135 : vector<16x128xf32> to vector<1x16x128xf32>
    tpu.vector_store %arg16[%136, %c0_45, %c0_46], %139 {strides = array<i32>} : memref<8x16x128xf32, #tpu.memory_space<vmem>>, vector<1x16x128xf32>,
    %c5_i32 = arith.constant 5 : i32
    %140 = arith.index_cast %c5_i32 : i32 to index
    %c0_47 = arith.constant 0 : index
    %c0_48 = arith.constant 0 : index
    %141 = vector.load %arg15[%140, %c0_47, %c0_48] : memref<8x16x512xf32, #tpu.memory_space<vmem>>, vector<1x16x512xf32>
    %142 = vector.shape_cast %141 : vector<1x16x512xf32> to vector<16x512xf32>
    %cst_49 = arith.constant dense<0.000000e+00> : vector<16x512xf32>
    %143 = tpu.matmul %135, %12, %cst_49 {dimension_numbers = #tpu.dot_dimension_numbers<[1], [0], [0], [1], [0, 0, 1, 1], [], []>} : vector<16x128xf32>, vector<128x512xf32>, vector<16x512xf32> -> vector<16x512xf32>
    %144 = arith.addf %142, %143 : vector<16x512xf32>
    %145 = vector.extract_strided_slice %144 {offsets = [0, 0], sizes = [16, 384], strides = [1, 1]} : vector<16x512xf32> to vector<16x384xf32>
    %146 = arith.negf %145 : vector<16x384xf32>
    %147 = math.exp %146 : vector<16x384xf32>
    %cst_50 = arith.constant 1.000000e+00 : f32
    %148 = vector.broadcast %cst_50 : f32 to vector<16x384xf32>
    %149 = arith.addf %148, %147 : vector<16x384xf32>
    %150 = arith.divf %148, %149 : vector<16x384xf32>
    %151 = vector.extract_strided_slice %150 {offsets = [0, 0], sizes = [16, 128], strides = [1, 1]} : vector<16x384xf32> to vector<16x128xf32>
    %152 = vector.extract_strided_slice %150 {offsets = [0, 128], sizes = [16, 128], strides = [1, 1]} : vector<16x384xf32> to vector<16x128xf32>
    %153 = vector.extract_strided_slice %150 {offsets = [0, 256], sizes = [16, 128], strides = [1, 1]} : vector<16x384xf32> to vector<16x128xf32>
    %154 = vector.extract_strided_slice %144 {offsets = [0, 384], sizes = [16, 128], strides = [1, 1]} : vector<16x512xf32> to vector<16x128xf32>
    %155 = math.tanh %154 : vector<16x128xf32>
    %156 = arith.mulf %152, %133 : vector<16x128xf32>
    %157 = arith.mulf %151, %155 : vector<16x128xf32>
    %158 = arith.addf %156, %157 : vector<16x128xf32>
    %159 = math.tanh %158 : vector<16x128xf32>
    %160 = arith.mulf %153, %159 : vector<16x128xf32>
    %161 = arith.index_cast %c5_i32 : i32 to index
    %c0_51 = arith.constant 0 : index
    %c0_52 = arith.constant 0 : index
    %162 = vector.load %arg16[%161, %c0_51, %c0_52] : memref<8x16x128xf32, #tpu.memory_space<vmem>>, vector<1x16x128xf32>
    %163 = vector.shape_cast %162 : vector<1x16x128xf32> to vector<16x128xf32>
    %164 = vector.shape_cast %160 : vector<16x128xf32> to vector<1x16x128xf32>
    tpu.vector_store %arg16[%161, %c0_51, %c0_52], %164 {strides = array<i32>} : memref<8x16x128xf32, #tpu.memory_space<vmem>>, vector<1x16x128xf32>,
    %c6_i32 = arith.constant 6 : i32
    %165 = arith.index_cast %c6_i32 : i32 to index
    %c0_53 = arith.constant 0 : index
    %c0_54 = arith.constant 0 : index
    %166 = vector.load %arg15[%165, %c0_53, %c0_54] : memref<8x16x512xf32, #tpu.memory_space<vmem>>, vector<1x16x512xf32>
    %167 = vector.shape_cast %166 : vector<1x16x512xf32> to vector<16x512xf32>
    %cst_55 = arith.constant dense<0.000000e+00> : vector<16x512xf32>
    %168 = tpu.matmul %160, %12, %cst_55 {dimension_numbers = #tpu.dot_dimension_numbers<[1], [0], [0], [1], [0, 0, 1, 1], [], []>} : vector<16x128xf32>, vector<128x512xf32>, vector<16x512xf32> -> vector<16x512xf32>
    %169 = arith.addf %167, %168 : vector<16x512xf32>
    %170 = vector.extract_strided_slice %169 {offsets = [0, 0], sizes = [16, 384], strides = [1, 1]} : vector<16x512xf32> to vector<16x384xf32>
    %171 = arith.negf %170 : vector<16x384xf32>
    %172 = math.exp %171 : vector<16x384xf32>
    %cst_56 = arith.constant 1.000000e+00 : f32
    %173 = vector.broadcast %cst_56 : f32 to vector<16x384xf32>
    %174 = arith.addf %173, %172 : vector<16x384xf32>
    %175 = arith.divf %173, %174 : vector<16x384xf32>
    %176 = vector.extract_strided_slice %175 {offsets = [0, 0], sizes = [16, 128], strides = [1, 1]} : vector<16x384xf32> to vector<16x128xf32>
    %177 = vector.extract_strided_slice %175 {offsets = [0, 128], sizes = [16, 128], strides = [1, 1]} : vector<16x384xf32> to vector<16x128xf32>
    %178 = vector.extract_strided_slice %175 {offsets = [0, 256], sizes = [16, 128], strides = [1, 1]} : vector<16x384xf32> to vector<16x128xf32>
    %179 = vector.extract_strided_slice %169 {offsets = [0, 384], sizes = [16, 128], strides = [1, 1]} : vector<16x512xf32> to vector<16x128xf32>
    %180 = math.tanh %179 : vector<16x128xf32>
    %181 = arith.mulf %177, %158 : vector<16x128xf32>
    %182 = arith.mulf %176, %180 : vector<16x128xf32>
    %183 = arith.addf %181, %182 : vector<16x128xf32>
    %184 = math.tanh %183 : vector<16x128xf32>
    %185 = arith.mulf %178, %184 : vector<16x128xf32>
    %186 = arith.index_cast %c6_i32 : i32 to index
    %c0_57 = arith.constant 0 : index
    %c0_58 = arith.constant 0 : index
    %187 = vector.load %arg16[%186, %c0_57, %c0_58] : memref<8x16x128xf32, #tpu.memory_space<vmem>>, vector<1x16x128xf32>
    %188 = vector.shape_cast %187 : vector<1x16x128xf32> to vector<16x128xf32>
    %189 = vector.shape_cast %185 : vector<16x128xf32> to vector<1x16x128xf32>
    tpu.vector_store %arg16[%186, %c0_57, %c0_58], %189 {strides = array<i32>} : memref<8x16x128xf32, #tpu.memory_space<vmem>>, vector<1x16x128xf32>,
    %c7_i32 = arith.constant 7 : i32
    %190 = arith.index_cast %c7_i32 : i32 to index
    %c0_59 = arith.constant 0 : index
    %c0_60 = arith.constant 0 : index
    %191 = vector.load %arg15[%190, %c0_59, %c0_60] : memref<8x16x512xf32, #tpu.memory_space<vmem>>, vector<1x16x512xf32>
    %192 = vector.shape_cast %191 : vector<1x16x512xf32> to vector<16x512xf32>
    %cst_61 = arith.constant dense<0.000000e+00> : vector<16x512xf32>
    %193 = tpu.matmul %185, %12, %cst_61 {dimension_numbers = #tpu.dot_dimension_numbers<[1], [0], [0], [1], [0, 0, 1, 1], [], []>} : vector<16x128xf32>, vector<128x512xf32>, vector<16x512xf32> -> vector<16x512xf32>
    %194 = arith.addf %192, %193 : vector<16x512xf32>
    %195 = vector.extract_strided_slice %194 {offsets = [0, 0], sizes = [16, 384], strides = [1, 1]} : vector<16x512xf32> to vector<16x384xf32>
    %196 = arith.negf %195 : vector<16x384xf32>
    %197 = math.exp %196 : vector<16x384xf32>
    %cst_62 = arith.constant 1.000000e+00 : f32
    %198 = vector.broadcast %cst_62 : f32 to vector<16x384xf32>
    %199 = arith.addf %198, %197 : vector<16x384xf32>
    %200 = arith.divf %198, %199 : vector<16x384xf32>
    %201 = vector.extract_strided_slice %200 {offsets = [0, 0], sizes = [16, 128], strides = [1, 1]} : vector<16x384xf32> to vector<16x128xf32>
    %202 = vector.extract_strided_slice %200 {offsets = [0, 128], sizes = [16, 128], strides = [1, 1]} : vector<16x384xf32> to vector<16x128xf32>
    %203 = vector.extract_strided_slice %200 {offsets = [0, 256], sizes = [16, 128], strides = [1, 1]} : vector<16x384xf32> to vector<16x128xf32>
    %204 = vector.extract_strided_slice %194 {offsets = [0, 384], sizes = [16, 128], strides = [1, 1]} : vector<16x512xf32> to vector<16x128xf32>
    %205 = math.tanh %204 : vector<16x128xf32>
    %206 = arith.mulf %202, %183 : vector<16x128xf32>
    %207 = arith.mulf %201, %205 : vector<16x128xf32>
    %208 = arith.addf %206, %207 : vector<16x128xf32>
    %209 = math.tanh %208 : vector<16x128xf32>
    %210 = arith.mulf %203, %209 : vector<16x128xf32>
    %211 = arith.index_cast %c7_i32 : i32 to index
    %c0_63 = arith.constant 0 : index
    %c0_64 = arith.constant 0 : index
    %212 = vector.load %arg16[%211, %c0_63, %c0_64] : memref<8x16x128xf32, #tpu.memory_space<vmem>>, vector<1x16x128xf32>
    %213 = vector.shape_cast %212 : vector<1x16x128xf32> to vector<16x128xf32>
    %214 = vector.shape_cast %210 : vector<16x128xf32> to vector<1x16x128xf32>
    tpu.vector_store %arg16[%211, %c0_63, %c0_64], %214 {strides = array<i32>} : memref<8x16x128xf32, #tpu.memory_space<vmem>>, vector<1x16x128xf32>,
    %c8_i32 = arith.constant 8 : i32
    %c0_65 = arith.constant 0 : index
    %c0_66 = arith.constant 0 : index
    %215 = vector.load %arg13[%c0_65, %c0_66] : memref<16x128xf32, #tpu.memory_space<vmem>>, vector<16x128xf32>
    tpu.vector_store %arg13[%c0_65, %c0_66], %210 {strides = array<i32>} : memref<16x128xf32, #tpu.memory_space<vmem>>, vector<16x128xf32>,
    %c0_67 = arith.constant 0 : index
    %c0_68 = arith.constant 0 : index
    %216 = vector.load %arg14[%c0_67, %c0_68] : memref<16x128xf32, #tpu.memory_space<vmem>>, vector<16x128xf32>
    tpu.vector_store %arg14[%c0_67, %c0_68], %208 {strides = array<i32>} : memref<16x128xf32, #tpu.memory_space<vmem>>, vector<16x128xf32>,
    %c0_69 = arith.constant 0 : index
    %c0_70 = arith.constant 0 : index
    %217 = vector.load %arg8[%c0_69, %c0_70] : memref<128x128xf32, #tpu.memory_space<vmem>>, vector<128x128xf32>
    %c0_71 = arith.constant 0 : index
    %c0_72 = arith.constant 0 : index
    %c0_73 = arith.constant 0 : index
    %218 = vector.load %arg16[%c0_71, %c0_72, %c0_73] : memref<8x16x128xf32, #tpu.memory_space<vmem>>, vector<8x16x128xf32>
    %219 = vector.shape_cast %218 : vector<8x16x128xf32> to vector<128x128xf32>
    %cst_74 = arith.constant dense<0.000000e+00> : vector<128x128xf32>
    %220 = tpu.matmul %219, %217, %cst_74 {dimension_numbers = #tpu.dot_dimension_numbers<[1], [0], [0], [1], [0, 0, 1, 1], [], []>} : vector<128x128xf32>, vector<128x128xf32>, vector<128x128xf32> -> vector<128x128xf32>
    %c0_75 = arith.constant 0 : index
    %c0_76 = arith.constant 0 : index
    %221 = vector.load %arg9[%c0_75, %c0_76] : memref<1x128xf32, #tpu.memory_space<vmem>>, vector<1x128xf32>
    %222 = vector.broadcast %221 : vector<1x128xf32> to vector<128x128xf32>
    %223 = arith.addf %220, %222 : vector<128x128xf32>
    %224 = vector.shape_cast %223 : vector<128x128xf32> to vector<8x16x128xf32>
    %225 = tpu.transpose %224, [1, 0, 2] : vector<8x16x128xf32> -> vector<16x8x128xf32>
    %c0_77 = arith.constant 0 : index
    %c0_78 = arith.constant 0 : index
    %c0_79 = arith.constant 0 : index
    %226 = vector.load %arg10[%c0_77, %c0_78, %c0_79] : memref<16x8x128xf32, #tpu.memory_space<vmem>>, vector<16x8x128xf32>
    tpu.vector_store %arg10[%c0_77, %c0_78, %c0_79], %225 {strides = array<i32>} : memref<16x8x128xf32, #tpu.memory_space<vmem>>, vector<16x8x128xf32>,
    %c0_i32_80 = arith.constant 0 : i32
    %227 = arith.cmpi eq, %arg1, %c0_i32_80 : i32
    %228 = arith.extui %227 : i1 to i32
    %c0_i32_81 = arith.constant 0 : i32
    %229 = arith.cmpi ne, %228, %c0_i32_81 : i32
    scf.if %229 {
      %c0_82 = arith.constant 0 : index
      %c0_83 = arith.constant 0 : index
      %230 = vector.load %arg11[%c0_82, %c0_83] : memref<16x128xf32, #tpu.memory_space<vmem>>, vector<16x128xf32>
      tpu.vector_store %arg11[%c0_82, %c0_83], %210 {strides = array<i32>} : memref<16x128xf32, #tpu.memory_space<vmem>>, vector<16x128xf32>,
      %c0_84 = arith.constant 0 : index
      %c0_85 = arith.constant 0 : index
      %231 = vector.load %arg12[%c0_84, %c0_85] : memref<16x128xf32, #tpu.memory_space<vmem>>, vector<16x128xf32>
      tpu.vector_store %arg12[%c0_84, %c0_85], %208 {strides = array<i32>} : memref<16x128xf32, #tpu.memory_space<vmem>>, vector<16x128xf32>,
    } else {
    }
    return
  }
  func.func @transform_0(%arg0: i32, %arg1: i32) -> (i32, i32, i32) {
    %c0_i32 = arith.constant 0 : i32
    %c0_i32_0 = arith.constant 0 : i32
    return %arg1, %arg0, %c0_i32 : i32, i32, i32
  }
  func.func @transform_1(%arg0: i32, %arg1: i32) -> (i32, i32) {
    %c0_i32 = arith.constant 0 : i32
    %c0_i32_0 = arith.constant 0 : i32
    %c0_i32_1 = arith.constant 0 : i32
    return %c0_i32, %c0_i32_0 : i32, i32
  }
  func.func @transform_2(%arg0: i32, %arg1: i32) -> (i32, i32) {
    %c0_i32 = arith.constant 0 : i32
    %c0_i32_0 = arith.constant 0 : i32
    %c0_i32_1 = arith.constant 0 : i32
    return %c0_i32, %c0_i32_0 : i32, i32
  }
  func.func @transform_3(%arg0: i32, %arg1: i32) -> (i32, i32) {
    %c0_i32 = arith.constant 0 : i32
    %c0_i32_0 = arith.constant 0 : i32
    %c0_i32_1 = arith.constant 0 : i32
    return %c0_i32, %c0_i32_0 : i32, i32
  }
  func.func @transform_4(%arg0: i32, %arg1: i32) -> (i32, i32) {
    %c0_i32 = arith.constant 0 : i32
    %c0_i32_0 = arith.constant 0 : i32
    return %arg0, %c0_i32 : i32, i32
  }
  func.func @transform_5(%arg0: i32, %arg1: i32) -> (i32, i32) {
    %c0_i32 = arith.constant 0 : i32
    %c0_i32_0 = arith.constant 0 : i32
    return %arg0, %c0_i32 : i32, i32
  }
  func.func @transform_6(%arg0: i32, %arg1: i32) -> (i32, i32) {
    %c0_i32 = arith.constant 0 : i32
    %c0_i32_0 = arith.constant 0 : i32
    %c0_i32_1 = arith.constant 0 : i32
    return %c0_i32, %c0_i32_0 : i32, i32
  }
  func.func @transform_7(%arg0: i32, %arg1: i32) -> (i32, i32) {
    %c0_i32 = arith.constant 0 : i32
    %c0_i32_0 = arith.constant 0 : i32
    %c0_i32_1 = arith.constant 0 : i32
    return %c0_i32, %c0_i32_0 : i32, i32
  }
  func.func @transform_8(%arg0: i32, %arg1: i32) -> (i32, i32, i32) {
    %c0_i32 = arith.constant 0 : i32
    %c0_i32_0 = arith.constant 0 : i32
    return %arg0, %arg1, %c0_i32 : i32, i32, i32
  }
  func.func @transform_9(%arg0: i32, %arg1: i32) -> (i32, i32) {
    %c0_i32 = arith.constant 0 : i32
    %c0_i32_0 = arith.constant 0 : i32
    return %arg0, %c0_i32 : i32, i32
  }
  func.func @transform_10(%arg0: i32, %arg1: i32) -> (i32, i32) {
    %c0_i32 = arith.constant 0 : i32
    %c0_i32_0 = arith.constant 0 : i32
    return %arg0, %c0_i32 : i32, i32
  }
}

module attributes {stable_mosaic.version = 11 : i64} {
  func.func @lstm_fc_kernel(%arg0: i32, %arg1: i32, %arg2: memref<8x16x128xf32, #tpu.memory_space<vmem>>, %arg3: memref<128x512xf32, #tpu.memory_space<vmem>>, %arg4: memref<128x512xf32, #tpu.memory_space<vmem>>, %arg5: memref<1x512xf32, #tpu.memory_space<vmem>>, %arg6: memref<16x128xf32, #tpu.memory_space<vmem>>, %arg7: memref<16x128xf32, #tpu.memory_space<vmem>>, %arg8: memref<128x128xf32, #tpu.memory_space<vmem>>, %arg9: memref<1x128xf32, #tpu.memory_space<vmem>>, %arg10: memref<16x8x128xf32, #tpu.memory_space<vmem>>, %arg11: memref<16x128xf32, #tpu.memory_space<vmem>>, %arg12: memref<16x128xf32, #tpu.memory_space<vmem>>, %arg13: memref<16x128xf32, #tpu.memory_space<vmem>>, %arg14: memref<16x128xf32, #tpu.memory_space<vmem>>, %arg15: memref<8x16x512xf32, #tpu.memory_space<vmem>>, %arg16: memref<8x16x128xf32, #tpu.memory_space<vmem>>) attributes {dimension_semantics = [#tpu.dimension_semantics<parallel>, #tpu.dimension_semantics<arbitrary>], iteration_bounds = array<i64: 1, 1>, scalar_prefetch = 0 : i64, scratch_operands = 4 : i64, tpu.core_type = #tpu.core_type<tc>, window_params = [{transform_indices = @transform_0, window_bounds = array<i64: 8, 16, 128>}, {pipeline_mode = #tpu.pipeline_mode<synchronous>, transform_indices = @transform_1, window_bounds = array<i64: 128, 512>}, {pipeline_mode = #tpu.pipeline_mode<synchronous>, transform_indices = @transform_2, window_bounds = array<i64: 128, 512>}, {pipeline_mode = #tpu.pipeline_mode<synchronous>, transform_indices = @transform_3, window_bounds = array<i64: 1, 512>}, {transform_indices = @transform_4, window_bounds = array<i64: 16, 128>}, {transform_indices = @transform_5, window_bounds = array<i64: 16, 128>}, {pipeline_mode = #tpu.pipeline_mode<synchronous>, transform_indices = @transform_6, window_bounds = array<i64: 128, 128>}, {pipeline_mode = #tpu.pipeline_mode<synchronous>, transform_indices = @transform_7, window_bounds = array<i64: 1, 128>}, {transform_indices = @transform_8, window_bounds = array<i64: 16, 8, 128>}, {transform_indices = @transform_9, window_bounds = array<i64: 16, 128>}, {transform_indices = @transform_10, window_bounds = array<i64: 16, 128>}]} {
    %c0_i32 = arith.constant 0 : i32
    %0 = arith.cmpi eq, %arg1, %c0_i32 : i32
    %1 = arith.extui %0 : i1 to i32
    %c0_i32_0 = arith.constant 0 : i32
    %2 = arith.cmpi ne, %1, %c0_i32_0 : i32
    scf.if %2 {
      %c0_82 = arith.constant 0 : index
      %c0_83 = arith.constant 0 : index
      %230 = vector.load %arg6[%c0_82, %c0_83] : memref<16x128xf32, #tpu.memory_space<vmem>>, vector<16x128xf32>
      %c0_84 = arith.constant 0 : index
      %c0_85 = arith.constant 0 : index
      %231 = vector.load %arg13[%c0_84, %c0_85] : memref<16x128xf32, #tpu.memory_space<vmem>>, vector<16x128xf32>
      tpu.vector_store %arg13[%c0_84, %c0_85], %230 {strides = array<i32>} : memref<16x128xf32, #tpu.memory_space<vmem>>, vector<16x128xf32>,
      %c0_86 = arith.constant 0 : index
      %c0_87 = arith.constant 0 : index
      %232 = vector.load %arg7[%c0_86, %c0_87] : memref<16x128xf32, #tpu.memory_space<vmem>>, vector<16x128xf32>
      %c0_88 = arith.constant 0 : index
      %c0_89 = arith.constant 0 : index
      %233 = vector.load %arg14[%c0_88, %c0_89] : memref<16x128xf32, #tpu.memory_space<vmem>>, vector<16x128xf32>
      tpu.vector_store %arg14[%c0_88, %c0_89], %232 {strides = array<i32>} : memref<16x128xf32, #tpu.memory_space<vmem>>, vector<16x128xf32>,
    } else {
    }
    %c0 = arith.constant 0 : index
    %c0_1 = arith.constant 0 : index
    %c0_2 = arith.constant 0 : index
    %3 = vector.load %arg2[%c0, %c0_1, %c0_2] : memref<8x16x128xf32, #tpu.memory_space<vmem>>, vector<8x16x128xf32>
    %4 = vector.shape_cast %3 : vector<8x16x128xf32> to vector<128x128xf32>
    %c0_3 = arith.constant 0 : index
    %c0_4 = arith.constant 0 : index
    %5 = vector.load %arg3[%c0_3, %c0_4] : memref<128x512xf32, #tpu.memory_space<vmem>>, vector<128x512xf32>
    %cst = arith.constant dense<0.000000e+00> : vector<128x512xf32>
    %6 = tpu.matmul %4, %5, %cst {dimension_numbers = #tpu.dot_dimension_numbers<[1], [0], [0], [1], [0, 0, 1, 1], [], []>} : vector<128x128xf32>, vector<128x512xf32>, vector<128x512xf32> -> vector<128x512xf32>
    %c0_5 = arith.constant 0 : index
    %c0_6 = arith.constant 0 : index
    %7 = vector.load %arg5[%c0_5, %c0_6] : memref<1x512xf32, #tpu.memory_space<vmem>>, vector<1x512xf32>
    %8 = vector.broadcast %7 : vector<1x512xf32> to vector<128x512xf32>
    %9 = arith.addf %6, %8 : vector<128x512xf32>
    %10 = vector.shape_cast %9 : vector<128x512xf32> to vector<8x16x512xf32>
    %c0_7 = arith.constant 0 : index
    %c0_8 = arith.constant 0 : index
    %c0_9 = arith.constant 0 : index
    %11 = vector.load %arg15[%c0_7, %c0_8, %c0_9] : memref<8x16x512xf32, #tpu.memory_space<vmem>>, vector<8x16x512xf32>
    tpu.vector_store %arg15[%c0_7, %c0_8, %c0_9], %10 {strides = array<i32>} : memref<8x16x512xf32, #tpu.memory_space<vmem>>, vector<8x16x512xf32>,
    %c0_10 = arith.constant 0 : index
    %c0_11 = arith.constant 0 : index
    %12 = vector.load %arg4[%c0_10, %c0_11] : memref<128x512xf32, #tpu.memory_space<vmem>>, vector<128x512xf32>
    %c0_12 = arith.constant 0 : index
    %c0_13 = arith.constant 0 : index
    %13 = vector.load %arg13[%c0_12, %c0_13] : memref<16x128xf32, #tpu.memory_space<vmem>>, vector<16x128xf32>
    %c0_14 = arith.constant 0 : index
    %c0_15 = arith.constant 0 : index
    %14 = vector.load %arg14[%c0_14, %c0_15] : memref<16x128xf32, #tpu.memory_space<vmem>>, vector<16x128xf32>
    %c0_i32_16 = arith.constant 0 : i32
    %15 = arith.index_cast %c0_i32_16 : i32 to index
    %c0_17 = arith.constant 0 : index
    %c0_18 = arith.constant 0 : index
    %16 = vector.load %arg15[%15, %c0_17, %c0_18] : memref<8x16x512xf32, #tpu.memory_space<vmem>>, vector<1x16x512xf32>
    %17 = vector.shape_cast %16 : vector<1x16x512xf32> to vector<16x512xf32>
    %cst_19 = arith.constant dense<0.000000e+00> : vector<16x512xf32>
    %18 = tpu.matmul %13, %12, %cst_19 {dimension_numbers = #tpu.dot_dimension_numbers<[1], [0], [0], [1], [0, 0, 1, 1], [], []>} : vector<16x128xf32>, vector<128x512xf32>, vector<16x512xf32> -> vector<16x512xf32>
    %19 = arith.addf %17, %18 : vector<16x512xf32>
    %20 = vector.extract_strided_slice %19 {offsets = [0, 0], sizes = [16, 384], strides = [1, 1]} : vector<16x512xf32> to vector<16x384xf32>
    %21 = arith.negf %20 : vector<16x384xf32>
    %22 = math.exp %21 : vector<16x384xf32>
    %cst_20 = arith.constant 1.000000e+00 : f32
    %23 = vector.broadcast %cst_20 : f32 to vector<16x384xf32>
    %24 = arith.addf %23, %22 : vector<16x384xf32>
    %25 = arith.divf %23, %24 : vector<16x384xf32>
    %26 = vector.extract_strided_slice %25 {offsets = [0, 0], sizes = [16, 128], strides = [1, 1]} : vector<16x384xf32> to vector<16x128xf32>
    %27 = vector.extract_strided_slice %25 {offsets = [0, 128], sizes = [16, 128], strides = [1, 1]} : vector<16x384xf32> to vector<16x128xf32>
    %28 = vector.extract_strided_slice %25 {offsets = [0, 256], sizes = [16, 128], strides = [1, 1]} : vector<16x384xf32> to vector<16x128xf32>
    %29 = vector.extract_strided_slice %19 {offsets = [0, 384], sizes = [16, 128], strides = [1, 1]} : vector<16x512xf32> to vector<16x128xf32>
    %30 = math.tanh %29 : vector<16x128xf32>
    %31 = arith.mulf %27, %14 : vector<16x128xf32>
    %32 = arith.mulf %26, %30 : vector<16x128xf32>
    %33 = arith.addf %31, %32 : vector<16x128xf32>
    %34 = math.tanh %33 : vector<16x128xf32>
    %35 = arith.mulf %28, %34 : vector<16x128xf32>
    %36 = arith.index_cast %c0_i32_16 : i32 to index
    %c0_21 = arith.constant 0 : index
    %c0_22 = arith.constant 0 : index
    %37 = vector.load %arg16[%36, %c0_21, %c0_22] : memref<8x16x128xf32, #tpu.memory_space<vmem>>, vector<1x16x128xf32>
    %38 = vector.shape_cast %37 : vector<1x16x128xf32> to vector<16x128xf32>
    %39 = vector.shape_cast %35 : vector<16x128xf32> to vector<1x16x128xf32>
    tpu.vector_store %arg16[%36, %c0_21, %c0_22], %39 {strides = array<i32>} : memref<8x16x128xf32, #tpu.memory_space<vmem>>, vector<1x16x128xf32>,
    %c1_i32 = arith.constant 1 : i32
    %40 = arith.index_cast %c1_i32 : i32 to index
    %c0_23 = arith.constant 0 : index
    %c0_24 = arith.constant 0 : index
    %41 = vector.load %arg15[%40, %c0_23, %c0_24] : memref<8x16x512xf32, #tpu.memory_space<vmem>>, vector<1x16x512xf32>
    %42 = vector.shape_cast %41 : vector<1x16x512xf32> to vector<16x512xf32>
    %cst_25 = arith.constant dense<0.000000e+00> : vector<16x512xf32>
    %43 = tpu.matmul %35, %12, %cst_25 {dimension_numbers = #tpu.dot_dimension_numbers<[1], [0], [0], [1], [0, 0, 1, 1], [], []>} : vector<16x128xf32>, vector<128x512xf32>, vector<16x512xf32> -> vector<16x512xf32>
    %44 = arith.addf %42, %43 : vector<16x512xf32>
    %45 = vector.extract_strided_slice %44 {offsets = [0, 0], sizes = [16, 384], strides = [1, 1]} : vector<16x512xf32> to vector<16x384xf32>
    %46 = arith.negf %45 : vector<16x384xf32>
    %47 = math.exp %46 : vector<16x384xf32>
    %cst_26 = arith.constant 1.000000e+00 : f32
    %48 = vector.broadcast %cst_26 : f32 to vector<16x384xf32>
    %49 = arith.addf %48, %47 : vector<16x384xf32>
    %50 = arith.divf %48, %49 : vector<16x384xf32>
    %51 = vector.extract_strided_slice %50 {offsets = [0, 0], sizes = [16, 128], strides = [1, 1]} : vector<16x384xf32> to vector<16x128xf32>
    %52 = vector.extract_strided_slice %50 {offsets = [0, 128], sizes = [16, 128], strides = [1, 1]} : vector<16x384xf32> to vector<16x128xf32>
    %53 = vector.extract_strided_slice %50 {offsets = [0, 256], sizes = [16, 128], strides = [1, 1]} : vector<16x384xf32> to vector<16x128xf32>
    %54 = vector.extract_strided_slice %44 {offsets = [0, 384], sizes = [16, 128], strides = [1, 1]} : vector<16x512xf32> to vector<16x128xf32>
    %55 = math.tanh %54 : vector<16x128xf32>
    %56 = arith.mulf %52, %33 : vector<16x128xf32>
    %57 = arith.mulf %51, %55 : vector<16x128xf32>
    %58 = arith.addf %56, %57 : vector<16x128xf32>
    %59 = math.tanh %58 : vector<16x128xf32>
    %60 = arith.mulf %53, %59 : vector<16x128xf32>
    %61 = arith.index_cast %c1_i32 : i32 to index
    %c0_27 = arith.constant 0 : index
    %c0_28 = arith.constant 0 : index
    %62 = vector.load %arg16[%61, %c0_27, %c0_28] : memref<8x16x128xf32, #tpu.memory_space<vmem>>, vector<1x16x128xf32>
    %63 = vector.shape_cast %62 : vector<1x16x128xf32> to vector<16x128xf32>
    %64 = vector.shape_cast %60 : vector<16x128xf32> to vector<1x16x128xf32>
    tpu.vector_store %arg16[%61, %c0_27, %c0_28], %64 {strides = array<i32>} : memref<8x16x128xf32, #tpu.memory_space<vmem>>, vector<1x16x128xf32>,
    %c2_i32 = arith.constant 2 : i32
    %65 = arith.index_cast %c2_i32 : i32 to index
    %c0_29 = arith.constant 0 : index
    %c0_30 = arith.constant 0 : index
    %66 = vector.load %arg15[%65, %c0_29, %c0_30] : memref<8x16x512xf32, #tpu.memory_space<vmem>>, vector<1x16x512xf32>
    %67 = vector.shape_cast %66 : vector<1x16x512xf32> to vector<16x512xf32>
    %cst_31 = arith.constant dense<0.000000e+00> : vector<16x512xf32>
    %68 = tpu.matmul %60, %12, %cst_31 {dimension_numbers = #tpu.dot_dimension_numbers<[1], [0], [0], [1], [0, 0, 1, 1], [], []>} : vector<16x128xf32>, vector<128x512xf32>, vector<16x512xf32> -> vector<16x512xf32>
    %69 = arith.addf %67, %68 : vector<16x512xf32>
    %70 = vector.extract_strided_slice %69 {offsets = [0, 0], sizes = [16, 384], strides = [1, 1]} : vector<16x512xf32> to vector<16x384xf32>
    %71 = arith.negf %70 : vector<16x384xf32>
    %72 = math.exp %71 : vector<16x384xf32>
    %cst_32 = arith.constant 1.000000e+00 : f32
    %73 = vector.broadcast %cst_32 : f32 to vector<16x384xf32>
    %74 = arith.addf %73, %72 : vector<16x384xf32>
    %75 = arith.divf %73, %74 : vector<16x384xf32>
    %76 = vector.extract_strided_slice %75 {offsets = [0, 0], sizes = [16, 128], strides = [1, 1]} : vector<16x384xf32> to vector<16x128xf32>
    %77 = vector.extract_strided_slice %75 {offsets = [0, 128], sizes = [16, 128], strides = [1, 1]} : vector<16x384xf32> to vector<16x128xf32>
    %78 = vector.extract_strided_slice %75 {offsets = [0, 256], sizes = [16, 128], strides = [1, 1]} : vector<16x384xf32> to vector<16x128xf32>
    %79 = vector.extract_strided_slice %69 {offsets = [0, 384], sizes = [16, 128], strides = [1, 1]} : vector<16x512xf32> to vector<16x128xf32>
    %80 = math.tanh %79 : vector<16x128xf32>
    %81 = arith.mulf %77, %58 : vector<16x128xf32>
    %82 = arith.mulf %76, %80 : vector<16x128xf32>
    %83 = arith.addf %81, %82 : vector<16x128xf32>
    %84 = math.tanh %83 : vector<16x128xf32>
    %85 = arith.mulf %78, %84 : vector<16x128xf32>
    %86 = arith.index_cast %c2_i32 : i32 to index
    %c0_33 = arith.constant 0 : index
    %c0_34 = arith.constant 0 : index
    %87 = vector.load %arg16[%86, %c0_33, %c0_34] : memref<8x16x128xf32, #tpu.memory_space<vmem>>, vector<1x16x128xf32>
    %88 = vector.shape_cast %87 : vector<1x16x128xf32> to vector<16x128xf32>
    %89 = vector.shape_cast %85 : vector<16x128xf32> to vector<1x16x128xf32>
    tpu.vector_store %arg16[%86, %c0_33, %c0_34], %89 {strides = array<i32>} : memref<8x16x128xf32, #tpu.memory_space<vmem>>, vector<1x16x128xf32>,
    %c3_i32 = arith.constant 3 : i32
    %90 = arith.index_cast %c3_i32 : i32 to index
    %c0_35 = arith.constant 0 : index
    %c0_36 = arith.constant 0 : index
    %91 = vector.load %arg15[%90, %c0_35, %c0_36] : memref<8x16x512xf32, #tpu.memory_space<vmem>>, vector<1x16x512xf32>
    %92 = vector.shape_cast %91 : vector<1x16x512xf32> to vector<16x512xf32>
    %cst_37 = arith.constant dense<0.000000e+00> : vector<16x512xf32>
    %93 = tpu.matmul %85, %12, %cst_37 {dimension_numbers = #tpu.dot_dimension_numbers<[1], [0], [0], [1], [0, 0, 1, 1], [], []>} : vector<16x128xf32>, vector<128x512xf32>, vector<16x512xf32> -> vector<16x512xf32>
    %94 = arith.addf %92, %93 : vector<16x512xf32>
    %95 = vector.extract_strided_slice %94 {offsets = [0, 0], sizes = [16, 384], strides = [1, 1]} : vector<16x512xf32> to vector<16x384xf32>
    %96 = arith.negf %95 : vector<16x384xf32>
    %97 = math.exp %96 : vector<16x384xf32>
    %cst_38 = arith.constant 1.000000e+00 : f32
    %98 = vector.broadcast %cst_38 : f32 to vector<16x384xf32>
    %99 = arith.addf %98, %97 : vector<16x384xf32>
    %100 = arith.divf %98, %99 : vector<16x384xf32>
    %101 = vector.extract_strided_slice %100 {offsets = [0, 0], sizes = [16, 128], strides = [1, 1]} : vector<16x384xf32> to vector<16x128xf32>
    %102 = vector.extract_strided_slice %100 {offsets = [0, 128], sizes = [16, 128], strides = [1, 1]} : vector<16x384xf32> to vector<16x128xf32>
    %103 = vector.extract_strided_slice %100 {offsets = [0, 256], sizes = [16, 128], strides = [1, 1]} : vector<16x384xf32> to vector<16x128xf32>
    %104 = vector.extract_strided_slice %94 {offsets = [0, 384], sizes = [16, 128], strides = [1, 1]} : vector<16x512xf32> to vector<16x128xf32>
    %105 = math.tanh %104 : vector<16x128xf32>
    %106 = arith.mulf %102, %83 : vector<16x128xf32>
    %107 = arith.mulf %101, %105 : vector<16x128xf32>
    %108 = arith.addf %106, %107 : vector<16x128xf32>
    %109 = math.tanh %108 : vector<16x128xf32>
    %110 = arith.mulf %103, %109 : vector<16x128xf32>
    %111 = arith.index_cast %c3_i32 : i32 to index
    %c0_39 = arith.constant 0 : index
    %c0_40 = arith.constant 0 : index
    %112 = vector.load %arg16[%111, %c0_39, %c0_40] : memref<8x16x128xf32, #tpu.memory_space<vmem>>, vector<1x16x128xf32>
    %113 = vector.shape_cast %112 : vector<1x16x128xf32> to vector<16x128xf32>
    %114 = vector.shape_cast %110 : vector<16x128xf32> to vector<1x16x128xf32>
    tpu.vector_store %arg16[%111, %c0_39, %c0_40], %114 {strides = array<i32>} : memref<8x16x128xf32, #tpu.memory_space<vmem>>, vector<1x16x128xf32>,
    %c4_i32 = arith.constant 4 : i32
    %115 = arith.index_cast %c4_i32 : i32 to index
    %c0_41 = arith.constant 0 : index
    %c0_42 = arith.constant 0 : index
    %116 = vector.load %arg15[%115, %c0_41, %c0_42] : memref<8x16x512xf32, #tpu.memory_space<vmem>>, vector<1x16x512xf32>
    %117 = vector.shape_cast %116 : vector<1x16x512xf32> to vector<16x512xf32>
    %cst_43 = arith.constant dense<0.000000e+00> : vector<16x512xf32>
    %118 = tpu.matmul %110, %12, %cst_43 {dimension_numbers = #tpu.dot_dimension_numbers<[1], [0], [0], [1], [0, 0, 1, 1], [], []>} : vector<16x128xf32>, vector<128x512xf32>, vector<16x512xf32> -> vector<16x512xf32>
    %119 = arith.addf %117, %118 : vector<16x512xf32>
    %120 = vector.extract_strided_slice %119 {offsets = [0, 0], sizes = [16, 384], strides = [1, 1]} : vector<16x512xf32> to vector<16x384xf32>
    %121 = arith.negf %120 : vector<16x384xf32>
    %122 = math.exp %121 : vector<16x384xf32>
    %cst_44 = arith.constant 1.000000e+00 : f32
    %123 = vector.broadcast %cst_44 : f32 to vector<16x384xf32>
    %124 = arith.addf %123, %122 : vector<16x384xf32>
    %125 = arith.divf %123, %124 : vector<16x384xf32>
    %126 = vector.extract_strided_slice %125 {offsets = [0, 0], sizes = [16, 128], strides = [1, 1]} : vector<16x384xf32> to vector<16x128xf32>
    %127 = vector.extract_strided_slice %125 {offsets = [0, 128], sizes = [16, 128], strides = [1, 1]} : vector<16x384xf32> to vector<16x128xf32>
    %128 = vector.extract_strided_slice %125 {offsets = [0, 256], sizes = [16, 128], strides = [1, 1]} : vector<16x384xf32> to vector<16x128xf32>
    %129 = vector.extract_strided_slice %119 {offsets = [0, 384], sizes = [16, 128], strides = [1, 1]} : vector<16x512xf32> to vector<16x128xf32>
    %130 = math.tanh %129 : vector<16x128xf32>
    %131 = arith.mulf %127, %108 : vector<16x128xf32>
    %132 = arith.mulf %126, %130 : vector<16x128xf32>
    %133 = arith.addf %131, %132 : vector<16x128xf32>
    %134 = math.tanh %133 : vector<16x128xf32>
    %135 = arith.mulf %128, %134 : vector<16x128xf32>
    %136 = arith.index_cast %c4_i32 : i32 to index
    %c0_45 = arith.constant 0 : index
    %c0_46 = arith.constant 0 : index
    %137 = vector.load %arg16[%136, %c0_45, %c0_46] : memref<8x16x128xf32, #tpu.memory_space<vmem>>, vector<1x16x128xf32>
    %138 = vector.shape_cast %137 : vector<1x16x128xf32> to vector<16x128xf32>
    %139 = vector.shape_cast %135 : vector<16x128xf32> to vector<1x16x128xf32>
    tpu.vector_store %arg16[%136, %c0_45, %c0_46], %139 {strides = array<i32>} : memref<8x16x128xf32, #tpu.memory_space<vmem>>, vector<1x16x128xf32>,
    %c5_i32 = arith.constant 5 : i32
    %140 = arith.index_cast %c5_i32 : i32 to index
    %c0_47 = arith.constant 0 : index
    %c0_48 = arith.constant 0 : index
    %141 = vector.load %arg15[%140, %c0_47, %c0_48] : memref<8x16x512xf32, #tpu.memory_space<vmem>>, vector<1x16x512xf32>
    %142 = vector.shape_cast %141 : vector<1x16x512xf32> to vector<16x512xf32>
    %cst_49 = arith.constant dense<0.000000e+00> : vector<16x512xf32>
    %143 = tpu.matmul %135, %12, %cst_49 {dimension_numbers = #tpu.dot_dimension_numbers<[1], [0], [0], [1], [0, 0, 1, 1], [], []>} : vector<16x128xf32>, vector<128x512xf32>, vector<16x512xf32> -> vector<16x512xf32>
    %144 = arith.addf %142, %143 : vector<16x512xf32>
    %145 = vector.extract_strided_slice %144 {offsets = [0, 0], sizes = [16, 384], strides = [1, 1]} : vector<16x512xf32> to vector<16x384xf32>
    %146 = arith.negf %145 : vector<16x384xf32>
    %147 = math.exp %146 : vector<16x384xf32>
    %cst_50 = arith.constant 1.000000e+00 : f32
    %148 = vector.broadcast %cst_50 : f32 to vector<16x384xf32>
    %149 = arith.addf %148, %147 : vector<16x384xf32>
    %150 = arith.divf %148, %149 : vector<16x384xf32>
    %151 = vector.extract_strided_slice %150 {offsets = [0, 0], sizes = [16, 128], strides = [1, 1]} : vector<16x384xf32> to vector<16x128xf32>
    %152 = vector.extract_strided_slice %150 {offsets = [0, 128], sizes = [16, 128], strides = [1, 1]} : vector<16x384xf32> to vector<16x128xf32>
    %153 = vector.extract_strided_slice %150 {offsets = [0, 256], sizes = [16, 128], strides = [1, 1]} : vector<16x384xf32> to vector<16x128xf32>
    %154 = vector.extract_strided_slice %144 {offsets = [0, 384], sizes = [16, 128], strides = [1, 1]} : vector<16x512xf32> to vector<16x128xf32>
    %155 = math.tanh %154 : vector<16x128xf32>
    %156 = arith.mulf %152, %133 : vector<16x128xf32>
    %157 = arith.mulf %151, %155 : vector<16x128xf32>
    %158 = arith.addf %156, %157 : vector<16x128xf32>
    %159 = math.tanh %158 : vector<16x128xf32>
    %160 = arith.mulf %153, %159 : vector<16x128xf32>
    %161 = arith.index_cast %c5_i32 : i32 to index
    %c0_51 = arith.constant 0 : index
    %c0_52 = arith.constant 0 : index
    %162 = vector.load %arg16[%161, %c0_51, %c0_52] : memref<8x16x128xf32, #tpu.memory_space<vmem>>, vector<1x16x128xf32>
    %163 = vector.shape_cast %162 : vector<1x16x128xf32> to vector<16x128xf32>
    %164 = vector.shape_cast %160 : vector<16x128xf32> to vector<1x16x128xf32>
    tpu.vector_store %arg16[%161, %c0_51, %c0_52], %164 {strides = array<i32>} : memref<8x16x128xf32, #tpu.memory_space<vmem>>, vector<1x16x128xf32>,
    %c6_i32 = arith.constant 6 : i32
    %165 = arith.index_cast %c6_i32 : i32 to index
    %c0_53 = arith.constant 0 : index
    %c0_54 = arith.constant 0 : index
    %166 = vector.load %arg15[%165, %c0_53, %c0_54] : memref<8x16x512xf32, #tpu.memory_space<vmem>>, vector<1x16x512xf32>
    %167 = vector.shape_cast %166 : vector<1x16x512xf32> to vector<16x512xf32>
    %cst_55 = arith.constant dense<0.000000e+00> : vector<16x512xf32>
    %168 = tpu.matmul %160, %12, %cst_55 {dimension_numbers = #tpu.dot_dimension_numbers<[1], [0], [0], [1], [0, 0, 1, 1], [], []>} : vector<16x128xf32>, vector<128x512xf32>, vector<16x512xf32> -> vector<16x512xf32>
    %169 = arith.addf %167, %168 : vector<16x512xf32>
    %170 = vector.extract_strided_slice %169 {offsets = [0, 0], sizes = [16, 384], strides = [1, 1]} : vector<16x512xf32> to vector<16x384xf32>
    %171 = arith.negf %170 : vector<16x384xf32>
    %172 = math.exp %171 : vector<16x384xf32>
    %cst_56 = arith.constant 1.000000e+00 : f32
    %173 = vector.broadcast %cst_56 : f32 to vector<16x384xf32>
    %174 = arith.addf %173, %172 : vector<16x384xf32>
    %175 = arith.divf %173, %174 : vector<16x384xf32>
    %176 = vector.extract_strided_slice %175 {offsets = [0, 0], sizes = [16, 128], strides = [1, 1]} : vector<16x384xf32> to vector<16x128xf32>
    %177 = vector.extract_strided_slice %175 {offsets = [0, 128], sizes = [16, 128], strides = [1, 1]} : vector<16x384xf32> to vector<16x128xf32>
    %178 = vector.extract_strided_slice %175 {offsets = [0, 256], sizes = [16, 128], strides = [1, 1]} : vector<16x384xf32> to vector<16x128xf32>
    %179 = vector.extract_strided_slice %169 {offsets = [0, 384], sizes = [16, 128], strides = [1, 1]} : vector<16x512xf32> to vector<16x128xf32>
    %180 = math.tanh %179 : vector<16x128xf32>
    %181 = arith.mulf %177, %158 : vector<16x128xf32>
    %182 = arith.mulf %176, %180 : vector<16x128xf32>
    %183 = arith.addf %181, %182 : vector<16x128xf32>
    %184 = math.tanh %183 : vector<16x128xf32>
    %185 = arith.mulf %178, %184 : vector<16x128xf32>
    %186 = arith.index_cast %c6_i32 : i32 to index
    %c0_57 = arith.constant 0 : index
    %c0_58 = arith.constant 0 : index
    %187 = vector.load %arg16[%186, %c0_57, %c0_58] : memref<8x16x128xf32, #tpu.memory_space<vmem>>, vector<1x16x128xf32>
    %188 = vector.shape_cast %187 : vector<1x16x128xf32> to vector<16x128xf32>
    %189 = vector.shape_cast %185 : vector<16x128xf32> to vector<1x16x128xf32>
    tpu.vector_store %arg16[%186, %c0_57, %c0_58], %189 {strides = array<i32>} : memref<8x16x128xf32, #tpu.memory_space<vmem>>, vector<1x16x128xf32>,
    %c7_i32 = arith.constant 7 : i32
    %190 = arith.index_cast %c7_i32 : i32 to index
    %c0_59 = arith.constant 0 : index
    %c0_60 = arith.constant 0 : index
    %191 = vector.load %arg15[%190, %c0_59, %c0_60] : memref<8x16x512xf32, #tpu.memory_space<vmem>>, vector<1x16x512xf32>
    %192 = vector.shape_cast %191 : vector<1x16x512xf32> to vector<16x512xf32>
    %cst_61 = arith.constant dense<0.000000e+00> : vector<16x512xf32>
    %193 = tpu.matmul %185, %12, %cst_61 {dimension_numbers = #tpu.dot_dimension_numbers<[1], [0], [0], [1], [0, 0, 1, 1], [], []>} : vector<16x128xf32>, vector<128x512xf32>, vector<16x512xf32> -> vector<16x512xf32>
    %194 = arith.addf %192, %193 : vector<16x512xf32>
    %195 = vector.extract_strided_slice %194 {offsets = [0, 0], sizes = [16, 384], strides = [1, 1]} : vector<16x512xf32> to vector<16x384xf32>
    %196 = arith.negf %195 : vector<16x384xf32>
    %197 = math.exp %196 : vector<16x384xf32>
    %cst_62 = arith.constant 1.000000e+00 : f32
    %198 = vector.broadcast %cst_62 : f32 to vector<16x384xf32>
    %199 = arith.addf %198, %197 : vector<16x384xf32>
    %200 = arith.divf %198, %199 : vector<16x384xf32>
    %201 = vector.extract_strided_slice %200 {offsets = [0, 0], sizes = [16, 128], strides = [1, 1]} : vector<16x384xf32> to vector<16x128xf32>
    %202 = vector.extract_strided_slice %200 {offsets = [0, 128], sizes = [16, 128], strides = [1, 1]} : vector<16x384xf32> to vector<16x128xf32>
    %203 = vector.extract_strided_slice %200 {offsets = [0, 256], sizes = [16, 128], strides = [1, 1]} : vector<16x384xf32> to vector<16x128xf32>
    %204 = vector.extract_strided_slice %194 {offsets = [0, 384], sizes = [16, 128], strides = [1, 1]} : vector<16x512xf32> to vector<16x128xf32>
    %205 = math.tanh %204 : vector<16x128xf32>
    %206 = arith.mulf %202, %183 : vector<16x128xf32>
    %207 = arith.mulf %201, %205 : vector<16x128xf32>
    %208 = arith.addf %206, %207 : vector<16x128xf32>
    %209 = math.tanh %208 : vector<16x128xf32>
    %210 = arith.mulf %203, %209 : vector<16x128xf32>
    %211 = arith.index_cast %c7_i32 : i32 to index
    %c0_63 = arith.constant 0 : index
    %c0_64 = arith.constant 0 : index
    %212 = vector.load %arg16[%211, %c0_63, %c0_64] : memref<8x16x128xf32, #tpu.memory_space<vmem>>, vector<1x16x128xf32>
    %213 = vector.shape_cast %212 : vector<1x16x128xf32> to vector<16x128xf32>
    %214 = vector.shape_cast %210 : vector<16x128xf32> to vector<1x16x128xf32>
    tpu.vector_store %arg16[%211, %c0_63, %c0_64], %214 {strides = array<i32>} : memref<8x16x128xf32, #tpu.memory_space<vmem>>, vector<1x16x128xf32>,
    %c8_i32 = arith.constant 8 : i32
    %c0_65 = arith.constant 0 : index
    %c0_66 = arith.constant 0 : index
    %215 = vector.load %arg13[%c0_65, %c0_66] : memref<16x128xf32, #tpu.memory_space<vmem>>, vector<16x128xf32>
    tpu.vector_store %arg13[%c0_65, %c0_66], %210 {strides = array<i32>} : memref<16x128xf32, #tpu.memory_space<vmem>>, vector<16x128xf32>,
    %c0_67 = arith.constant 0 : index
    %c0_68 = arith.constant 0 : index
    %216 = vector.load %arg14[%c0_67, %c0_68] : memref<16x128xf32, #tpu.memory_space<vmem>>, vector<16x128xf32>
    tpu.vector_store %arg14[%c0_67, %c0_68], %208 {strides = array<i32>} : memref<16x128xf32, #tpu.memory_space<vmem>>, vector<16x128xf32>,
    %c0_69 = arith.constant 0 : index
    %c0_70 = arith.constant 0 : index
    %217 = vector.load %arg8[%c0_69, %c0_70] : memref<128x128xf32, #tpu.memory_space<vmem>>, vector<128x128xf32>
    %c0_71 = arith.constant 0 : index
    %c0_72 = arith.constant 0 : index
    %c0_73 = arith.constant 0 : index
    %218 = vector.load %arg16[%c0_71, %c0_72, %c0_73] : memref<8x16x128xf32, #tpu.memory_space<vmem>>, vector<8x16x128xf32>
    %219 = vector.shape_cast %218 : vector<8x16x128xf32> to vector<128x128xf32>
    %cst_74 = arith.constant dense<0.000000e+00> : vector<128x128xf32>
    %220 = tpu.matmul %219, %217, %cst_74 {dimension_numbers = #tpu.dot_dimension_numbers<[1], [0], [0], [1], [0, 0, 1, 1], [], []>} : vector<128x128xf32>, vector<128x128xf32>, vector<128x128xf32> -> vector<128x128xf32>
    %c0_75 = arith.constant 0 : index
    %c0_76 = arith.constant 0 : index
    %221 = vector.load %arg9[%c0_75, %c0_76] : memref<1x128xf32, #tpu.memory_space<vmem>>, vector<1x128xf32>
    %222 = vector.broadcast %221 : vector<1x128xf32> to vector<128x128xf32>
    %223 = arith.addf %220, %222 : vector<128x128xf32>
    %224 = vector.shape_cast %223 : vector<128x128xf32> to vector<8x16x128xf32>
    %225 = tpu.transpose %224, [1, 0, 2] : vector<8x16x128xf32> -> vector<16x8x128xf32>
    %c0_77 = arith.constant 0 : index
    %c0_78 = arith.constant 0 : index
    %c0_79 = arith.constant 0 : index
    %226 = vector.load %arg10[%c0_77, %c0_78, %c0_79] : memref<16x8x128xf32, #tpu.memory_space<vmem>>, vector<16x8x128xf32>
    tpu.vector_store %arg10[%c0_77, %c0_78, %c0_79], %225 {strides = array<i32>} : memref<16x8x128xf32, #tpu.memory_space<vmem>>, vector<16x8x128xf32>,
    %c0_i32_80 = arith.constant 0 : i32
    %227 = arith.cmpi eq, %arg1, %c0_i32_80 : i32
    %228 = arith.extui %227 : i1 to i32
    %c0_i32_81 = arith.constant 0 : i32
    %229 = arith.cmpi ne, %228, %c0_i32_81 : i32
    scf.if %229 {
      %c0_82 = arith.constant 0 : index
      %c0_83 = arith.constant 0 : index
      %230 = vector.load %arg11[%c0_82, %c0_83] : memref<16x128xf32, #tpu.memory_space<vmem>>, vector<16x128xf32>
      tpu.vector_store %arg11[%c0_82, %c0_83], %210 {strides = array<i32>} : memref<16x128xf32, #tpu.memory_space<vmem>>, vector<16x128xf32>,
      %c0_84 = arith.constant 0 : index
      %c0_85 = arith.constant 0 : index
      %231 = vector.load %arg12[%c0_84, %c0_85] : memref<16x128xf32, #tpu.memory_space<vmem>>, vector<16x128xf32>
      tpu.vector_store %arg12[%c0_84, %c0_85], %208 {strides = array<i32>} : memref<16x128xf32, #tpu.memory_space<vmem>>, vector<16x128xf32>,
    } else {
    }
    return
  }
  func.func @transform_0(%arg0: i32, %arg1: i32) -> (i32, i32, i32) {
    %c0_i32 = arith.constant 0 : i32
    %c0_i32_0 = arith.constant 0 : i32
    return %arg1, %arg0, %c0_i32 : i32, i32, i32
  }
  func.func @transform_1(%arg0: i32, %arg1: i32) -> (i32, i32) {
    %c0_i32 = arith.constant 0 : i32
    %c0_i32_0 = arith.constant 0 : i32
    %c0_i32_1 = arith.constant 0 : i32
    return %c0_i32, %c0_i32_0 : i32, i32
  }
  func.func @transform_2(%arg0: i32, %arg1: i32) -> (i32, i32) {
    %c0_i32 = arith.constant 0 : i32
    %c0_i32_0 = arith.constant 0 : i32
    %c0_i32_1 = arith.constant 0 : i32
    return %c0_i32, %c0_i32_0 : i32, i32
  }
  func.func @transform_3(%arg0: i32, %arg1: i32) -> (i32, i32) {
    %c0_i32 = arith.constant 0 : i32
    %c0_i32_0 = arith.constant 0 : i32
    %c0_i32_1 = arith.constant 0 : i32
    return %c0_i32, %c0_i32_0 : i32, i32
  }
  func.func @transform_4(%arg0: i32, %arg1: i32) -> (i32, i32) {
    %c0_i32 = arith.constant 0 : i32
    %c0_i32_0 = arith.constant 0 : i32
    return %arg0, %c0_i32 : i32, i32
  }
  func.func @transform_5(%arg0: i32, %arg1: i32) -> (i32, i32) {
    %c0_i32 = arith.constant 0 : i32
    %c0_i32_0 = arith.constant 0 : i32
    return %arg0, %c0_i32 : i32, i32
  }
  func.func @transform_6(%arg0: i32, %arg1: i32) -> (i32, i32) {
    %c0_i32 = arith.constant 0 : i32
    %c0_i32_0 = arith.constant 0 : i32
    %c0_i32_1 = arith.constant 0 : i32
    return %c0_i32, %c0_i32_0 : i32, i32
  }
  func.func @transform_7(%arg0: i32, %arg1: i32) -> (i32, i32) {
    %c0_i32 = arith.constant 0 : i32
    %c0_i32_0 = arith.constant 0 : i32
    %c0_i32_1 = arith.constant 0 : i32
    return %c0_i32, %c0_i32_0 : i32, i32
  }
  func.func @transform_8(%arg0: i32, %arg1: i32) -> (i32, i32, i32) {
    %c0_i32 = arith.constant 0 : i32
    %c0_i32_0 = arith.constant 0 : i32
    return %arg0, %arg1, %c0_i32 : i32, i32, i32
  }
  func.func @transform_9(%arg0: i32, %arg1: i32) -> (i32, i32) {
    %c0_i32 = arith.constant 0 : i32
    %c0_i32_0 = arith.constant 0 : i32
    return %arg0, %c0_i32 : i32, i32
  }
  func.func @transform_10(%arg0: i32, %arg1: i32) -> (i32, i32) {
    %c0_i32 = arith.constant 0 : i32
    %c0_i32_0 = arith.constant 0 : i32
    return %arg0, %c0_i32 : i32, i32
  }
}

module attributes {stable_mosaic.version = 11 : i64} {
  func.func @lstm_fc_kernel(%arg0: i32, %arg1: i32, %arg2: memref<8x16x128xf32, #tpu.memory_space<vmem>>, %arg3: memref<128x512xf32, #tpu.memory_space<vmem>>, %arg4: memref<128x512xf32, #tpu.memory_space<vmem>>, %arg5: memref<1x512xf32, #tpu.memory_space<vmem>>, %arg6: memref<16x128xf32, #tpu.memory_space<vmem>>, %arg7: memref<16x128xf32, #tpu.memory_space<vmem>>, %arg8: memref<128x128xf32, #tpu.memory_space<vmem>>, %arg9: memref<1x128xf32, #tpu.memory_space<vmem>>, %arg10: memref<8x16x128xf32, #tpu.memory_space<vmem>>, %arg11: memref<16x128xf32, #tpu.memory_space<vmem>>, %arg12: memref<16x128xf32, #tpu.memory_space<vmem>>, %arg13: memref<16x128xf32, #tpu.memory_space<vmem>>, %arg14: memref<16x128xf32, #tpu.memory_space<vmem>>, %arg15: memref<8x16x512xf32, #tpu.memory_space<vmem>>, %arg16: memref<8x16x128xf32, #tpu.memory_space<vmem>>) attributes {dimension_semantics = [#tpu.dimension_semantics<parallel>, #tpu.dimension_semantics<arbitrary>], iteration_bounds = array<i64: 1, 1>, scalar_prefetch = 0 : i64, scratch_operands = 4 : i64, tpu.core_type = #tpu.core_type<tc>, window_params = [{transform_indices = @transform_0, window_bounds = array<i64: 8, 16, 128>}, {pipeline_mode = #tpu.pipeline_mode<synchronous>, transform_indices = @transform_1, window_bounds = array<i64: 128, 512>}, {pipeline_mode = #tpu.pipeline_mode<synchronous>, transform_indices = @transform_2, window_bounds = array<i64: 128, 512>}, {pipeline_mode = #tpu.pipeline_mode<synchronous>, transform_indices = @transform_3, window_bounds = array<i64: 1, 512>}, {transform_indices = @transform_4, window_bounds = array<i64: 16, 128>}, {transform_indices = @transform_5, window_bounds = array<i64: 16, 128>}, {pipeline_mode = #tpu.pipeline_mode<synchronous>, transform_indices = @transform_6, window_bounds = array<i64: 128, 128>}, {pipeline_mode = #tpu.pipeline_mode<synchronous>, transform_indices = @transform_7, window_bounds = array<i64: 1, 128>}, {transform_indices = @transform_8, window_bounds = array<i64: 8, 16, 128>}, {transform_indices = @transform_9, window_bounds = array<i64: 16, 128>}, {transform_indices = @transform_10, window_bounds = array<i64: 16, 128>}]} {
    %c0_i32 = arith.constant 0 : i32
    %0 = arith.cmpi eq, %arg1, %c0_i32 : i32
    %1 = arith.extui %0 : i1 to i32
    %c0_i32_0 = arith.constant 0 : i32
    %2 = arith.cmpi ne, %1, %c0_i32_0 : i32
    scf.if %2 {
      %c0_82 = arith.constant 0 : index
      %c0_83 = arith.constant 0 : index
      %229 = vector.load %arg6[%c0_82, %c0_83] : memref<16x128xf32, #tpu.memory_space<vmem>>, vector<16x128xf32>
      %c0_84 = arith.constant 0 : index
      %c0_85 = arith.constant 0 : index
      %230 = vector.load %arg13[%c0_84, %c0_85] : memref<16x128xf32, #tpu.memory_space<vmem>>, vector<16x128xf32>
      tpu.vector_store %arg13[%c0_84, %c0_85], %229 {strides = array<i32>} : memref<16x128xf32, #tpu.memory_space<vmem>>, vector<16x128xf32>,
      %c0_86 = arith.constant 0 : index
      %c0_87 = arith.constant 0 : index
      %231 = vector.load %arg7[%c0_86, %c0_87] : memref<16x128xf32, #tpu.memory_space<vmem>>, vector<16x128xf32>
      %c0_88 = arith.constant 0 : index
      %c0_89 = arith.constant 0 : index
      %232 = vector.load %arg14[%c0_88, %c0_89] : memref<16x128xf32, #tpu.memory_space<vmem>>, vector<16x128xf32>
      tpu.vector_store %arg14[%c0_88, %c0_89], %231 {strides = array<i32>} : memref<16x128xf32, #tpu.memory_space<vmem>>, vector<16x128xf32>,
    } else {
    }
    %c0 = arith.constant 0 : index
    %c0_1 = arith.constant 0 : index
    %c0_2 = arith.constant 0 : index
    %3 = vector.load %arg2[%c0, %c0_1, %c0_2] : memref<8x16x128xf32, #tpu.memory_space<vmem>>, vector<8x16x128xf32>
    %4 = vector.shape_cast %3 : vector<8x16x128xf32> to vector<128x128xf32>
    %c0_3 = arith.constant 0 : index
    %c0_4 = arith.constant 0 : index
    %5 = vector.load %arg3[%c0_3, %c0_4] : memref<128x512xf32, #tpu.memory_space<vmem>>, vector<128x512xf32>
    %cst = arith.constant dense<0.000000e+00> : vector<128x512xf32>
    %6 = tpu.matmul %4, %5, %cst {dimension_numbers = #tpu.dot_dimension_numbers<[1], [0], [0], [1], [0, 0, 1, 1], [], []>} : vector<128x128xf32>, vector<128x512xf32>, vector<128x512xf32> -> vector<128x512xf32>
    %c0_5 = arith.constant 0 : index
    %c0_6 = arith.constant 0 : index
    %7 = vector.load %arg5[%c0_5, %c0_6] : memref<1x512xf32, #tpu.memory_space<vmem>>, vector<1x512xf32>
    %8 = vector.broadcast %7 : vector<1x512xf32> to vector<128x512xf32>
    %9 = arith.addf %6, %8 : vector<128x512xf32>
    %10 = vector.shape_cast %9 : vector<128x512xf32> to vector<8x16x512xf32>
    %c0_7 = arith.constant 0 : index
    %c0_8 = arith.constant 0 : index
    %c0_9 = arith.constant 0 : index
    %11 = vector.load %arg15[%c0_7, %c0_8, %c0_9] : memref<8x16x512xf32, #tpu.memory_space<vmem>>, vector<8x16x512xf32>
    tpu.vector_store %arg15[%c0_7, %c0_8, %c0_9], %10 {strides = array<i32>} : memref<8x16x512xf32, #tpu.memory_space<vmem>>, vector<8x16x512xf32>,
    %c0_10 = arith.constant 0 : index
    %c0_11 = arith.constant 0 : index
    %12 = vector.load %arg4[%c0_10, %c0_11] : memref<128x512xf32, #tpu.memory_space<vmem>>, vector<128x512xf32>
    %c0_12 = arith.constant 0 : index
    %c0_13 = arith.constant 0 : index
    %13 = vector.load %arg13[%c0_12, %c0_13] : memref<16x128xf32, #tpu.memory_space<vmem>>, vector<16x128xf32>
    %c0_14 = arith.constant 0 : index
    %c0_15 = arith.constant 0 : index
    %14 = vector.load %arg14[%c0_14, %c0_15] : memref<16x128xf32, #tpu.memory_space<vmem>>, vector<16x128xf32>
    %c0_i32_16 = arith.constant 0 : i32
    %15 = arith.index_cast %c0_i32_16 : i32 to index
    %c0_17 = arith.constant 0 : index
    %c0_18 = arith.constant 0 : index
    %16 = vector.load %arg15[%15, %c0_17, %c0_18] : memref<8x16x512xf32, #tpu.memory_space<vmem>>, vector<1x16x512xf32>
    %17 = vector.shape_cast %16 : vector<1x16x512xf32> to vector<16x512xf32>
    %cst_19 = arith.constant dense<0.000000e+00> : vector<16x512xf32>
    %18 = tpu.matmul %13, %12, %cst_19 {dimension_numbers = #tpu.dot_dimension_numbers<[1], [0], [0], [1], [0, 0, 1, 1], [], []>} : vector<16x128xf32>, vector<128x512xf32>, vector<16x512xf32> -> vector<16x512xf32>
    %19 = arith.addf %17, %18 : vector<16x512xf32>
    %20 = vector.extract_strided_slice %19 {offsets = [0, 0], sizes = [16, 384], strides = [1, 1]} : vector<16x512xf32> to vector<16x384xf32>
    %21 = arith.negf %20 : vector<16x384xf32>
    %22 = math.exp %21 : vector<16x384xf32>
    %cst_20 = arith.constant 1.000000e+00 : f32
    %23 = vector.broadcast %cst_20 : f32 to vector<16x384xf32>
    %24 = arith.addf %23, %22 : vector<16x384xf32>
    %25 = arith.divf %23, %24 : vector<16x384xf32>
    %26 = vector.extract_strided_slice %25 {offsets = [0, 0], sizes = [16, 128], strides = [1, 1]} : vector<16x384xf32> to vector<16x128xf32>
    %27 = vector.extract_strided_slice %25 {offsets = [0, 128], sizes = [16, 128], strides = [1, 1]} : vector<16x384xf32> to vector<16x128xf32>
    %28 = vector.extract_strided_slice %25 {offsets = [0, 256], sizes = [16, 128], strides = [1, 1]} : vector<16x384xf32> to vector<16x128xf32>
    %29 = vector.extract_strided_slice %19 {offsets = [0, 384], sizes = [16, 128], strides = [1, 1]} : vector<16x512xf32> to vector<16x128xf32>
    %30 = math.tanh %29 : vector<16x128xf32>
    %31 = arith.mulf %27, %14 : vector<16x128xf32>
    %32 = arith.mulf %26, %30 : vector<16x128xf32>
    %33 = arith.addf %31, %32 : vector<16x128xf32>
    %34 = math.tanh %33 : vector<16x128xf32>
    %35 = arith.mulf %28, %34 : vector<16x128xf32>
    %36 = arith.index_cast %c0_i32_16 : i32 to index
    %c0_21 = arith.constant 0 : index
    %c0_22 = arith.constant 0 : index
    %37 = vector.load %arg16[%36, %c0_21, %c0_22] : memref<8x16x128xf32, #tpu.memory_space<vmem>>, vector<1x16x128xf32>
    %38 = vector.shape_cast %37 : vector<1x16x128xf32> to vector<16x128xf32>
    %39 = vector.shape_cast %35 : vector<16x128xf32> to vector<1x16x128xf32>
    tpu.vector_store %arg16[%36, %c0_21, %c0_22], %39 {strides = array<i32>} : memref<8x16x128xf32, #tpu.memory_space<vmem>>, vector<1x16x128xf32>,
    %c1_i32 = arith.constant 1 : i32
    %40 = arith.index_cast %c1_i32 : i32 to index
    %c0_23 = arith.constant 0 : index
    %c0_24 = arith.constant 0 : index
    %41 = vector.load %arg15[%40, %c0_23, %c0_24] : memref<8x16x512xf32, #tpu.memory_space<vmem>>, vector<1x16x512xf32>
    %42 = vector.shape_cast %41 : vector<1x16x512xf32> to vector<16x512xf32>
    %cst_25 = arith.constant dense<0.000000e+00> : vector<16x512xf32>
    %43 = tpu.matmul %35, %12, %cst_25 {dimension_numbers = #tpu.dot_dimension_numbers<[1], [0], [0], [1], [0, 0, 1, 1], [], []>} : vector<16x128xf32>, vector<128x512xf32>, vector<16x512xf32> -> vector<16x512xf32>
    %44 = arith.addf %42, %43 : vector<16x512xf32>
    %45 = vector.extract_strided_slice %44 {offsets = [0, 0], sizes = [16, 384], strides = [1, 1]} : vector<16x512xf32> to vector<16x384xf32>
    %46 = arith.negf %45 : vector<16x384xf32>
    %47 = math.exp %46 : vector<16x384xf32>
    %cst_26 = arith.constant 1.000000e+00 : f32
    %48 = vector.broadcast %cst_26 : f32 to vector<16x384xf32>
    %49 = arith.addf %48, %47 : vector<16x384xf32>
    %50 = arith.divf %48, %49 : vector<16x384xf32>
    %51 = vector.extract_strided_slice %50 {offsets = [0, 0], sizes = [16, 128], strides = [1, 1]} : vector<16x384xf32> to vector<16x128xf32>
    %52 = vector.extract_strided_slice %50 {offsets = [0, 128], sizes = [16, 128], strides = [1, 1]} : vector<16x384xf32> to vector<16x128xf32>
    %53 = vector.extract_strided_slice %50 {offsets = [0, 256], sizes = [16, 128], strides = [1, 1]} : vector<16x384xf32> to vector<16x128xf32>
    %54 = vector.extract_strided_slice %44 {offsets = [0, 384], sizes = [16, 128], strides = [1, 1]} : vector<16x512xf32> to vector<16x128xf32>
    %55 = math.tanh %54 : vector<16x128xf32>
    %56 = arith.mulf %52, %33 : vector<16x128xf32>
    %57 = arith.mulf %51, %55 : vector<16x128xf32>
    %58 = arith.addf %56, %57 : vector<16x128xf32>
    %59 = math.tanh %58 : vector<16x128xf32>
    %60 = arith.mulf %53, %59 : vector<16x128xf32>
    %61 = arith.index_cast %c1_i32 : i32 to index
    %c0_27 = arith.constant 0 : index
    %c0_28 = arith.constant 0 : index
    %62 = vector.load %arg16[%61, %c0_27, %c0_28] : memref<8x16x128xf32, #tpu.memory_space<vmem>>, vector<1x16x128xf32>
    %63 = vector.shape_cast %62 : vector<1x16x128xf32> to vector<16x128xf32>
    %64 = vector.shape_cast %60 : vector<16x128xf32> to vector<1x16x128xf32>
    tpu.vector_store %arg16[%61, %c0_27, %c0_28], %64 {strides = array<i32>} : memref<8x16x128xf32, #tpu.memory_space<vmem>>, vector<1x16x128xf32>,
    %c2_i32 = arith.constant 2 : i32
    %65 = arith.index_cast %c2_i32 : i32 to index
    %c0_29 = arith.constant 0 : index
    %c0_30 = arith.constant 0 : index
    %66 = vector.load %arg15[%65, %c0_29, %c0_30] : memref<8x16x512xf32, #tpu.memory_space<vmem>>, vector<1x16x512xf32>
    %67 = vector.shape_cast %66 : vector<1x16x512xf32> to vector<16x512xf32>
    %cst_31 = arith.constant dense<0.000000e+00> : vector<16x512xf32>
    %68 = tpu.matmul %60, %12, %cst_31 {dimension_numbers = #tpu.dot_dimension_numbers<[1], [0], [0], [1], [0, 0, 1, 1], [], []>} : vector<16x128xf32>, vector<128x512xf32>, vector<16x512xf32> -> vector<16x512xf32>
    %69 = arith.addf %67, %68 : vector<16x512xf32>
    %70 = vector.extract_strided_slice %69 {offsets = [0, 0], sizes = [16, 384], strides = [1, 1]} : vector<16x512xf32> to vector<16x384xf32>
    %71 = arith.negf %70 : vector<16x384xf32>
    %72 = math.exp %71 : vector<16x384xf32>
    %cst_32 = arith.constant 1.000000e+00 : f32
    %73 = vector.broadcast %cst_32 : f32 to vector<16x384xf32>
    %74 = arith.addf %73, %72 : vector<16x384xf32>
    %75 = arith.divf %73, %74 : vector<16x384xf32>
    %76 = vector.extract_strided_slice %75 {offsets = [0, 0], sizes = [16, 128], strides = [1, 1]} : vector<16x384xf32> to vector<16x128xf32>
    %77 = vector.extract_strided_slice %75 {offsets = [0, 128], sizes = [16, 128], strides = [1, 1]} : vector<16x384xf32> to vector<16x128xf32>
    %78 = vector.extract_strided_slice %75 {offsets = [0, 256], sizes = [16, 128], strides = [1, 1]} : vector<16x384xf32> to vector<16x128xf32>
    %79 = vector.extract_strided_slice %69 {offsets = [0, 384], sizes = [16, 128], strides = [1, 1]} : vector<16x512xf32> to vector<16x128xf32>
    %80 = math.tanh %79 : vector<16x128xf32>
    %81 = arith.mulf %77, %58 : vector<16x128xf32>
    %82 = arith.mulf %76, %80 : vector<16x128xf32>
    %83 = arith.addf %81, %82 : vector<16x128xf32>
    %84 = math.tanh %83 : vector<16x128xf32>
    %85 = arith.mulf %78, %84 : vector<16x128xf32>
    %86 = arith.index_cast %c2_i32 : i32 to index
    %c0_33 = arith.constant 0 : index
    %c0_34 = arith.constant 0 : index
    %87 = vector.load %arg16[%86, %c0_33, %c0_34] : memref<8x16x128xf32, #tpu.memory_space<vmem>>, vector<1x16x128xf32>
    %88 = vector.shape_cast %87 : vector<1x16x128xf32> to vector<16x128xf32>
    %89 = vector.shape_cast %85 : vector<16x128xf32> to vector<1x16x128xf32>
    tpu.vector_store %arg16[%86, %c0_33, %c0_34], %89 {strides = array<i32>} : memref<8x16x128xf32, #tpu.memory_space<vmem>>, vector<1x16x128xf32>,
    %c3_i32 = arith.constant 3 : i32
    %90 = arith.index_cast %c3_i32 : i32 to index
    %c0_35 = arith.constant 0 : index
    %c0_36 = arith.constant 0 : index
    %91 = vector.load %arg15[%90, %c0_35, %c0_36] : memref<8x16x512xf32, #tpu.memory_space<vmem>>, vector<1x16x512xf32>
    %92 = vector.shape_cast %91 : vector<1x16x512xf32> to vector<16x512xf32>
    %cst_37 = arith.constant dense<0.000000e+00> : vector<16x512xf32>
    %93 = tpu.matmul %85, %12, %cst_37 {dimension_numbers = #tpu.dot_dimension_numbers<[1], [0], [0], [1], [0, 0, 1, 1], [], []>} : vector<16x128xf32>, vector<128x512xf32>, vector<16x512xf32> -> vector<16x512xf32>
    %94 = arith.addf %92, %93 : vector<16x512xf32>
    %95 = vector.extract_strided_slice %94 {offsets = [0, 0], sizes = [16, 384], strides = [1, 1]} : vector<16x512xf32> to vector<16x384xf32>
    %96 = arith.negf %95 : vector<16x384xf32>
    %97 = math.exp %96 : vector<16x384xf32>
    %cst_38 = arith.constant 1.000000e+00 : f32
    %98 = vector.broadcast %cst_38 : f32 to vector<16x384xf32>
    %99 = arith.addf %98, %97 : vector<16x384xf32>
    %100 = arith.divf %98, %99 : vector<16x384xf32>
    %101 = vector.extract_strided_slice %100 {offsets = [0, 0], sizes = [16, 128], strides = [1, 1]} : vector<16x384xf32> to vector<16x128xf32>
    %102 = vector.extract_strided_slice %100 {offsets = [0, 128], sizes = [16, 128], strides = [1, 1]} : vector<16x384xf32> to vector<16x128xf32>
    %103 = vector.extract_strided_slice %100 {offsets = [0, 256], sizes = [16, 128], strides = [1, 1]} : vector<16x384xf32> to vector<16x128xf32>
    %104 = vector.extract_strided_slice %94 {offsets = [0, 384], sizes = [16, 128], strides = [1, 1]} : vector<16x512xf32> to vector<16x128xf32>
    %105 = math.tanh %104 : vector<16x128xf32>
    %106 = arith.mulf %102, %83 : vector<16x128xf32>
    %107 = arith.mulf %101, %105 : vector<16x128xf32>
    %108 = arith.addf %106, %107 : vector<16x128xf32>
    %109 = math.tanh %108 : vector<16x128xf32>
    %110 = arith.mulf %103, %109 : vector<16x128xf32>
    %111 = arith.index_cast %c3_i32 : i32 to index
    %c0_39 = arith.constant 0 : index
    %c0_40 = arith.constant 0 : index
    %112 = vector.load %arg16[%111, %c0_39, %c0_40] : memref<8x16x128xf32, #tpu.memory_space<vmem>>, vector<1x16x128xf32>
    %113 = vector.shape_cast %112 : vector<1x16x128xf32> to vector<16x128xf32>
    %114 = vector.shape_cast %110 : vector<16x128xf32> to vector<1x16x128xf32>
    tpu.vector_store %arg16[%111, %c0_39, %c0_40], %114 {strides = array<i32>} : memref<8x16x128xf32, #tpu.memory_space<vmem>>, vector<1x16x128xf32>,
    %c4_i32 = arith.constant 4 : i32
    %115 = arith.index_cast %c4_i32 : i32 to index
    %c0_41 = arith.constant 0 : index
    %c0_42 = arith.constant 0 : index
    %116 = vector.load %arg15[%115, %c0_41, %c0_42] : memref<8x16x512xf32, #tpu.memory_space<vmem>>, vector<1x16x512xf32>
    %117 = vector.shape_cast %116 : vector<1x16x512xf32> to vector<16x512xf32>
    %cst_43 = arith.constant dense<0.000000e+00> : vector<16x512xf32>
    %118 = tpu.matmul %110, %12, %cst_43 {dimension_numbers = #tpu.dot_dimension_numbers<[1], [0], [0], [1], [0, 0, 1, 1], [], []>} : vector<16x128xf32>, vector<128x512xf32>, vector<16x512xf32> -> vector<16x512xf32>
    %119 = arith.addf %117, %118 : vector<16x512xf32>
    %120 = vector.extract_strided_slice %119 {offsets = [0, 0], sizes = [16, 384], strides = [1, 1]} : vector<16x512xf32> to vector<16x384xf32>
    %121 = arith.negf %120 : vector<16x384xf32>
    %122 = math.exp %121 : vector<16x384xf32>
    %cst_44 = arith.constant 1.000000e+00 : f32
    %123 = vector.broadcast %cst_44 : f32 to vector<16x384xf32>
    %124 = arith.addf %123, %122 : vector<16x384xf32>
    %125 = arith.divf %123, %124 : vector<16x384xf32>
    %126 = vector.extract_strided_slice %125 {offsets = [0, 0], sizes = [16, 128], strides = [1, 1]} : vector<16x384xf32> to vector<16x128xf32>
    %127 = vector.extract_strided_slice %125 {offsets = [0, 128], sizes = [16, 128], strides = [1, 1]} : vector<16x384xf32> to vector<16x128xf32>
    %128 = vector.extract_strided_slice %125 {offsets = [0, 256], sizes = [16, 128], strides = [1, 1]} : vector<16x384xf32> to vector<16x128xf32>
    %129 = vector.extract_strided_slice %119 {offsets = [0, 384], sizes = [16, 128], strides = [1, 1]} : vector<16x512xf32> to vector<16x128xf32>
    %130 = math.tanh %129 : vector<16x128xf32>
    %131 = arith.mulf %127, %108 : vector<16x128xf32>
    %132 = arith.mulf %126, %130 : vector<16x128xf32>
    %133 = arith.addf %131, %132 : vector<16x128xf32>
    %134 = math.tanh %133 : vector<16x128xf32>
    %135 = arith.mulf %128, %134 : vector<16x128xf32>
    %136 = arith.index_cast %c4_i32 : i32 to index
    %c0_45 = arith.constant 0 : index
    %c0_46 = arith.constant 0 : index
    %137 = vector.load %arg16[%136, %c0_45, %c0_46] : memref<8x16x128xf32, #tpu.memory_space<vmem>>, vector<1x16x128xf32>
    %138 = vector.shape_cast %137 : vector<1x16x128xf32> to vector<16x128xf32>
    %139 = vector.shape_cast %135 : vector<16x128xf32> to vector<1x16x128xf32>
    tpu.vector_store %arg16[%136, %c0_45, %c0_46], %139 {strides = array<i32>} : memref<8x16x128xf32, #tpu.memory_space<vmem>>, vector<1x16x128xf32>,
    %c5_i32 = arith.constant 5 : i32
    %140 = arith.index_cast %c5_i32 : i32 to index
    %c0_47 = arith.constant 0 : index
    %c0_48 = arith.constant 0 : index
    %141 = vector.load %arg15[%140, %c0_47, %c0_48] : memref<8x16x512xf32, #tpu.memory_space<vmem>>, vector<1x16x512xf32>
    %142 = vector.shape_cast %141 : vector<1x16x512xf32> to vector<16x512xf32>
    %cst_49 = arith.constant dense<0.000000e+00> : vector<16x512xf32>
    %143 = tpu.matmul %135, %12, %cst_49 {dimension_numbers = #tpu.dot_dimension_numbers<[1], [0], [0], [1], [0, 0, 1, 1], [], []>} : vector<16x128xf32>, vector<128x512xf32>, vector<16x512xf32> -> vector<16x512xf32>
    %144 = arith.addf %142, %143 : vector<16x512xf32>
    %145 = vector.extract_strided_slice %144 {offsets = [0, 0], sizes = [16, 384], strides = [1, 1]} : vector<16x512xf32> to vector<16x384xf32>
    %146 = arith.negf %145 : vector<16x384xf32>
    %147 = math.exp %146 : vector<16x384xf32>
    %cst_50 = arith.constant 1.000000e+00 : f32
    %148 = vector.broadcast %cst_50 : f32 to vector<16x384xf32>
    %149 = arith.addf %148, %147 : vector<16x384xf32>
    %150 = arith.divf %148, %149 : vector<16x384xf32>
    %151 = vector.extract_strided_slice %150 {offsets = [0, 0], sizes = [16, 128], strides = [1, 1]} : vector<16x384xf32> to vector<16x128xf32>
    %152 = vector.extract_strided_slice %150 {offsets = [0, 128], sizes = [16, 128], strides = [1, 1]} : vector<16x384xf32> to vector<16x128xf32>
    %153 = vector.extract_strided_slice %150 {offsets = [0, 256], sizes = [16, 128], strides = [1, 1]} : vector<16x384xf32> to vector<16x128xf32>
    %154 = vector.extract_strided_slice %144 {offsets = [0, 384], sizes = [16, 128], strides = [1, 1]} : vector<16x512xf32> to vector<16x128xf32>
    %155 = math.tanh %154 : vector<16x128xf32>
    %156 = arith.mulf %152, %133 : vector<16x128xf32>
    %157 = arith.mulf %151, %155 : vector<16x128xf32>
    %158 = arith.addf %156, %157 : vector<16x128xf32>
    %159 = math.tanh %158 : vector<16x128xf32>
    %160 = arith.mulf %153, %159 : vector<16x128xf32>
    %161 = arith.index_cast %c5_i32 : i32 to index
    %c0_51 = arith.constant 0 : index
    %c0_52 = arith.constant 0 : index
    %162 = vector.load %arg16[%161, %c0_51, %c0_52] : memref<8x16x128xf32, #tpu.memory_space<vmem>>, vector<1x16x128xf32>
    %163 = vector.shape_cast %162 : vector<1x16x128xf32> to vector<16x128xf32>
    %164 = vector.shape_cast %160 : vector<16x128xf32> to vector<1x16x128xf32>
    tpu.vector_store %arg16[%161, %c0_51, %c0_52], %164 {strides = array<i32>} : memref<8x16x128xf32, #tpu.memory_space<vmem>>, vector<1x16x128xf32>,
    %c6_i32 = arith.constant 6 : i32
    %165 = arith.index_cast %c6_i32 : i32 to index
    %c0_53 = arith.constant 0 : index
    %c0_54 = arith.constant 0 : index
    %166 = vector.load %arg15[%165, %c0_53, %c0_54] : memref<8x16x512xf32, #tpu.memory_space<vmem>>, vector<1x16x512xf32>
    %167 = vector.shape_cast %166 : vector<1x16x512xf32> to vector<16x512xf32>
    %cst_55 = arith.constant dense<0.000000e+00> : vector<16x512xf32>
    %168 = tpu.matmul %160, %12, %cst_55 {dimension_numbers = #tpu.dot_dimension_numbers<[1], [0], [0], [1], [0, 0, 1, 1], [], []>} : vector<16x128xf32>, vector<128x512xf32>, vector<16x512xf32> -> vector<16x512xf32>
    %169 = arith.addf %167, %168 : vector<16x512xf32>
    %170 = vector.extract_strided_slice %169 {offsets = [0, 0], sizes = [16, 384], strides = [1, 1]} : vector<16x512xf32> to vector<16x384xf32>
    %171 = arith.negf %170 : vector<16x384xf32>
    %172 = math.exp %171 : vector<16x384xf32>
    %cst_56 = arith.constant 1.000000e+00 : f32
    %173 = vector.broadcast %cst_56 : f32 to vector<16x384xf32>
    %174 = arith.addf %173, %172 : vector<16x384xf32>
    %175 = arith.divf %173, %174 : vector<16x384xf32>
    %176 = vector.extract_strided_slice %175 {offsets = [0, 0], sizes = [16, 128], strides = [1, 1]} : vector<16x384xf32> to vector<16x128xf32>
    %177 = vector.extract_strided_slice %175 {offsets = [0, 128], sizes = [16, 128], strides = [1, 1]} : vector<16x384xf32> to vector<16x128xf32>
    %178 = vector.extract_strided_slice %175 {offsets = [0, 256], sizes = [16, 128], strides = [1, 1]} : vector<16x384xf32> to vector<16x128xf32>
    %179 = vector.extract_strided_slice %169 {offsets = [0, 384], sizes = [16, 128], strides = [1, 1]} : vector<16x512xf32> to vector<16x128xf32>
    %180 = math.tanh %179 : vector<16x128xf32>
    %181 = arith.mulf %177, %158 : vector<16x128xf32>
    %182 = arith.mulf %176, %180 : vector<16x128xf32>
    %183 = arith.addf %181, %182 : vector<16x128xf32>
    %184 = math.tanh %183 : vector<16x128xf32>
    %185 = arith.mulf %178, %184 : vector<16x128xf32>
    %186 = arith.index_cast %c6_i32 : i32 to index
    %c0_57 = arith.constant 0 : index
    %c0_58 = arith.constant 0 : index
    %187 = vector.load %arg16[%186, %c0_57, %c0_58] : memref<8x16x128xf32, #tpu.memory_space<vmem>>, vector<1x16x128xf32>
    %188 = vector.shape_cast %187 : vector<1x16x128xf32> to vector<16x128xf32>
    %189 = vector.shape_cast %185 : vector<16x128xf32> to vector<1x16x128xf32>
    tpu.vector_store %arg16[%186, %c0_57, %c0_58], %189 {strides = array<i32>} : memref<8x16x128xf32, #tpu.memory_space<vmem>>, vector<1x16x128xf32>,
    %c7_i32 = arith.constant 7 : i32
    %190 = arith.index_cast %c7_i32 : i32 to index
    %c0_59 = arith.constant 0 : index
    %c0_60 = arith.constant 0 : index
    %191 = vector.load %arg15[%190, %c0_59, %c0_60] : memref<8x16x512xf32, #tpu.memory_space<vmem>>, vector<1x16x512xf32>
    %192 = vector.shape_cast %191 : vector<1x16x512xf32> to vector<16x512xf32>
    %cst_61 = arith.constant dense<0.000000e+00> : vector<16x512xf32>
    %193 = tpu.matmul %185, %12, %cst_61 {dimension_numbers = #tpu.dot_dimension_numbers<[1], [0], [0], [1], [0, 0, 1, 1], [], []>} : vector<16x128xf32>, vector<128x512xf32>, vector<16x512xf32> -> vector<16x512xf32>
    %194 = arith.addf %192, %193 : vector<16x512xf32>
    %195 = vector.extract_strided_slice %194 {offsets = [0, 0], sizes = [16, 384], strides = [1, 1]} : vector<16x512xf32> to vector<16x384xf32>
    %196 = arith.negf %195 : vector<16x384xf32>
    %197 = math.exp %196 : vector<16x384xf32>
    %cst_62 = arith.constant 1.000000e+00 : f32
    %198 = vector.broadcast %cst_62 : f32 to vector<16x384xf32>
    %199 = arith.addf %198, %197 : vector<16x384xf32>
    %200 = arith.divf %198, %199 : vector<16x384xf32>
    %201 = vector.extract_strided_slice %200 {offsets = [0, 0], sizes = [16, 128], strides = [1, 1]} : vector<16x384xf32> to vector<16x128xf32>
    %202 = vector.extract_strided_slice %200 {offsets = [0, 128], sizes = [16, 128], strides = [1, 1]} : vector<16x384xf32> to vector<16x128xf32>
    %203 = vector.extract_strided_slice %200 {offsets = [0, 256], sizes = [16, 128], strides = [1, 1]} : vector<16x384xf32> to vector<16x128xf32>
    %204 = vector.extract_strided_slice %194 {offsets = [0, 384], sizes = [16, 128], strides = [1, 1]} : vector<16x512xf32> to vector<16x128xf32>
    %205 = math.tanh %204 : vector<16x128xf32>
    %206 = arith.mulf %202, %183 : vector<16x128xf32>
    %207 = arith.mulf %201, %205 : vector<16x128xf32>
    %208 = arith.addf %206, %207 : vector<16x128xf32>
    %209 = math.tanh %208 : vector<16x128xf32>
    %210 = arith.mulf %203, %209 : vector<16x128xf32>
    %211 = arith.index_cast %c7_i32 : i32 to index
    %c0_63 = arith.constant 0 : index
    %c0_64 = arith.constant 0 : index
    %212 = vector.load %arg16[%211, %c0_63, %c0_64] : memref<8x16x128xf32, #tpu.memory_space<vmem>>, vector<1x16x128xf32>
    %213 = vector.shape_cast %212 : vector<1x16x128xf32> to vector<16x128xf32>
    %214 = vector.shape_cast %210 : vector<16x128xf32> to vector<1x16x128xf32>
    tpu.vector_store %arg16[%211, %c0_63, %c0_64], %214 {strides = array<i32>} : memref<8x16x128xf32, #tpu.memory_space<vmem>>, vector<1x16x128xf32>,
    %c8_i32 = arith.constant 8 : i32
    %c0_65 = arith.constant 0 : index
    %c0_66 = arith.constant 0 : index
    %215 = vector.load %arg13[%c0_65, %c0_66] : memref<16x128xf32, #tpu.memory_space<vmem>>, vector<16x128xf32>
    tpu.vector_store %arg13[%c0_65, %c0_66], %210 {strides = array<i32>} : memref<16x128xf32, #tpu.memory_space<vmem>>, vector<16x128xf32>,
    %c0_67 = arith.constant 0 : index
    %c0_68 = arith.constant 0 : index
    %216 = vector.load %arg14[%c0_67, %c0_68] : memref<16x128xf32, #tpu.memory_space<vmem>>, vector<16x128xf32>
    tpu.vector_store %arg14[%c0_67, %c0_68], %208 {strides = array<i32>} : memref<16x128xf32, #tpu.memory_space<vmem>>, vector<16x128xf32>,
    %c0_69 = arith.constant 0 : index
    %c0_70 = arith.constant 0 : index
    %217 = vector.load %arg8[%c0_69, %c0_70] : memref<128x128xf32, #tpu.memory_space<vmem>>, vector<128x128xf32>
    %c0_71 = arith.constant 0 : index
    %c0_72 = arith.constant 0 : index
    %c0_73 = arith.constant 0 : index
    %218 = vector.load %arg16[%c0_71, %c0_72, %c0_73] : memref<8x16x128xf32, #tpu.memory_space<vmem>>, vector<8x16x128xf32>
    %219 = vector.shape_cast %218 : vector<8x16x128xf32> to vector<128x128xf32>
    %cst_74 = arith.constant dense<0.000000e+00> : vector<128x128xf32>
    %220 = tpu.matmul %219, %217, %cst_74 {dimension_numbers = #tpu.dot_dimension_numbers<[1], [0], [0], [1], [0, 0, 1, 1], [], []>} : vector<128x128xf32>, vector<128x128xf32>, vector<128x128xf32> -> vector<128x128xf32>
    %c0_75 = arith.constant 0 : index
    %c0_76 = arith.constant 0 : index
    %221 = vector.load %arg9[%c0_75, %c0_76] : memref<1x128xf32, #tpu.memory_space<vmem>>, vector<1x128xf32>
    %222 = vector.broadcast %221 : vector<1x128xf32> to vector<128x128xf32>
    %223 = arith.addf %220, %222 : vector<128x128xf32>
    %224 = vector.shape_cast %223 : vector<128x128xf32> to vector<8x16x128xf32>
    %c0_77 = arith.constant 0 : index
    %c0_78 = arith.constant 0 : index
    %c0_79 = arith.constant 0 : index
    %225 = vector.load %arg10[%c0_77, %c0_78, %c0_79] : memref<8x16x128xf32, #tpu.memory_space<vmem>>, vector<8x16x128xf32>
    tpu.vector_store %arg10[%c0_77, %c0_78, %c0_79], %224 {strides = array<i32>} : memref<8x16x128xf32, #tpu.memory_space<vmem>>, vector<8x16x128xf32>,
    %c0_i32_80 = arith.constant 0 : i32
    %226 = arith.cmpi eq, %arg1, %c0_i32_80 : i32
    %227 = arith.extui %226 : i1 to i32
    %c0_i32_81 = arith.constant 0 : i32
    %228 = arith.cmpi ne, %227, %c0_i32_81 : i32
    scf.if %228 {
      %c0_82 = arith.constant 0 : index
      %c0_83 = arith.constant 0 : index
      %229 = vector.load %arg11[%c0_82, %c0_83] : memref<16x128xf32, #tpu.memory_space<vmem>>, vector<16x128xf32>
      tpu.vector_store %arg11[%c0_82, %c0_83], %210 {strides = array<i32>} : memref<16x128xf32, #tpu.memory_space<vmem>>, vector<16x128xf32>,
      %c0_84 = arith.constant 0 : index
      %c0_85 = arith.constant 0 : index
      %230 = vector.load %arg12[%c0_84, %c0_85] : memref<16x128xf32, #tpu.memory_space<vmem>>, vector<16x128xf32>
      tpu.vector_store %arg12[%c0_84, %c0_85], %208 {strides = array<i32>} : memref<16x128xf32, #tpu.memory_space<vmem>>, vector<16x128xf32>,
    } else {
    }
    return
  }
  func.func @transform_0(%arg0: i32, %arg1: i32) -> (i32, i32, i32) {
    %c0_i32 = arith.constant 0 : i32
    %c0_i32_0 = arith.constant 0 : i32
    return %arg1, %arg0, %c0_i32 : i32, i32, i32
  }
  func.func @transform_1(%arg0: i32, %arg1: i32) -> (i32, i32) {
    %c0_i32 = arith.constant 0 : i32
    %c0_i32_0 = arith.constant 0 : i32
    %c0_i32_1 = arith.constant 0 : i32
    return %c0_i32, %c0_i32_0 : i32, i32
  }
  func.func @transform_2(%arg0: i32, %arg1: i32) -> (i32, i32) {
    %c0_i32 = arith.constant 0 : i32
    %c0_i32_0 = arith.constant 0 : i32
    %c0_i32_1 = arith.constant 0 : i32
    return %c0_i32, %c0_i32_0 : i32, i32
  }
  func.func @transform_3(%arg0: i32, %arg1: i32) -> (i32, i32) {
    %c0_i32 = arith.constant 0 : i32
    %c0_i32_0 = arith.constant 0 : i32
    %c0_i32_1 = arith.constant 0 : i32
    return %c0_i32, %c0_i32_0 : i32, i32
  }
  func.func @transform_4(%arg0: i32, %arg1: i32) -> (i32, i32) {
    %c0_i32 = arith.constant 0 : i32
    %c0_i32_0 = arith.constant 0 : i32
    return %arg0, %c0_i32 : i32, i32
  }
  func.func @transform_5(%arg0: i32, %arg1: i32) -> (i32, i32) {
    %c0_i32 = arith.constant 0 : i32
    %c0_i32_0 = arith.constant 0 : i32
    return %arg0, %c0_i32 : i32, i32
  }
  func.func @transform_6(%arg0: i32, %arg1: i32) -> (i32, i32) {
    %c0_i32 = arith.constant 0 : i32
    %c0_i32_0 = arith.constant 0 : i32
    %c0_i32_1 = arith.constant 0 : i32
    return %c0_i32, %c0_i32_0 : i32, i32
  }
  func.func @transform_7(%arg0: i32, %arg1: i32) -> (i32, i32) {
    %c0_i32 = arith.constant 0 : i32
    %c0_i32_0 = arith.constant 0 : i32
    %c0_i32_1 = arith.constant 0 : i32
    return %c0_i32, %c0_i32_0 : i32, i32
  }
  func.func @transform_8(%arg0: i32, %arg1: i32) -> (i32, i32, i32) {
    %c0_i32 = arith.constant 0 : i32
    %c0_i32_0 = arith.constant 0 : i32
    return %arg1, %arg0, %c0_i32 : i32, i32, i32
  }
  func.func @transform_9(%arg0: i32, %arg1: i32) -> (i32, i32) {
    %c0_i32 = arith.constant 0 : i32
    %c0_i32_0 = arith.constant 0 : i32
    return %arg0, %c0_i32 : i32, i32
  }
  func.func @transform_10(%arg0: i32, %arg1: i32) -> (i32, i32) {
    %c0_i32 = arith.constant 0 : i32
    %c0_i32_0 = arith.constant 0 : i32
    return %arg0, %c0_i32 : i32, i32
  }
}

</mosaic_0001>

<bundles_post_ra>
// kernel: tpu_custom_call.1
= control target key start
LH: loop header
LB: loop body
LE: loop exit
PB: predicated region body
PF: predicated region fallthrough
CT: control target
= control target key end

     0   :  { %16 = vsyncpa [#allocation7], 0  ;;  %s5373_s0 = inlined_call_operand.hbm [shape: f32[8,16,128], index: 0, kind: input, shape index: {}]   ;;  %s5374_s1 = inlined_call_operand.hbm [shape: f32[128,512], index: 1, kind: input, shape index: {}]   ;;  %s5375_s2 = inlined_call_operand.hbm [shape: f32[128,512], index: 2, kind: input, shape index: {}]   ;;  %s5376_s3 = inlined_call_operand.hbm [shape: f32[1,512], index: 3, kind: input, shape index: {}]   ;;  %s5377_s4 = inlined_call_operand.hbm [shape: f32[16,128], index: 4, kind: input, shape index: {}]   ;;  %s5378_s5 = inlined_call_operand.vmem [shape: f32[16,128], index: 5, kind: input, shape index: {}]   ;;  %s5379_s6 = inlined_call_operand.hbm [shape: f32[128,128], index: 6, kind: input, shape index: {}]   ;;  %s5380_s7 = inlined_call_operand.vmem [shape: f32[1,128], index: 7, kind: input, shape index: {}]   ;;  %s5381_s8 = inlined_call_operand.hbm [shape: f32[16,8,128], index: 8, kind: output, shape index: {0}]   ;;  %s5382_s9 = inlined_call_operand.hbm [shape: f32[16,128], index: 9, kind: output, shape index: {1}]   ;;  %s5383_s10 = inlined_call_operand.hbm [shape: f32[16,128], index: 10, kind: output, shape index: {2}]  }
   0x1   :  { %17 = vsyncpa [#allocation10], 0 }
   0x2   :  { %18 = vsyncpa [#allocation13], 0 }
   0x3   :  { %19 = vsyncpa [#allocation16], 0 }
   0x4   :  { %20 = vsyncpa [#allocation8], 0 }
   0x5   :  { %21 = vsyncpa [#allocation19], 0  ;;  %s4361_s13 = smov [#allocation9]   ;;  %s4151_s17 = scalar_lea.hbm %s5374_s1, 8192 }
   0x6   :  { %s39_s14 = sshll.u32 %s4361_s13, 4  ;;  %p4152_p0 = scmp.ne.s32.totalorder %s5374_s1, %s4151_s17  ;;  %s40_s14 = int_to_ptr.vmem [resolvable:$true] %s39_s14 }
   0x7   :  { %p4155_p1 = scmp.lt.u32.totalorder %s4151_s17, %s5374_s1 }
   0x9   :  { %p4157_p2 = pnand %p4155_p1, %p4152_p0 }
   0xb   :  { %4160 = shalt.err (!%p4157_p2)
}
   0xc   :  { %s4161_s22 = scalar_lea.vmem %s40_s14, 8192  ;;  %p4166_p4 = scmp.lt.s32.totalorder %s40_s14, %s40_s14 }
   0xd   :  { %p4162_p3 = scmp.ne.s32.totalorder %s40_s14, %s4161_s22  ;;  %p4167_p5 = scmp.lt.s32.totalorder %s4161_s22, %s4161_s22 }
   0xf   :  { %p4168_p6 = por %p4167_p5, %p4166_p4 }
  0x11   :  { %p4169_p7 = pnand %p4168_p6, %p4162_p3 }
  0x13   :  { %4172 = shalt.err (!%p4169_p7)
}
  0x14   :  { %s4362_s23 = smov 512   ;;  %s4363_s24 = smov 32  }
  0x15   :  { %45 = dma.hbm_to_vmem [thread:$0]  %s5374_s1, 8192, %s40_s14, [#allocation10], %s4362_s23, %s4362_s23, %s4363_s24  }
  0x16   :  { %s4364_s27 = smov [#allocation12]   ;;  %s4365_s29 = smov [#allocation6]  }
  0x17   :  { %s64_s28 = sshll.u32 %s4364_s27, 4  ;;  %s27_s30 = sshll.u32 %s4365_s29, 4  ;;  %s65_s28 = int_to_ptr.vmem [resolvable:$true] %s64_s28  ;;  %s28_s30 = int_to_ptr.vmem [resolvable:$true] %s27_s30 }
  0x18   :  { %s4173_s13 = scalar_lea.hbm %s5376_s3, 64 }
  0x19   :  { %p4174_p8 = scmp.ne.s32.totalorder %s5376_s3, %s4173_s13  ;;  %p4177_p9 = scmp.lt.u32.totalorder %s4173_s13, %s5376_s3 }
  0x1b   :  { %p4179_p10 = pnand %p4177_p9, %p4174_p8 }
  0x1d   :  { %4182 = shalt.err (!%p4179_p10)
}
  0x1e   :  { %s4183_s1 = scalar_lea.vmem %s65_s28, 64  ;;  %p4188_p12 = scmp.lt.s32.totalorder %s65_s28, %s65_s28 }
  0x1f   :  { %p4184_p11 = scmp.ne.s32.totalorder %s65_s28, %s4183_s1  ;;  %p4189_p13 = scmp.lt.s32.totalorder %s4183_s1, %s4183_s1 }
  0x21   :  { %p4190_p0 = por %p4189_p13, %p4188_p12 }
  0x23   :  { %p4191_p1 = pnand %p4190_p0, %p4184_p11 }
  0x25   :  { %4194 = shalt.err (!%p4191_p1)
}
  0x26   :  { %67 = dma.hbm_to_vmem [thread:$0]  %s5376_s3, 64, %s65_s28, [#allocation13]  }
  0x27   :  { %s4195_s22 = scalar_lea.hbm %s5373_s0, 2048 }
  0x28   :  { %p4196_p2 = scmp.ne.s32.totalorder %s5373_s0, %s4195_s22  ;;  %p4199_p3 = scmp.lt.u32.totalorder %s4195_s22, %s5373_s0 }
  0x2a   :  { %p4201_p4 = pnand %p4199_p3, %p4196_p2 }
  0x2c   :  { %4204 = shalt.err (!%p4201_p4)
}
  0x2d   :  { %s4205_s11 = scalar_lea.vmem %s28_s30, 2048  ;;  %p4210_p6 = scmp.lt.s32.totalorder %s28_s30, %s28_s30 }
  0x2e   :  { %p4206_p5 = scmp.ne.s32.totalorder %s28_s30, %s4205_s11  ;;  %p4211_p7 = scmp.lt.s32.totalorder %s4205_s11, %s4205_s11 }
  0x30   :  { %p4212_p8 = por %p4211_p7, %p4210_p6 }
  0x32   :  { %p4213_p9 = pnand %p4212_p8, %p4206_p5 }
  0x34   :  { %4216 = shalt.err (!%p4213_p9)
}
  0x35   :  { %s4366_s3 = smov 128   ;;  %s4367_s28 = smov 8  }
  0x36   :  { %33 = dma.hbm_to_vmem [thread:$0]  %s5373_s0, 2048, %s28_s30, [#allocation7], %s4366_s3, %s4366_s3, %s4367_s28  }
  0x37   :  { %s4368_s15 = smov [#allocation11]   ;;  %s4369_s17 = smov [#allocation14]  }
  0x38   :  { %s51_s16 = sshll.u32 %s4368_s15, 4  ;;  %s73_s18 = sshll.u32 %s4369_s17, 4  ;;  %s52_s16 = int_to_ptr.vmem [resolvable:$true] %s51_s16  ;;  %s74_s18 = int_to_ptr.vmem [resolvable:$true] %s73_s18 }
  0x39   :  { %s4217_s19 = scalar_lea.hbm %s5375_s2, 8192 }
  0x3a   :  { %p4218_p10 = scmp.ne.s32.totalorder %s5375_s2, %s4217_s19  ;;  %p4221_p11 = scmp.lt.u32.totalorder %s4217_s19, %s5375_s2 }
  0x3c   :  { %p4223_p12 = pnand %p4221_p11, %p4218_p10 }
  0x3e   :  { %4226 = shalt.err (!%p4223_p12)
}
  0x3f   :  { %s4227_s0 = scalar_lea.vmem %s52_s16, 8192  ;;  %p4232_p0 = scmp.lt.s32.totalorder %s52_s16, %s52_s16 }
  0x40   :  { %p4228_p13 = scmp.ne.s32.totalorder %s52_s16, %s4227_s0  ;;  %p4233_p1 = scmp.lt.s32.totalorder %s4227_s0, %s4227_s0 }
  0x42   :  { %p4234_p2 = por %p4233_p1, %p4232_p0 }
  0x44   :  { %p4235_p3 = pnand %p4234_p2, %p4228_p13 }
  0x46   :  { %4238 = shalt.err (!%p4235_p3)
}
  0x47   :  { %57 = dma.hbm_to_vmem [thread:$0]  %s5375_s2, 8192, %s52_s16, [#allocation10], %s4362_s23, %s4362_s23, %s4363_s24  }
  0x48   :  { %s4239_s11 = scalar_lea.hbm %s5377_s4, 256 }
  0x49   :  { %p4240_p4 = scmp.ne.s32.totalorder %s5377_s4, %s4239_s11  ;;  %p4243_p5 = scmp.lt.u32.totalorder %s4239_s11, %s5377_s4 }
  0x4b   :  { %p4245_p6 = pnand %p4243_p5, %p4240_p4 }
  0x4d   :  { %4248 = shalt.err (!%p4245_p6)
}
  0x4e   :  { %s4249_s1 = scalar_lea.vmem %s74_s18, 256  ;;  %p4254_p8 = scmp.lt.s32.totalorder %s74_s18, %s74_s18 }
  0x4f   :  { %p4250_p7 = scmp.ne.s32.totalorder %s74_s18, %s4249_s1  ;;  %p4255_p9 = scmp.lt.s32.totalorder %s4249_s1, %s4249_s1 }
  0x51   :  { %p4256_p10 = por %p4255_p9, %p4254_p8 }
  0x53   :  { %p4257_p11 = pnand %p4256_p10, %p4250_p7 }
  0x55   :  { %4260 = shalt.err (!%p4257_p11)
}
  0x56   :  { %79 = dma.hbm_to_vmem [thread:$0]  %s5377_s4, 256, %s74_s18, [#allocation13], %s4366_s3, %s4366_s3, %s4367_s28  }
  0x57   :  { %s4370_s24 = smov [#allocation15]   ;;  %s4261_s20 = scalar_lea.hbm %s5379_s6, 2048 }
  0x58   :  { %s87_s16 = sshll.u32 %s4370_s24, 4  ;;  %p4262_p12 = scmp.ne.s32.totalorder %s5379_s6, %s4261_s20  ;;  %s88_s16 = int_to_ptr.vmem [resolvable:$true] %s87_s16 }
  0x59   :  { %p4265_p13 = scmp.lt.u32.totalorder %s4261_s20, %s5379_s6 }
  0x5b   :  { %p4267_p0 = pnand %p4265_p13, %p4262_p12 }
  0x5d   :  { %4270 = shalt.err (!%p4267_p0)
}
  0x5e   :  { %s4271_s30 = scalar_lea.vmem %s88_s16, 2048  ;;  %p4276_p2 = scmp.lt.s32.totalorder %s88_s16, %s88_s16 }
  0x5f   :  { %p4272_p1 = scmp.ne.s32.totalorder %s88_s16, %s4271_s30  ;;  %p4277_p3 = scmp.lt.s32.totalorder %s4271_s30, %s4271_s30 }
  0x61   :  { %p4278_p4 = por %p4277_p3, %p4276_p2 }
  0x63   :  { %p4279_p5 = pnand %p4278_p4, %p4272_p1 }
  0x65   :  { %4282 = shalt.err (!%p4279_p5)
}
  0x66   :  { %93 = dma.hbm_to_vmem [thread:$0]  %s5379_s6, 2048, %s88_s16, [#allocation16], %s4366_s3, %s4366_s3, %s4367_s28  }
  0x67   :  { %4349 = dma.done.wait [#allocation7], 2048  }
  0x68   :  { %4350 = vsyncadd [#allocation7], 4294965248 }
  0x69   :  { %4351 = dma.done.wait [#allocation10], 16384  }
  0x6a   :  { %4352 = vsyncadd [#allocation10], 4294950912 }
  0x6b   :  { %4353 = dma.done.wait [#allocation13], 320  }
  0x6c   :  { %4354 = vsyncadd [#allocation13], 4294966976 }
  0x6d   :  { %4355 = dma.done.wait [#allocation16], 2048  }
  0x6e   :  { %4356 = vsyncadd [#allocation16], 4294965248  ;;  %v5384_v0 = vmov 0.0   ;;  %v143_v1 = vld [vmem:[#allocation9 + $0x8] sm:$0xff]  ;;  %v142_v3 = vld [vmem:[#allocation9] sm:$0xff] }
  0x6f   :  { %340 = vmatprep.mubr.f32.mxu1 %v5384_v0  ;;  %292 = vmatprep.mubr.f32.mxu0 %v5384_v0  ;;  %v147_v2 = vld [vmem:[#allocation9 + $0x28] sm:$0xff]  ;;  %v146_v5 = vld [vmem:[#allocation9 + $0x20] sm:$0xff]  ;;  %v145_v48 = vld [vmem:[#allocation9 + $0x18] sm:$0xff] }
  0x70   :  { %v3127_v4 = vpack.c.bf16 %v147_v2, %v143_v1  ;;  %v151_v6 = vld [vmem:[#allocation9 + $0x48] sm:$0xff]  ;;  %v3129_v8 = vpack.c.bf16 %v146_v5, %v142_v3  ;;  %v150_v10 = vld [vmem:[#allocation9 + $0x40] sm:$0xff]  ;;  %v149_v49 = vld [vmem:[#allocation9 + $0x38] sm:$0xff] }
  0x71   :  { %v155_v7 = vld [vmem:[#allocation9 + $0x68] sm:$0xff]  ;;  %v154_v11 = vld [vmem:[#allocation9 + $0x60] sm:$0xff]  ;;  %v3159_v53 = vpack.c.bf16 %v149_v49, %v145_v48  ;;  %v144_v54 = vld [vmem:[#allocation9 + $0x10] sm:$0xff] }
  0x72   :  { %v3131_v9 = vpack.c.bf16 %v155_v7, %v151_v6  ;;  %v159_v12 = vld [vmem:[#allocation9 + $0x88] sm:$0xff]  ;;  %3735 = vmatprep.subr.bf16.mxu1 %v3127_v4  ;;  %3128 = vmatprep.subr.bf16.mxu0 %v3127_v4  ;;  %v3133_v14 = vpack.c.bf16 %v154_v11, %v150_v10  ;;  %v158_v16 = vld [vmem:[#allocation9 + $0x80] sm:$0xff]  ;;  %v148_v55 = vld [vmem:[#allocation9 + $0x30] sm:$0xff] }
  0x73   :  { %v163_v13 = vld [vmem:[#allocation9 + $0xa8] sm:$0xff]  ;;  %3743 = vmatpush1.bf16.msra.mxu1 %v3129_v8  ;;  %3130 = vmatpush1.bf16.msra.mxu0 %v3129_v8  ;;  %v162_v17 = vld [vmem:[#allocation9 + $0xa0] sm:$0xff]  ;;  %v153_v56 = vld [vmem:[#allocation9 + $0x58] sm:$0xff]  ;;  %v3161_v1 = vpack.c.bf16 %v148_v55, %v144_v54 }
  0x74   :  { %3736 = vmatprep.subr.bf16.mxu1 %v3131_v9  ;;  %v3135_v15 = vpack.c.bf16 %v163_v13, %v159_v12  ;;  %3132 = vmatprep.subr.bf16.mxu0 %v3131_v9  ;;  %v167_v18 = vld [vmem:[#allocation9 + $0xc8] sm:$0xff]  ;;  %v3137_v20 = vpack.c.bf16 %v162_v17, %v158_v16  ;;  %v166_v22 = vld [vmem:[#allocation9 + $0xc0] sm:$0xff]  ;;  %v157_v58 = vld [vmem:[#allocation9 + $0x78] sm:$0xff] }
  0x75   :  { %v171_v19 = vld [vmem:[#allocation9 + $0xe8] sm:$0xff]  ;;  %v170_v23 = vld [vmem:[#allocation9 + $0xe0] sm:$0xff]  ;;  %v3163_v3 = vpack.c.bf16 %v157_v58, %v153_v56  ;;  %v152_v4 = vld [vmem:[#allocation9 + $0x50] sm:$0xff] }
  0x76   :  { %v3139_v21 = vpack.c.bf16 %v171_v19, %v167_v18  ;;  %v175_v24 = vld [vmem:[#allocation9 + $0x108] sm:$0xff]  ;;  %v3141_v26 = vpack.c.bf16 %v170_v23, %v166_v22  ;;  %v174_v28 = vld [vmem:[#allocation9 + $0x100] sm:$0xff]  ;;  %v156_v5 = vld [vmem:[#allocation9 + $0x70] sm:$0xff] }
  0x77   :  { %3744 = vmatpush1.bf16.msra.mxu1 %v3133_v14  ;;  %3134 = vmatpush1.bf16.msra.mxu0 %v3133_v14  ;;  %v179_v25 = vld [vmem:[#allocation9 + $0x128] sm:$0xff]  ;;  %v178_v29 = vld [vmem:[#allocation9 + $0x120] sm:$0xff]  ;;  %v161_v6 = vld [vmem:[#allocation9 + $0x98] sm:$0xff] }
  0x78   :  { %3737 = vmatprep.subr.bf16.mxu1 %v3135_v15  ;;  %3136 = vmatprep.subr.bf16.mxu0 %v3135_v15  ;;  %v3143_v27 = vpack.c.bf16 %v179_v25, %v175_v24  ;;  %v183_v30 = vld [vmem:[#allocation9 + $0x148] sm:$0xff]  ;;  %v3145_v32 = vpack.c.bf16 %v178_v29, %v174_v28  ;;  %v182_v34 = vld [vmem:[#allocation9 + $0x140] sm:$0xff]  ;;  %v165_v8 = vld [vmem:[#allocation9 + $0xb8] sm:$0xff]  ;;  %v3165_v15 = vpack.c.bf16 %v156_v5, %v152_v4 }
  0x79   :  { %v187_v31 = vld [vmem:[#allocation9 + $0x168] sm:$0xff]  ;;  %v186_v35 = vld [vmem:[#allocation9 + $0x160] sm:$0xff]  ;;  %v3167_v17 = vpack.c.bf16 %v165_v8, %v161_v6  ;;  %v160_v18 = vld [vmem:[#allocation9 + $0x90] sm:$0xff] }
  0x7a   :  { %v3147_v33 = vpack.c.bf16 %v187_v31, %v183_v30  ;;  %v191_v36 = vld [vmem:[#allocation9 + $0x188] sm:$0xff]  ;;  %v3149_v38 = vpack.c.bf16 %v186_v35, %v182_v34  ;;  %v190_v40 = vld [vmem:[#allocation9 + $0x180] sm:$0xff]  ;;  %v164_v19 = vld [vmem:[#allocation9 + $0xb0] sm:$0xff] }
  0x7b   :  { %3745 = vmatpush1.bf16.msra.mxu1 %v3137_v20  ;;  %3138 = vmatpush1.bf16.msra.mxu0 %v3137_v20  ;;  %v195_v37 = vld [vmem:[#allocation9 + $0x1a8] sm:$0xff]  ;;  %v194_v41 = vld [vmem:[#allocation9 + $0x1a0] sm:$0xff]  ;;  %v169_v20 = vld [vmem:[#allocation9 + $0xd8] sm:$0xff]  ;;  %v3169_v29 = vpack.c.bf16 %v164_v19, %v160_v18 }
  0x7c   :  { %3738 = vmatprep.subr.bf16.mxu1 %v3139_v21  ;;  %3140 = vmatprep.subr.bf16.mxu0 %v3139_v21  ;;  %v3151_v39 = vpack.c.bf16 %v195_v37, %v191_v36  ;;  %v199_v42 = vld [vmem:[#allocation9 + $0x1c8] sm:$0xff]  ;;  %v3153_v44 = vpack.c.bf16 %v194_v41, %v190_v40  ;;  %v198_v46 = vld [vmem:[#allocation9 + $0x1c0] sm:$0xff]  ;;  %v173_v22 = vld [vmem:[#allocation9 + $0xf8] sm:$0xff] }
  0x7d   :  { %v203_v43 = vld [vmem:[#allocation9 + $0x1e8] sm:$0xff]  ;;  %v202_v47 = vld [vmem:[#allocation9 + $0x1e0] sm:$0xff]  ;;  %v4549_v28 = vld [vmem:[#allocation6 + $0x50] sm:$0xff]  ;;  %v3171_v31 = vpack.c.bf16 %v173_v22, %v169_v20 }
  0x7e   :  { %v3155_v45 = vpack.c.bf16 %v203_v43, %v199_v42  ;;  %v615_v50 = vld [vmem:[#allocation11 + $0x8] sm:$0xff]  ;;  %v3157_v52 = vpack.c.bf16 %v202_v47, %v198_v46  ;;  %v614_v59 = vld [vmem:[#allocation11] sm:$0xff]  ;;  %v4551_v30 = vld [vmem:[#allocation6 + $0x10] sm:$0xff] }
  0x7f   :  { %3746 = vmatpush1.bf16.msra.mxu1 %v3141_v26  ;;  %3142 = vmatpush1.bf16.msra.mxu0 %v3141_v26  ;;  %v619_v51 = vld [vmem:[#allocation11 + $0x28] sm:$0xff]  ;;  %v618_v60 = vld [vmem:[#allocation11 + $0x20] sm:$0xff]  ;;  %v177_v34 = vld [vmem:[#allocation9 + $0x118] sm:$0xff] }
  0x80   :  { %3739 = vmatprep.subr.bf16.mxu1 %v3143_v27  ;;  %3144 = vmatprep.subr.bf16.mxu0 %v3143_v27  ;;  %v4521_v57 = vpack.c.bf16 %v619_v51, %v615_v50  ;;  %v623_v61 = vld [vmem:[#allocation11 + $0x48] sm:$0xff]  ;;  %v4523_v63 = vld [vmem:[#allocation6 + $0x40] sm:$0xff]  ;;  %v4528_v7 = vpack.c.bf16 %v618_v60, %v614_v59  ;;  %v181_v36 = vld [vmem:[#allocation9 + $0x138] sm:$0xff] }
  0x81   :  { %v627_v62 = vld [vmem:[#allocation11 + $0x68] sm:$0xff]  ;;  %v4525_v2 = vld [vmem:[#allocation6] sm:$0xff]  ;;  %v4563_v42 = vld [vmem:[#allocation6 + $0x58] sm:$0xff] }
  0x82   :  { %v4530_v9 = vpack.c.bf16 %v627_v62, %v623_v61  ;;  %v622_v10 = vld [vmem:[#allocation11 + $0x40] sm:$0xff]  ;;  %v631_v12 = vld [vmem:[#allocation11 + $0x88] sm:$0xff]  ;;  %v176_v46 = vld [vmem:[#allocation9 + $0x110] sm:$0xff] }
  0x83   :  { %3747 = vmatpush1.bf16.msra.mxu1 %v3145_v32  ;;  %3146 = vmatpush1.bf16.msra.mxu0 %v3145_v32  ;;  %v626_v11 = vld [vmem:[#allocation11 + $0x60] sm:$0xff]  ;;  %v635_v13 = vld [vmem:[#allocation11 + $0xa8] sm:$0xff]  ;;  %v168_v32 = vld [vmem:[#allocation9 + $0xd0] sm:$0xff] }
  0x84   :  { %3740 = vmatprep.subr.bf16.mxu1 %v3147_v33  ;;  %3148 = vmatprep.subr.bf16.mxu0 %v3147_v33  ;;  %v4535_v14 = vld [vmem:[#allocation6 + $0x48] sm:$0xff]  ;;  %v4540_v21 = vpack.c.bf16 %v626_v11, %v622_v10  ;;  %v4544_v23 = vpack.c.bf16 %v635_v13, %v631_v12  ;;  %v630_v24 = vld [vmem:[#allocation11 + $0x80] sm:$0xff]  ;;  %v172_v33 = vld [vmem:[#allocation9 + $0xf0] sm:$0xff] }
  0x85   :  { %v4537_v16 = vld [vmem:[#allocation6 + $0x8] sm:$0xff]  ;;  %v634_v25 = vld [vmem:[#allocation11 + $0xa0] sm:$0xff]  ;;  %v3173_v43 = vpack.c.bf16 %v172_v33, %v168_v32  ;;  %v180_v47 = vld [vmem:[#allocation9 + $0x130] sm:$0xff] }
  0x86   :  { %v639_v26 = vld [vmem:[#allocation11 + $0xc8] sm:$0xff]  ;;  %v4554_v35 = vpack.c.bf16 %v634_v25, %v630_v24  ;;  %v185_v48 = vld [vmem:[#allocation9 + $0x158] sm:$0xff]  ;;  %v4577_v56 = vld [vmem:[#allocation6 + $0x60] sm:$0xff]  ;;  %v3177_v58 = vpack.c.bf16 %v180_v47, %v176_v46 }
  0x87   :  { %3748 = vmatpush1.bf16.msra.mxu1 %v3149_v38  ;;  %3150 = vmatpush1.bf16.msra.mxu0 %v3149_v38  ;;  %v643_v27 = vld [vmem:[#allocation11 + $0xe8] sm:$0xff]  ;;  %v638_v38 = vld [vmem:[#allocation11 + $0xc0] sm:$0xff]  ;;  %v189_v50 = vld [vmem:[#allocation9 + $0x178] sm:$0xff] }
  0x88   :  { %3741 = vmatprep.subr.bf16.mxu1 %v3151_v39  ;;  %3152 = vmatprep.subr.bf16.mxu0 %v3151_v39  ;;  %v4558_v37 = vpack.c.bf16 %v643_v27, %v639_v26  ;;  %v642_v39 = vld [vmem:[#allocation11 + $0xe0] sm:$0xff]  ;;  %v647_v40 = vld [vmem:[#allocation11 + $0x108] sm:$0xff]  ;;  %v3179_v60 = vpack.c.bf16 %v189_v50, %v185_v48  ;;  %v184_v61 = vld [vmem:[#allocation9 + $0x150] sm:$0xff] }
  0x89   :  { %v651_v41 = vld [vmem:[#allocation11 + $0x128] sm:$0xff]  ;;  %v4568_v49 = vpack.c.bf16 %v642_v39, %v638_v38  ;;  %v4579_v59 = vld [vmem:[#allocation6 + $0x20] sm:$0xff]  ;;  %v188_v62 = vld [vmem:[#allocation9 + $0x170] sm:$0xff] }
  0x8a   :  { %v4572_v51 = vpack.c.bf16 %v651_v41, %v647_v40  ;;  %v655_v54 = vld [vmem:[#allocation11 + $0x148] sm:$0xff]  ;;  %v197_v4 = vld [vmem:[#allocation9 + $0x1b8] sm:$0xff]  ;;  %v654_v6 = vld [vmem:[#allocation11 + $0x140] sm:$0xff]  ;;  %v3181_v13 = vpack.c.bf16 %v188_v62, %v184_v61 }
  0x8b   :  { %3749 = vmatpush1.bf16.msra.mxu1 %v3153_v44  ;;  %3154 = vmatpush1.bf16.msra.mxu0 %v3153_v44  ;;  %v4565_v44 = vld [vmem:[#allocation6 + $0x18] sm:$0xff]  ;;  %v659_v55 = vld [vmem:[#allocation11 + $0x168] sm:$0xff]  ;;  %v658_v8 = vld [vmem:[#allocation11 + $0x160] sm:$0xff] }
  0x8c   :  { %3742 = vmatprep.subr.bf16.mxu1 %v3155_v45  ;;  %3156 = vmatprep.subr.bf16.mxu0 %v3155_v45  ;;  %v3175_v45 = vpack.c.bf16 %v181_v36, %v177_v34  ;;  %v4586_v5 = vpack.c.bf16 %v659_v55, %v655_v54  ;;  %v663_v10 = vld [vmem:[#allocation11 + $0x188] sm:$0xff]  ;;  %v192_v18 = vld [vmem:[#allocation9 + $0x190] sm:$0xff]  ;;  %v201_v20 = vld [vmem:[#allocation9 + $0x1d8] sm:$0xff]  ;;  %v4596_v22 = vpack.c.bf16 %v658_v8, %v654_v6 }
  0x8d   :  { %v667_v11 = vld [vmem:[#allocation11 + $0x1a8] sm:$0xff]  ;;  %v196_v19 = vld [vmem:[#allocation9 + $0x1b0] sm:$0xff]  ;;  %v205_v24 = vld [vmem:[#allocation9 + $0x1f8] sm:$0xff] }
  0x8e   :  { %v4591_v12 = vld [vmem:[#allocation6 + $0x68] sm:$0xff]  ;;  %v4600_v25 = vpack.c.bf16 %v667_v11, %v663_v10  ;;  %v662_v26 = vld [vmem:[#allocation11 + $0x180] sm:$0xff]  ;;  %v4605_v32 = vld [vmem:[#allocation6 + $0x70] sm:$0xff]  ;;  %v3185_v33 = vpack.c.bf16 %v196_v19, %v192_v18  ;;  %v3187_v36 = vpack.c.bf16 %v205_v24, %v201_v20 }
  0x8f   :  { %3750 = vmatpush1.bf16.msra.mxu1 %v3157_v52  ;;  %3158 = vmatpush1.bf16.msra.mxu0 %v3157_v52  ;;  %v646_v52 = vld [vmem:[#allocation11 + $0x100] sm:$0xff]  ;;  %v4607_v34 = vld [vmem:[#allocation6 + $0x30] sm:$0xff]  ;;  %v617_v40 = vld [vmem:[#allocation11 + $0x18] sm:$0xff] }
  0x90   :  { %3160 = vmatprep.subr.bf16.mxu1 %v3159_v53  ;;  %3192 = vmatprep.subr.bf16.mxu0 %v4521_v57  ;;  %v650_v53 = vld [vmem:[#allocation11 + $0x120] sm:$0xff]  ;;  %v200_v38 = vld [vmem:[#allocation9 + $0x1d0] sm:$0xff]  ;;  %v4619_v48 = vld [vmem:[#allocation6 + $0x78] sm:$0xff] }
  0x91   :  { %v666_v27 = vld [vmem:[#allocation11 + $0x1a0] sm:$0xff]  ;;  %v204_v39 = vld [vmem:[#allocation9 + $0x1f0] sm:$0xff]  ;;  %v629_v61 = vld [vmem:[#allocation11 + $0x78] sm:$0xff] }
  0x92   :  { %341 = vmatmul.mubr.f32.vlgmr.msra.gmra.mrb[0].mxu1 %v4523_v63  ;;  %293 = vmatmul.mubr.f32.vlgmr.msra.gmra.mrb[0].mxu0 %v4525_v2  ;;  %v4610_v41 = vpack.c.bf16 %v666_v27, %v662_v26  ;;  %v670_v46 = vld [vmem:[#allocation11 + $0x1c0] sm:$0xff]  ;;  %v3189_v50 = vpack.c.bf16 %v204_v39, %v200_v38  ;;  %v616_v54 = vld [vmem:[#allocation11 + $0x10] sm:$0xff]  ;;  %v633_v8 = vld [vmem:[#allocation11 + $0x98] sm:$0xff] }
  0x93   :  { %3162 = vmatpush1.bf16.msra.mxu1 %v3161_v1  ;;  %346 = vmatprep.mubr.f32.mxu1 %v5384_v0  ;;  %v193_v1 = vld [vmem:[#allocation9 + $0x198] sm:$0xff]  ;;  %v674_v47 = vld [vmem:[#allocation11 + $0x1e0] sm:$0xff]  ;;  %v620_v55 = vld [vmem:[#allocation11 + $0x30] sm:$0xff] }
  0x94   :  { %3164 = vmatprep.subr.bf16.mxu1 %v3163_v3  ;;  %3194 = vmatpush1.bf16.msra.mxu0 %v4528_v7  ;;  %v4582_v3 = vpack.c.bf16 %v650_v53, %v646_v52  ;;  %v4621_v52 = vld [vmem:[#allocation6 + $0x38] sm:$0xff]  ;;  %v4633_v62 = vpack.c.bf16 %v620_v55, %v616_v54  ;;  %v628_v6 = vld [vmem:[#allocation11 + $0x70] sm:$0xff]  ;;  %v4640_v11 = vld [vmem:[#allocation14] sm:$0xff] }
  0x95   :  { %298 = vmatprep.mubr.f32.mxu0 %v5384_v0  ;;  %3196 = vmatprep.subr.bf16.mxu0 %v4530_v9  ;;  %v637_v10 = vld [vmem:[#allocation11 + $0xb8] sm:$0xff]  ;;  %v632_v18 = vld [vmem:[#allocation11 + $0x90] sm:$0xff] }
  0x96   :  { %347 = vmatmul.mubr.f32.gmra.mrb[2].mxu1 %v4535_v14  ;;  %299 = vmatmul.mubr.f32.gmra.mrb[2].mxu0 %v4537_v16  ;;  %v636_v19 = vld [vmem:[#allocation11 + $0xb0] sm:$0xff]  ;;  %v641_v24 = vld [vmem:[#allocation11 + $0xd8] sm:$0xff] }
  0x97   :  { %3166 = vmatpush1.bf16.msra.mxu1 %v3165_v15  ;;  %352 = vmatprep.mubr.f32.mxu1 %v5384_v0  ;;  %v4593_v15 = vld [vmem:[#allocation6 + $0x28] sm:$0xff]  ;;  %v4660_v26 = vpack.c.bf16 %v636_v19, %v632_v18  ;;  %v648_v39 = vld [vmem:[#allocation11 + $0x110] sm:$0xff]  ;;  %v665_v55 = vld [vmem:[#allocation11 + $0x198] sm:$0xff] }
  0x98   :  { %3168 = vmatprep.subr.bf16.mxu1 %v3167_v17  ;;  %3198 = vmatpush1.bf16.msra.mxu0 %v4540_v21  ;;  %v3183_v17 = vpack.c.bf16 %v197_v4, %v193_v1  ;;  %v624_v4 = vld [vmem:[#allocation11 + $0x50] sm:$0xff] }
  0x99   :  { %304 = vmatprep.mubr.f32.mxu0 %v5384_v0  ;;  %3200 = vmatprep.subr.bf16.mxu0 %v4544_v23  ;;  %v4653_v20 = vld [vmem:[#allocation14 + $0x8] sm:$0xff] }
  0x9a   :  { %353 = vmatmul.mubr.f32.gmra.mrb[4].mxu1 %v4549_v28  ;;  %305 = vmatmul.mubr.f32.gmra.mrb[4].mxu0 %v4551_v30  ;;  %v660_v54 = vld [vmem:[#allocation11 + $0x170] sm:$0xff] }
  0x9b   :  { %3170 = vmatpush1.bf16.msra.mxu1 %v3169_v29  ;;  %358 = vmatprep.mubr.f32.mxu1 %v5384_v0  ;;  %v671_v29 = vld [vmem:[#allocation11 + $0x1c8] sm:$0xff]  ;;  %v672_v19 = vld [vmem:[#allocation11 + $0x1d0] sm:$0xff] }
  0x9c   :  { %3172 = vmatprep.subr.bf16.mxu1 %v3171_v31  ;;  %3202 = vmatpush1.bf16.msra.mxu0 %v4554_v35  ;;  %v675_v31 = vld [vmem:[#allocation11 + $0x1e8] sm:$0xff] }
  0x9d   :  { %310 = vmatprep.mubr.f32.mxu0 %v5384_v0  ;;  %3204 = vmatprep.subr.bf16.mxu0 %v4558_v37 }
  0x9e   :  { %359 = vmatmul.mubr.f32.gmra.mrb[6].mxu1 %v4563_v42  ;;  %311 = vmatmul.mubr.f32.gmra.mrb[6].mxu0 %v4565_v44 }
  0x9f   :  { %3174 = vmatpush1.bf16.msra.mxu1 %v3173_v43  ;;  %364 = vmatprep.mubr.f32.mxu1 %v5384_v0  ;;  %v621_v43 = vld [vmem:[#allocation11 + $0x38] sm:$0xff] }
  0xa0   :  { %3176 = vmatprep.subr.bf16.mxu1 %v3175_v45  ;;  %3206 = vmatpush1.bf16.msra.mxu0 %v4568_v49  ;;  %v4614_v45 = vpack.c.bf16 %v675_v31, %v671_v29  ;;  %v4623_v53 = vpack.c.bf16 %v621_v43, %v617_v40  ;;  %v640_v29 = vld [vmem:[#allocation11 + $0xd0] sm:$0xff]  ;;  %v657_v43 = vld [vmem:[#allocation11 + $0x158] sm:$0xff] }
  0xa1   :  { %316 = vmatprep.mubr.f32.mxu0 %v5384_v0  ;;  %3208 = vmatprep.subr.bf16.mxu0 %v4572_v51  ;;  %v644_v31 = vld [vmem:[#allocation11 + $0xf0] sm:$0xff] }
  0xa2   :  { %365 = vmatmul.mubr.f32.gmra.mrb[8].mxu1 %v4577_v56  ;;  %317 = vmatmul.mubr.f32.gmra.mrb[8].mxu0 %v4579_v59  ;;  %v652_v40 = vld [vmem:[#allocation11 + $0x130] sm:$0xff] }
  0xa3   :  { %3178 = vmatpush1.bf16.msra.mxu1 %v3177_v58  ;;  %370 = vmatprep.mubr.f32.mxu1 %v5384_v0  ;;  %v4626_v58 = vpack.c.bf16 %v674_v47, %v670_v46  ;;  %v661_v46 = vld [vmem:[#allocation11 + $0x178] sm:$0xff] }
  0xa4   :  { %3180 = vmatprep.subr.bf16.mxu1 %v3179_v60  ;;  %3210 = vmatpush1.bf16.msra.mxu0 %v4582_v3  ;;  %v625_v60 = vld [vmem:[#allocation11 + $0x58] sm:$0xff]  ;;  %v4685_v47 = vpack.c.bf16 %v661_v46, %v657_v43  ;;  %v208_v46 = vlaneseq }
  0xa5   :  { %322 = vmatprep.mubr.f32.mxu0 %v5384_v0  ;;  %3212 = vmatprep.subr.bf16.mxu0 %v4586_v5  ;;  %v4636_v1 = vpack.c.bf16 %v629_v61, %v625_v60  ;;  %v669_v60 = vld [vmem:[#allocation11 + $0x1b8] sm:$0xff] }
  0xa6   :  { %371 = vmatmul.mubr.f32.gmra.mrb[10].mxu1 %v4591_v12  ;;  %323 = vmatmul.mubr.f32.gmra.mrb[10].mxu0 %v4593_v15  ;;  %v4695_v61 = vpack.c.bf16 %v669_v60, %v665_v55  ;;  %v206_v55 = vld [vmem:[#allocation12] sm:$0xf] }
  0xa7   :  { %3182 = vmatpush1.bf16.msra.mxu1 %v3181_v13  ;;  %376 = vmatprep.mubr.f32.mxu1 %v5384_v0  ;;  %v4646_v13 = vpack.c.bf16 %v628_v6, %v624_v4  ;;  %v664_v4 = vld [vmem:[#allocation11 + $0x190] sm:$0xff] }
  0xa8   :  { %3184 = vmatprep.subr.bf16.mxu1 %v3183_v17  ;;  %3214 = vmatpush1.bf16.msra.mxu0 %v4596_v22  ;;  %v4649_v17 = vpack.c.bf16 %v637_v10, %v633_v8  ;;  %v668_v6 = vld [vmem:[#allocation11 + $0x1b0] sm:$0xff]  ;;  %v673_v8 = vld [vmem:[#allocation11 + $0x1d8] sm:$0xff] }
  0xa9   :  { %328 = vmatprep.mubr.f32.mxu0 %v5384_v0  ;;  %3216 = vmatprep.subr.bf16.mxu0 %v4600_v25  ;;  %v677_v10 = vld [vmem:[#allocation11 + $0x1f8] sm:$0xff] }
  0xaa   :  { %377 = vmatmul.mubr.f32.gmra.mrb[12].mxu1 %v4605_v32  ;;  %329 = vmatmul.mubr.f32.gmra.mrb[12].mxu0 %v4607_v34  ;;  %v4705_v18 = vpack.c.bf16 %v677_v10, %v673_v8 }
  0xab   :  { %3186 = vmatpush1.bf16.msra.mxu1 %v3185_v33  ;;  %382 = vmatprep.mubr.f32.mxu1 %v5384_v0  ;;  %v649_v33 = vld [vmem:[#allocation11 + $0x118] sm:$0xff] }
  0xac   :  { %3188 = vmatprep.subr.bf16.mxu1 %v3187_v36  ;;  %3218 = vmatpush1.bf16.msra.mxu0 %v4610_v41  ;;  %v653_v36 = vld [vmem:[#allocation11 + $0x138] sm:$0xff] }
  0xad   :  { %334 = vmatprep.mubr.f32.mxu0 %v5384_v0  ;;  %3220 = vmatprep.subr.bf16.mxu0 %v4614_v45  ;;  %v4675_v38 = vpack.c.bf16 %v653_v36, %v649_v33 }
  0xae   :  { %383 = vmatmul.mubr.f32.gmra.mrb[14].mxu1 %v4619_v48  ;;  %335 = vmatmul.mubr.f32.gmra.mrb[14].mxu0 %v4621_v52 }
  0xaf   :  { %3190 = vmatpush1.bf16.msra.mxu1 %v3189_v50  ;;  %453 = vmatprep.mubr.f32.mxu1 %v5384_v0  ;;  %v656_v50 = vld [vmem:[#allocation11 + $0x150] sm:$0xff] }
  0xb0   :  { %3224 = vmatprep.subr.bf16.mxu1 %v4623_v53  ;;  %3222 = vmatpush1.bf16.msra.mxu0 %v4626_v58 }
  0xb1   :  { %754 = vmatprep.mubr.f32.mxu0 %v5384_v0  ;;  %3256 = vmatprep.subr.bf16.mxu0 %v4521_v57 }
  0xb2   :  { %454 = vmatmul.mubr.f32.vlgmr.msra.gmra.mrb[16].mxu1 %v4525_v2  ;;  %v645_v2 = vld [vmem:[#allocation11 + $0xf8] sm:$0xff] }
  0xb3   :  { %3226 = vmatpush1.bf16.msra.mxu1 %v4633_v62  ;;  %459 = vmatprep.mubr.f32.mxu1 %v5384_v0  ;;  %v4664_v27 = vpack.c.bf16 %v645_v2, %v641_v24  ;;  %v676_v24 = vld [vmem:[#allocation11 + $0x1f0] sm:$0xff] }
  0xb4   :  { %3228 = vmatprep.subr.bf16.mxu1 %v4636_v1  ;;  %755 = vmatmul.mubr.f32.vlgmr.msra.gmra.mrb[0].mxu0 %v4640_v11 }
  0xb5   :  { %760 = vmatprep.mubr.f32.mxu0 %v5384_v0  ;;  %3258 = vmatpush1.bf16.msra.mxu0 %v4528_v7 }
  0xb6   :  { %460 = vmatmul.mubr.f32.gmra.mrb[18].mxu1 %v4537_v16  ;;  %3260 = vmatprep.subr.bf16.mxu0 %v4530_v9  ;;  %v4672_v16 = vpack.c.bf16 %v644_v31, %v640_v29 }
  0xb7   :  { %465 = vmatprep.mubr.f32.mxu1 %v5384_v0  ;;  %3230 = vmatpush1.bf16.msra.mxu1 %v4646_v13 }
  0xb8   :  { %3232 = vmatprep.subr.bf16.mxu1 %v4649_v17  ;;  %761 = vmatmul.mubr.f32.gmra.mrb[2].mxu0 %v4653_v20 }
  0xb9   :  { %3262 = vmatpush1.bf16.msra.mxu0 %v4540_v21  ;;  %975 = vmatprep.mubr.f32.mxu0 %v5384_v0 }
  0xba   :  { %466 = vmatmul.mubr.f32.gmra.mrb[20].mxu1 %v4551_v30  ;;  %3264 = vmatprep.subr.bf16.mxu0 %v4544_v23  ;;  %v4682_v30 = vpack.c.bf16 %v652_v40, %v648_v39 }
  0xbb   :  { %471 = vmatprep.mubr.f32.mxu1 %v5384_v0  ;;  %3234 = vmatpush1.bf16.msra.mxu1 %v4660_v26 }
  0xbc   :  { %3236 = vmatprep.subr.bf16.mxu1 %v4664_v27 }
  0xbd   :  { %3266 = vmatpush1.bf16.msra.mxu0 %v4554_v35 }
  0xbe   :  { %472 = vmatmul.mubr.f32.gmra.mrb[22].mxu1 %v4565_v44  ;;  %3268 = vmatprep.subr.bf16.mxu0 %v4558_v37  ;;  %v4692_v44 = vpack.c.bf16 %v660_v54, %v656_v50  ;;  %v4791_v50 = vshrl.u32 %v208_v46, 7 }
  0xbf   :  { %477 = vmatprep.mubr.f32.mxu1 %v5384_v0  ;;  %3238 = vmatpush1.bf16.msra.mxu1 %v4672_v16 }
  0xc0   :  { %3240 = vmatprep.subr.bf16.mxu1 %v4675_v38  ;;  %5403 = vst [vmem:[#allocation36_spill] sm:$0xff] %v4791_v50  ;;  %v214_v54 = vsub.s32 1, %v4791_v50  ;;  %v210_v60 = vsub.s32 0, %v4791_v50 }
  0xc1   :  { %3270 = vmatpush1.bf16.msra.mxu0 %v4568_v49 }
  0xc2   :  { %478 = vmatmul.mubr.f32.gmra.mrb[24].mxu1 %v4579_v59  ;;  %3272 = vmatprep.subr.bf16.mxu0 %v4572_v51  ;;  %v4702_v59 = vpack.c.bf16 %v668_v6, %v664_v4  ;;  %v4795_v4 = vrot.slane %v206_v55, %v214_v54  ;;  %v4797_v6 = vrot.slane %v206_v55, %v210_v60  ;;  %v218_v54 = vsub.s32 2, %v4791_v50 }
  0xc3   :  { %483 = vmatprep.mubr.f32.mxu1 %v5384_v0  ;;  %3242 = vmatpush1.bf16.msra.mxu1 %v4682_v30  ;;  %v222_v60 = vsub.s32 3, %v4791_v50 }
  0xc4   :  { %3244 = vmatprep.subr.bf16.mxu1 %v4685_v47 }
  0xc5   :  { %3274 = vmatpush1.bf16.msra.mxu0 %v4582_v3 }
  0xc6   :  { %484 = vmatmul.mubr.f32.gmra.mrb[26].mxu1 %v4593_v15  ;;  %3276 = vmatprep.subr.bf16.mxu0 %v4586_v5  ;;  %v4712_v15 = vpack.c.bf16 %v676_v24, %v672_v19 }
  0xc7   :  { %489 = vmatprep.mubr.f32.mxu1 %v5384_v0  ;;  %3246 = vmatpush1.bf16.msra.mxu1 %v4692_v44 }
  0xc8   :  { %3248 = vmatprep.subr.bf16.mxu1 %v4695_v61 }
  0xc9   :  { %3278 = vmatpush1.bf16.msra.mxu0 %v4596_v22 }
  0xca   :  { %490 = vmatmul.mubr.f32.gmra.mrb[28].mxu1 %v4607_v34  ;;  %3280 = vmatprep.subr.bf16.mxu0 %v4600_v25 }
  0xcb   :  { %495 = vmatprep.mubr.f32.mxu1 %v5384_v0  ;;  %3250 = vmatpush1.bf16.msra.mxu1 %v4702_v59 }
  0xcc   :  { %3252 = vmatprep.subr.bf16.mxu1 %v4705_v18 }
  0xcd   :  { %3282 = vmatpush1.bf16.msra.mxu0 %v4610_v41 }
  0xce   :  { %496 = vmatmul.mubr.f32.gmra.mrb[30].mxu1 %v4621_v52  ;;  %3284 = vmatprep.subr.bf16.mxu0 %v4614_v45 }
  0xcf   :  { %501 = vmatprep.mubr.f32.mxu1 %v5384_v0  ;;  %3254 = vmatpush1.bf16.msra.mxu1 %v4712_v15 }
  0xd0   :  { %3288 = vmatprep.subr.bf16.mxu1 %v4623_v53 }
  0xd1   :  { %3286 = vmatpush1.bf16.msra.mxu0 %v4626_v58 }
  0xd2   :  { %502 = vmatmul.mubr.f32.gmra.mrb[32].mxu1 %v4523_v63  ;;  %3320 = vmatprep.subr.bf16.mxu0 %v4521_v57 }
  0xd3   :  { %507 = vmatprep.mubr.f32.mxu1 %v5384_v0 }
  0xd6   :  { %508 = vmatmul.mubr.f32.gmra.mrb[34].mxu1 %v4535_v14 }
  0xd7   :  { %513 = vmatprep.mubr.f32.mxu1 %v5384_v0 }
  0xda   :  { %514 = vmatmul.mubr.f32.gmra.mrb[36].mxu1 %v4549_v28 }
  0xdb   :  { %519 = vmatprep.mubr.f32.mxu1 %v5384_v0 }
  0xde   :  { %520 = vmatmul.mubr.f32.gmra.mrb[38].mxu1 %v4563_v42 }
  0xdf   :  { %525 = vmatprep.mubr.f32.mxu1 %v5384_v0 }
  0xe2   :  { %526 = vmatmul.mubr.f32.gmra.mrb[40].mxu1 %v4577_v56 }
  0xe3   :  { %531 = vmatprep.mubr.f32.mxu1 %v5384_v0 }
  0xe6   :  { %532 = vmatmul.mubr.f32.gmra.mrb[42].mxu1 %v4591_v12 }
  0xe7   :  { %537 = vmatprep.mubr.f32.mxu1 %v5384_v0 }
  0xea   :  { %538 = vmatmul.mubr.f32.gmra.mrb[44].mxu1 %v4605_v32 }
  0xeb   :  { %543 = vmatprep.mubr.f32.mxu1 %v5384_v0 }
  0xee   :  { %544 = vmatmul.mubr.f32.gmra.mrb[46].mxu1 %v4619_v48 }
  0xef   :  { %831 = vmatprep.mubr.f32.mxu1 %v5384_v0 }
  0xf2   :  { %832 = vmatmul.mubr.f32.vlgmr.msra.gmra.mrb[16].mxu1 %v4640_v11 }
  0xf3   :  { %837 = vmatprep.mubr.f32.mxu1 %v5384_v0  ;;  %3290 = vmatpush1.bf16.msra.mxu1 %v4633_v62 }
  0xf4   :  { %3292 = vmatprep.subr.bf16.mxu1 %v4636_v1 }
  0xf6   :  { %838 = vmatmul.mubr.f32.gmra.mrb[18].mxu1 %v4653_v20 }
  0xf7   :  { %3294 = vmatpush1.bf16.msra.mxu1 %v4646_v13  ;;  %1052 = vmatprep.mubr.f32.mxu1 %v5384_v0 }
  0xf8   :  { %3296 = vmatprep.subr.bf16.mxu1 %v4649_v17 }
  0xfb   :  { %3298 = vmatpush1.bf16.msra.mxu1 %v4660_v26 }
  0xfc   :  { %3300 = vmatprep.subr.bf16.mxu1 %v4664_v27 }
  0xff   :  { %3302 = vmatpush1.bf16.msra.mxu1 %v4672_v16 }
 0x100   :  { %3304 = vmatprep.subr.bf16.mxu1 %v4675_v38 }
 0x103   :  { %3306 = vmatpush1.bf16.msra.mxu1 %v4682_v30 }
 0x104   :  { %3308 = vmatprep.subr.bf16.mxu1 %v4685_v47 }
 0x107   :  { %3310 = vmatpush1.bf16.msra.mxu1 %v4692_v44 }
 0x108   :  { %3312 = vmatprep.subr.bf16.mxu1 %v4695_v61 }
 0x10b   :  { %3314 = vmatpush1.bf16.msra.mxu1 %v4702_v59 }
 0x10c   :  { %3316 = vmatprep.subr.bf16.mxu1 %v4705_v18 }
 0x10f   :  { %3318 = vmatpush1.bf16.msra.mxu1 %v4712_v15 }
 0x110   :  { %3352 = vmatprep.subr.bf16.mxu1 %v4623_v53 }
 0x165   :  { %v4759_v63 = vpop.f32.mrb[0].mxu1 }
 0x166   :  { %v4761_v14 = vpop.f32.mrb[1].mxu1 }
 0x169   :  { %v4763_v28 = vpop.f32.mrb[2].mxu1 }
 0x16a   :  { %v4765_v42 = vpop.f32.mrb[3].mxu1 }
 0x16d   :  { %v4767_v56 = vpop.f32.mrb[4].mxu1 }
 0x16e   :  { %v4769_v12 = vpop.f32.mrb[5].mxu1 }
 0x171   :  { %v4771_v32 = vpop.f32.mrb[6].mxu1 }
 0x172   :  { %v4773_v34 = vpop.f32.mrb[7].mxu1 }
 0x173   :  { %5394 = vst [vmem:[#allocation27_spill] sm:$0xff] %v4773_v34 }
 0x175   :  { %v4775_v48 = vpop.f32.mrb[8].mxu1 }
 0x176   :  { %5395 = vst [vmem:[#allocation28_spill] sm:$0xff] %v4775_v48  ;;  %v4777_v52 = vpop.f32.mrb[9].mxu1 }
 0x177   :  { %5396 = vst [vmem:[#allocation29_spill] sm:$0xff] %v4777_v52 }
 0x179   :  { %v4779_v11 = vpop.f32.mrb[10].mxu1 }
 0x17a   :  { %5397 = vst [vmem:[#allocation30_spill] sm:$0xff] %v4779_v11  ;;  %v4781_v20 = vpop.f32.mrb[11].mxu1 }
 0x17b   :  { %5398 = vst [vmem:[#allocation31_spill] sm:$0xff] %v4781_v20 }
 0x17d   :  { %v4783_v2 = vpop.f32.mrb[12].mxu1 }
 0x17e   :  { %5399 = vst [vmem:[#allocation32_spill] sm:$0xff] %v4783_v2  ;;  %v4785_v29 = vpop.f32.mrb[13].mxu1  ;;  %v4805_v2 = vrot.slane %v206_v55, %v218_v54 }
 0x17f   :  { %5400 = vst [vmem:[#allocation33_spill] sm:$0xff] %v4785_v29 }
 0x181   :  { %v4787_v31 = vpop.f32.mrb[14].mxu1 }
 0x182   :  { %5401 = vst [vmem:[#allocation34_spill] sm:$0xff] %v4787_v31  ;;  %v4789_v33 = vpop.f32.mrb[15].mxu1 }
 0x183   :  { %5402 = vst [vmem:[#allocation35_spill] sm:$0xff] %v4789_v33 }
 0x187   :  { %v756_v36 = vpop.f32.mrb[0].mxu0 }
 0x188   :  { %v758_v39 = vpop.f32.mrb[1].mxu0  ;;  %v3751_v10 = vadd.f32 %v756_v36, %v4797_v6 }
 0x189   :  { %v3752_v8 = vadd.f32 %v758_v39, %v4795_v4 }
 0x18a   :  { %v2990_v0 = vmul.f32 -1.442695, %v3751_v10 }
 0x18b   :  { %v762_v40 = vpop.f32.mrb[2].mxu0  ;;  %v2991_v19 = vmul.f32 -1.442695, %v3752_v8  ;;  %v4807_v8 = vrot.slane %v206_v55, %v222_v60 }
 0x18c   :  { %v764_v43 = vpop.f32.mrb[3].mxu0  ;;  %v3753_v46 = vadd.f32 %v762_v40, %v4797_v6 }
 0x18d   :  { %v3754_v24 = vadd.f32 %v764_v43, %v4795_v4  ;;  %3895 = vpow2.f32 %v2991_v19 }
 0x18e   :  { %3897 = vpow2.f32 %v2990_v0  ;;  %v2993_v31 = vmul.f32 -1.442695, %v3753_v46 }
 0x18f   :  { %v2994_v33 = vmul.f32 -1.442695, %v3754_v24 }
 0x191   :  { %3899 = vpow2.f32 %v2994_v33 }
 0x192   :  { %3901 = vpow2.f32 %v2993_v31 }
 0x197   :  { %v3896_v29 = vpop.eup %3895 }
 0x198   :  { %v3898_v39 = vpop.eup %3897  ;;  %v871_v36 = vadd.f32 1.0, %v3896_v29 }
 0x199   :  { %v870_v10 = vadd.f32 1.0, %v3898_v39 }
 0x19a   :  { %3903 = vrcp.f32 %v871_v36 }
 0x19b   :  { %v3900_v43 = vpop.eup %3899  ;;  %3905 = vrcp.f32 %v870_v10 }
 0x19c   :  { %v3902_v40 = vpop.eup %3901  ;;  %v874_v31 = vadd.f32 1.0, %v3900_v43  ;;  %v122_v43 = vld [vmem:[%s5378_s5] sm:$0xff] }
 0x19d   :  { %v873_v46 = vadd.f32 1.0, %v3902_v40 }
 0x1a4   :  { %v3904_v36 = vpop.eup %3903 }
 0x1a5   :  { %v3906_v10 = vpop.eup %3905 }
 0x1c5   :  { %v833_v19 = vpop.f32.mrb[16].mxu1 }
 0x1c6   :  { %v3799_v0 = vadd.f32 %v833_v19, %v4805_v2  ;;  %v835_v24 = vpop.f32.mrb[17].mxu1 }
 0x1c7   :  { %v3800_v33 = vadd.f32 %v835_v24, %v4807_v8 }
 0x1c8   :  { %v2992_v50 = vmul.f32 -1.442695, %v3799_v0  ;;  %v890_v0 = vmul.f32 %v3904_v36, %v122_v43 }
 0x1c9   :  { %3907 = vtanh.f32 %v3800_v33  ;;  %v839_v54 = vpop.f32.mrb[18].mxu1 }
 0x1ca   :  { %3909 = vpow2.f32 %v2992_v50  ;;  %v3801_v29 = vadd.f32 %v839_v54, %v4805_v2  ;;  %v841_v55 = vpop.f32.mrb[19].mxu1 }
 0x1cb   :  { %3911 = vrcp.f32 %v874_v31  ;;  %v3802_v60 = vadd.f32 %v841_v55, %v4807_v8  ;;  %v123_v31 = vld [vmem:[%s5378_s5 + $0x8] sm:$0xff] }
 0x1cc   :  { %3913 = vrcp.f32 %v873_v46  ;;  %v2995_v39 = vmul.f32 -1.442695, %v3801_v29 }
 0x1cd   :  { %3915 = vtanh.f32 %v3802_v60 }
 0x1ce   :  { %3917 = vpow2.f32 %v2995_v39 }
 0x1d3   :  { %v3908_v40 = vpop.eup %3907 }
 0x1d4   :  { %v3910_v19 = vpop.eup %3909  ;;  %v892_v50 = vmul.f32 %v3908_v40, %v3906_v10 }
 0x1d5   :  { %v3912_v24 = vpop.eup %3911  ;;  %v872_v33 = vadd.f32 1.0, %v3910_v19 }
 0x1d6   :  { %v3914_v46 = vpop.eup %3913  ;;  %v4819_v54 = vadd.f32 %v892_v50, %v890_v0  ;;  %v891_v60 = vmul.f32 %v3912_v24, %v123_v31  ;;  %v5405_v0 = vmov 0.0  }
 0x1d7   :  { %v3916_v29 = vpop.eup %3915  ;;  %3919 = vrcp.f32 %v872_v33 }
 0x1d8   :  { %v3918_v55 = vpop.eup %3917  ;;  %3921 = vtanh.f32 %v4819_v54  ;;  %v893_v39 = vmul.f32 %v3916_v29, %v3914_v46 }
 0x1d9   :  { %v875_v20 = vadd.f32 1.0, %v3918_v55 }
 0x1da   :  { %v4822_v11 = vadd.f32 %v893_v39, %v891_v60 }
 0x1db   :  { %3923 = vrcp.f32 %v875_v20 }
 0x1dc   :  { %3925 = vtanh.f32 %v4822_v11 }
 0x1e1   :  { %v3920_v36 = vpop.eup %3919 }
 0x1e2   :  { %v3922_v43 = vpop.eup %3921 }
 0x1e3   :  { %v4825_v10 = vmul.f32 %v3922_v43, %v3920_v36 }
 0x1e5   :  { %5404 = vst [vmem:[#allocation37_spill] sm:$0xff] %v4825_v10  ;;  %v3924_v40 = vpop.eup %3923  ;;  %976 = vmatmul.mubr.f32.vlgmr.msra.gmra.mrb[4].mxu0 %v4825_v10  ;;  %1053 = vmatmul.mubr.f32.vlgmr.msra.gmra.mrb[20].mxu1 %v4825_v10 }
 0x1e6   :  { %v3926_v19 = vpop.eup %3925  ;;  %981 = vmatprep.mubr.f32.mxu0 %v5405_v0  ;;  %1058 = vmatprep.mubr.f32.mxu1 %v5405_v0 }
 0x1e7   :  { %v4831_v50 = vmul.f32 %v3926_v19, %v3924_v40  ;;  %3322 = vmatpush1.bf16.msra.mxu0 %v4528_v7  ;;  %3354 = vmatpush1.bf16.msra.mxu1 %v4633_v62 }
 0x1e8   :  { %3324 = vmatprep.subr.bf16.mxu0 %v4530_v9  ;;  %3356 = vmatprep.subr.bf16.mxu1 %v4636_v1 }
 0x1e9   :  { %5406 = vst [vmem:[#allocation38_spill] sm:$0xff] %v4831_v50  ;;  %982 = vmatmul.mubr.f32.gmra.mrb[6].mxu0 %v4831_v50  ;;  %1059 = vmatmul.mubr.f32.gmra.mrb[22].mxu1 %v4831_v50 }
 0x1ea   :  { %1197 = vmatprep.mubr.f32.mxu0 %v5405_v0  ;;  %1274 = vmatprep.mubr.f32.mxu1 %v5405_v0 }
 0x1eb   :  { %3326 = vmatpush1.bf16.msra.mxu0 %v4540_v21  ;;  %3358 = vmatpush1.bf16.msra.mxu1 %v4646_v13 }
 0x1ec   :  { %3328 = vmatprep.subr.bf16.mxu0 %v4544_v23  ;;  %3360 = vmatprep.subr.bf16.mxu1 %v4649_v17 }
 0x1ef   :  { %3330 = vmatpush1.bf16.msra.mxu0 %v4554_v35  ;;  %3362 = vmatpush1.bf16.msra.mxu1 %v4660_v26 }
 0x1f0   :  { %3332 = vmatprep.subr.bf16.mxu0 %v4558_v37  ;;  %3364 = vmatprep.subr.bf16.mxu1 %v4664_v27 }
 0x1f3   :  { %3334 = vmatpush1.bf16.msra.mxu0 %v4568_v49  ;;  %3366 = vmatpush1.bf16.msra.mxu1 %v4672_v16 }
 0x1f4   :  { %3336 = vmatprep.subr.bf16.mxu0 %v4572_v51  ;;  %3368 = vmatprep.subr.bf16.mxu1 %v4675_v38 }
 0x1f7   :  { %3338 = vmatpush1.bf16.msra.mxu0 %v4582_v3  ;;  %3370 = vmatpush1.bf16.msra.mxu1 %v4682_v30 }
 0x1f8   :  { %3340 = vmatprep.subr.bf16.mxu0 %v4586_v5  ;;  %3372 = vmatprep.subr.bf16.mxu1 %v4685_v47 }
 0x1fb   :  { %3342 = vmatpush1.bf16.msra.mxu0 %v4596_v22  ;;  %3374 = vmatpush1.bf16.msra.mxu1 %v4692_v44 }
 0x1fc   :  { %3344 = vmatprep.subr.bf16.mxu0 %v4600_v25  ;;  %3376 = vmatprep.subr.bf16.mxu1 %v4695_v61 }
 0x1ff   :  { %3346 = vmatpush1.bf16.msra.mxu0 %v4610_v41  ;;  %3378 = vmatpush1.bf16.msra.mxu1 %v4702_v59 }
 0x200   :  { %3348 = vmatprep.subr.bf16.mxu0 %v4614_v45  ;;  %3380 = vmatprep.subr.bf16.mxu1 %v4705_v18 }
 0x203   :  { %3350 = vmatpush1.bf16.msra.mxu0 %v4626_v58  ;;  %3382 = vmatpush1.bf16.msra.mxu1 %v4712_v15 }
 0x204   :  { %3384 = vmatprep.subr.bf16.mxu0 %v4521_v57  ;;  %3416 = vmatprep.subr.bf16.mxu1 %v4623_v53 }
 0x2b8   :  { %v977_v20 = vpop.f32.mrb[4].mxu0  ;;  %v1054_v24 = vpop.f32.mrb[20].mxu1 }
 0x2b9   :  { %v3755_v31 = vadd.f32 %v977_v20, %v4797_v6  ;;  %v979_v33 = vpop.f32.mrb[5].mxu0  ;;  %v1056_v46 = vpop.f32.mrb[21].mxu1  ;;  %v3803_v20 = vadd.f32 %v1054_v24, %v4805_v2 }
 0x2ba   :  { %v3756_v29 = vadd.f32 %v979_v33, %v4795_v4  ;;  %v3804_v33 = vadd.f32 %v1056_v46, %v4807_v8 }
 0x2bb   :  { %v2996_v55 = vmul.f32 -1.442695, %v3755_v31  ;;  %v2998_v31 = vmul.f32 -1.442695, %v3803_v20 }
 0x2bc   :  { %v2997_v60 = vmul.f32 -1.442695, %v3756_v29  ;;  %v983_v39 = vpop.f32.mrb[6].mxu0  ;;  %v1060_v36 = vpop.f32.mrb[22].mxu1 }
 0x2bd   :  { %3927 = vpow2.f32 %v2996_v55  ;;  %v3757_v43 = vadd.f32 %v983_v39, %v4797_v6  ;;  %v985_v40 = vpop.f32.mrb[7].mxu0  ;;  %v1062_v19 = vpop.f32.mrb[23].mxu1  ;;  %v3805_v29 = vadd.f32 %v1060_v36, %v4805_v2 }
 0x2be   :  { %v3758_v50 = vadd.f32 %v985_v40, %v4795_v4  ;;  %3929 = vpow2.f32 %v2997_v60  ;;  %v3806_v55 = vadd.f32 %v1062_v19, %v4807_v8 }
 0x2bf   :  { %v2999_v10 = vmul.f32 -1.442695, %v3757_v43  ;;  %v3001_v40 = vmul.f32 -1.442695, %v3805_v29 }
 0x2c0   :  { %v3000_v52 = vmul.f32 -1.442695, %v3758_v50 }
 0x2c1   :  { %3931 = vpow2.f32 %v2999_v10 }
 0x2c2   :  { %3933 = vpow2.f32 %v3000_v52 }
 0x2c3   :  { %3935 = vtanh.f32 %v3804_v33 }
 0x2c4   :  { %3937 = vpow2.f32 %v2998_v31 }
 0x2c7   :  { %v3928_v48 = vpop.eup %3927 }
 0x2c8   :  { %v1091_v39 = vadd.f32 1.0, %v3928_v48  ;;  %v3930_v34 = vpop.eup %3929 }
 0x2c9   :  { %v1092_v60 = vadd.f32 1.0, %v3930_v34 }
 0x2ca   :  { %3939 = vrcp.f32 %v1091_v39 }
 0x2cb   :  { %v3932_v50 = vpop.eup %3931  ;;  %3941 = vtanh.f32 %v3806_v55 }
 0x2cc   :  { %3943 = vrcp.f32 %v1092_v60  ;;  %v1094_v10 = vadd.f32 1.0, %v3932_v50  ;;  %v3934_v52 = vpop.eup %3933 }
 0x2cd   :  { %3945 = vpow2.f32 %v3001_v40  ;;  %v1095_v24 = vadd.f32 1.0, %v3934_v52  ;;  %v3936_v46 = vpop.eup %3935 }
 0x2ce   :  { %3947 = vrcp.f32 %v1094_v10  ;;  %v3938_v36 = vpop.eup %3937 }
 0x2cf   :  { %3949 = vrcp.f32 %v1095_v24  ;;  %v1093_v33 = vadd.f32 1.0, %v3938_v36 }
 0x2d1   :  { %3951 = vrcp.f32 %v1093_v33 }
 0x2d4   :  { %v3940_v43 = vpop.eup %3939 }
 0x2d5   :  { %v3942_v19 = vpop.eup %3941  ;;  %v1113_v48 = vmul.f32 %v3940_v43, %v3936_v46 }
 0x2d6   :  { %v3944_v20 = vpop.eup %3943 }
 0x2d7   :  { %v3946_v31 = vpop.eup %3945  ;;  %v1111_v29 = vmul.f32 %v3944_v20, %v4819_v54 }
 0x2d8   :  { %v3948_v34 = vpop.eup %3947  ;;  %v1096_v40 = vadd.f32 1.0, %v3946_v31 }
 0x2d9   :  { %v4878_v39 = vadd.f32 %v1113_v48, %v1111_v29  ;;  %v1114_v55 = vmul.f32 %v3948_v34, %v3942_v19  ;;  %v3950_v60 = vpop.eup %3949 }
 0x2da   :  { %v1112_v50 = vmul.f32 %v3950_v60, %v4822_v11 }
 0x2db   :  { %3953 = vtanh.f32 %v4878_v39  ;;  %v3952_v52 = vpop.eup %3951 }
 0x2dc   :  { %v4882_v10 = vadd.f32 %v1114_v55, %v1112_v50  ;;  %3955 = vrcp.f32 %v1096_v40 }
 0x2de   :  { %3957 = vtanh.f32 %v4882_v10 }
 0x2e5   :  { %v3954_v24 = vpop.eup %3953 }
 0x2e6   :  { %v4885_v46 = vmul.f32 %v3954_v24, %v3952_v52  ;;  %v3956_v54 = vpop.eup %3955 }
 0x2e8   :  { %5407 = vst [vmem:[#allocation39_spill] sm:$0xff] %v4885_v46  ;;  %1198 = vmatmul.mubr.f32.vlgmr.msra.gmra.mrb[8].mxu0 %v4885_v46  ;;  %1275 = vmatmul.mubr.f32.vlgmr.msra.gmra.mrb[24].mxu1 %v4885_v46  ;;  %v3958_v36 = vpop.eup %3957 }
 0x2e9   :  { %1203 = vmatprep.mubr.f32.mxu0 %v5405_v0  ;;  %1280 = vmatprep.mubr.f32.mxu1 %v5405_v0  ;;  %v4891_v11 = vmul.f32 %v3958_v36, %v3956_v54 }
 0x2ea   :  { %3386 = vmatpush1.bf16.msra.mxu0 %v4528_v7  ;;  %3418 = vmatpush1.bf16.msra.mxu1 %v4633_v62 }
 0x2eb   :  { %5408 = vst [vmem:[#allocation40_spill] sm:$0xff] %v4891_v11  ;;  %3388 = vmatprep.subr.bf16.mxu0 %v4530_v9  ;;  %3420 = vmatprep.subr.bf16.mxu1 %v4636_v1 }
 0x2ec   :  { %1204 = vmatmul.mubr.f32.gmra.mrb[10].mxu0 %v4891_v11  ;;  %1281 = vmatmul.mubr.f32.gmra.mrb[26].mxu1 %v4891_v11 }
 0x2ed   :  { %1419 = vmatprep.mubr.f32.mxu0 %v5405_v0  ;;  %1496 = vmatprep.mubr.f32.mxu1 %v5405_v0 }
 0x2ee   :  { %3390 = vmatpush1.bf16.msra.mxu0 %v4540_v21  ;;  %3422 = vmatpush1.bf16.msra.mxu1 %v4646_v13 }
 0x2ef   :  { %3392 = vmatprep.subr.bf16.mxu0 %v4544_v23  ;;  %3424 = vmatprep.subr.bf16.mxu1 %v4649_v17 }
 0x2f2   :  { %3394 = vmatpush1.bf16.msra.mxu0 %v4554_v35  ;;  %3426 = vmatpush1.bf16.msra.mxu1 %v4660_v26 }
 0x2f3   :  { %3396 = vmatprep.subr.bf16.mxu0 %v4558_v37  ;;  %3428 = vmatprep.subr.bf16.mxu1 %v4664_v27 }
 0x2f6   :  { %3398 = vmatpush1.bf16.msra.mxu0 %v4568_v49  ;;  %3430 = vmatpush1.bf16.msra.mxu1 %v4672_v16 }
 0x2f7   :  { %3400 = vmatprep.subr.bf16.mxu0 %v4572_v51  ;;  %3432 = vmatprep.subr.bf16.mxu1 %v4675_v38 }
 0x2fa   :  { %3402 = vmatpush1.bf16.msra.mxu0 %v4582_v3  ;;  %3434 = vmatpush1.bf16.msra.mxu1 %v4682_v30 }
 0x2fb   :  { %3404 = vmatprep.subr.bf16.mxu0 %v4586_v5  ;;  %3436 = vmatprep.subr.bf16.mxu1 %v4685_v47 }
 0x2fe   :  { %3406 = vmatpush1.bf16.msra.mxu0 %v4596_v22  ;;  %3438 = vmatpush1.bf16.msra.mxu1 %v4692_v44 }
 0x2ff   :  { %3408 = vmatprep.subr.bf16.mxu0 %v4600_v25  ;;  %3440 = vmatprep.subr.bf16.mxu1 %v4695_v61 }
 0x302   :  { %3410 = vmatpush1.bf16.msra.mxu0 %v4610_v41  ;;  %3442 = vmatpush1.bf16.msra.mxu1 %v4702_v59 }
 0x303   :  { %3412 = vmatprep.subr.bf16.mxu0 %v4614_v45  ;;  %3444 = vmatprep.subr.bf16.mxu1 %v4705_v18 }
 0x306   :  { %3414 = vmatpush1.bf16.msra.mxu0 %v4626_v58  ;;  %3446 = vmatpush1.bf16.msra.mxu1 %v4712_v15 }
 0x307   :  { %3448 = vmatprep.subr.bf16.mxu0 %v4521_v57  ;;  %3480 = vmatprep.subr.bf16.mxu1 %v4623_v53 }
 0x3bb   :  { %v1199_v43 = vpop.f32.mrb[8].mxu0  ;;  %v1276_v19 = vpop.f32.mrb[24].mxu1 }
 0x3bc   :  { %v3759_v48 = vadd.f32 %v1199_v43, %v4797_v6  ;;  %v1201_v20 = vpop.f32.mrb[9].mxu0  ;;  %v1278_v33 = vpop.f32.mrb[25].mxu1  ;;  %v3807_v43 = vadd.f32 %v1276_v19, %v4805_v2 }
 0x3bd   :  { %v3760_v31 = vadd.f32 %v1201_v20, %v4795_v4  ;;  %v3808_v20 = vadd.f32 %v1278_v33, %v4807_v8 }
 0x3be   :  { %v3002_v29 = vmul.f32 -1.442695, %v3759_v48  ;;  %v3004_v48 = vmul.f32 -1.442695, %v3807_v43 }
 0x3bf   :  { %v3003_v34 = vmul.f32 -1.442695, %v3760_v31  ;;  %v1205_v55 = vpop.f32.mrb[10].mxu0  ;;  %v1282_v60 = vpop.f32.mrb[26].mxu1 }
 0x3c0   :  { %3959 = vpow2.f32 %v3002_v29  ;;  %v3761_v40 = vadd.f32 %v1205_v55, %v4797_v6  ;;  %v1207_v50 = vpop.f32.mrb[11].mxu0  ;;  %v1284_v52 = vpop.f32.mrb[27].mxu1  ;;  %v3809_v31 = vadd.f32 %v1282_v60, %v4805_v2 }
 0x3c1   :  { %v3762_v24 = vadd.f32 %v1207_v50, %v4795_v4  ;;  %3961 = vpow2.f32 %v3003_v34  ;;  %v3810_v29 = vadd.f32 %v1284_v52, %v4807_v8 }
 0x3c2   :  { %v3005_v54 = vmul.f32 -1.442695, %v3761_v40  ;;  %v3007_v50 = vmul.f32 -1.442695, %v3809_v31 }
 0x3c3   :  { %v3006_v36 = vmul.f32 -1.442695, %v3762_v24 }
 0x3c4   :  { %3963 = vpow2.f32 %v3005_v54 }
 0x3c5   :  { %3965 = vpow2.f32 %v3006_v36 }
 0x3c6   :  { %3967 = vtanh.f32 %v3808_v20 }
 0x3c7   :  { %3969 = vpow2.f32 %v3004_v48 }
 0x3ca   :  { %v3960_v11 = vpop.eup %3959 }
 0x3cb   :  { %v1313_v55 = vadd.f32 1.0, %v3960_v11  ;;  %v3962_v46 = vpop.eup %3961 }
 0x3cc   :  { %v1314_v34 = vadd.f32 1.0, %v3962_v46 }
 0x3cd   :  { %3971 = vrcp.f32 %v1313_v55 }
 0x3ce   :  { %v3964_v40 = vpop.eup %3963  ;;  %3973 = vtanh.f32 %v3810_v29 }
 0x3cf   :  { %3975 = vrcp.f32 %v1314_v34  ;;  %v1316_v19 = vadd.f32 1.0, %v3964_v40  ;;  %v3966_v24 = vpop.eup %3965 }
 0x3d0   :  { %3977 = vpow2.f32 %v3007_v50  ;;  %v1317_v33 = vadd.f32 1.0, %v3966_v24  ;;  %v3968_v60 = vpop.eup %3967 }
 0x3d1   :  { %3979 = vrcp.f32 %v1316_v19  ;;  %v3970_v54 = vpop.eup %3969 }
 0x3d2   :  { %3981 = vrcp.f32 %v1317_v33  ;;  %v1315_v20 = vadd.f32 1.0, %v3970_v54 }
 0x3d4   :  { %3983 = vrcp.f32 %v1315_v20 }
 0x3d7   :  { %v3972_v36 = vpop.eup %3971 }
 0x3d8   :  { %v3974_v52 = vpop.eup %3973  ;;  %v1335_v11 = vmul.f32 %v3972_v36, %v3968_v60 }
 0x3d9   :  { %v3976_v43 = vpop.eup %3975 }
 0x3da   :  { %v3978_v48 = vpop.eup %3977  ;;  %v1333_v31 = vmul.f32 %v3976_v43, %v4878_v39 }
 0x3db   :  { %v3980_v46 = vpop.eup %3979  ;;  %v1318_v50 = vadd.f32 1.0, %v3978_v48 }
 0x3dc   :  { %v4938_v55 = vadd.f32 %v1335_v11, %v1333_v31  ;;  %v1336_v29 = vmul.f32 %v3980_v46, %v3974_v52  ;;  %v3982_v34 = vpop.eup %3981 }
 0x3dd   :  { %v1334_v40 = vmul.f32 %v3982_v34, %v4882_v10 }
 0x3de   :  { %3985 = vtanh.f32 %v4938_v55  ;;  %v3984_v24 = vpop.eup %3983 }
 0x3df   :  { %v4942_v19 = vadd.f32 %v1336_v29, %v1334_v40  ;;  %3987 = vrcp.f32 %v1318_v50 }
 0x3e1   :  { %3989 = vtanh.f32 %v4942_v19 }
 0x3e8   :  { %v3986_v33 = vpop.eup %3985 }
 0x3e9   :  { %v4945_v60 = vmul.f32 %v3986_v33, %v3984_v24  ;;  %v3988_v39 = vpop.eup %3987 }
 0x3eb   :  { %5409 = vst [vmem:[#allocation41_spill] sm:$0xff] %v4945_v60  ;;  %1420 = vmatmul.mubr.f32.vlgmr.msra.gmra.mrb[12].mxu0 %v4945_v60  ;;  %1497 = vmatmul.mubr.f32.vlgmr.msra.gmra.mrb[28].mxu1 %v4945_v60  ;;  %v3990_v54 = vpop.eup %3989 }
 0x3ec   :  { %1425 = vmatprep.mubr.f32.mxu0 %v5405_v0  ;;  %1502 = vmatprep.mubr.f32.mxu1 %v5405_v0  ;;  %v4951_v10 = vmul.f32 %v3990_v54, %v3988_v39 }
 0x3ed   :  { %3450 = vmatpush1.bf16.msra.mxu0 %v4528_v7  ;;  %3482 = vmatpush1.bf16.msra.mxu1 %v4633_v62 }
 0x3ee   :  { %5410 = vst [vmem:[#allocation42_spill] sm:$0xff] %v4951_v10  ;;  %3452 = vmatprep.subr.bf16.mxu0 %v4530_v9  ;;  %3484 = vmatprep.subr.bf16.mxu1 %v4636_v1 }
 0x3ef   :  { %1426 = vmatmul.mubr.f32.gmra.mrb[14].mxu0 %v4951_v10  ;;  %1503 = vmatmul.mubr.f32.gmra.mrb[30].mxu1 %v4951_v10 }
 0x3f0   :  { %1641 = vmatprep.mubr.f32.mxu0 %v5405_v0  ;;  %1718 = vmatprep.mubr.f32.mxu1 %v5405_v0 }
 0x3f1   :  { %3454 = vmatpush1.bf16.msra.mxu0 %v4540_v21  ;;  %3486 = vmatpush1.bf16.msra.mxu1 %v4646_v13 }
 0x3f2   :  { %3456 = vmatprep.subr.bf16.mxu0 %v4544_v23  ;;  %3488 = vmatprep.subr.bf16.mxu1 %v4649_v17 }
 0x3f5   :  { %3458 = vmatpush1.bf16.msra.mxu0 %v4554_v35  ;;  %3490 = vmatpush1.bf16.msra.mxu1 %v4660_v26 }
 0x3f6   :  { %3460 = vmatprep.subr.bf16.mxu0 %v4558_v37  ;;  %3492 = vmatprep.subr.bf16.mxu1 %v4664_v27 }
 0x3f9   :  { %3462 = vmatpush1.bf16.msra.mxu0 %v4568_v49  ;;  %3494 = vmatpush1.bf16.msra.mxu1 %v4672_v16 }
 0x3fa   :  { %3464 = vmatprep.subr.bf16.mxu0 %v4572_v51  ;;  %3496 = vmatprep.subr.bf16.mxu1 %v4675_v38 }
 0x3fd   :  { %3466 = vmatpush1.bf16.msra.mxu0 %v4582_v3  ;;  %3498 = vmatpush1.bf16.msra.mxu1 %v4682_v30 }
 0x3fe   :  { %3468 = vmatprep.subr.bf16.mxu0 %v4586_v5  ;;  %3500 = vmatprep.subr.bf16.mxu1 %v4685_v47 }
 0x401   :  { %3470 = vmatpush1.bf16.msra.mxu0 %v4596_v22  ;;  %3502 = vmatpush1.bf16.msra.mxu1 %v4692_v44 }
 0x402   :  { %3472 = vmatprep.subr.bf16.mxu0 %v4600_v25  ;;  %3504 = vmatprep.subr.bf16.mxu1 %v4695_v61 }
 0x405   :  { %3474 = vmatpush1.bf16.msra.mxu0 %v4610_v41  ;;  %3506 = vmatpush1.bf16.msra.mxu1 %v4702_v59 }
 0x406   :  { %3476 = vmatprep.subr.bf16.mxu0 %v4614_v45  ;;  %3508 = vmatprep.subr.bf16.mxu1 %v4705_v18 }
 0x409   :  { %3478 = vmatpush1.bf16.msra.mxu0 %v4626_v58  ;;  %3510 = vmatpush1.bf16.msra.mxu1 %v4712_v15 }
 0x40a   :  { %3512 = vmatprep.subr.bf16.mxu0 %v4521_v57  ;;  %3544 = vmatprep.subr.bf16.mxu1 %v4623_v53 }
 0x4be   :  { %v1421_v36 = vpop.f32.mrb[12].mxu0  ;;  %v1498_v52 = vpop.f32.mrb[28].mxu1 }
 0x4bf   :  { %v3763_v11 = vadd.f32 %v1421_v36, %v4797_v6  ;;  %v1423_v43 = vpop.f32.mrb[13].mxu0  ;;  %v1500_v20 = vpop.f32.mrb[29].mxu1  ;;  %v3811_v36 = vadd.f32 %v1498_v52, %v4805_v2 }
 0x4c0   :  { %v3764_v48 = vadd.f32 %v1423_v43, %v4795_v4  ;;  %v3812_v43 = vadd.f32 %v1500_v20, %v4807_v8 }
 0x4c1   :  { %v3008_v31 = vmul.f32 -1.442695, %v3763_v11  ;;  %v3010_v11 = vmul.f32 -1.442695, %v3811_v36 }
 0x4c2   :  { %v3009_v46 = vmul.f32 -1.442695, %v3764_v48  ;;  %v1427_v29 = vpop.f32.mrb[14].mxu0  ;;  %v1504_v34 = vpop.f32.mrb[30].mxu1 }
 0x4c3   :  { %3991 = vpow2.f32 %v3008_v31  ;;  %v3765_v50 = vadd.f32 %v1427_v29, %v4797_v6  ;;  %v1429_v40 = vpop.f32.mrb[15].mxu0  ;;  %v1506_v24 = vpop.f32.mrb[31].mxu1  ;;  %v3813_v48 = vadd.f32 %v1504_v34, %v4805_v2 }
 0x4c4   :  { %v3766_v33 = vadd.f32 %v1429_v40, %v4795_v4  ;;  %3993 = vpow2.f32 %v3009_v46  ;;  %v3814_v31 = vadd.f32 %v1506_v24, %v4807_v8 }
 0x4c5   :  { %v3011_v39 = vmul.f32 -1.442695, %v3765_v50  ;;  %v3013_v40 = vmul.f32 -1.442695, %v3813_v48 }
 0x4c6   :  { %v3012_v54 = vmul.f32 -1.442695, %v3766_v33 }
 0x4c7   :  { %3995 = vpow2.f32 %v3011_v39 }
 0x4c8   :  { %3997 = vpow2.f32 %v3012_v54 }
 0x4c9   :  { %3999 = vtanh.f32 %v3812_v43 }
 0x4ca   :  { %4001 = vpow2.f32 %v3010_v11 }
 0x4cd   :  { %v3992_v10 = vpop.eup %3991 }
 0x4ce   :  { %v1535_v29 = vadd.f32 1.0, %v3992_v10  ;;  %v3994_v60 = vpop.eup %3993 }
 0x4cf   :  { %v1536_v46 = vadd.f32 1.0, %v3994_v60 }
 0x4d0   :  { %4003 = vrcp.f32 %v1535_v29 }
 0x4d1   :  { %v3996_v50 = vpop.eup %3995  ;;  %4005 = vtanh.f32 %v3814_v31 }
 0x4d2   :  { %4007 = vrcp.f32 %v1536_v46  ;;  %v1538_v52 = vadd.f32 1.0, %v3996_v50  ;;  %v3998_v33 = vpop.eup %3997 }
 0x4d3   :  { %4009 = vpow2.f32 %v3013_v40  ;;  %v1539_v20 = vadd.f32 1.0, %v3998_v33  ;;  %v4000_v34 = vpop.eup %3999 }
 0x4d4   :  { %4011 = vrcp.f32 %v1538_v52  ;;  %v4002_v39 = vpop.eup %4001 }
 0x4d5   :  { %4013 = vrcp.f32 %v1539_v20  ;;  %v1537_v43 = vadd.f32 1.0, %v4002_v39 }
 0x4d7   :  { %4015 = vrcp.f32 %v1537_v43 }
 0x4da   :  { %v4004_v54 = vpop.eup %4003 }
 0x4db   :  { %v4006_v24 = vpop.eup %4005  ;;  %v1557_v10 = vmul.f32 %v4004_v54, %v4000_v34  ;;  %v343_v54 = vadd.f32 %v4759_v63, %v4797_v6 }
 0x4dc   :  { %v4008_v36 = vpop.eup %4007 }
 0x4dd   :  { %v4010_v11 = vpop.eup %4009  ;;  %v1555_v48 = vmul.f32 %v4008_v36, %v4938_v55 }
 0x4de   :  { %v4012_v60 = vpop.eup %4011  ;;  %v1540_v40 = vadd.f32 1.0, %v4010_v11 }
 0x4df   :  { %v4998_v29 = vadd.f32 %v1557_v10, %v1555_v48  ;;  %v1558_v31 = vmul.f32 %v4012_v60, %v4006_v24  ;;  %v4014_v46 = vpop.eup %4013  ;;  %v345_v24 = vadd.f32 %v4761_v14, %v4795_v4 }
 0x4e0   :  { %v1556_v50 = vmul.f32 %v4014_v46, %v4942_v19 }
 0x4e1   :  { %4017 = vtanh.f32 %v4998_v29  ;;  %v4016_v33 = vpop.eup %4015 }
 0x4e2   :  { %v5002_v52 = vadd.f32 %v1558_v31, %v1556_v50  ;;  %4019 = vrcp.f32 %v1540_v40  ;;  %v349_v31 = vadd.f32 %v4763_v28, %v4797_v6  ;;  %v351_v40 = vadd.f32 %v4765_v42, %v4795_v4 }
 0x4e4   :  { %4021 = vtanh.f32 %v5002_v52 }
 0x4eb   :  { %v4018_v20 = vpop.eup %4017 }
 0x4ec   :  { %v5005_v34 = vmul.f32 %v4018_v20, %v4016_v33  ;;  %v4020_v55 = vpop.eup %4019 }
 0x4ee   :  { %1642 = vmatmul.mubr.f32.vlgmr.msra.gmra.mrb[16].mxu0 %v5005_v34  ;;  %1719 = vmatmul.mubr.f32.vlgmr.msra.gmra.mrb[32].mxu1 %v5005_v34  ;;  %v4022_v39 = vpop.eup %4021 }
 0x4ef   :  { %1647 = vmatprep.mubr.f32.mxu0 %v5405_v0  ;;  %1724 = vmatprep.mubr.f32.mxu1 %v5405_v0  ;;  %v5011_v19 = vmul.f32 %v4022_v39, %v4020_v55 }
 0x4f0   :  { %3514 = vmatpush1.bf16.msra.mxu0 %v4528_v7  ;;  %3546 = vmatpush1.bf16.msra.mxu1 %v4633_v62 }
 0x4f1   :  { %3516 = vmatprep.subr.bf16.mxu0 %v4530_v9  ;;  %3548 = vmatprep.subr.bf16.mxu1 %v4636_v1 }
 0x4f2   :  { %1648 = vmatmul.mubr.f32.gmra.mrb[18].mxu0 %v5011_v19  ;;  %1725 = vmatmul.mubr.f32.gmra.mrb[34].mxu1 %v5011_v19 }
 0x4f3   :  { %1863 = vmatprep.mubr.f32.mxu0 %v5405_v0  ;;  %1940 = vmatprep.mubr.f32.mxu1 %v5405_v0 }
 0x4f4   :  { %3518 = vmatpush1.bf16.msra.mxu0 %v4540_v21  ;;  %3550 = vmatpush1.bf16.msra.mxu1 %v4646_v13 }
 0x4f5   :  { %3520 = vmatprep.subr.bf16.mxu0 %v4544_v23  ;;  %3552 = vmatprep.subr.bf16.mxu1 %v4649_v17 }
 0x4f8   :  { %3522 = vmatpush1.bf16.msra.mxu0 %v4554_v35  ;;  %3554 = vmatpush1.bf16.msra.mxu1 %v4660_v26 }
 0x4f9   :  { %3524 = vmatprep.subr.bf16.mxu0 %v4558_v37  ;;  %3556 = vmatprep.subr.bf16.mxu1 %v4664_v27 }
 0x4fc   :  { %3526 = vmatpush1.bf16.msra.mxu0 %v4568_v49  ;;  %3558 = vmatpush1.bf16.msra.mxu1 %v4672_v16 }
 0x4fd   :  { %3528 = vmatprep.subr.bf16.mxu0 %v4572_v51  ;;  %3560 = vmatprep.subr.bf16.mxu1 %v4675_v38 }
 0x500   :  { %3530 = vmatpush1.bf16.msra.mxu0 %v4582_v3  ;;  %3562 = vmatpush1.bf16.msra.mxu1 %v4682_v30 }
 0x501   :  { %3532 = vmatprep.subr.bf16.mxu0 %v4586_v5  ;;  %3564 = vmatprep.subr.bf16.mxu1 %v4685_v47 }
 0x504   :  { %3534 = vmatpush1.bf16.msra.mxu0 %v4596_v22  ;;  %3566 = vmatpush1.bf16.msra.mxu1 %v4692_v44 }
 0x505   :  { %3536 = vmatprep.subr.bf16.mxu0 %v4600_v25  ;;  %3568 = vmatprep.subr.bf16.mxu1 %v4695_v61 }
 0x508   :  { %3538 = vmatpush1.bf16.msra.mxu0 %v4610_v41  ;;  %3570 = vmatpush1.bf16.msra.mxu1 %v4702_v59 }
 0x509   :  { %3540 = vmatprep.subr.bf16.mxu0 %v4614_v45  ;;  %3572 = vmatprep.subr.bf16.mxu1 %v4705_v18 }
 0x50c   :  { %3542 = vmatpush1.bf16.msra.mxu0 %v4626_v58  ;;  %3574 = vmatpush1.bf16.msra.mxu1 %v4712_v15 }
 0x50d   :  { %3576 = vmatprep.subr.bf16.mxu0 %v4521_v57  ;;  %3608 = vmatprep.subr.bf16.mxu1 %v4623_v53 }
 0x5c1   :  { %v1643_v10 = vpop.f32.mrb[16].mxu0  ;;  %v1720_v36 = vpop.f32.mrb[32].mxu1 }
 0x5c2   :  { %v1731_v43 = vadd.f32 %v1643_v10, %v343_v54  ;;  %v1645_v11 = vpop.f32.mrb[17].mxu0  ;;  %v1722_v48 = vpop.f32.mrb[33].mxu1 }
 0x5c3   :  { %v1732_v60 = vadd.f32 %v1645_v11, %v345_v24  ;;  %v3815_v24 = vadd.f32 %v1720_v36, %v4805_v2  ;;  %v3816_v28 = vadd.f32 %v1722_v48, %v4807_v8 }
 0x5c4   :  { %v3014_v46 = vmul.f32 -1.442695, %v1731_v43 }
 0x5c5   :  { %v3015_v50 = vmul.f32 -1.442695, %v1732_v60  ;;  %v1649_v33 = vpop.f32.mrb[18].mxu0  ;;  %v1726_v20 = vpop.f32.mrb[34].mxu1  ;;  %v3016_v43 = vmul.f32 -1.442695, %v3815_v24 }
 0x5c6   :  { %4023 = vpow2.f32 %v3014_v46  ;;  %v1735_v63 = vadd.f32 %v1649_v33, %v349_v31  ;;  %v1651_v55 = vpop.f32.mrb[19].mxu0  ;;  %v1728_v14 = vpop.f32.mrb[35].mxu1  ;;  %v3817_v42 = vadd.f32 %v1726_v20, %v4805_v2 }
 0x5c7   :  { %v1736_v39 = vadd.f32 %v1651_v55, %v351_v40  ;;  %4025 = vpow2.f32 %v3015_v50  ;;  %v3818_v60 = vadd.f32 %v1728_v14, %v4807_v8 }
 0x5c8   :  { %v3017_v54 = vmul.f32 -1.442695, %v1735_v63  ;;  %v3019_v40 = vmul.f32 -1.442695, %v3817_v42 }
 0x5c9   :  { %v3018_v10 = vmul.f32 -1.442695, %v1736_v39 }
 0x5ca   :  { %4027 = vpow2.f32 %v3017_v54 }
 0x5cb   :  { %4029 = vpow2.f32 %v3018_v10 }
 0x5cc   :  { %4031 = vtanh.f32 %v3816_v28 }
 0x5cd   :  { %4033 = vpow2.f32 %v3016_v43 }
 0x5d0   :  { %v4024_v11 = vpop.eup %4023 }
 0x5d1   :  { %v1757_v46 = vadd.f32 1.0, %v4024_v11  ;;  %v4026_v31 = vpop.eup %4025 }
 0x5d2   :  { %v1758_v50 = vadd.f32 1.0, %v4026_v31 }
 0x5d3   :  { %4035 = vrcp.f32 %v1757_v46 }
 0x5d4   :  { %v4028_v33 = vpop.eup %4027  ;;  %4037 = vtanh.f32 %v3818_v60 }
 0x5d5   :  { %4039 = vrcp.f32 %v1758_v50  ;;  %v1760_v36 = vadd.f32 1.0, %v4028_v33  ;;  %v4030_v63 = vpop.eup %4029 }
 0x5d6   :  { %4041 = vpow2.f32 %v3019_v40  ;;  %v1761_v48 = vadd.f32 1.0, %v4030_v63  ;;  %v4032_v20 = vpop.eup %4031 }
 0x5d7   :  { %4043 = vrcp.f32 %v1760_v36  ;;  %v4034_v55 = vpop.eup %4033 }
 0x5d8   :  { %4045 = vrcp.f32 %v1761_v48  ;;  %v1759_v24 = vadd.f32 1.0, %v4034_v55  ;;  %v357_v55 = vadd.f32 %v4769_v12, %v4795_v4 }
 0x5da   :  { %4047 = vrcp.f32 %v1759_v24 }
 0x5dd   :  { %v4036_v39 = vpop.eup %4035 }
 0x5de   :  { %v4038_v14 = vpop.eup %4037  ;;  %v1779_v54 = vmul.f32 %v4036_v39, %v4032_v20  ;;  %v355_v20 = vadd.f32 %v4767_v56, %v4797_v6 }
 0x5df   :  { %v4040_v10 = vpop.eup %4039 }
 0x5e0   :  { %v4042_v28 = vpop.eup %4041  ;;  %v1777_v43 = vmul.f32 %v4040_v10, %v4998_v29 }
 0x5e1   :  { %v4044_v42 = vpop.eup %4043  ;;  %v1762_v31 = vadd.f32 1.0, %v4042_v28 }
 0x5e2   :  { %v5062_v11 = vadd.f32 %v1779_v54, %v1777_v43  ;;  %v1780_v60 = vmul.f32 %v4044_v42, %v4038_v14  ;;  %v4046_v46 = vpop.eup %4045  ;;  %v361_v43 = vadd.f32 %v4771_v32, %v4797_v6 }
 0x5e3   :  { %v1778_v40 = vmul.f32 %v4046_v46, %v5002_v52 }
 0x5e4   :  { %4049 = vtanh.f32 %v5062_v11  ;;  %v4048_v33 = vpop.eup %4047 }
 0x5e5   :  { %v5066_v50 = vadd.f32 %v1780_v60, %v1778_v40  ;;  %4051 = vrcp.f32 %v1762_v31 }
 0x5e7   :  { %4053 = vtanh.f32 %v5066_v50 }
 0x5ee   :  { %v4050_v36 = vpop.eup %4049 }
 0x5ef   :  { %v5069_v63 = vmul.f32 %v4050_v36, %v4048_v33  ;;  %v4052_v29 = vpop.eup %4051 }
 0x5f1   :  { %1864 = vmatmul.mubr.f32.vlgmr.msra.gmra.mrb[20].mxu0 %v5069_v63  ;;  %1941 = vmatmul.mubr.f32.vlgmr.msra.gmra.mrb[36].mxu1 %v5069_v63  ;;  %v4054_v48 = vpop.eup %4053 }
 0x5f2   :  { %1869 = vmatprep.mubr.f32.mxu0 %v5405_v0  ;;  %1946 = vmatprep.mubr.f32.mxu1 %v5405_v0  ;;  %v5075_v52 = vmul.f32 %v4054_v48, %v4052_v29 }
 0x5f3   :  { %3578 = vmatpush1.bf16.msra.mxu0 %v4528_v7  ;;  %3610 = vmatpush1.bf16.msra.mxu1 %v4633_v62 }
 0x5f4   :  { %3580 = vmatprep.subr.bf16.mxu0 %v4530_v9  ;;  %3612 = vmatprep.subr.bf16.mxu1 %v4636_v1 }
 0x5f5   :  { %1870 = vmatmul.mubr.f32.gmra.mrb[22].mxu0 %v5075_v52  ;;  %1947 = vmatmul.mubr.f32.gmra.mrb[38].mxu1 %v5075_v52 }
 0x5f6   :  { %2085 = vmatprep.mubr.f32.mxu0 %v5405_v0  ;;  %2162 = vmatprep.mubr.f32.mxu1 %v5405_v0 }
 0x5f7   :  { %3582 = vmatpush1.bf16.msra.mxu0 %v4540_v21  ;;  %3614 = vmatpush1.bf16.msra.mxu1 %v4646_v13 }
 0x5f8   :  { %3584 = vmatprep.subr.bf16.mxu0 %v4544_v23  ;;  %3616 = vmatprep.subr.bf16.mxu1 %v4649_v17 }
 0x5fb   :  { %3586 = vmatpush1.bf16.msra.mxu0 %v4554_v35  ;;  %3618 = vmatpush1.bf16.msra.mxu1 %v4660_v26 }
 0x5fc   :  { %3588 = vmatprep.subr.bf16.mxu0 %v4558_v37  ;;  %3620 = vmatprep.subr.bf16.mxu1 %v4664_v27 }
 0x5ff   :  { %3590 = vmatpush1.bf16.msra.mxu0 %v4568_v49  ;;  %3622 = vmatpush1.bf16.msra.mxu1 %v4672_v16 }
 0x600   :  { %3592 = vmatprep.subr.bf16.mxu0 %v4572_v51  ;;  %3624 = vmatprep.subr.bf16.mxu1 %v4675_v38 }
 0x603   :  { %3594 = vmatpush1.bf16.msra.mxu0 %v4582_v3  ;;  %3626 = vmatpush1.bf16.msra.mxu1 %v4682_v30 }
 0x604   :  { %3596 = vmatprep.subr.bf16.mxu0 %v4586_v5  ;;  %3628 = vmatprep.subr.bf16.mxu1 %v4685_v47 }
 0x607   :  { %3598 = vmatpush1.bf16.msra.mxu0 %v4596_v22  ;;  %3630 = vmatpush1.bf16.msra.mxu1 %v4692_v44 }
 0x608   :  { %3600 = vmatprep.subr.bf16.mxu0 %v4600_v25  ;;  %3632 = vmatprep.subr.bf16.mxu1 %v4695_v61 }
 0x60b   :  { %3602 = vmatpush1.bf16.msra.mxu0 %v4610_v41  ;;  %3634 = vmatpush1.bf16.msra.mxu1 %v4702_v59 }
 0x60c   :  { %3604 = vmatprep.subr.bf16.mxu0 %v4614_v45  ;;  %3636 = vmatprep.subr.bf16.mxu1 %v4705_v18 }
 0x60f   :  { %3606 = vmatpush1.bf16.msra.mxu0 %v4626_v58  ;;  %3638 = vmatpush1.bf16.msra.mxu1 %v4712_v15 }
 0x610   :  { %3640 = vmatprep.subr.bf16.mxu0 %v4521_v57  ;;  %3672 = vmatprep.subr.bf16.mxu1 %v4623_v53  ;;  %v5411_v57 = vld [vmem:[#allocation27_spill] sm:$0xff] }
 0x611   :  { %v363_v60 = vadd.f32 %v5411_v57, %v4795_v4 }
 0x6c4   :  { %v1865_v39 = vpop.f32.mrb[20].mxu0  ;;  %v1942_v14 = vpop.f32.mrb[36].mxu1 }
 0x6c5   :  { %v1953_v54 = vadd.f32 %v1865_v39, %v355_v20  ;;  %v1867_v10 = vpop.f32.mrb[21].mxu0  ;;  %v1944_v24 = vpop.f32.mrb[37].mxu1  ;;  %v3819_v48 = vadd.f32 %v1942_v14, %v4805_v2 }
 0x6c6   :  { %v1954_v28 = vadd.f32 %v1867_v10, %v357_v55  ;;  %v3820_v32 = vadd.f32 %v1944_v24, %v4807_v8 }
 0x6c7   :  { %v3020_v42 = vmul.f32 -1.442695, %v1953_v54  ;;  %v3022_v20 = vmul.f32 -1.442695, %v3819_v48 }
 0x6c8   :  { %v3021_v53 = vmul.f32 -1.442695, %v1954_v28  ;;  %v1871_v46 = vpop.f32.mrb[22].mxu0  ;;  %v1948_v31 = vpop.f32.mrb[38].mxu1 }
 0x6c9   :  { %4055 = vpow2.f32 %v3020_v42  ;;  %v1957_v56 = vadd.f32 %v1871_v46, %v361_v43  ;;  %v1873_v40 = vpop.f32.mrb[23].mxu0  ;;  %v1950_v12 = vpop.f32.mrb[39].mxu1  ;;  %v3821_v55 = vadd.f32 %v1948_v31, %v4805_v2 }
 0x6ca   :  { %v1958_v33 = vadd.f32 %v1873_v40, %v363_v60  ;;  %4057 = vpow2.f32 %v3021_v53  ;;  %v3822_v54 = vadd.f32 %v1950_v12, %v4807_v8 }
 0x6cb   :  { %v3023_v36 = vmul.f32 -1.442695, %v1957_v56  ;;  %v3025_v43 = vmul.f32 -1.442695, %v3821_v55 }
 0x6cc   :  { %v3024_v29 = vmul.f32 -1.442695, %v1958_v33 }
 0x6cd   :  { %4059 = vpow2.f32 %v3023_v36 }
 0x6ce   :  { %4061 = vpow2.f32 %v3024_v29 }
 0x6cf   :  { %4063 = vtanh.f32 %v3820_v32 }
 0x6d0   :  { %4065 = vpow2.f32 %v3022_v20 }
 0x6d3   :  { %v4056_v39 = vpop.eup %4055 }
 0x6d4   :  { %v1979_v10 = vadd.f32 1.0, %v4056_v39  ;;  %v4058_v28 = vpop.eup %4057 }
 0x6d5   :  { %v1980_v42 = vadd.f32 1.0, %v4058_v28 }
 0x6d6   :  { %4067 = vrcp.f32 %v1979_v10 }
 0x6d7   :  { %v4060_v57 = vpop.eup %4059  ;;  %4069 = vtanh.f32 %v3822_v54 }
 0x6d8   :  { %4071 = vrcp.f32 %v1980_v42  ;;  %v1982_v14 = vadd.f32 1.0, %v4060_v57  ;;  %v4062_v60 = vpop.eup %4061 }
 0x6d9   :  { %4073 = vpow2.f32 %v3025_v43  ;;  %v1983_v24 = vadd.f32 1.0, %v4062_v60  ;;  %v4064_v53 = vpop.eup %4063 }
 0x6da   :  { %4075 = vrcp.f32 %v1982_v14  ;;  %v4066_v46 = vpop.eup %4065 }
 0x6db   :  { %4077 = vrcp.f32 %v1983_v24  ;;  %v1981_v33 = vadd.f32 1.0, %v4066_v46 }
 0x6dd   :  { %4079 = vrcp.f32 %v1981_v33 }
 0x6e0   :  { %v4068_v31 = vpop.eup %4067 }
 0x6e1   :  { %v4070_v56 = vpop.eup %4069  ;;  %v2001_v40 = vmul.f32 %v4068_v31, %v4064_v53 }
 0x6e2   :  { %v4072_v12 = vpop.eup %4071 }
 0x6e3   :  { %v4074_v36 = vpop.eup %4073  ;;  %v1999_v29 = vmul.f32 %v4072_v12, %v5062_v11 }
 0x6e4   :  { %v4076_v48 = vpop.eup %4075  ;;  %v1984_v39 = vadd.f32 1.0, %v4074_v36 }
 0x6e5   :  { %v5126_v32 = vadd.f32 %v2001_v40, %v1999_v29  ;;  %v2002_v20 = vmul.f32 %v4076_v48, %v4070_v56  ;;  %v4078_v55 = vpop.eup %4077 }
 0x6e6   :  { %v2000_v54 = vmul.f32 %v4078_v55, %v5066_v50 }
 0x6e7   :  { %4081 = vtanh.f32 %v5126_v32  ;;  %v4080_v28 = vpop.eup %4079 }
 0x6e8   :  { %v5130_v10 = vadd.f32 %v2002_v20, %v2000_v54  ;;  %4083 = vrcp.f32 %v1984_v39 }
 0x6ea   :  { %4085 = vtanh.f32 %v5130_v10 }
 0x6f1   :  { %v4082_v43 = vpop.eup %4081 }
 0x6f2   :  { %v5133_v42 = vmul.f32 %v4082_v43, %v4080_v28  ;;  %v4084_v11 = vpop.eup %4083 }
 0x6f4   :  { %2086 = vmatmul.mubr.f32.vlgmr.msra.gmra.mrb[24].mxu0 %v5133_v42  ;;  %2163 = vmatmul.mubr.f32.vlgmr.msra.gmra.mrb[40].mxu1 %v5133_v42  ;;  %v4086_v57 = vpop.eup %4085 }
 0x6f5   :  { %2091 = vmatprep.mubr.f32.mxu0 %v5405_v0  ;;  %2168 = vmatprep.mubr.f32.mxu1 %v5405_v0  ;;  %v5139_v50 = vmul.f32 %v4086_v57, %v4084_v11 }
 0x6f6   :  { %3642 = vmatpush1.bf16.msra.mxu0 %v4528_v7  ;;  %3674 = vmatpush1.bf16.msra.mxu1 %v4633_v62  ;;  %v2460_v7 = vld [vmem:[#allocation15] sm:$0xff] }
 0x6f7   :  { %3644 = vmatprep.subr.bf16.mxu0 %v4530_v9  ;;  %3676 = vmatprep.subr.bf16.mxu1 %v4636_v1  ;;  %v2461_v9 = vld [vmem:[#allocation15 + $0x8] sm:$0xff]  ;;  %v5415_v1 = vld [vmem:[#allocation31_spill] sm:$0xff] }
 0x6f8   :  { %2092 = vmatmul.mubr.f32.gmra.mrb[26].mxu0 %v5139_v50  ;;  %2169 = vmatmul.mubr.f32.gmra.mrb[42].mxu1 %v5139_v50 }
 0x6f9   :  { %2307 = vmatprep.mubr.f32.mxu0 %v5405_v0  ;;  %2384 = vmatprep.mubr.f32.mxu1 %v5405_v0 }
 0x6fa   :  { %3646 = vmatpush1.bf16.msra.mxu0 %v4540_v21  ;;  %3678 = vmatpush1.bf16.msra.mxu1 %v4646_v13  ;;  %v5175_v21 = vpack.c.bf16 %v2461_v9, %v2460_v7  ;;  %v375_v13 = vadd.f32 %v5415_v1, %v4795_v4 }
 0x6fb   :  { %3648 = vmatprep.subr.bf16.mxu0 %v4544_v23  ;;  %3680 = vmatprep.subr.bf16.mxu1 %v4649_v17  ;;  %v5412_v23 = vld [vmem:[#allocation28_spill] sm:$0xff] }
 0x6fe   :  { %3650 = vmatpush1.bf16.msra.mxu0 %v4554_v35  ;;  %3682 = vmatpush1.bf16.msra.mxu1 %v4660_v26  ;;  %v367_v35 = vadd.f32 %v5412_v23, %v4797_v6 }
 0x6ff   :  { %3652 = vmatprep.subr.bf16.mxu0 %v4558_v37  ;;  %3684 = vmatprep.subr.bf16.mxu1 %v4664_v27  ;;  %v5413_v37 = vld [vmem:[#allocation29_spill] sm:$0xff] }
 0x702   :  { %3654 = vmatpush1.bf16.msra.mxu0 %v4568_v49  ;;  %3686 = vmatpush1.bf16.msra.mxu1 %v4672_v16  ;;  %v369_v49 = vadd.f32 %v5413_v37, %v4795_v4 }
 0x703   :  { %3656 = vmatprep.subr.bf16.mxu0 %v4572_v51  ;;  %3688 = vmatprep.subr.bf16.mxu1 %v4675_v38 }
 0x706   :  { %3658 = vmatpush1.bf16.msra.mxu0 %v4582_v3  ;;  %3690 = vmatpush1.bf16.msra.mxu1 %v4682_v30 }
 0x707   :  { %3660 = vmatprep.subr.bf16.mxu0 %v4586_v5  ;;  %3692 = vmatprep.subr.bf16.mxu1 %v4685_v47 }
 0x70a   :  { %3662 = vmatpush1.bf16.msra.mxu0 %v4596_v22  ;;  %3694 = vmatpush1.bf16.msra.mxu1 %v4692_v44 }
 0x70b   :  { %3664 = vmatprep.subr.bf16.mxu0 %v4600_v25  ;;  %3696 = vmatprep.subr.bf16.mxu1 %v4695_v61 }
 0x70e   :  { %3666 = vmatpush1.bf16.msra.mxu0 %v4610_v41  ;;  %3698 = vmatpush1.bf16.msra.mxu1 %v4702_v59 }
 0x70f   :  { %3668 = vmatprep.subr.bf16.mxu0 %v4614_v45  ;;  %3700 = vmatprep.subr.bf16.mxu1 %v4705_v18  ;;  %v5414_v45 = vld [vmem:[#allocation30_spill] sm:$0xff] }
 0x712   :  { %3670 = vmatpush1.bf16.msra.mxu0 %v4626_v58  ;;  %3702 = vmatpush1.bf16.msra.mxu1 %v4712_v15  ;;  %v373_v58 = vadd.f32 %v5414_v45, %v4797_v6  ;;  %v2465_v45 = vld [vmem:[#allocation15 + $0x28] sm:$0xff] }
 0x713   :  { %3704 = vmatprep.subr.bf16.mxu0 %v5175_v21 }
 0x7c7   :  { %v2087_v51 = vpop.f32.mrb[24].mxu0  ;;  %v2164_v3 = vpop.f32.mrb[40].mxu1 }
 0x7c8   :  { %v2175_v5 = vadd.f32 %v2087_v51, %v367_v35  ;;  %v2089_v22 = vpop.f32.mrb[25].mxu0  ;;  %v2166_v25 = vpop.f32.mrb[41].mxu1  ;;  %v3823_v59 = vadd.f32 %v2164_v3, %v4805_v2  ;;  %v2462_v51 = vld [vmem:[#allocation15 + $0x10] sm:$0xff]  ;;  %v2463_v3 = vld [vmem:[#allocation15 + $0x18] sm:$0xff] }
 0x7c9   :  { %v2176_v41 = vadd.f32 %v2089_v22, %v369_v49  ;;  %v3824_v18 = vadd.f32 %v2166_v25, %v4807_v8  ;;  %v3707_v25 = vpack.c.bf16 %v2463_v3, %v2462_v51 }
 0x7ca   :  { %v3026_v62 = vmul.f32 -1.442695, %v2175_v5  ;;  %v3028_v15 = vmul.f32 -1.442695, %v3823_v59 }
 0x7cb   :  { %v3027_v17 = vmul.f32 -1.442695, %v2176_v41  ;;  %v2093_v26 = vpop.f32.mrb[26].mxu0  ;;  %v2170_v27 = vpop.f32.mrb[42].mxu1  ;;  %v2464_v41 = vld [vmem:[#allocation15 + $0x20] sm:$0xff] }
 0x7cc   :  { %4087 = vpow2.f32 %v3026_v62  ;;  %v2179_v16 = vadd.f32 %v2093_v26, %v373_v58  ;;  %v2095_v38 = vpop.f32.mrb[27].mxu0  ;;  %v2172_v30 = vpop.f32.mrb[43].mxu1  ;;  %v3825_v14 = vadd.f32 %v2170_v27, %v4805_v2  ;;  %v3711_v1 = vpack.c.bf16 %v2465_v45, %v2464_v41  ;;  %v5416_v26 = vld [vmem:[#allocation37_spill] sm:$0xff] }
 0x7cd   :  { %v2180_v47 = vadd.f32 %v2095_v38, %v375_v13  ;;  %4089 = vpow2.f32 %v3027_v17  ;;  %v3826_v24 = vadd.f32 %v2172_v30, %v4807_v8  ;;  %v2466_v13 = vld [vmem:[#allocation15 + $0x30] sm:$0xff]  ;;  %v2467_v17 = vld [vmem:[#allocation15 + $0x38] sm:$0xff]  ;;  %v2469_v38 = vld [vmem:[#allocation15 + $0x48] sm:$0xff] }
 0x7ce   :  { %v3029_v44 = vmul.f32 -1.442695, %v2179_v16  ;;  %v3031_v31 = vmul.f32 -1.442695, %v3825_v14  ;;  %v3715_v27 = vpack.c.bf16 %v2467_v17, %v2466_v13  ;;  %v2468_v16 = vld [vmem:[#allocation15 + $0x40] sm:$0xff]  ;;  %v2470_v30 = vld [vmem:[#allocation15 + $0x50] sm:$0xff] }
 0x7cf   :  { %v3030_v61 = vmul.f32 -1.442695, %v2180_v47  ;;  %v2471_v47 = vld [vmem:[#allocation15 + $0x58] sm:$0xff] }
 0x7d0   :  { %4091 = vpow2.f32 %v3029_v44  ;;  %v2472_v44 = vld [vmem:[#allocation15 + $0x60] sm:$0xff] }
 0x7d1   :  { %4093 = vpow2.f32 %v3030_v61  ;;  %v2473_v61 = vld [vmem:[#allocation15 + $0x68] sm:$0xff] }
 0x7d2   :  { %4095 = vtanh.f32 %v3824_v18  ;;  %v3727_v59 = vpack.c.bf16 %v2473_v61, %v2472_v44  ;;  %v2474_v18 = vld [vmem:[#allocation15 + $0x70] sm:$0xff] }
 0x7d3   :  { %4097 = vpow2.f32 %v3028_v15  ;;  %v2475_v15 = vld [vmem:[#allocation15 + $0x78] sm:$0xff] }
 0x7d4   :  { %v3731_v14 = vpack.c.bf16 %v2475_v15, %v2474_v18 }
 0x7d6   :  { %v4088_v60 = vpop.eup %4087 }
 0x7d7   :  { %v2201_v53 = vadd.f32 1.0, %v4088_v60  ;;  %v4090_v46 = vpop.eup %4089  ;;  %v5417_v60 = vld [vmem:[#allocation38_spill] sm:$0xff] }
 0x7d8   :  { %v2202_v56 = vadd.f32 1.0, %v4090_v46  ;;  %v5420_v46 = vld [vmem:[#allocation41_spill] sm:$0xff] }
 0x7d9   :  { %4099 = vrcp.f32 %v2201_v53  ;;  %v5419_v53 = vld [vmem:[#allocation40_spill] sm:$0xff] }
 0x7da   :  { %v4092_v40 = vpop.eup %4091  ;;  %4101 = vtanh.f32 %v3826_v24  ;;  %v5418_v24 = vld [vmem:[#allocation39_spill] sm:$0xff] }
 0x7db   :  { %4103 = vrcp.f32 %v2202_v56  ;;  %v2204_v12 = vadd.f32 1.0, %v4092_v40  ;;  %v4094_v33 = vpop.eup %4093  ;;  %v5422_v56 = vld [vmem:[#allocation32_spill] sm:$0xff] }
 0x7dc   :  { %4105 = vpow2.f32 %v3031_v31  ;;  %v2205_v36 = vadd.f32 1.0, %v4094_v33  ;;  %v4096_v29 = vpop.eup %4095  ;;  %v5421_v31 = vld [vmem:[#allocation42_spill] sm:$0xff]  ;;  %v379_v40 = vadd.f32 %v5422_v56, %v4797_v6 }
 0x7dd   :  { %4107 = vrcp.f32 %v2204_v12  ;;  %v4098_v48 = vpop.eup %4097  ;;  %v5423_v12 = vld [vmem:[#allocation33_spill] sm:$0xff] }
 0x7de   :  { %4109 = vrcp.f32 %v2205_v36  ;;  %v2203_v28 = vadd.f32 1.0, %v4098_v48  ;;  %v381_v33 = vadd.f32 %v5423_v12, %v4795_v4 }
 0x7e0   :  { %4111 = vrcp.f32 %v2203_v28 }
 0x7e3   :  { %v4100_v20 = vpop.eup %4099 }
 0x7e4   :  { %v4102_v55 = vpop.eup %4101  ;;  %v2223_v39 = vmul.f32 %v4100_v20, %v4096_v29 }
 0x7e5   :  { %v4104_v54 = vpop.eup %4103 }
 0x7e6   :  { %v4106_v43 = vpop.eup %4105  ;;  %v2221_v11 = vmul.f32 %v4104_v54, %v5126_v32 }
 0x7e7   :  { %v4108_v57 = vpop.eup %4107  ;;  %v2206_v35 = vadd.f32 1.0, %v4106_v43 }
 0x7e8   :  { %v5191_v7 = vadd.f32 %v2223_v39, %v2221_v11  ;;  %v2224_v9 = vmul.f32 %v4108_v57, %v4102_v55  ;;  %v4110_v23 = vpop.eup %4109 }
 0x7e9   :  { %v2222_v37 = vmul.f32 %v4110_v23, %v5130_v10 }
 0x7ea   :  { %4113 = vtanh.f32 %v5191_v7  ;;  %v4112_v5 = vpop.eup %4111 }
 0x7eb   :  { %v5195_v49 = vadd.f32 %v2224_v9, %v2222_v37  ;;  %4115 = vrcp.f32 %v2206_v35 }
 0x7ed   :  { %4117 = vtanh.f32 %v5195_v49 }
 0x7f4   :  { %v4114_v32 = vpop.eup %4113 }
 0x7f5   :  { %v2229_v22 = vmul.f32 %v4114_v32, %v4112_v5  ;;  %v4116_v58 = vpop.eup %4115 }
 0x7f7   :  { %2308 = vmatmul.mubr.f32.vlgmr.msra.gmra.mrb[28].mxu0 %v2229_v22  ;;  %2385 = vmatmul.mubr.f32.vlgmr.msra.gmra.mrb[44].mxu1 %v2229_v22  ;;  %v4118_v62 = vpop.eup %4117 }
 0x7f8   :  { %3706 = vmatpush3.bf16.msra.mxu0 %v5175_v21  ;;  %2313 = vmatprep.mubr.f32.mxu0 %v5405_v0  ;;  %v2230_v10 = vmul.f32 %v4118_v62, %v4116_v58  ;;  %v3719_v21 = vpack.c.bf16 %v2469_v38, %v2468_v16 }
 0x7f9   :  { %2390 = vmatprep.mubr.f32.mxu1 %v5405_v0  ;;  %3708 = vmatprep.subr.bf16.mxu0 %v3707_v25  ;;  %v3723_v0 = vpack.c.bf16 %v2471_v47, %v2470_v30 }
 0x7fb   :  { %2314 = vmatmul.mubr.f32.gmra.mrb[30].mxu0 %v2230_v10  ;;  %2391 = vmatmul.mubr.f32.gmra.mrb[46].mxu1 %v2230_v10 }
 0x7fc   :  { %3710 = vmatpush3.bf16.msra.mxu0 %v3707_v25  ;;  %3103 = vmatprep.mubr.f32.mxu0 %v5416_v26 }
 0x7fd   :  { %3712 = vmatprep.subr.bf16.mxu0 %v3711_v1 }
 0x800   :  { %3714 = vmatpush3.bf16.msra.mxu0 %v3711_v1 }
 0x801   :  { %3716 = vmatprep.subr.bf16.mxu0 %v3715_v27 }
 0x804   :  { %3718 = vmatpush3.bf16.msra.mxu0 %v3715_v27 }
 0x805   :  { %3720 = vmatprep.subr.bf16.mxu0 %v3719_v21 }
 0x808   :  { %3722 = vmatpush3.bf16.msra.mxu0 %v3719_v21 }
 0x809   :  { %3724 = vmatprep.subr.bf16.mxu0 %v3723_v0 }
 0x80c   :  { %3726 = vmatpush3.bf16.msra.mxu0 %v3723_v0 }
 0x80d   :  { %3728 = vmatprep.subr.bf16.mxu0 %v3727_v59 }
 0x810   :  { %3730 = vmatpush3.bf16.msra.mxu0 %v3727_v59 }
 0x811   :  { %3732 = vmatprep.subr.bf16.mxu0 %v3731_v14 }
 0x814   :  { %3734 = vmatpush3.bf16.msra.mxu0 %v3731_v14  ;;  %v4372_v14 = vmov 1983009808  }
 0x817   :  { %3104 = vmatmul.mubr.f32.vlgmr.msra.gmra.mrb[32].mxu0 %v5417_v60  ;;  %v2647_v60 = vunpack.c.l.s4 %v4372_v14 }
 0x818   :  { %3106 = vmatprep.mubr.f32.mxu0 %v5418_v24 }
 0x81b   :  { %3107 = vmatmul.mubr.f32.gmra.mrb[34].mxu0 %v5419_v53 }
 0x81c   :  { %3109 = vmatprep.mubr.f32.mxu0 %v5420_v46 }
 0x81f   :  { %3110 = vmatmul.mubr.f32.gmra.mrb[36].mxu0 %v5421_v31  ;;  %v2648_v31 = vunpack.c.0.s8 %v2647_v60 }
 0x820   :  { %3112 = vmatprep.mubr.f32.mxu0 %v5005_v34 }
 0x823   :  { %3113 = vmatmul.mubr.f32.gmra.mrb[38].mxu0 %v5011_v19 }
 0x824   :  { %3115 = vmatprep.mubr.f32.mxu0 %v5069_v63 }
 0x827   :  { %3116 = vmatmul.mubr.f32.gmra.mrb[40].mxu0 %v5075_v52  ;;  %v5424_v52 = vld [vmem:[#allocation34_spill] sm:$0xff] }
 0x828   :  { %3118 = vmatprep.mubr.f32.mxu0 %v5133_v42  ;;  %v385_v20 = vadd.f32 %v5424_v52, %v4797_v6 }
 0x82b   :  { %3119 = vmatmul.mubr.f32.gmra.mrb[42].mxu0 %v5139_v50  ;;  %v5425_v50 = vld [vmem:[#allocation35_spill] sm:$0xff] }
 0x82c   :  { %3121 = vmatprep.mubr.f32.mxu0 %v2229_v22  ;;  %v387_v55 = vadd.f32 %v5425_v50, %v4795_v4 }
 0x82f   :  { %3122 = vmatmul.mubr.f32.gmra.mrb[44].mxu0 %v2230_v10 }
 0x8ca   :  { %v2309_v36 = vpop.f32.mrb[28].mxu0  ;;  %v2386_v34 = vpop.f32.mrb[44].mxu1 }
 0x8cb   :  { %v2397_v29 = vadd.f32 %v2309_v36, %v379_v40  ;;  %v2311_v19 = vpop.f32.mrb[29].mxu0  ;;  %v2388_v48 = vpop.f32.mrb[45].mxu1  ;;  %v3827_v37 = vadd.f32 %v2386_v34, %v4805_v2 }
 0x8cc   :  { %v2398_v63 = vadd.f32 %v2311_v19, %v381_v33  ;;  %v3828_v6 = vadd.f32 %v2388_v48, %v4807_v8  ;;  %v5426_v19 = vld [vmem:[#allocation36_spill] sm:$0xff] }
 0x8cd   :  { %v3032_v42 = vmul.f32 -1.442695, %v2397_v29  ;;  %v3034_v51 = vmul.f32 -1.442695, %v3827_v37  ;;  %v5237_v48 = vsub.s32 %v2648_v31, %v5426_v19 }
 0x8ce   :  { %v3033_v39 = vmul.f32 -1.442695, %v2398_v63  ;;  %v2315_v54 = vpop.f32.mrb[30].mxu0  ;;  %v2392_v28 = vpop.f32.mrb[46].mxu1 }
 0x8cf   :  { %4119 = vpow2.f32 %v3032_v42  ;;  %v2401_v43 = vadd.f32 %v2315_v54, %v385_v20  ;;  %v2317_v11 = vpop.f32.mrb[31].mxu0  ;;  %v2394_v57 = vpop.f32.mrb[47].mxu1  ;;  %v3829_v4 = vadd.f32 %v2392_v28, %v4805_v2 }
 0x8d0   :  { %v2402_v9 = vadd.f32 %v2317_v11, %v387_v55  ;;  %4121 = vpow2.f32 %v3033_v39  ;;  %v3830_v5 = vadd.f32 %v2394_v57, %v4807_v8 }
 0x8d1   :  { %v3035_v23 = vmul.f32 -1.442695, %v2401_v43  ;;  %v3037_v25 = vmul.f32 -1.442695, %v3829_v4 }
 0x8d2   :  { %v3036_v35 = vmul.f32 -1.442695, %v2402_v9 }
 0x8d3   :  { %4123 = vpow2.f32 %v3035_v23 }
 0x8d4   :  { %4125 = vpow2.f32 %v3036_v35 }
 0x8d5   :  { %4127 = vtanh.f32 %v3828_v6 }
 0x8d6   :  { %4129 = vpow2.f32 %v3034_v51 }
 0x8d9   :  { %v4120_v3 = vpop.eup %4119 }
 0x8da   :  { %v2423_v32 = vadd.f32 1.0, %v4120_v3  ;;  %v4122_v22 = vpop.eup %4121 }
 0x8db   :  { %v2424_v41 = vadd.f32 1.0, %v4122_v22 }
 0x8dc   :  { %4131 = vrcp.f32 %v2423_v32 }
 0x8dd   :  { %v4124_v45 = vpop.eup %4123  ;;  %4133 = vtanh.f32 %v3830_v5 }
 0x8de   :  { %4135 = vrcp.f32 %v2424_v41  ;;  %v2426_v58 = vadd.f32 1.0, %v4124_v45  ;;  %v4126_v62 = vpop.eup %4125 }
 0x8df   :  { %4137 = vpow2.f32 %v3037_v25  ;;  %v2427_v10 = vadd.f32 1.0, %v4126_v62  ;;  %v4128_v2 = vpop.eup %4127 }
 0x8e0   :  { %4139 = vrcp.f32 %v2426_v58  ;;  %v4130_v1 = vpop.eup %4129 }
 0x8e1   :  { %4141 = vrcp.f32 %v2427_v10  ;;  %v2425_v27 = vadd.f32 1.0, %v4130_v1 }
 0x8e3   :  { %4143 = vrcp.f32 %v2425_v27 }
 0x8e6   :  { %v4132_v13 = vpop.eup %4131 }
 0x8e7   :  { %v4134_v8 = vpop.eup %4133  ;;  %v2445_v17 = vmul.f32 %v4132_v13, %v4128_v2 }
 0x8e8   :  { %v4136_v26 = vpop.eup %4135 }
 0x8e9   :  { %v4138_v16 = vpop.eup %4137  ;;  %v2443_v38 = vmul.f32 %v4136_v26, %v5191_v7  ;;  %v5230_v7 = vld [vmem:[%s5380_s7] ss:$0 sm:$0xff]  ;;  %s4373_s7 = smov [#allocation18]  }
 0x8ea   :  { %v4140_v21 = vpop.eup %4139  ;;  %v3105_v30 = vpop.f32.mrb[32].mxu0  ;;  %v2428_v59 = vadd.f32 1.0, %v4138_v16  ;;  %s2956_s12 = sshll.u32 %s4373_s7, 4  ;;  %s2957_s12 = int_to_ptr.vmem [resolvable:$true] %s2956_s12 }
 0x8eb   :  { %v2447_v47 = vadd.f32 %v2445_v17, %v2443_v38  ;;  %v2446_v0 = vmul.f32 %v4140_v21, %v4134_v8  ;;  %v2565_v44 = vpop.f32.mrb[33].mxu0  ;;  %v4142_v61 = vpop.eup %4141  ;;  %v2571_v56 = vadd.f32 %v3105_v30, %v5230_v7  ;;  %s4283_s13 = scalar_lea.vmem %s2957_s12, 256  ;;  %p4288_p7 = scmp.lt.s32.totalorder %s2957_s12, %s2957_s12 }
 0x8ec   :  { %v2444_v18 = vmul.f32 %v4142_v61, %v5195_v49  ;;  %v2566_v12 = vadd.f32 %v5230_v7, %v2565_v44  ;;  %p4284_p6 = scmp.ne.s32.totalorder %s2957_s12, %s4283_s13  ;;  %p4289_p8 = scmp.lt.s32.totalorder %s4283_s13, %s4283_s13 }
 0x8ed   :  { %2937 = vst [vmem:[#allocation20] sm:$0xff] %v2447_v47  ;;  %4145 = vtanh.f32 %v2447_v47  ;;  %v4144_v29 = vpop.eup %4143 }
 0x8ee   :  { %v3108_v15 = vpop.f32.mrb[34].mxu0  ;;  %v2448_v24 = vadd.f32 %v2446_v0, %v2444_v18  ;;  %4147 = vrcp.f32 %v2428_v59  ;;  %p4290_p9 = por %p4289_p8, %p4288_p7 }
 0x8ef   :  { %v2575_v53 = vpop.f32.mrb[35].mxu0  ;;  %v2581_v50 = vadd.f32 %v3108_v15, %v5230_v7 }
 0x8f0   :  { %2938 = vst [vmem:[#allocation20 + $0x8] sm:$0xff] %v2448_v24  ;;  %4149 = vtanh.f32 %v2448_v24  ;;  %v2576_v54 = vadd.f32 %v5230_v7, %v2575_v53  ;;  %p4291_p10 = pnand %p4290_p9, %p4284_p6 }
 0x8f2   :  { %v3111_v46 = vpop.f32.mrb[36].mxu0 }
 0x8f3   :  { %v2591_v49 = vadd.f32 %v3111_v46, %v5230_v7  ;;  %v2585_v40 = vpop.f32.mrb[37].mxu0 }
 0x8f4   :  { %v2586_v33 = vadd.f32 %v5230_v7, %v2585_v40 }
 0x8f5   :  { %v2780_v36 = vcombine.low %v2571_v56, %v2591_v49  ;;  %v2781_v34 = vcombine.high %v2571_v56, %v2591_v49 }
 0x8f6   :  { %v2644_v63 = vcombine.low %v2566_v12, %v2586_v33  ;;  %v2645_v52 = vcombine.high %v2566_v12, %v2586_v33  ;;  %v3114_v20 = vpop.f32.mrb[38].mxu0 }
 0x8f7   :  { %v4146_v42 = vpop.eup %4145  ;;  %v2601_v55 = vadd.f32 %v3114_v20, %v5230_v7  ;;  %v2595_v39 = vpop.f32.mrb[39].mxu0  ;;  %v5244_v23 = vrot.slane %v2780_v36, %v5237_v48  ;;  %v5247_v4 = vrot.slane %v2781_v34, %v5237_v48 }
 0x8f8   :  { %v2596_v28 = vadd.f32 %v5230_v7, %v2595_v39  ;;  %v2451_v43 = vmul.f32 %v4146_v42, %v4144_v29  ;;  %v4148_v9 = vpop.eup %4147  ;;  %v5250_v3 = vrot.slane %v2644_v63, %v5237_v48  ;;  %v5259_v25 = vrot.slane %v2645_v52, %v5237_v48 }
 0x8f9   :  { %v2796_v11 = vcombine.low %v2581_v50, %v2601_v55  ;;  %v2797_v57 = vcombine.high %v2581_v50, %v2601_v55 }
 0x8fa   :  { %v2660_v35 = vcombine.low %v2576_v54, %v2596_v28  ;;  %v2661_v37 = vcombine.high %v2576_v54, %v2596_v28  ;;  %v3117_v6 = vpop.f32.mrb[40].mxu0  ;;  %3124 = vmatprep.mubr.f32.mxu0 %v2451_v43  ;;  %2935 = vst [vmem:[#allocation18] sm:$0xff] %v2451_v43  ;;  %v4150_v51 = vpop.eup %4149 }
 0x8fb   :  { %v5253_v5 = vrot.slane %v2796_v11, %v5237_v48  ;;  %v5256_v32 = vrot.slane %v2797_v57, %v5237_v48  ;;  %v2605_v22 = vpop.f32.mrb[41].mxu0  ;;  %v2452_v58 = vmul.f32 %v4150_v51, %v4148_v9  ;;  %v5284_v21 = vadd.f32 %v3117_v6, %v5230_v7 }
 0x8fc   :  { %v5262_v41 = vrot.slane %v2660_v35, %v5237_v48  ;;  %v5265_v45 = vrot.slane %v2661_v37, %v5237_v48  ;;  %v5290_v0 = vadd.f32 %v5230_v7, %v2605_v22 }
 0x8fd   :  { %v2844_v62 = vcombine.low %v5244_v23, %v5253_v5  ;;  %v2845_v10 = vcombine.high %v5244_v23, %v5253_v5  ;;  %v2860_v2 = vcombine.low %v5247_v4, %v5256_v32  ;;  %v2861_v1 = vcombine.high %v5247_v4, %v5256_v32  ;;  %3125 = vmatmul.mubr.f32.gmra.mrb[46].mxu0 %v2452_v58 }
 0x8fe   :  { %v2708_v13 = vcombine.low %v5250_v3, %v5262_v41  ;;  %v2709_v8 = vcombine.high %v5250_v3, %v5262_v41  ;;  %v2724_v17 = vcombine.low %v5259_v25, %v5265_v45  ;;  %v2725_v26 = vcombine.high %v5259_v25, %v5265_v45  ;;  %v3120_v27 = vpop.f32.mrb[42].mxu0  ;;  %2936 = vst [vmem:[#allocation18 + $0x8] sm:$0xff] %v2452_v58 }
 0x8ff   :  { %v2615_v16 = vpop.f32.mrb[43].mxu0 }
 0x902   :  { %v3123_v38 = vpop.f32.mrb[44].mxu0 }
 0x903   :  { %v5287_v30 = vadd.f32 %v3123_v38, %v5230_v7  ;;  %v2625_v47 = vpop.f32.mrb[45].mxu0 }
 0x904   :  { %v5293_v44 = vadd.f32 %v5230_v7, %v2625_v47 }
 0x905   :  { %v2812_v61 = vcombine.low %v5284_v21, %v5287_v30  ;;  %v2813_v59 = vcombine.high %v5284_v21, %v5287_v30 }
 0x906   :  { %v2676_v18 = vcombine.low %v5290_v0, %v5293_v44  ;;  %v2677_v15 = vcombine.high %v5290_v0, %v5293_v44 }
 0x907   :  { %4294 = shalt.err (!%p4291_p10)
}
 0x908   :  { %s4295_s1 = scalar_lea.hbm %s5382_s9, 256 }
 0x909   :  { %p4296_p11 = scmp.ne.s32.totalorder %s5382_s9, %s4295_s1  ;;  %p4299_p12 = scmp.lt.u32.totalorder %s4295_s1, %s5382_s9 }
 0x90b   :  { %p4301_p13 = pnand %p4299_p12, %p4296_p11 }
 0x90d   :  { %4304 = shalt.err (!%p4301_p13)
}
 0x90e   :  { %2962 = dma.vmem_to_hbm [thread:$0]  %s2957_s12, 256, %s5382_s9, [#allocation19], %s4366_s3, %s4366_s3, %s4367_s28  }
 0x90f   :  { %s4374_s20 = smov [#allocation20]  }
 0x910   :  { %s2968_s21 = sshll.u32 %s4374_s20, 4  ;;  %s2969_s21 = int_to_ptr.vmem [resolvable:$true] %s2968_s21 }
 0x911   :  { %s4305_s22 = scalar_lea.vmem %s2969_s21, 256  ;;  %p4310_p1 = scmp.lt.s32.totalorder %s2969_s21, %s2969_s21 }
 0x912   :  { %p4306_p0 = scmp.ne.s32.totalorder %s2969_s21, %s4305_s22  ;;  %p4311_p2 = scmp.lt.s32.totalorder %s4305_s22, %s4305_s22 }
 0x914   :  { %p4312_p3 = por %p4311_p2, %p4310_p1 }
 0x916   :  { %p4313_p4 = pnand %p4312_p3, %p4306_p0 }
 0x918   :  { %4316 = shalt.err (!%p4313_p4)
}
 0x919   :  { %s4317_s30 = scalar_lea.hbm %s5383_s10, 256 }
 0x91a   :  { %p4318_p5 = scmp.ne.s32.totalorder %s5383_s10, %s4317_s30  ;;  %p4321_p6 = scmp.lt.u32.totalorder %s4317_s30, %s5383_s10 }
 0x91c   :  { %p4323_p7 = pnand %p4321_p6, %p4318_p5 }
 0x91e   :  { %4326 = shalt.err (!%p4323_p7)
}
 0x91f   :  { %2974 = dma.vmem_to_hbm [thread:$0]  %s2969_s21, 256, %s5383_s10, [#allocation19], %s4366_s3, %s4366_s3, %s4367_s28   ;;  %v4375_v14 = vmov 1934713408   ;;  %v2621_v49 = vadd.f32 %v3120_v27, %v5230_v7  ;;  %v2616_v34 = vadd.f32 %v5230_v7, %v2615_v16  ;;  %v2820_v39 = vrot.slane %v2812_v61, %v5237_v48 }
 0x920   :  { %v2711_v60 = vunpack.c.l.s4 %v4375_v14  ;;  %v2827_v54 = vrot.slane %v2813_v59, %v5237_v48  ;;  %v2684_v11 = vrot.slane %v2676_v18, %v5237_v48  ;;  %v2691_v57 = vrot.slane %v2677_v15, %v5237_v48  ;;  %s4376_s10 = smov [#allocation17]  }
 0x921   :  { %s2944_s29 = sshll.u32 %s4376_s10, 4  ;;  %s2945_s29 = int_to_ptr.vmem [resolvable:$true] %s2944_s29 }
 0x922   :  { %v2712_v24 = vunpack.c.0.s8 %v2711_v60  ;;  %s4327_s5 = scalar_lea.vmem %s2945_s29, 2048  ;;  %p4332_p9 = scmp.lt.s32.totalorder %s2945_s29, %s2945_s29 }
 0x923   :  { %p4328_p8 = scmp.ne.s32.totalorder %s2945_s29, %s4327_s5  ;;  %p4333_p10 = scmp.lt.s32.totalorder %s4327_s5, %s4327_s5 }
 0x924   :  { %v2715_v53 = vsub.s32 %v2712_v24, %v5426_v19 }
 0x925   :  { %p4334_p11 = por %p4333_p10, %p4332_p9 }
 0x926   :  { %v2852_v31 = vrot.slane %v2844_v62, %v2715_v53  ;;  %v2859_v56 = vrot.slane %v2845_v10, %v2715_v53  ;;  %v2868_v33 = vrot.slane %v2860_v2, %v2715_v53  ;;  %v2875_v36 = vrot.slane %v2861_v1, %v2715_v53 }
 0x927   :  { %v2716_v63 = vrot.slane %v2708_v13, %v2715_v53  ;;  %v2723_v19 = vrot.slane %v2709_v8, %v2715_v53  ;;  %v2732_v42 = vrot.slane %v2724_v17, %v2715_v53  ;;  %v2739_v50 = vrot.slane %v2725_v26, %v2715_v53  ;;  %p4335_p12 = pnand %p4334_p11, %p4328_p8 }
 0x9d0   :  { %v3126_v46 = vpop.f32.mrb[46].mxu0 }
 0x9d1   :  { %v2641_v40 = vadd.f32 %v3126_v46, %v5230_v7  ;;  %v2635_v12 = vpop.f32.mrb[47].mxu0 }
 0x9d2   :  { %v2636_v29 = vadd.f32 %v5230_v7, %v2635_v12 }
 0x9d3   :  { %v2828_v52 = vcombine.low %v2621_v49, %v2641_v40  ;;  %v2829_v20 = vcombine.high %v2621_v49, %v2641_v40 }
 0x9d4   :  { %v2692_v55 = vcombine.low %v2616_v34, %v2636_v29  ;;  %v2693_v7 = vcombine.high %v2616_v34, %v2636_v29 }
 0x9d5   :  { %v2836_v28 = vrot.slane %v2828_v52, %v5237_v48  ;;  %v2843_v43 = vrot.slane %v2829_v20, %v5237_v48 }
 0x9d6   :  { %v2700_v9 = vrot.slane %v2692_v55, %v5237_v48  ;;  %v2707_v23 = vrot.slane %v2693_v7, %v5237_v48 }
 0x9d7   :  { %v2876_v35 = vcombine.low %v2820_v39, %v2836_v28  ;;  %v2877_v37 = vcombine.high %v2820_v39, %v2836_v28  ;;  %v2892_v6 = vcombine.low %v2827_v54, %v2843_v43  ;;  %v2893_v51 = vcombine.high %v2827_v54, %v2843_v43 }
 0x9d8   :  { %v2740_v4 = vcombine.low %v2684_v11, %v2700_v9  ;;  %v2741_v3 = vcombine.high %v2684_v11, %v2700_v9  ;;  %v2756_v5 = vcombine.low %v2691_v57, %v2707_v23  ;;  %v2757_v32 = vcombine.high %v2691_v57, %v2707_v23 }
 0x9d9   :  { %v2884_v22 = vrot.slane %v2876_v35, %v2715_v53  ;;  %v2891_v25 = vrot.slane %v2877_v37, %v2715_v53  ;;  %v2900_v41 = vrot.slane %v2892_v6, %v2715_v53  ;;  %v2907_v45 = vrot.slane %v2893_v51, %v2715_v53 }
 0x9da   :  { %v2748_v58 = vrot.slane %v2740_v4, %v2715_v53  ;;  %v2755_v62 = vrot.slane %v2741_v3, %v2715_v53  ;;  %v2764_v10 = vrot.slane %v2756_v5, %v2715_v53  ;;  %v2771_v2 = vrot.slane %v2757_v32, %v2715_v53 }
 0x9db   :  { %v2908_v1 = vcombine.low %v2852_v31, %v2884_v22  ;;  %v2909_v13 = vcombine.high %v2852_v31, %v2884_v22  ;;  %v2910_v8 = vcombine.low %v2859_v56, %v2891_v25  ;;  %v2911_v48 = vcombine.high %v2859_v56, %v2891_v25 }
 0x9dc   :  { %v2912_v17 = vcombine.low %v2868_v33, %v2900_v41  ;;  %v2913_v26 = vcombine.high %v2868_v33, %v2900_v41  ;;  %v2914_v27 = vcombine.low %v2875_v36, %v2907_v45  ;;  %v2915_v16 = vcombine.high %v2875_v36, %v2907_v45 }
 0x9dd   :  { %2924 = vst [vmem:[#allocation17 + $0x40] sm:$0xff] %v2908_v1  ;;  %2925 = vst [vmem:[#allocation17 + $0x48] sm:$0xff] %v2909_v13  ;;  %v2772_v38 = vcombine.low %v2716_v63, %v2748_v58  ;;  %v2773_v21 = vcombine.high %v2716_v63, %v2748_v58  ;;  %v2774_v30 = vcombine.low %v2723_v19, %v2755_v62 }
 0x9de   :  { %2926 = vst [vmem:[#allocation17 + $0x50] sm:$0xff] %v2910_v8  ;;  %2927 = vst [vmem:[#allocation17 + $0x58] sm:$0xff] %v2911_v48  ;;  %v2775_v47 = vcombine.high %v2723_v19, %v2755_v62  ;;  %v2776_v0 = vcombine.low %v2732_v42, %v2764_v10  ;;  %v2777_v44 = vcombine.high %v2732_v42, %v2764_v10 }
 0x9df   :  { %2928 = vst [vmem:[#allocation17 + $0x60] sm:$0xff] %v2912_v17  ;;  %2929 = vst [vmem:[#allocation17 + $0x68] sm:$0xff] %v2913_v26  ;;  %v2778_v61 = vcombine.low %v2739_v50, %v2771_v2  ;;  %v2779_v59 = vcombine.high %v2739_v50, %v2771_v2 }
 0x9e0   :  { %2930 = vst [vmem:[#allocation17 + $0x70] sm:$0xff] %v2914_v27  ;;  %2931 = vst [vmem:[#allocation17 + $0x78] sm:$0xff] %v2915_v16 }
 0x9e1   :  { %2916 = vst [vmem:[#allocation17] sm:$0xff] %v2772_v38  ;;  %2917 = vst [vmem:[#allocation17 + $0x8] sm:$0xff] %v2773_v21 }
 0x9e2   :  { %2918 = vst [vmem:[#allocation17 + $0x10] sm:$0xff] %v2774_v30  ;;  %2919 = vst [vmem:[#allocation17 + $0x18] sm:$0xff] %v2775_v47 }
 0x9e3   :  { %2920 = vst [vmem:[#allocation17 + $0x20] sm:$0xff] %v2776_v0  ;;  %2921 = vst [vmem:[#allocation17 + $0x28] sm:$0xff] %v2777_v44 }
 0x9e4   :  { %2922 = vst [vmem:[#allocation17 + $0x30] sm:$0xff] %v2778_v61  ;;  %2923 = vst [vmem:[#allocation17 + $0x38] sm:$0xff] %v2779_v59 }
 0x9e5   :  { %4338 = shalt.err (!%p4335_p12)
}
 0x9e6   :  { %s4339_s12 = scalar_lea.hbm %s5381_s8, 2048 }
 0x9e7   :  { %p4340_p13 = scmp.ne.s32.totalorder %s5381_s8, %s4339_s12  ;;  %p4343_p0 = scmp.lt.u32.totalorder %s4339_s12, %s5381_s8 }
 0x9e9   :  { %p4345_p1 = pnand %p4343_p0, %p4340_p13 }
 0x9eb   :  { %4348 = shalt.err (!%p4345_p1)
}
 0x9ec   :  { %2950 = dma.vmem_to_hbm [thread:$0]  %s2945_s29, 2048, %s5381_s8, [#allocation8], %s4366_s3, %s4366_s3, %s4367_s28  }
 0x9ed   :  { %4357 = dma.done.wait [#allocation8], 2048  }
 0x9ee   :  { %4358 = vsyncadd [#allocation8], 4294965248 }
 0x9ef   :  { %4359 = dma.done.wait [#allocation19], 512  }
 0x9f0   :  { %4360 = vsyncadd [#allocation19], 4294966784 }
 0x9f1   :  { %2984 = vsyncpa [#allocation7], 1 }
 0x9f2   :  { %2985 = vsyncpa [#allocation10], 1 }
 0x9f3   :  { %2986 = vsyncpa [#allocation13], 1 }
 0x9f4   :  { %2987 = vsyncpa [#allocation16], 1 }
 0x9f5   :  { %2988 = vsyncpa [#allocation8], 1 }
 0x9f6   :  { %2989 = vsyncpa [#allocation19], 1 }

// kernel: tpu_custom_call.1
= control target key start
LH: loop header
LB: loop body
LE: loop exit
PB: predicated region body
PF: predicated region fallthrough
CT: control target
= control target key end

     0   :  { %16 = vsyncpa [#allocation7], 0  ;;  %s5373_s0 = inlined_call_operand.hbm [shape: f32[8,16,128], index: 0, kind: input, shape index: {}]   ;;  %s5374_s1 = inlined_call_operand.hbm [shape: f32[128,512], index: 1, kind: input, shape index: {}]   ;;  %s5375_s2 = inlined_call_operand.hbm [shape: f32[128,512], index: 2, kind: input, shape index: {}]   ;;  %s5376_s3 = inlined_call_operand.hbm [shape: f32[1,512], index: 3, kind: input, shape index: {}]   ;;  %s5377_s4 = inlined_call_operand.hbm [shape: f32[16,128], index: 4, kind: input, shape index: {}]   ;;  %s5378_s5 = inlined_call_operand.vmem [shape: f32[16,128], index: 5, kind: input, shape index: {}]   ;;  %s5379_s6 = inlined_call_operand.hbm [shape: f32[128,128], index: 6, kind: input, shape index: {}]   ;;  %s5380_s7 = inlined_call_operand.vmem [shape: f32[1,128], index: 7, kind: input, shape index: {}]   ;;  %s5381_s8 = inlined_call_operand.hbm [shape: f32[16,8,128], index: 8, kind: output, shape index: {0}]   ;;  %s5382_s9 = inlined_call_operand.hbm [shape: f32[16,128], index: 9, kind: output, shape index: {1}]   ;;  %s5383_s10 = inlined_call_operand.hbm [shape: f32[16,128], index: 10, kind: output, shape index: {2}]  }
   0x1   :  { %17 = vsyncpa [#allocation10], 0 }
   0x2   :  { %18 = vsyncpa [#allocation13], 0 }
   0x3   :  { %19 = vsyncpa [#allocation16], 0 }
   0x4   :  { %20 = vsyncpa [#allocation8], 0 }
   0x5   :  { %21 = vsyncpa [#allocation19], 0  ;;  %s4361_s13 = smov [#allocation9]   ;;  %s4151_s17 = scalar_lea.hbm %s5374_s1, 8192 }
   0x6   :  { %s39_s14 = sshll.u32 %s4361_s13, 4  ;;  %p4152_p0 = scmp.ne.s32.totalorder %s5374_s1, %s4151_s17  ;;  %s40_s14 = int_to_ptr.vmem [resolvable:$true] %s39_s14 }
   0x7   :  { %p4155_p1 = scmp.lt.u32.totalorder %s4151_s17, %s5374_s1 }
   0x9   :  { %p4157_p2 = pnand %p4155_p1, %p4152_p0 }
   0xb   :  { %4160 = shalt.err (!%p4157_p2)
}
   0xc   :  { %s4161_s22 = scalar_lea.vmem %s40_s14, 8192  ;;  %p4166_p4 = scmp.lt.s32.totalorder %s40_s14, %s40_s14 }
   0xd   :  { %p4162_p3 = scmp.ne.s32.totalorder %s40_s14, %s4161_s22  ;;  %p4167_p5 = scmp.lt.s32.totalorder %s4161_s22, %s4161_s22 }
   0xf   :  { %p4168_p6 = por %p4167_p5, %p4166_p4 }
  0x11   :  { %p4169_p7 = pnand %p4168_p6, %p4162_p3 }
  0x13   :  { %4172 = shalt.err (!%p4169_p7)
}
  0x14   :  { %s4362_s23 = smov 512   ;;  %s4363_s24 = smov 32  }
  0x15   :  { %45 = dma.hbm_to_vmem [thread:$0]  %s5374_s1, 8192, %s40_s14, [#allocation10], %s4362_s23, %s4362_s23, %s4363_s24  }
  0x16   :  { %s4364_s27 = smov [#allocation12]   ;;  %s4365_s29 = smov [#allocation6]  }
  0x17   :  { %s64_s28 = sshll.u32 %s4364_s27, 4  ;;  %s27_s30 = sshll.u32 %s4365_s29, 4  ;;  %s65_s28 = int_to_ptr.vmem [resolvable:$true] %s64_s28  ;;  %s28_s30 = int_to_ptr.vmem [resolvable:$true] %s27_s30 }
  0x18   :  { %s4173_s13 = scalar_lea.hbm %s5376_s3, 64 }
  0x19   :  { %p4174_p8 = scmp.ne.s32.totalorder %s5376_s3, %s4173_s13  ;;  %p4177_p9 = scmp.lt.u32.totalorder %s4173_s13, %s5376_s3 }
  0x1b   :  { %p4179_p10 = pnand %p4177_p9, %p4174_p8 }
  0x1d   :  { %4182 = shalt.err (!%p4179_p10)
}
  0x1e   :  { %s4183_s1 = scalar_lea.vmem %s65_s28, 64  ;;  %p4188_p12 = scmp.lt.s32.totalorder %s65_s28, %s65_s28 }
  0x1f   :  { %p4184_p11 = scmp.ne.s32.totalorder %s65_s28, %s4183_s1  ;;  %p4189_p13 = scmp.lt.s32.totalorder %s4183_s1, %s4183_s1 }
  0x21   :  { %p4190_p0 = por %p4189_p13, %p4188_p12 }
  0x23   :  { %p4191_p1 = pnand %p4190_p0, %p4184_p11 }
  0x25   :  { %4194 = shalt.err (!%p4191_p1)
}
  0x26   :  { %67 = dma.hbm_to_vmem [thread:$0]  %s5376_s3, 64, %s65_s28, [#allocation13]  }
  0x27   :  { %s4195_s22 = scalar_lea.hbm %s5373_s0, 2048 }
  0x28   :  { %p4196_p2 = scmp.ne.s32.totalorder %s5373_s0, %s4195_s22  ;;  %p4199_p3 = scmp.lt.u32.totalorder %s4195_s22, %s5373_s0 }
  0x2a   :  { %p4201_p4 = pnand %p4199_p3, %p4196_p2 }
  0x2c   :  { %4204 = shalt.err (!%p4201_p4)
}
  0x2d   :  { %s4205_s11 = scalar_lea.vmem %s28_s30, 2048  ;;  %p4210_p6 = scmp.lt.s32.totalorder %s28_s30, %s28_s30 }
  0x2e   :  { %p4206_p5 = scmp.ne.s32.totalorder %s28_s30, %s4205_s11  ;;  %p4211_p7 = scmp.lt.s32.totalorder %s4205_s11, %s4205_s11 }
  0x30   :  { %p4212_p8 = por %p4211_p7, %p4210_p6 }
  0x32   :  { %p4213_p9 = pnand %p4212_p8, %p4206_p5 }
  0x34   :  { %4216 = shalt.err (!%p4213_p9)
}
  0x35   :  { %s4366_s3 = smov 128   ;;  %s4367_s28 = smov 8  }
  0x36   :  { %33 = dma.hbm_to_vmem [thread:$0]  %s5373_s0, 2048, %s28_s30, [#allocation7], %s4366_s3, %s4366_s3, %s4367_s28  }
  0x37   :  { %s4368_s15 = smov [#allocation11]   ;;  %s4369_s17 = smov [#allocation14]  }
  0x38   :  { %s51_s16 = sshll.u32 %s4368_s15, 4  ;;  %s73_s18 = sshll.u32 %s4369_s17, 4  ;;  %s52_s16 = int_to_ptr.vmem [resolvable:$true] %s51_s16  ;;  %s74_s18 = int_to_ptr.vmem [resolvable:$true] %s73_s18 }
  0x39   :  { %s4217_s19 = scalar_lea.hbm %s5375_s2, 8192 }
  0x3a   :  { %p4218_p10 = scmp.ne.s32.totalorder %s5375_s2, %s4217_s19  ;;  %p4221_p11 = scmp.lt.u32.totalorder %s4217_s19, %s5375_s2 }
  0x3c   :  { %p4223_p12 = pnand %p4221_p11, %p4218_p10 }
  0x3e   :  { %4226 = shalt.err (!%p4223_p12)
}
  0x3f   :  { %s4227_s0 = scalar_lea.vmem %s52_s16, 8192  ;;  %p4232_p0 = scmp.lt.s32.totalorder %s52_s16, %s52_s16 }
  0x40   :  { %p4228_p13 = scmp.ne.s32.totalorder %s52_s16, %s4227_s0  ;;  %p4233_p1 = scmp.lt.s32.totalorder %s4227_s0, %s4227_s0 }
  0x42   :  { %p4234_p2 = por %p4233_p1, %p4232_p0 }
  0x44   :  { %p4235_p3 = pnand %p4234_p2, %p4228_p13 }
  0x46   :  { %4238 = shalt.err (!%p4235_p3)
}
  0x47   :  { %57 = dma.hbm_to_vmem [thread:$0]  %s5375_s2, 8192, %s52_s16, [#allocation10], %s4362_s23, %s4362_s23, %s4363_s24  }
  0x48   :  { %s4239_s11 = scalar_lea.hbm %s5377_s4, 256 }
  0x49   :  { %p4240_p4 = scmp.ne.s32.totalorder %s5377_s4, %s4239_s11  ;;  %p4243_p5 = scmp.lt.u32.totalorder %s4239_s11, %s5377_s4 }
  0x4b   :  { %p4245_p6 = pnand %p4243_p5, %p4240_p4 }
  0x4d   :  { %4248 = shalt.err (!%p4245_p6)
}
  0x4e   :  { %s4249_s1 = scalar_lea.vmem %s74_s18, 256  ;;  %p4254_p8 = scmp.lt.s32.totalorder %s74_s18, %s74_s18 }
  0x4f   :  { %p4250_p7 = scmp.ne.s32.totalorder %s74_s18, %s4249_s1  ;;  %p4255_p9 = scmp.lt.s32.totalorder %s4249_s1, %s4249_s1 }
  0x51   :  { %p4256_p10 = por %p4255_p9, %p4254_p8 }
  0x53   :  { %p4257_p11 = pnand %p4256_p10, %p4250_p7 }
  0x55   :  { %4260 = shalt.err (!%p4257_p11)
}
  0x56   :  { %79 = dma.hbm_to_vmem [thread:$0]  %s5377_s4, 256, %s74_s18, [#allocation13], %s4366_s3, %s4366_s3, %s4367_s28  }
  0x57   :  { %s4370_s24 = smov [#allocation15]   ;;  %s4261_s20 = scalar_lea.hbm %s5379_s6, 2048 }
  0x58   :  { %s87_s16 = sshll.u32 %s4370_s24, 4  ;;  %p4262_p12 = scmp.ne.s32.totalorder %s5379_s6, %s4261_s20  ;;  %s88_s16 = int_to_ptr.vmem [resolvable:$true] %s87_s16 }
  0x59   :  { %p4265_p13 = scmp.lt.u32.totalorder %s4261_s20, %s5379_s6 }
  0x5b   :  { %p4267_p0 = pnand %p4265_p13, %p4262_p12 }
  0x5d   :  { %4270 = shalt.err (!%p4267_p0)
}
  0x5e   :  { %s4271_s30 = scalar_lea.vmem %s88_s16, 2048  ;;  %p4276_p2 = scmp.lt.s32.totalorder %s88_s16, %s88_s16 }
  0x5f   :  { %p4272_p1 = scmp.ne.s32.totalorder %s88_s16, %s4271_s30  ;;  %p4277_p3 = scmp.lt.s32.totalorder %s4271_s30, %s4271_s30 }
  0x61   :  { %p4278_p4 = por %p4277_p3, %p4276_p2 }
  0x63   :  { %p4279_p5 = pnand %p4278_p4, %p4272_p1 }
  0x65   :  { %4282 = shalt.err (!%p4279_p5)
}
  0x66   :  { %93 = dma.hbm_to_vmem [thread:$0]  %s5379_s6, 2048, %s88_s16, [#allocation16], %s4366_s3, %s4366_s3, %s4367_s28  }
  0x67   :  { %4349 = dma.done.wait [#allocation7], 2048  }
  0x68   :  { %4350 = vsyncadd [#allocation7], 4294965248 }
  0x69   :  { %4351 = dma.done.wait [#allocation10], 16384  }
  0x6a   :  { %4352 = vsyncadd [#allocation10], 4294950912 }
  0x6b   :  { %4353 = dma.done.wait [#allocation13], 320  }
  0x6c   :  { %4354 = vsyncadd [#allocation13], 4294966976 }
  0x6d   :  { %4355 = dma.done.wait [#allocation16], 2048  }
  0x6e   :  { %4356 = vsyncadd [#allocation16], 4294965248  ;;  %v5384_v0 = vmov 0.0   ;;  %v143_v1 = vld [vmem:[#allocation9 + $0x8] sm:$0xff]  ;;  %v142_v3 = vld [vmem:[#allocation9] sm:$0xff] }
  0x6f   :  { %340 = vmatprep.mubr.f32.mxu1 %v5384_v0  ;;  %292 = vmatprep.mubr.f32.mxu0 %v5384_v0  ;;  %v147_v2 = vld [vmem:[#allocation9 + $0x28] sm:$0xff]  ;;  %v146_v5 = vld [vmem:[#allocation9 + $0x20] sm:$0xff]  ;;  %v145_v48 = vld [vmem:[#allocation9 + $0x18] sm:$0xff] }
  0x70   :  { %v3127_v4 = vpack.c.bf16 %v147_v2, %v143_v1  ;;  %v151_v6 = vld [vmem:[#allocation9 + $0x48] sm:$0xff]  ;;  %v3129_v8 = vpack.c.bf16 %v146_v5, %v142_v3  ;;  %v150_v10 = vld [vmem:[#allocation9 + $0x40] sm:$0xff]  ;;  %v149_v49 = vld [vmem:[#allocation9 + $0x38] sm:$0xff] }
  0x71   :  { %v155_v7 = vld [vmem:[#allocation9 + $0x68] sm:$0xff]  ;;  %v154_v11 = vld [vmem:[#allocation9 + $0x60] sm:$0xff]  ;;  %v3159_v53 = vpack.c.bf16 %v149_v49, %v145_v48  ;;  %v144_v54 = vld [vmem:[#allocation9 + $0x10] sm:$0xff] }
  0x72   :  { %v3131_v9 = vpack.c.bf16 %v155_v7, %v151_v6  ;;  %v159_v12 = vld [vmem:[#allocation9 + $0x88] sm:$0xff]  ;;  %3735 = vmatprep.subr.bf16.mxu1 %v3127_v4  ;;  %3128 = vmatprep.subr.bf16.mxu0 %v3127_v4  ;;  %v3133_v14 = vpack.c.bf16 %v154_v11, %v150_v10  ;;  %v158_v16 = vld [vmem:[#allocation9 + $0x80] sm:$0xff]  ;;  %v148_v55 = vld [vmem:[#allocation9 + $0x30] sm:$0xff] }
  0x73   :  { %v163_v13 = vld [vmem:[#allocation9 + $0xa8] sm:$0xff]  ;;  %3743 = vmatpush1.bf16.msra.mxu1 %v3129_v8  ;;  %3130 = vmatpush1.bf16.msra.mxu0 %v3129_v8  ;;  %v162_v17 = vld [vmem:[#allocation9 + $0xa0] sm:$0xff]  ;;  %v153_v56 = vld [vmem:[#allocation9 + $0x58] sm:$0xff]  ;;  %v3161_v1 = vpack.c.bf16 %v148_v55, %v144_v54 }
  0x74   :  { %3736 = vmatprep.subr.bf16.mxu1 %v3131_v9  ;;  %v3135_v15 = vpack.c.bf16 %v163_v13, %v159_v12  ;;  %3132 = vmatprep.subr.bf16.mxu0 %v3131_v9  ;;  %v167_v18 = vld [vmem:[#allocation9 + $0xc8] sm:$0xff]  ;;  %v3137_v20 = vpack.c.bf16 %v162_v17, %v158_v16  ;;  %v166_v22 = vld [vmem:[#allocation9 + $0xc0] sm:$0xff]  ;;  %v157_v58 = vld [vmem:[#allocation9 + $0x78] sm:$0xff] }
  0x75   :  { %v171_v19 = vld [vmem:[#allocation9 + $0xe8] sm:$0xff]  ;;  %v170_v23 = vld [vmem:[#allocation9 + $0xe0] sm:$0xff]  ;;  %v3163_v3 = vpack.c.bf16 %v157_v58, %v153_v56  ;;  %v152_v4 = vld [vmem:[#allocation9 + $0x50] sm:$0xff] }
  0x76   :  { %v3139_v21 = vpack.c.bf16 %v171_v19, %v167_v18  ;;  %v175_v24 = vld [vmem:[#allocation9 + $0x108] sm:$0xff]  ;;  %v3141_v26 = vpack.c.bf16 %v170_v23, %v166_v22  ;;  %v174_v28 = vld [vmem:[#allocation9 + $0x100] sm:$0xff]  ;;  %v156_v5 = vld [vmem:[#allocation9 + $0x70] sm:$0xff] }
  0x77   :  { %3744 = vmatpush1.bf16.msra.mxu1 %v3133_v14  ;;  %3134 = vmatpush1.bf16.msra.mxu0 %v3133_v14  ;;  %v179_v25 = vld [vmem:[#allocation9 + $0x128] sm:$0xff]  ;;  %v178_v29 = vld [vmem:[#allocation9 + $0x120] sm:$0xff]  ;;  %v161_v6 = vld [vmem:[#allocation9 + $0x98] sm:$0xff] }
  0x78   :  { %3737 = vmatprep.subr.bf16.mxu1 %v3135_v15  ;;  %3136 = vmatprep.subr.bf16.mxu0 %v3135_v15  ;;  %v3143_v27 = vpack.c.bf16 %v179_v25, %v175_v24  ;;  %v183_v30 = vld [vmem:[#allocation9 + $0x148] sm:$0xff]  ;;  %v3145_v32 = vpack.c.bf16 %v178_v29, %v174_v28  ;;  %v182_v34 = vld [vmem:[#allocation9 + $0x140] sm:$0xff]  ;;  %v165_v8 = vld [vmem:[#allocation9 + $0xb8] sm:$0xff]  ;;  %v3165_v15 = vpack.c.bf16 %v156_v5, %v152_v4 }
  0x79   :  { %v187_v31 = vld [vmem:[#allocation9 + $0x168] sm:$0xff]  ;;  %v186_v35 = vld [vmem:[#allocation9 + $0x160] sm:$0xff]  ;;  %v3167_v17 = vpack.c.bf16 %v165_v8, %v161_v6  ;;  %v160_v18 = vld [vmem:[#allocation9 + $0x90] sm:$0xff] }
  0x7a   :  { %v3147_v33 = vpack.c.bf16 %v187_v31, %v183_v30  ;;  %v191_v36 = vld [vmem:[#allocation9 + $0x188] sm:$0xff]  ;;  %v3149_v38 = vpack.c.bf16 %v186_v35, %v182_v34  ;;  %v190_v40 = vld [vmem:[#allocation9 + $0x180] sm:$0xff]  ;;  %v164_v19 = vld [vmem:[#allocation9 + $0xb0] sm:$0xff] }
  0x7b   :  { %3745 = vmatpush1.bf16.msra.mxu1 %v3137_v20  ;;  %3138 = vmatpush1.bf16.msra.mxu0 %v3137_v20  ;;  %v195_v37 = vld [vmem:[#allocation9 + $0x1a8] sm:$0xff]  ;;  %v194_v41 = vld [vmem:[#allocation9 + $0x1a0] sm:$0xff]  ;;  %v169_v20 = vld [vmem:[#allocation9 + $0xd8] sm:$0xff]  ;;  %v3169_v29 = vpack.c.bf16 %v164_v19, %v160_v18 }
  0x7c   :  { %3738 = vmatprep.subr.bf16.mxu1 %v3139_v21  ;;  %3140 = vmatprep.subr.bf16.mxu0 %v3139_v21  ;;  %v3151_v39 = vpack.c.bf16 %v195_v37, %v191_v36  ;;  %v199_v42 = vld [vmem:[#allocation9 + $0x1c8] sm:$0xff]  ;;  %v3153_v44 = vpack.c.bf16 %v194_v41, %v190_v40  ;;  %v198_v46 = vld [vmem:[#allocation9 + $0x1c0] sm:$0xff]  ;;  %v173_v22 = vld [vmem:[#allocation9 + $0xf8] sm:$0xff] }
  0x7d   :  { %v203_v43 = vld [vmem:[#allocation9 + $0x1e8] sm:$0xff]  ;;  %v202_v47 = vld [vmem:[#allocation9 + $0x1e0] sm:$0xff]  ;;  %v4549_v28 = vld [vmem:[#allocation6 + $0x50] sm:$0xff]  ;;  %v3171_v31 = vpack.c.bf16 %v173_v22, %v169_v20 }
  0x7e   :  { %v3155_v45 = vpack.c.bf16 %v203_v43, %v199_v42  ;;  %v615_v50 = vld [vmem:[#allocation11 + $0x8] sm:$0xff]  ;;  %v3157_v52 = vpack.c.bf16 %v202_v47, %v198_v46  ;;  %v614_v59 = vld [vmem:[#allocation11] sm:$0xff]  ;;  %v4551_v30 = vld [vmem:[#allocation6 + $0x10] sm:$0xff] }
  0x7f   :  { %3746 = vmatpush1.bf16.msra.mxu1 %v3141_v26  ;;  %3142 = vmatpush1.bf16.msra.mxu0 %v3141_v26  ;;  %v619_v51 = vld [vmem:[#allocation11 + $0x28] sm:$0xff]  ;;  %v618_v60 = vld [vmem:[#allocation11 + $0x20] sm:$0xff]  ;;  %v177_v34 = vld [vmem:[#allocation9 + $0x118] sm:$0xff] }
  0x80   :  { %3739 = vmatprep.subr.bf16.mxu1 %v3143_v27  ;;  %3144 = vmatprep.subr.bf16.mxu0 %v3143_v27  ;;  %v4521_v57 = vpack.c.bf16 %v619_v51, %v615_v50  ;;  %v623_v61 = vld [vmem:[#allocation11 + $0x48] sm:$0xff]  ;;  %v4523_v63 = vld [vmem:[#allocation6 + $0x40] sm:$0xff]  ;;  %v4528_v7 = vpack.c.bf16 %v618_v60, %v614_v59  ;;  %v181_v36 = vld [vmem:[#allocation9 + $0x138] sm:$0xff] }
  0x81   :  { %v627_v62 = vld [vmem:[#allocation11 + $0x68] sm:$0xff]  ;;  %v4525_v2 = vld [vmem:[#allocation6] sm:$0xff]  ;;  %v4563_v42 = vld [vmem:[#allocation6 + $0x58] sm:$0xff] }
  0x82   :  { %v4530_v9 = vpack.c.bf16 %v627_v62, %v623_v61  ;;  %v622_v10 = vld [vmem:[#allocation11 + $0x40] sm:$0xff]  ;;  %v631_v12 = vld [vmem:[#allocation11 + $0x88] sm:$0xff]  ;;  %v176_v46 = vld [vmem:[#allocation9 + $0x110] sm:$0xff] }
  0x83   :  { %3747 = vmatpush1.bf16.msra.mxu1 %v3145_v32  ;;  %3146 = vmatpush1.bf16.msra.mxu0 %v3145_v32  ;;  %v626_v11 = vld [vmem:[#allocation11 + $0x60] sm:$0xff]  ;;  %v635_v13 = vld [vmem:[#allocation11 + $0xa8] sm:$0xff]  ;;  %v168_v32 = vld [vmem:[#allocation9 + $0xd0] sm:$0xff] }
  0x84   :  { %3740 = vmatprep.subr.bf16.mxu1 %v3147_v33  ;;  %3148 = vmatprep.subr.bf16.mxu0 %v3147_v33  ;;  %v4535_v14 = vld [vmem:[#allocation6 + $0x48] sm:$0xff]  ;;  %v4540_v21 = vpack.c.bf16 %v626_v11, %v622_v10  ;;  %v4544_v23 = vpack.c.bf16 %v635_v13, %v631_v12  ;;  %v630_v24 = vld [vmem:[#allocation11 + $0x80] sm:$0xff]  ;;  %v172_v33 = vld [vmem:[#allocation9 + $0xf0] sm:$0xff] }
  0x85   :  { %v4537_v16 = vld [vmem:[#allocation6 + $0x8] sm:$0xff]  ;;  %v634_v25 = vld [vmem:[#allocation11 + $0xa0] sm:$0xff]  ;;  %v3173_v43 = vpack.c.bf16 %v172_v33, %v168_v32  ;;  %v180_v47 = vld [vmem:[#allocation9 + $0x130] sm:$0xff] }
  0x86   :  { %v639_v26 = vld [vmem:[#allocation11 + $0xc8] sm:$0xff]  ;;  %v4554_v35 = vpack.c.bf16 %v634_v25, %v630_v24  ;;  %v185_v48 = vld [vmem:[#allocation9 + $0x158] sm:$0xff]  ;;  %v4577_v56 = vld [vmem:[#allocation6 + $0x60] sm:$0xff]  ;;  %v3177_v58 = vpack.c.bf16 %v180_v47, %v176_v46 }
  0x87   :  { %3748 = vmatpush1.bf16.msra.mxu1 %v3149_v38  ;;  %3150 = vmatpush1.bf16.msra.mxu0 %v3149_v38  ;;  %v643_v27 = vld [vmem:[#allocation11 + $0xe8] sm:$0xff]  ;;  %v638_v38 = vld [vmem:[#allocation11 + $0xc0] sm:$0xff]  ;;  %v189_v50 = vld [vmem:[#allocation9 + $0x178] sm:$0xff] }
  0x88   :  { %3741 = vmatprep.subr.bf16.mxu1 %v3151_v39  ;;  %3152 = vmatprep.subr.bf16.mxu0 %v3151_v39  ;;  %v4558_v37 = vpack.c.bf16 %v643_v27, %v639_v26  ;;  %v642_v39 = vld [vmem:[#allocation11 + $0xe0] sm:$0xff]  ;;  %v647_v40 = vld [vmem:[#allocation11 + $0x108] sm:$0xff]  ;;  %v3179_v60 = vpack.c.bf16 %v189_v50, %v185_v48  ;;  %v184_v61 = vld [vmem:[#allocation9 + $0x150] sm:$0xff] }
  0x89   :  { %v651_v41 = vld [vmem:[#allocation11 + $0x128] sm:$0xff]  ;;  %v4568_v49 = vpack.c.bf16 %v642_v39, %v638_v38  ;;  %v4579_v59 = vld [vmem:[#allocation6 + $0x20] sm:$0xff]  ;;  %v188_v62 = vld [vmem:[#allocation9 + $0x170] sm:$0xff] }
  0x8a   :  { %v4572_v51 = vpack.c.bf16 %v651_v41, %v647_v40  ;;  %v655_v54 = vld [vmem:[#allocation11 + $0x148] sm:$0xff]  ;;  %v197_v4 = vld [vmem:[#allocation9 + $0x1b8] sm:$0xff]  ;;  %v654_v6 = vld [vmem:[#allocation11 + $0x140] sm:$0xff]  ;;  %v3181_v13 = vpack.c.bf16 %v188_v62, %v184_v61 }
  0x8b   :  { %3749 = vmatpush1.bf16.msra.mxu1 %v3153_v44  ;;  %3154 = vmatpush1.bf16.msra.mxu0 %v3153_v44  ;;  %v4565_v44 = vld [vmem:[#allocation6 + $0x18] sm:$0xff]  ;;  %v659_v55 = vld [vmem:[#allocation11 + $0x168] sm:$0xff]  ;;  %v658_v8 = vld [vmem:[#allocation11 + $0x160] sm:$0xff] }
  0x8c   :  { %3742 = vmatprep.subr.bf16.mxu1 %v3155_v45  ;;  %3156 = vmatprep.subr.bf16.mxu0 %v3155_v45  ;;  %v3175_v45 = vpack.c.bf16 %v181_v36, %v177_v34  ;;  %v4586_v5 = vpack.c.bf16 %v659_v55, %v655_v54  ;;  %v663_v10 = vld [vmem:[#allocation11 + $0x188] sm:$0xff]  ;;  %v192_v18 = vld [vmem:[#allocation9 + $0x190] sm:$0xff]  ;;  %v201_v20 = vld [vmem:[#allocation9 + $0x1d8] sm:$0xff]  ;;  %v4596_v22 = vpack.c.bf16 %v658_v8, %v654_v6 }
  0x8d   :  { %v667_v11 = vld [vmem:[#allocation11 + $0x1a8] sm:$0xff]  ;;  %v196_v19 = vld [vmem:[#allocation9 + $0x1b0] sm:$0xff]  ;;  %v205_v24 = vld [vmem:[#allocation9 + $0x1f8] sm:$0xff] }
  0x8e   :  { %v4591_v12 = vld [vmem:[#allocation6 + $0x68] sm:$0xff]  ;;  %v4600_v25 = vpack.c.bf16 %v667_v11, %v663_v10  ;;  %v662_v26 = vld [vmem:[#allocation11 + $0x180] sm:$0xff]  ;;  %v4605_v32 = vld [vmem:[#allocation6 + $0x70] sm:$0xff]  ;;  %v3185_v33 = vpack.c.bf16 %v196_v19, %v192_v18  ;;  %v3187_v36 = vpack.c.bf16 %v205_v24, %v201_v20 }
  0x8f   :  { %3750 = vmatpush1.bf16.msra.mxu1 %v3157_v52  ;;  %3158 = vmatpush1.bf16.msra.mxu0 %v3157_v52  ;;  %v646_v52 = vld [vmem:[#allocation11 + $0x100] sm:$0xff]  ;;  %v4607_v34 = vld [vmem:[#allocation6 + $0x30] sm:$0xff]  ;;  %v617_v40 = vld [vmem:[#allocation11 + $0x18] sm:$0xff] }
  0x90   :  { %3160 = vmatprep.subr.bf16.mxu1 %v3159_v53  ;;  %3192 = vmatprep.subr.bf16.mxu0 %v4521_v57  ;;  %v650_v53 = vld [vmem:[#allocation11 + $0x120] sm:$0xff]  ;;  %v200_v38 = vld [vmem:[#allocation9 + $0x1d0] sm:$0xff]  ;;  %v4619_v48 = vld [vmem:[#allocation6 + $0x78] sm:$0xff] }
  0x91   :  { %v666_v27 = vld [vmem:[#allocation11 + $0x1a0] sm:$0xff]  ;;  %v204_v39 = vld [vmem:[#allocation9 + $0x1f0] sm:$0xff]  ;;  %v629_v61 = vld [vmem:[#allocation11 + $0x78] sm:$0xff] }
  0x92   :  { %341 = vmatmul.mubr.f32.vlgmr.msra.gmra.mrb[0].mxu1 %v4523_v63  ;;  %293 = vmatmul.mubr.f32.vlgmr.msra.gmra.mrb[0].mxu0 %v4525_v2  ;;  %v4610_v41 = vpack.c.bf16 %v666_v27, %v662_v26  ;;  %v670_v46 = vld [vmem:[#allocation11 + $0x1c0] sm:$0xff]  ;;  %v3189_v50 = vpack.c.bf16 %v204_v39, %v200_v38  ;;  %v616_v54 = vld [vmem:[#allocation11 + $0x10] sm:$0xff]  ;;  %v633_v8 = vld [vmem:[#allocation11 + $0x98] sm:$0xff] }
  0x93   :  { %3162 = vmatpush1.bf16.msra.mxu1 %v3161_v1  ;;  %346 = vmatprep.mubr.f32.mxu1 %v5384_v0  ;;  %v193_v1 = vld [vmem:[#allocation9 + $0x198] sm:$0xff]  ;;  %v674_v47 = vld [vmem:[#allocation11 + $0x1e0] sm:$0xff]  ;;  %v620_v55 = vld [vmem:[#allocation11 + $0x30] sm:$0xff] }
  0x94   :  { %3164 = vmatprep.subr.bf16.mxu1 %v3163_v3  ;;  %3194 = vmatpush1.bf16.msra.mxu0 %v4528_v7  ;;  %v4582_v3 = vpack.c.bf16 %v650_v53, %v646_v52  ;;  %v4621_v52 = vld [vmem:[#allocation6 + $0x38] sm:$0xff]  ;;  %v4633_v62 = vpack.c.bf16 %v620_v55, %v616_v54  ;;  %v628_v6 = vld [vmem:[#allocation11 + $0x70] sm:$0xff]  ;;  %v4640_v11 = vld [vmem:[#allocation14] sm:$0xff] }
  0x95   :  { %298 = vmatprep.mubr.f32.mxu0 %v5384_v0  ;;  %3196 = vmatprep.subr.bf16.mxu0 %v4530_v9  ;;  %v637_v10 = vld [vmem:[#allocation11 + $0xb8] sm:$0xff]  ;;  %v632_v18 = vld [vmem:[#allocation11 + $0x90] sm:$0xff] }
  0x96   :  { %347 = vmatmul.mubr.f32.gmra.mrb[2].mxu1 %v4535_v14  ;;  %299 = vmatmul.mubr.f32.gmra.mrb[2].mxu0 %v4537_v16  ;;  %v636_v19 = vld [vmem:[#allocation11 + $0xb0] sm:$0xff]  ;;  %v641_v24 = vld [vmem:[#allocation11 + $0xd8] sm:$0xff] }
  0x97   :  { %3166 = vmatpush1.bf16.msra.mxu1 %v3165_v15  ;;  %352 = vmatprep.mubr.f32.mxu1 %v5384_v0  ;;  %v4593_v15 = vld [vmem:[#allocation6 + $0x28] sm:$0xff]  ;;  %v4660_v26 = vpack.c.bf16 %v636_v19, %v632_v18  ;;  %v648_v39 = vld [vmem:[#allocation11 + $0x110] sm:$0xff]  ;;  %v665_v55 = vld [vmem:[#allocation11 + $0x198] sm:$0xff] }
  0x98   :  { %3168 = vmatprep.subr.bf16.mxu1 %v3167_v17  ;;  %3198 = vmatpush1.bf16.msra.mxu0 %v4540_v21  ;;  %v3183_v17 = vpack.c.bf16 %v197_v4, %v193_v1  ;;  %v624_v4 = vld [vmem:[#allocation11 + $0x50] sm:$0xff] }
  0x99   :  { %304 = vmatprep.mubr.f32.mxu0 %v5384_v0  ;;  %3200 = vmatprep.subr.bf16.mxu0 %v4544_v23  ;;  %v4653_v20 = vld [vmem:[#allocation14 + $0x8] sm:$0xff] }
  0x9a   :  { %353 = vmatmul.mubr.f32.gmra.mrb[4].mxu1 %v4549_v28  ;;  %305 = vmatmul.mubr.f32.gmra.mrb[4].mxu0 %v4551_v30  ;;  %v660_v54 = vld [vmem:[#allocation11 + $0x170] sm:$0xff] }
  0x9b   :  { %3170 = vmatpush1.bf16.msra.mxu1 %v3169_v29  ;;  %358 = vmatprep.mubr.f32.mxu1 %v5384_v0  ;;  %v671_v29 = vld [vmem:[#allocation11 + $0x1c8] sm:$0xff]  ;;  %v672_v19 = vld [vmem:[#allocation11 + $0x1d0] sm:$0xff] }
  0x9c   :  { %3172 = vmatprep.subr.bf16.mxu1 %v3171_v31  ;;  %3202 = vmatpush1.bf16.msra.mxu0 %v4554_v35  ;;  %v675_v31 = vld [vmem:[#allocation11 + $0x1e8] sm:$0xff] }
  0x9d   :  { %310 = vmatprep.mubr.f32.mxu0 %v5384_v0  ;;  %3204 = vmatprep.subr.bf16.mxu0 %v4558_v37 }
  0x9e   :  { %359 = vmatmul.mubr.f32.gmra.mrb[6].mxu1 %v4563_v42  ;;  %311 = vmatmul.mubr.f32.gmra.mrb[6].mxu0 %v4565_v44 }
  0x9f   :  { %3174 = vmatpush1.bf16.msra.mxu1 %v3173_v43  ;;  %364 = vmatprep.mubr.f32.mxu1 %v5384_v0  ;;  %v621_v43 = vld [vmem:[#allocation11 + $0x38] sm:$0xff] }
  0xa0   :  { %3176 = vmatprep.subr.bf16.mxu1 %v3175_v45  ;;  %3206 = vmatpush1.bf16.msra.mxu0 %v4568_v49  ;;  %v4614_v45 = vpack.c.bf16 %v675_v31, %v671_v29  ;;  %v4623_v53 = vpack.c.bf16 %v621_v43, %v617_v40  ;;  %v640_v29 = vld [vmem:[#allocation11 + $0xd0] sm:$0xff]  ;;  %v657_v43 = vld [vmem:[#allocation11 + $0x158] sm:$0xff] }
  0xa1   :  { %316 = vmatprep.mubr.f32.mxu0 %v5384_v0  ;;  %3208 = vmatprep.subr.bf16.mxu0 %v4572_v51  ;;  %v644_v31 = vld [vmem:[#allocation11 + $0xf0] sm:$0xff] }
  0xa2   :  { %365 = vmatmul.mubr.f32.gmra.mrb[8].mxu1 %v4577_v56  ;;  %317 = vmatmul.mubr.f32.gmra.mrb[8].mxu0 %v4579_v59  ;;  %v652_v40 = vld [vmem:[#allocation11 + $0x130] sm:$0xff] }
  0xa3   :  { %3178 = vmatpush1.bf16.msra.mxu1 %v3177_v58  ;;  %370 = vmatprep.mubr.f32.mxu1 %v5384_v0  ;;  %v4626_v58 = vpack.c.bf16 %v674_v47, %v670_v46  ;;  %v661_v46 = vld [vmem:[#allocation11 + $0x178] sm:$0xff] }
  0xa4   :  { %3180 = vmatprep.subr.bf16.mxu1 %v3179_v60  ;;  %3210 = vmatpush1.bf16.msra.mxu0 %v4582_v3  ;;  %v625_v60 = vld [vmem:[#allocation11 + $0x58] sm:$0xff]  ;;  %v4685_v47 = vpack.c.bf16 %v661_v46, %v657_v43  ;;  %v208_v46 = vlaneseq }
  0xa5   :  { %322 = vmatprep.mubr.f32.mxu0 %v5384_v0  ;;  %3212 = vmatprep.subr.bf16.mxu0 %v4586_v5  ;;  %v4636_v1 = vpack.c.bf16 %v629_v61, %v625_v60  ;;  %v669_v60 = vld [vmem:[#allocation11 + $0x1b8] sm:$0xff] }
  0xa6   :  { %371 = vmatmul.mubr.f32.gmra.mrb[10].mxu1 %v4591_v12  ;;  %323 = vmatmul.mubr.f32.gmra.mrb[10].mxu0 %v4593_v15  ;;  %v4695_v61 = vpack.c.bf16 %v669_v60, %v665_v55  ;;  %v206_v55 = vld [vmem:[#allocation12] sm:$0xf] }
  0xa7   :  { %3182 = vmatpush1.bf16.msra.mxu1 %v3181_v13  ;;  %376 = vmatprep.mubr.f32.mxu1 %v5384_v0  ;;  %v4646_v13 = vpack.c.bf16 %v628_v6, %v624_v4  ;;  %v664_v4 = vld [vmem:[#allocation11 + $0x190] sm:$0xff] }
  0xa8   :  { %3184 = vmatprep.subr.bf16.mxu1 %v3183_v17  ;;  %3214 = vmatpush1.bf16.msra.mxu0 %v4596_v22  ;;  %v4649_v17 = vpack.c.bf16 %v637_v10, %v633_v8  ;;  %v668_v6 = vld [vmem:[#allocation11 + $0x1b0] sm:$0xff]  ;;  %v673_v8 = vld [vmem:[#allocation11 + $0x1d8] sm:$0xff] }
  0xa9   :  { %328 = vmatprep.mubr.f32.mxu0 %v5384_v0  ;;  %3216 = vmatprep.subr.bf16.mxu0 %v4600_v25  ;;  %v677_v10 = vld [vmem:[#allocation11 + $0x1f8] sm:$0xff] }
  0xaa   :  { %377 = vmatmul.mubr.f32.gmra.mrb[12].mxu1 %v4605_v32  ;;  %329 = vmatmul.mubr.f32.gmra.mrb[12].mxu0 %v4607_v34  ;;  %v4705_v18 = vpack.c.bf16 %v677_v10, %v673_v8 }
  0xab   :  { %3186 = vmatpush1.bf16.msra.mxu1 %v3185_v33  ;;  %382 = vmatprep.mubr.f32.mxu1 %v5384_v0  ;;  %v649_v33 = vld [vmem:[#allocation11 + $0x118] sm:$0xff] }
  0xac   :  { %3188 = vmatprep.subr.bf16.mxu1 %v3187_v36  ;;  %3218 = vmatpush1.bf16.msra.mxu0 %v4610_v41  ;;  %v653_v36 = vld [vmem:[#allocation11 + $0x138] sm:$0xff] }
  0xad   :  { %334 = vmatprep.mubr.f32.mxu0 %v5384_v0  ;;  %3220 = vmatprep.subr.bf16.mxu0 %v4614_v45  ;;  %v4675_v38 = vpack.c.bf16 %v653_v36, %v649_v33 }
  0xae   :  { %383 = vmatmul.mubr.f32.gmra.mrb[14].mxu1 %v4619_v48  ;;  %335 = vmatmul.mubr.f32.gmra.mrb[14].mxu0 %v4621_v52 }
  0xaf   :  { %3190 = vmatpush1.bf16.msra.mxu1 %v3189_v50  ;;  %453 = vmatprep.mubr.f32.mxu1 %v5384_v0  ;;  %v656_v50 = vld [vmem:[#allocation11 + $0x150] sm:$0xff] }
  0xb0   :  { %3224 = vmatprep.subr.bf16.mxu1 %v4623_v53  ;;  %3222 = vmatpush1.bf16.msra.mxu0 %v4626_v58 }
  0xb1   :  { %754 = vmatprep.mubr.f32.mxu0 %v5384_v0  ;;  %3256 = vmatprep.subr.bf16.mxu0 %v4521_v57 }
  0xb2   :  { %454 = vmatmul.mubr.f32.vlgmr.msra.gmra.mrb[16].mxu1 %v4525_v2  ;;  %v645_v2 = vld [vmem:[#allocation11 + $0xf8] sm:$0xff] }
  0xb3   :  { %3226 = vmatpush1.bf16.msra.mxu1 %v4633_v62  ;;  %459 = vmatprep.mubr.f32.mxu1 %v5384_v0  ;;  %v4664_v27 = vpack.c.bf16 %v645_v2, %v641_v24  ;;  %v676_v24 = vld [vmem:[#allocation11 + $0x1f0] sm:$0xff] }
  0xb4   :  { %3228 = vmatprep.subr.bf16.mxu1 %v4636_v1  ;;  %755 = vmatmul.mubr.f32.vlgmr.msra.gmra.mrb[0].mxu0 %v4640_v11 }
  0xb5   :  { %760 = vmatprep.mubr.f32.mxu0 %v5384_v0  ;;  %3258 = vmatpush1.bf16.msra.mxu0 %v4528_v7 }
  0xb6   :  { %460 = vmatmul.mubr.f32.gmra.mrb[18].mxu1 %v4537_v16  ;;  %3260 = vmatprep.subr.bf16.mxu0 %v4530_v9  ;;  %v4672_v16 = vpack.c.bf16 %v644_v31, %v640_v29 }
  0xb7   :  { %465 = vmatprep.mubr.f32.mxu1 %v5384_v0  ;;  %3230 = vmatpush1.bf16.msra.mxu1 %v4646_v13 }
  0xb8   :  { %3232 = vmatprep.subr.bf16.mxu1 %v4649_v17  ;;  %761 = vmatmul.mubr.f32.gmra.mrb[2].mxu0 %v4653_v20 }
  0xb9   :  { %3262 = vmatpush1.bf16.msra.mxu0 %v4540_v21  ;;  %975 = vmatprep.mubr.f32.mxu0 %v5384_v0 }
  0xba   :  { %466 = vmatmul.mubr.f32.gmra.mrb[20].mxu1 %v4551_v30  ;;  %3264 = vmatprep.subr.bf16.mxu0 %v4544_v23  ;;  %v4682_v30 = vpack.c.bf16 %v652_v40, %v648_v39 }
  0xbb   :  { %471 = vmatprep.mubr.f32.mxu1 %v5384_v0  ;;  %3234 = vmatpush1.bf16.msra.mxu1 %v4660_v26 }
  0xbc   :  { %3236 = vmatprep.subr.bf16.mxu1 %v4664_v27 }
  0xbd   :  { %3266 = vmatpush1.bf16.msra.mxu0 %v4554_v35 }
  0xbe   :  { %472 = vmatmul.mubr.f32.gmra.mrb[22].mxu1 %v4565_v44  ;;  %3268 = vmatprep.subr.bf16.mxu0 %v4558_v37  ;;  %v4692_v44 = vpack.c.bf16 %v660_v54, %v656_v50  ;;  %v4791_v50 = vshrl.u32 %v208_v46, 7 }
  0xbf   :  { %477 = vmatprep.mubr.f32.mxu1 %v5384_v0  ;;  %3238 = vmatpush1.bf16.msra.mxu1 %v4672_v16 }
  0xc0   :  { %3240 = vmatprep.subr.bf16.mxu1 %v4675_v38  ;;  %5403 = vst [vmem:[#allocation36_spill] sm:$0xff] %v4791_v50  ;;  %v214_v54 = vsub.s32 1, %v4791_v50  ;;  %v210_v60 = vsub.s32 0, %v4791_v50 }
  0xc1   :  { %3270 = vmatpush1.bf16.msra.mxu0 %v4568_v49 }
  0xc2   :  { %478 = vmatmul.mubr.f32.gmra.mrb[24].mxu1 %v4579_v59  ;;  %3272 = vmatprep.subr.bf16.mxu0 %v4572_v51  ;;  %v4702_v59 = vpack.c.bf16 %v668_v6, %v664_v4  ;;  %v4795_v4 = vrot.slane %v206_v55, %v214_v54  ;;  %v4797_v6 = vrot.slane %v206_v55, %v210_v60  ;;  %v218_v54 = vsub.s32 2, %v4791_v50 }
  0xc3   :  { %483 = vmatprep.mubr.f32.mxu1 %v5384_v0  ;;  %3242 = vmatpush1.bf16.msra.mxu1 %v4682_v30  ;;  %v222_v60 = vsub.s32 3, %v4791_v50 }
  0xc4   :  { %3244 = vmatprep.subr.bf16.mxu1 %v4685_v47 }
  0xc5   :  { %3274 = vmatpush1.bf16.msra.mxu0 %v4582_v3 }
  0xc6   :  { %484 = vmatmul.mubr.f32.gmra.mrb[26].mxu1 %v4593_v15  ;;  %3276 = vmatprep.subr.bf16.mxu0 %v4586_v5  ;;  %v4712_v15 = vpack.c.bf16 %v676_v24, %v672_v19 }
  0xc7   :  { %489 = vmatprep.mubr.f32.mxu1 %v5384_v0  ;;  %3246 = vmatpush1.bf16.msra.mxu1 %v4692_v44 }
  0xc8   :  { %3248 = vmatprep.subr.bf16.mxu1 %v4695_v61 }
  0xc9   :  { %3278 = vmatpush1.bf16.msra.mxu0 %v4596_v22 }
  0xca   :  { %490 = vmatmul.mubr.f32.gmra.mrb[28].mxu1 %v4607_v34  ;;  %3280 = vmatprep.subr.bf16.mxu0 %v4600_v25 }
  0xcb   :  { %495 = vmatprep.mubr.f32.mxu1 %v5384_v0  ;;  %3250 = vmatpush1.bf16.msra.mxu1 %v4702_v59 }
  0xcc   :  { %3252 = vmatprep.subr.bf16.mxu1 %v4705_v18 }
  0xcd   :  { %3282 = vmatpush1.bf16.msra.mxu0 %v4610_v41 }
  0xce   :  { %496 = vmatmul.mubr.f32.gmra.mrb[30].mxu1 %v4621_v52  ;;  %3284 = vmatprep.subr.bf16.mxu0 %v4614_v45 }
  0xcf   :  { %501 = vmatprep.mubr.f32.mxu1 %v5384_v0  ;;  %3254 = vmatpush1.bf16.msra.mxu1 %v4712_v15 }
  0xd0   :  { %3288 = vmatprep.subr.bf16.mxu1 %v4623_v53 }
  0xd1   :  { %3286 = vmatpush1.bf16.msra.mxu0 %v4626_v58 }
  0xd2   :  { %502 = vmatmul.mubr.f32.gmra.mrb[32].mxu1 %v4523_v63  ;;  %3320 = vmatprep.subr.bf16.mxu0 %v4521_v57 }
  0xd3   :  { %507 = vmatprep.mubr.f32.mxu1 %v5384_v0 }
  0xd6   :  { %508 = vmatmul.mubr.f32.gmra.mrb[34].mxu1 %v4535_v14 }
  0xd7   :  { %513 = vmatprep.mubr.f32.mxu1 %v5384_v0 }
  0xda   :  { %514 = vmatmul.mubr.f32.gmra.mrb[36].mxu1 %v4549_v28 }
  0xdb   :  { %519 = vmatprep.mubr.f32.mxu1 %v5384_v0 }
  0xde   :  { %520 = vmatmul.mubr.f32.gmra.mrb[38].mxu1 %v4563_v42 }
  0xdf   :  { %525 = vmatprep.mubr.f32.mxu1 %v5384_v0 }
  0xe2   :  { %526 = vmatmul.mubr.f32.gmra.mrb[40].mxu1 %v4577_v56 }
  0xe3   :  { %531 = vmatprep.mubr.f32.mxu1 %v5384_v0 }
  0xe6   :  { %532 = vmatmul.mubr.f32.gmra.mrb[42].mxu1 %v4591_v12 }
  0xe7   :  { %537 = vmatprep.mubr.f32.mxu1 %v5384_v0 }
  0xea   :  { %538 = vmatmul.mubr.f32.gmra.mrb[44].mxu1 %v4605_v32 }
  0xeb   :  { %543 = vmatprep.mubr.f32.mxu1 %v5384_v0 }
  0xee   :  { %544 = vmatmul.mubr.f32.gmra.mrb[46].mxu1 %v4619_v48 }
  0xef   :  { %831 = vmatprep.mubr.f32.mxu1 %v5384_v0 }
  0xf2   :  { %832 = vmatmul.mubr.f32.vlgmr.msra.gmra.mrb[16].mxu1 %v4640_v11 }
  0xf3   :  { %837 = vmatprep.mubr.f32.mxu1 %v5384_v0  ;;  %3290 = vmatpush1.bf16.msra.mxu1 %v4633_v62 }
  0xf4   :  { %3292 = vmatprep.subr.bf16.mxu1 %v4636_v1 }
  0xf6   :  { %838 = vmatmul.mubr.f32.gmra.mrb[18].mxu1 %v4653_v20 }
  0xf7   :  { %3294 = vmatpush1.bf16.msra.mxu1 %v4646_v13  ;;  %1052 = vmatprep.mubr.f32.mxu1 %v5384_v0 }
  0xf8   :  { %3296 = vmatprep.subr.bf16.mxu1 %v4649_v17 }
  0xfb   :  { %3298 = vmatpush1.bf16.msra.mxu1 %v4660_v26 }
  0xfc   :  { %3300 = vmatprep.subr.bf16.mxu1 %v4664_v27 }
  0xff   :  { %3302 = vmatpush1.bf16.msra.mxu1 %v4672_v16 }
 0x100   :  { %3304 = vmatprep.subr.bf16.mxu1 %v4675_v38 }
 0x103   :  { %3306 = vmatpush1.bf16.msra.mxu1 %v4682_v30 }
 0x104   :  { %3308 = vmatprep.subr.bf16.mxu1 %v4685_v47 }
 0x107   :  { %3310 = vmatpush1.bf16.msra.mxu1 %v4692_v44 }
 0x108   :  { %3312 = vmatprep.subr.bf16.mxu1 %v4695_v61 }
 0x10b   :  { %3314 = vmatpush1.bf16.msra.mxu1 %v4702_v59 }
 0x10c   :  { %3316 = vmatprep.subr.bf16.mxu1 %v4705_v18 }
 0x10f   :  { %3318 = vmatpush1.bf16.msra.mxu1 %v4712_v15 }
 0x110   :  { %3352 = vmatprep.subr.bf16.mxu1 %v4623_v53 }
 0x165   :  { %v4759_v63 = vpop.f32.mrb[0].mxu1 }
 0x166   :  { %v4761_v14 = vpop.f32.mrb[1].mxu1 }
 0x169   :  { %v4763_v28 = vpop.f32.mrb[2].mxu1 }
 0x16a   :  { %v4765_v42 = vpop.f32.mrb[3].mxu1 }
 0x16d   :  { %v4767_v56 = vpop.f32.mrb[4].mxu1 }
 0x16e   :  { %v4769_v12 = vpop.f32.mrb[5].mxu1 }
 0x171   :  { %v4771_v32 = vpop.f32.mrb[6].mxu1 }
 0x172   :  { %v4773_v34 = vpop.f32.mrb[7].mxu1 }
 0x173   :  { %5394 = vst [vmem:[#allocation27_spill] sm:$0xff] %v4773_v34 }
 0x175   :  { %v4775_v48 = vpop.f32.mrb[8].mxu1 }
 0x176   :  { %5395 = vst [vmem:[#allocation28_spill] sm:$0xff] %v4775_v48  ;;  %v4777_v52 = vpop.f32.mrb[9].mxu1 }
 0x177   :  { %5396 = vst [vmem:[#allocation29_spill] sm:$0xff] %v4777_v52 }
 0x179   :  { %v4779_v11 = vpop.f32.mrb[10].mxu1 }
 0x17a   :  { %5397 = vst [vmem:[#allocation30_spill] sm:$0xff] %v4779_v11  ;;  %v4781_v20 = vpop.f32.mrb[11].mxu1 }
 0x17b   :  { %5398 = vst [vmem:[#allocation31_spill] sm:$0xff] %v4781_v20 }
 0x17d   :  { %v4783_v2 = vpop.f32.mrb[12].mxu1 }
 0x17e   :  { %5399 = vst [vmem:[#allocation32_spill] sm:$0xff] %v4783_v2  ;;  %v4785_v29 = vpop.f32.mrb[13].mxu1  ;;  %v4805_v2 = vrot.slane %v206_v55, %v218_v54 }
 0x17f   :  { %5400 = vst [vmem:[#allocation33_spill] sm:$0xff] %v4785_v29 }
 0x181   :  { %v4787_v31 = vpop.f32.mrb[14].mxu1 }
 0x182   :  { %5401 = vst [vmem:[#allocation34_spill] sm:$0xff] %v4787_v31  ;;  %v4789_v33 = vpop.f32.mrb[15].mxu1 }
 0x183   :  { %5402 = vst [vmem:[#allocation35_spill] sm:$0xff] %v4789_v33 }
 0x187   :  { %v756_v36 = vpop.f32.mrb[0].mxu0 }
 0x188   :  { %v758_v39 = vpop.f32.mrb[1].mxu0  ;;  %v3751_v10 = vadd.f32 %v756_v36, %v4797_v6 }
 0x189   :  { %v3752_v8 = vadd.f32 %v758_v39, %v4795_v4 }
 0x18a   :  { %v2990_v0 = vmul.f32 -1.442695, %v3751_v10 }
 0x18b   :  { %v762_v40 = vpop.f32.mrb[2].mxu0  ;;  %v2991_v19 = vmul.f32 -1.442695, %v3752_v8  ;;  %v4807_v8 = vrot.slane %v206_v55, %v222_v60 }
 0x18c   :  { %v764_v43 = vpop.f32.mrb[3].mxu0  ;;  %v3753_v46 = vadd.f32 %v762_v40, %v4797_v6 }
 0x18d   :  { %v3754_v24 = vadd.f32 %v764_v43, %v4795_v4  ;;  %3895 = vpow2.f32 %v2991_v19 }
 0x18e   :  { %3897 = vpow2.f32 %v2990_v0  ;;  %v2993_v31 = vmul.f32 -1.442695, %v3753_v46 }
 0x18f   :  { %v2994_v33 = vmul.f32 -1.442695, %v3754_v24 }
 0x191   :  { %3899 = vpow2.f32 %v2994_v33 }
 0x192   :  { %3901 = vpow2.f32 %v2993_v31 }
 0x197   :  { %v3896_v29 = vpop.eup %3895 }
 0x198   :  { %v3898_v39 = vpop.eup %3897  ;;  %v871_v36 = vadd.f32 1.0, %v3896_v29 }
 0x199   :  { %v870_v10 = vadd.f32 1.0, %v3898_v39 }
 0x19a   :  { %3903 = vrcp.f32 %v871_v36 }
 0x19b   :  { %v3900_v43 = vpop.eup %3899  ;;  %3905 = vrcp.f32 %v870_v10 }
 0x19c   :  { %v3902_v40 = vpop.eup %3901  ;;  %v874_v31 = vadd.f32 1.0, %v3900_v43  ;;  %v122_v43 = vld [vmem:[%s5378_s5] sm:$0xff] }
 0x19d   :  { %v873_v46 = vadd.f32 1.0, %v3902_v40 }
 0x1a4   :  { %v3904_v36 = vpop.eup %3903 }
 0x1a5   :  { %v3906_v10 = vpop.eup %3905 }
 0x1c5   :  { %v833_v19 = vpop.f32.mrb[16].mxu1 }
 0x1c6   :  { %v3799_v0 = vadd.f32 %v833_v19, %v4805_v2  ;;  %v835_v24 = vpop.f32.mrb[17].mxu1 }
 0x1c7   :  { %v3800_v33 = vadd.f32 %v835_v24, %v4807_v8 }
 0x1c8   :  { %v2992_v50 = vmul.f32 -1.442695, %v3799_v0  ;;  %v890_v0 = vmul.f32 %v3904_v36, %v122_v43 }
 0x1c9   :  { %3907 = vtanh.f32 %v3800_v33  ;;  %v839_v54 = vpop.f32.mrb[18].mxu1 }
 0x1ca   :  { %3909 = vpow2.f32 %v2992_v50  ;;  %v3801_v29 = vadd.f32 %v839_v54, %v4805_v2  ;;  %v841_v55 = vpop.f32.mrb[19].mxu1 }
 0x1cb   :  { %3911 = vrcp.f32 %v874_v31  ;;  %v3802_v60 = vadd.f32 %v841_v55, %v4807_v8  ;;  %v123_v31 = vld [vmem:[%s5378_s5 + $0x8] sm:$0xff] }
 0x1cc   :  { %3913 = vrcp.f32 %v873_v46  ;;  %v2995_v39 = vmul.f32 -1.442695, %v3801_v29 }
 0x1cd   :  { %3915 = vtanh.f32 %v3802_v60 }
 0x1ce   :  { %3917 = vpow2.f32 %v2995_v39 }
 0x1d3   :  { %v3908_v40 = vpop.eup %3907 }
 0x1d4   :  { %v3910_v19 = vpop.eup %3909  ;;  %v892_v50 = vmul.f32 %v3908_v40, %v3906_v10 }
 0x1d5   :  { %v3912_v24 = vpop.eup %3911  ;;  %v872_v33 = vadd.f32 1.0, %v3910_v19 }
 0x1d6   :  { %v3914_v46 = vpop.eup %3913  ;;  %v4819_v54 = vadd.f32 %v892_v50, %v890_v0  ;;  %v891_v60 = vmul.f32 %v3912_v24, %v123_v31  ;;  %v5405_v0 = vmov 0.0  }
 0x1d7   :  { %v3916_v29 = vpop.eup %3915  ;;  %3919 = vrcp.f32 %v872_v33 }
 0x1d8   :  { %v3918_v55 = vpop.eup %3917  ;;  %3921 = vtanh.f32 %v4819_v54  ;;  %v893_v39 = vmul.f32 %v3916_v29, %v3914_v46 }
 0x1d9   :  { %v875_v20 = vadd.f32 1.0, %v3918_v55 }
 0x1da   :  { %v4822_v11 = vadd.f32 %v893_v39, %v891_v60 }
 0x1db   :  { %3923 = vrcp.f32 %v875_v20 }
 0x1dc   :  { %3925 = vtanh.f32 %v4822_v11 }
 0x1e1   :  { %v3920_v36 = vpop.eup %3919 }
 0x1e2   :  { %v3922_v43 = vpop.eup %3921 }
 0x1e3   :  { %v4825_v10 = vmul.f32 %v3922_v43, %v3920_v36 }
 0x1e5   :  { %5404 = vst [vmem:[#allocation37_spill] sm:$0xff] %v4825_v10  ;;  %v3924_v40 = vpop.eup %3923  ;;  %976 = vmatmul.mubr.f32.vlgmr.msra.gmra.mrb[4].mxu0 %v4825_v10  ;;  %1053 = vmatmul.mubr.f32.vlgmr.msra.gmra.mrb[20].mxu1 %v4825_v10 }
 0x1e6   :  { %v3926_v19 = vpop.eup %3925  ;;  %981 = vmatprep.mubr.f32.mxu0 %v5405_v0  ;;  %1058 = vmatprep.mubr.f32.mxu1 %v5405_v0 }
 0x1e7   :  { %v4831_v50 = vmul.f32 %v3926_v19, %v3924_v40  ;;  %3322 = vmatpush1.bf16.msra.mxu0 %v4528_v7  ;;  %3354 = vmatpush1.bf16.msra.mxu1 %v4633_v62 }
 0x1e8   :  { %3324 = vmatprep.subr.bf16.mxu0 %v4530_v9  ;;  %3356 = vmatprep.subr.bf16.mxu1 %v4636_v1 }
 0x1e9   :  { %5406 = vst [vmem:[#allocation38_spill] sm:$0xff] %v4831_v50  ;;  %982 = vmatmul.mubr.f32.gmra.mrb[6].mxu0 %v4831_v50  ;;  %1059 = vmatmul.mubr.f32.gmra.mrb[22].mxu1 %v4831_v50 }
 0x1ea   :  { %1197 = vmatprep.mubr.f32.mxu0 %v5405_v0  ;;  %1274 = vmatprep.mubr.f32.mxu1 %v5405_v0 }
 0x1eb   :  { %3326 = vmatpush1.bf16.msra.mxu0 %v4540_v21  ;;  %3358 = vmatpush1.bf16.msra.mxu1 %v4646_v13 }
 0x1ec   :  { %3328 = vmatprep.subr.bf16.mxu0 %v4544_v23  ;;  %3360 = vmatprep.subr.bf16.mxu1 %v4649_v17 }
 0x1ef   :  { %3330 = vmatpush1.bf16.msra.mxu0 %v4554_v35  ;;  %3362 = vmatpush1.bf16.msra.mxu1 %v4660_v26 }
 0x1f0   :  { %3332 = vmatprep.subr.bf16.mxu0 %v4558_v37  ;;  %3364 = vmatprep.subr.bf16.mxu1 %v4664_v27 }
 0x1f3   :  { %3334 = vmatpush1.bf16.msra.mxu0 %v4568_v49  ;;  %3366 = vmatpush1.bf16.msra.mxu1 %v4672_v16 }
 0x1f4   :  { %3336 = vmatprep.subr.bf16.mxu0 %v4572_v51  ;;  %3368 = vmatprep.subr.bf16.mxu1 %v4675_v38 }
 0x1f7   :  { %3338 = vmatpush1.bf16.msra.mxu0 %v4582_v3  ;;  %3370 = vmatpush1.bf16.msra.mxu1 %v4682_v30 }
 0x1f8   :  { %3340 = vmatprep.subr.bf16.mxu0 %v4586_v5  ;;  %3372 = vmatprep.subr.bf16.mxu1 %v4685_v47 }
 0x1fb   :  { %3342 = vmatpush1.bf16.msra.mxu0 %v4596_v22  ;;  %3374 = vmatpush1.bf16.msra.mxu1 %v4692_v44 }
 0x1fc   :  { %3344 = vmatprep.subr.bf16.mxu0 %v4600_v25  ;;  %3376 = vmatprep.subr.bf16.mxu1 %v4695_v61 }
 0x1ff   :  { %3346 = vmatpush1.bf16.msra.mxu0 %v4610_v41  ;;  %3378 = vmatpush1.bf16.msra.mxu1 %v4702_v59 }
 0x200   :  { %3348 = vmatprep.subr.bf16.mxu0 %v4614_v45  ;;  %3380 = vmatprep.subr.bf16.mxu1 %v4705_v18 }
 0x203   :  { %3350 = vmatpush1.bf16.msra.mxu0 %v4626_v58  ;;  %3382 = vmatpush1.bf16.msra.mxu1 %v4712_v15 }
 0x204   :  { %3384 = vmatprep.subr.bf16.mxu0 %v4521_v57  ;;  %3416 = vmatprep.subr.bf16.mxu1 %v4623_v53 }
 0x2b8   :  { %v977_v20 = vpop.f32.mrb[4].mxu0  ;;  %v1054_v24 = vpop.f32.mrb[20].mxu1 }
 0x2b9   :  { %v3755_v31 = vadd.f32 %v977_v20, %v4797_v6  ;;  %v979_v33 = vpop.f32.mrb[5].mxu0  ;;  %v1056_v46 = vpop.f32.mrb[21].mxu1  ;;  %v3803_v20 = vadd.f32 %v1054_v24, %v4805_v2 }
 0x2ba   :  { %v3756_v29 = vadd.f32 %v979_v33, %v4795_v4  ;;  %v3804_v33 = vadd.f32 %v1056_v46, %v4807_v8 }
 0x2bb   :  { %v2996_v55 = vmul.f32 -1.442695, %v3755_v31  ;;  %v2998_v31 = vmul.f32 -1.442695, %v3803_v20 }
 0x2bc   :  { %v2997_v60 = vmul.f32 -1.442695, %v3756_v29  ;;  %v983_v39 = vpop.f32.mrb[6].mxu0  ;;  %v1060_v36 = vpop.f32.mrb[22].mxu1 }
 0x2bd   :  { %3927 = vpow2.f32 %v2996_v55  ;;  %v3757_v43 = vadd.f32 %v983_v39, %v4797_v6  ;;  %v985_v40 = vpop.f32.mrb[7].mxu0  ;;  %v1062_v19 = vpop.f32.mrb[23].mxu1  ;;  %v3805_v29 = vadd.f32 %v1060_v36, %v4805_v2 }
 0x2be   :  { %v3758_v50 = vadd.f32 %v985_v40, %v4795_v4  ;;  %3929 = vpow2.f32 %v2997_v60  ;;  %v3806_v55 = vadd.f32 %v1062_v19, %v4807_v8 }
 0x2bf   :  { %v2999_v10 = vmul.f32 -1.442695, %v3757_v43  ;;  %v3001_v40 = vmul.f32 -1.442695, %v3805_v29 }
 0x2c0   :  { %v3000_v52 = vmul.f32 -1.442695, %v3758_v50 }
 0x2c1   :  { %3931 = vpow2.f32 %v2999_v10 }
 0x2c2   :  { %3933 = vpow2.f32 %v3000_v52 }
 0x2c3   :  { %3935 = vtanh.f32 %v3804_v33 }
 0x2c4   :  { %3937 = vpow2.f32 %v2998_v31 }
 0x2c7   :  { %v3928_v48 = vpop.eup %3927 }
 0x2c8   :  { %v1091_v39 = vadd.f32 1.0, %v3928_v48  ;;  %v3930_v34 = vpop.eup %3929 }
 0x2c9   :  { %v1092_v60 = vadd.f32 1.0, %v3930_v34 }
 0x2ca   :  { %3939 = vrcp.f32 %v1091_v39 }
 0x2cb   :  { %v3932_v50 = vpop.eup %3931  ;;  %3941 = vtanh.f32 %v3806_v55 }
 0x2cc   :  { %3943 = vrcp.f32 %v1092_v60  ;;  %v1094_v10 = vadd.f32 1.0, %v3932_v50  ;;  %v3934_v52 = vpop.eup %3933 }
 0x2cd   :  { %3945 = vpow2.f32 %v3001_v40  ;;  %v1095_v24 = vadd.f32 1.0, %v3934_v52  ;;  %v3936_v46 = vpop.eup %3935 }
 0x2ce   :  { %3947 = vrcp.f32 %v1094_v10  ;;  %v3938_v36 = vpop.eup %3937 }
 0x2cf   :  { %3949 = vrcp.f32 %v1095_v24  ;;  %v1093_v33 = vadd.f32 1.0, %v3938_v36 }
 0x2d1   :  { %3951 = vrcp.f32 %v1093_v33 }
 0x2d4   :  { %v3940_v43 = vpop.eup %3939 }
 0x2d5   :  { %v3942_v19 = vpop.eup %3941  ;;  %v1113_v48 = vmul.f32 %v3940_v43, %v3936_v46 }
 0x2d6   :  { %v3944_v20 = vpop.eup %3943 }
 0x2d7   :  { %v3946_v31 = vpop.eup %3945  ;;  %v1111_v29 = vmul.f32 %v3944_v20, %v4819_v54 }
 0x2d8   :  { %v3948_v34 = vpop.eup %3947  ;;  %v1096_v40 = vadd.f32 1.0, %v3946_v31 }
 0x2d9   :  { %v4878_v39 = vadd.f32 %v1113_v48, %v1111_v29  ;;  %v1114_v55 = vmul.f32 %v3948_v34, %v3942_v19  ;;  %v3950_v60 = vpop.eup %3949 }
 0x2da   :  { %v1112_v50 = vmul.f32 %v3950_v60, %v4822_v11 }
 0x2db   :  { %3953 = vtanh.f32 %v4878_v39  ;;  %v3952_v52 = vpop.eup %3951 }
 0x2dc   :  { %v4882_v10 = vadd.f32 %v1114_v55, %v1112_v50  ;;  %3955 = vrcp.f32 %v1096_v40 }
 0x2de   :  { %3957 = vtanh.f32 %v4882_v10 }
 0x2e5   :  { %v3954_v24 = vpop.eup %3953 }
 0x2e6   :  { %v4885_v46 = vmul.f32 %v3954_v24, %v3952_v52  ;;  %v3956_v54 = vpop.eup %3955 }
 0x2e8   :  { %5407 = vst [vmem:[#allocation39_spill] sm:$0xff] %v4885_v46  ;;  %1198 = vmatmul.mubr.f32.vlgmr.msra.gmra.mrb[8].mxu0 %v4885_v46  ;;  %1275 = vmatmul.mubr.f32.vlgmr.msra.gmra.mrb[24].mxu1 %v4885_v46  ;;  %v3958_v36 = vpop.eup %3957 }
 0x2e9   :  { %1203 = vmatprep.mubr.f32.mxu0 %v5405_v0  ;;  %1280 = vmatprep.mubr.f32.mxu1 %v5405_v0  ;;  %v4891_v11 = vmul.f32 %v3958_v36, %v3956_v54 }
 0x2ea   :  { %3386 = vmatpush1.bf16.msra.mxu0 %v4528_v7  ;;  %3418 = vmatpush1.bf16.msra.mxu1 %v4633_v62 }
 0x2eb   :  { %5408 = vst [vmem:[#allocation40_spill] sm:$0xff] %v4891_v11  ;;  %3388 = vmatprep.subr.bf16.mxu0 %v4530_v9  ;;  %3420 = vmatprep.subr.bf16.mxu1 %v4636_v1 }
 0x2ec   :  { %1204 = vmatmul.mubr.f32.gmra.mrb[10].mxu0 %v4891_v11  ;;  %1281 = vmatmul.mubr.f32.gmra.mrb[26].mxu1 %v4891_v11 }
 0x2ed   :  { %1419 = vmatprep.mubr.f32.mxu0 %v5405_v0  ;;  %1496 = vmatprep.mubr.f32.mxu1 %v5405_v0 }
 0x2ee   :  { %3390 = vmatpush1.bf16.msra.mxu0 %v4540_v21  ;;  %3422 = vmatpush1.bf16.msra.mxu1 %v4646_v13 }
 0x2ef   :  { %3392 = vmatprep.subr.bf16.mxu0 %v4544_v23  ;;  %3424 = vmatprep.subr.bf16.mxu1 %v4649_v17 }
 0x2f2   :  { %3394 = vmatpush1.bf16.msra.mxu0 %v4554_v35  ;;  %3426 = vmatpush1.bf16.msra.mxu1 %v4660_v26 }
 0x2f3   :  { %3396 = vmatprep.subr.bf16.mxu0 %v4558_v37  ;;  %3428 = vmatprep.subr.bf16.mxu1 %v4664_v27 }
 0x2f6   :  { %3398 = vmatpush1.bf16.msra.mxu0 %v4568_v49  ;;  %3430 = vmatpush1.bf16.msra.mxu1 %v4672_v16 }
 0x2f7   :  { %3400 = vmatprep.subr.bf16.mxu0 %v4572_v51  ;;  %3432 = vmatprep.subr.bf16.mxu1 %v4675_v38 }
 0x2fa   :  { %3402 = vmatpush1.bf16.msra.mxu0 %v4582_v3  ;;  %3434 = vmatpush1.bf16.msra.mxu1 %v4682_v30 }
 0x2fb   :  { %3404 = vmatprep.subr.bf16.mxu0 %v4586_v5  ;;  %3436 = vmatprep.subr.bf16.mxu1 %v4685_v47 }
 0x2fe   :  { %3406 = vmatpush1.bf16.msra.mxu0 %v4596_v22  ;;  %3438 = vmatpush1.bf16.msra.mxu1 %v4692_v44 }
 0x2ff   :  { %3408 = vmatprep.subr.bf16.mxu0 %v4600_v25  ;;  %3440 = vmatprep.subr.bf16.mxu1 %v4695_v61 }
 0x302   :  { %3410 = vmatpush1.bf16.msra.mxu0 %v4610_v41  ;;  %3442 = vmatpush1.bf16.msra.mxu1 %v4702_v59 }
 0x303   :  { %3412 = vmatprep.subr.bf16.mxu0 %v4614_v45  ;;  %3444 = vmatprep.subr.bf16.mxu1 %v4705_v18 }
 0x306   :  { %3414 = vmatpush1.bf16.msra.mxu0 %v4626_v58  ;;  %3446 = vmatpush1.bf16.msra.mxu1 %v4712_v15 }
 0x307   :  { %3448 = vmatprep.subr.bf16.mxu0 %v4521_v57  ;;  %3480 = vmatprep.subr.bf16.mxu1 %v4623_v53 }
 0x3bb   :  { %v1199_v43 = vpop.f32.mrb[8].mxu0  ;;  %v1276_v19 = vpop.f32.mrb[24].mxu1 }
 0x3bc   :  { %v3759_v48 = vadd.f32 %v1199_v43, %v4797_v6  ;;  %v1201_v20 = vpop.f32.mrb[9].mxu0  ;;  %v1278_v33 = vpop.f32.mrb[25].mxu1  ;;  %v3807_v43 = vadd.f32 %v1276_v19, %v4805_v2 }
 0x3bd   :  { %v3760_v31 = vadd.f32 %v1201_v20, %v4795_v4  ;;  %v3808_v20 = vadd.f32 %v1278_v33, %v4807_v8 }
 0x3be   :  { %v3002_v29 = vmul.f32 -1.442695, %v3759_v48  ;;  %v3004_v48 = vmul.f32 -1.442695, %v3807_v43 }
 0x3bf   :  { %v3003_v34 = vmul.f32 -1.442695, %v3760_v31  ;;  %v1205_v55 = vpop.f32.mrb[10].mxu0  ;;  %v1282_v60 = vpop.f32.mrb[26].mxu1 }
 0x3c0   :  { %3959 = vpow2.f32 %v3002_v29  ;;  %v3761_v40 = vadd.f32 %v1205_v55, %v4797_v6  ;;  %v1207_v50 = vpop.f32.mrb[11].mxu0  ;;  %v1284_v52 = vpop.f32.mrb[27].mxu1  ;;  %v3809_v31 = vadd.f32 %v1282_v60, %v4805_v2 }
 0x3c1   :  { %v3762_v24 = vadd.f32 %v1207_v50, %v4795_v4  ;;  %3961 = vpow2.f32 %v3003_v34  ;;  %v3810_v29 = vadd.f32 %v1284_v52, %v4807_v8 }
 0x3c2   :  { %v3005_v54 = vmul.f32 -1.442695, %v3761_v40  ;;  %v3007_v50 = vmul.f32 -1.442695, %v3809_v31 }
 0x3c3   :  { %v3006_v36 = vmul.f32 -1.442695, %v3762_v24 }
 0x3c4   :  { %3963 = vpow2.f32 %v3005_v54 }
 0x3c5   :  { %3965 = vpow2.f32 %v3006_v36 }
 0x3c6   :  { %3967 = vtanh.f32 %v3808_v20 }
 0x3c7   :  { %3969 = vpow2.f32 %v3004_v48 }
 0x3ca   :  { %v3960_v11 = vpop.eup %3959 }
 0x3cb   :  { %v1313_v55 = vadd.f32 1.0, %v3960_v11  ;;  %v3962_v46 = vpop.eup %3961 }
 0x3cc   :  { %v1314_v34 = vadd.f32 1.0, %v3962_v46 }
 0x3cd   :  { %3971 = vrcp.f32 %v1313_v55 }
 0x3ce   :  { %v3964_v40 = vpop.eup %3963  ;;  %3973 = vtanh.f32 %v3810_v29 }
 0x3cf   :  { %3975 = vrcp.f32 %v1314_v34  ;;  %v1316_v19 = vadd.f32 1.0, %v3964_v40  ;;  %v3966_v24 = vpop.eup %3965 }
 0x3d0   :  { %3977 = vpow2.f32 %v3007_v50  ;;  %v1317_v33 = vadd.f32 1.0, %v3966_v24  ;;  %v3968_v60 = vpop.eup %3967 }
 0x3d1   :  { %3979 = vrcp.f32 %v1316_v19  ;;  %v3970_v54 = vpop.eup %3969 }
 0x3d2   :  { %3981 = vrcp.f32 %v1317_v33  ;;  %v1315_v20 = vadd.f32 1.0, %v3970_v54 }
 0x3d4   :  { %3983 = vrcp.f32 %v1315_v20 }
 0x3d7   :  { %v3972_v36 = vpop.eup %3971 }
 0x3d8   :  { %v3974_v52 = vpop.eup %3973  ;;  %v1335_v11 = vmul.f32 %v3972_v36, %v3968_v60 }
 0x3d9   :  { %v3976_v43 = vpop.eup %3975 }
 0x3da   :  { %v3978_v48 = vpop.eup %3977  ;;  %v1333_v31 = vmul.f32 %v3976_v43, %v4878_v39 }
 0x3db   :  { %v3980_v46 = vpop.eup %3979  ;;  %v1318_v50 = vadd.f32 1.0, %v3978_v48 }
 0x3dc   :  { %v4938_v55 = vadd.f32 %v1335_v11, %v1333_v31  ;;  %v1336_v29 = vmul.f32 %v3980_v46, %v3974_v52  ;;  %v3982_v34 = vpop.eup %3981 }
 0x3dd   :  { %v1334_v40 = vmul.f32 %v3982_v34, %v4882_v10 }
 0x3de   :  { %3985 = vtanh.f32 %v4938_v55  ;;  %v3984_v24 = vpop.eup %3983 }
 0x3df   :  { %v4942_v19 = vadd.f32 %v1336_v29, %v1334_v40  ;;  %3987 = vrcp.f32 %v1318_v50 }
 0x3e1   :  { %3989 = vtanh.f32 %v4942_v19 }
 0x3e8   :  { %v3986_v33 = vpop.eup %3985 }
 0x3e9   :  { %v4945_v60 = vmul.f32 %v3986_v33, %v3984_v24  ;;  %v3988_v39 = vpop.eup %3987 }
 0x3eb   :  { %5409 = vst [vmem:[#allocation41_spill] sm:$0xff] %v4945_v60  ;;  %1420 = vmatmul.mubr.f32.vlgmr.msra.gmra.mrb[12].mxu0 %v4945_v60  ;;  %1497 = vmatmul.mubr.f32.vlgmr.msra.gmra.mrb[28].mxu1 %v4945_v60  ;;  %v3990_v54 = vpop.eup %3989 }
 0x3ec   :  { %1425 = vmatprep.mubr.f32.mxu0 %v5405_v0  ;;  %1502 = vmatprep.mubr.f32.mxu1 %v5405_v0  ;;  %v4951_v10 = vmul.f32 %v3990_v54, %v3988_v39 }
 0x3ed   :  { %3450 = vmatpush1.bf16.msra.mxu0 %v4528_v7  ;;  %3482 = vmatpush1.bf16.msra.mxu1 %v4633_v62 }
 0x3ee   :  { %5410 = vst [vmem:[#allocation42_spill] sm:$0xff] %v4951_v10  ;;  %3452 = vmatprep.subr.bf16.mxu0 %v4530_v9  ;;  %3484 = vmatprep.subr.bf16.mxu1 %v4636_v1 }
 0x3ef   :  { %1426 = vmatmul.mubr.f32.gmra.mrb[14].mxu0 %v4951_v10  ;;  %1503 = vmatmul.mubr.f32.gmra.mrb[30].mxu1 %v4951_v10 }
 0x3f0   :  { %1641 = vmatprep.mubr.f32.mxu0 %v5405_v0  ;;  %1718 = vmatprep.mubr.f32.mxu1 %v5405_v0 }
 0x3f1   :  { %3454 = vmatpush1.bf16.msra.mxu0 %v4540_v21  ;;  %3486 = vmatpush1.bf16.msra.mxu1 %v4646_v13 }
 0x3f2   :  { %3456 = vmatprep.subr.bf16.mxu0 %v4544_v23  ;;  %3488 = vmatprep.subr.bf16.mxu1 %v4649_v17 }
 0x3f5   :  { %3458 = vmatpush1.bf16.msra.mxu0 %v4554_v35  ;;  %3490 = vmatpush1.bf16.msra.mxu1 %v4660_v26 }
 0x3f6   :  { %3460 = vmatprep.subr.bf16.mxu0 %v4558_v37  ;;  %3492 = vmatprep.subr.bf16.mxu1 %v4664_v27 }
 0x3f9   :  { %3462 = vmatpush1.bf16.msra.mxu0 %v4568_v49  ;;  %3494 = vmatpush1.bf16.msra.mxu1 %v4672_v16 }
 0x3fa   :  { %3464 = vmatprep.subr.bf16.mxu0 %v4572_v51  ;;  %3496 = vmatprep.subr.bf16.mxu1 %v4675_v38 }
 0x3fd   :  { %3466 = vmatpush1.bf16.msra.mxu0 %v4582_v3  ;;  %3498 = vmatpush1.bf16.msra.mxu1 %v4682_v30 }
 0x3fe   :  { %3468 = vmatprep.subr.bf16.mxu0 %v4586_v5  ;;  %3500 = vmatprep.subr.bf16.mxu1 %v4685_v47 }
 0x401   :  { %3470 = vmatpush1.bf16.msra.mxu0 %v4596_v22  ;;  %3502 = vmatpush1.bf16.msra.mxu1 %v4692_v44 }
 0x402   :  { %3472 = vmatprep.subr.bf16.mxu0 %v4600_v25  ;;  %3504 = vmatprep.subr.bf16.mxu1 %v4695_v61 }
 0x405   :  { %3474 = vmatpush1.bf16.msra.mxu0 %v4610_v41  ;;  %3506 = vmatpush1.bf16.msra.mxu1 %v4702_v59 }
 0x406   :  { %3476 = vmatprep.subr.bf16.mxu0 %v4614_v45  ;;  %3508 = vmatprep.subr.bf16.mxu1 %v4705_v18 }
 0x409   :  { %3478 = vmatpush1.bf16.msra.mxu0 %v4626_v58  ;;  %3510 = vmatpush1.bf16.msra.mxu1 %v4712_v15 }
 0x40a   :  { %3512 = vmatprep.subr.bf16.mxu0 %v4521_v57  ;;  %3544 = vmatprep.subr.bf16.mxu1 %v4623_v53 }
 0x4be   :  { %v1421_v36 = vpop.f32.mrb[12].mxu0  ;;  %v1498_v52 = vpop.f32.mrb[28].mxu1 }
 0x4bf   :  { %v3763_v11 = vadd.f32 %v1421_v36, %v4797_v6  ;;  %v1423_v43 = vpop.f32.mrb[13].mxu0  ;;  %v1500_v20 = vpop.f32.mrb[29].mxu1  ;;  %v3811_v36 = vadd.f32 %v1498_v52, %v4805_v2 }
 0x4c0   :  { %v3764_v48 = vadd.f32 %v1423_v43, %v4795_v4  ;;  %v3812_v43 = vadd.f32 %v1500_v20, %v4807_v8 }
 0x4c1   :  { %v3008_v31 = vmul.f32 -1.442695, %v3763_v11  ;;  %v3010_v11 = vmul.f32 -1.442695, %v3811_v36 }
 0x4c2   :  { %v3009_v46 = vmul.f32 -1.442695, %v3764_v48  ;;  %v1427_v29 = vpop.f32.mrb[14].mxu0  ;;  %v1504_v34 = vpop.f32.mrb[30].mxu1 }
 0x4c3   :  { %3991 = vpow2.f32 %v3008_v31  ;;  %v3765_v50 = vadd.f32 %v1427_v29, %v4797_v6  ;;  %v1429_v40 = vpop.f32.mrb[15].mxu0  ;;  %v1506_v24 = vpop.f32.mrb[31].mxu1  ;;  %v3813_v48 = vadd.f32 %v1504_v34, %v4805_v2 }
 0x4c4   :  { %v3766_v33 = vadd.f32 %v1429_v40, %v4795_v4  ;;  %3993 = vpow2.f32 %v3009_v46  ;;  %v3814_v31 = vadd.f32 %v1506_v24, %v4807_v8 }
 0x4c5   :  { %v3011_v39 = vmul.f32 -1.442695, %v3765_v50  ;;  %v3013_v40 = vmul.f32 -1.442695, %v3813_v48 }
 0x4c6   :  { %v3012_v54 = vmul.f32 -1.442695, %v3766_v33 }
 0x4c7   :  { %3995 = vpow2.f32 %v3011_v39 }
 0x4c8   :  { %3997 = vpow2.f32 %v3012_v54 }
 0x4c9   :  { %3999 = vtanh.f32 %v3812_v43 }
 0x4ca   :  { %4001 = vpow2.f32 %v3010_v11 }
 0x4cd   :  { %v3992_v10 = vpop.eup %3991 }
 0x4ce   :  { %v1535_v29 = vadd.f32 1.0, %v3992_v10  ;;  %v3994_v60 = vpop.eup %3993 }
 0x4cf   :  { %v1536_v46 = vadd.f32 1.0, %v3994_v60 }
 0x4d0   :  { %4003 = vrcp.f32 %v1535_v29 }
 0x4d1   :  { %v3996_v50 = vpop.eup %3995  ;;  %4005 = vtanh.f32 %v3814_v31 }
 0x4d2   :  { %4007 = vrcp.f32 %v1536_v46  ;;  %v1538_v52 = vadd.f32 1.0, %v3996_v50  ;;  %v3998_v33 = vpop.eup %3997 }
 0x4d3   :  { %4009 = vpow2.f32 %v3013_v40  ;;  %v1539_v20 = vadd.f32 1.0, %v3998_v33  ;;  %v4000_v34 = vpop.eup %3999 }
 0x4d4   :  { %4011 = vrcp.f32 %v1538_v52  ;;  %v4002_v39 = vpop.eup %4001 }
 0x4d5   :  { %4013 = vrcp.f32 %v1539_v20  ;;  %v1537_v43 = vadd.f32 1.0, %v4002_v39 }
 0x4d7   :  { %4015 = vrcp.f32 %v1537_v43 }
 0x4da   :  { %v4004_v54 = vpop.eup %4003 }
 0x4db   :  { %v4006_v24 = vpop.eup %4005  ;;  %v1557_v10 = vmul.f32 %v4004_v54, %v4000_v34  ;;  %v343_v54 = vadd.f32 %v4759_v63, %v4797_v6 }
 0x4dc   :  { %v4008_v36 = vpop.eup %4007 }
 0x4dd   :  { %v4010_v11 = vpop.eup %4009  ;;  %v1555_v48 = vmul.f32 %v4008_v36, %v4938_v55 }
 0x4de   :  { %v4012_v60 = vpop.eup %4011  ;;  %v1540_v40 = vadd.f32 1.0, %v4010_v11 }
 0x4df   :  { %v4998_v29 = vadd.f32 %v1557_v10, %v1555_v48  ;;  %v1558_v31 = vmul.f32 %v4012_v60, %v4006_v24  ;;  %v4014_v46 = vpop.eup %4013  ;;  %v345_v24 = vadd.f32 %v4761_v14, %v4795_v4 }
 0x4e0   :  { %v1556_v50 = vmul.f32 %v4014_v46, %v4942_v19 }
 0x4e1   :  { %4017 = vtanh.f32 %v4998_v29  ;;  %v4016_v33 = vpop.eup %4015 }
 0x4e2   :  { %v5002_v52 = vadd.f32 %v1558_v31, %v1556_v50  ;;  %4019 = vrcp.f32 %v1540_v40  ;;  %v349_v31 = vadd.f32 %v4763_v28, %v4797_v6  ;;  %v351_v40 = vadd.f32 %v4765_v42, %v4795_v4 }
 0x4e4   :  { %4021 = vtanh.f32 %v5002_v52 }
 0x4eb   :  { %v4018_v20 = vpop.eup %4017 }
 0x4ec   :  { %v5005_v34 = vmul.f32 %v4018_v20, %v4016_v33  ;;  %v4020_v55 = vpop.eup %4019 }
 0x4ee   :  { %1642 = vmatmul.mubr.f32.vlgmr.msra.gmra.mrb[16].mxu0 %v5005_v34  ;;  %1719 = vmatmul.mubr.f32.vlgmr.msra.gmra.mrb[32].mxu1 %v5005_v34  ;;  %v4022_v39 = vpop.eup %4021 }
 0x4ef   :  { %1647 = vmatprep.mubr.f32.mxu0 %v5405_v0  ;;  %1724 = vmatprep.mubr.f32.mxu1 %v5405_v0  ;;  %v5011_v19 = vmul.f32 %v4022_v39, %v4020_v55 }
 0x4f0   :  { %3514 = vmatpush1.bf16.msra.mxu0 %v4528_v7  ;;  %3546 = vmatpush1.bf16.msra.mxu1 %v4633_v62 }
 0x4f1   :  { %3516 = vmatprep.subr.bf16.mxu0 %v4530_v9  ;;  %3548 = vmatprep.subr.bf16.mxu1 %v4636_v1 }
 0x4f2   :  { %1648 = vmatmul.mubr.f32.gmra.mrb[18].mxu0 %v5011_v19  ;;  %1725 = vmatmul.mubr.f32.gmra.mrb[34].mxu1 %v5011_v19 }
 0x4f3   :  { %1863 = vmatprep.mubr.f32.mxu0 %v5405_v0  ;;  %1940 = vmatprep.mubr.f32.mxu1 %v5405_v0 }
 0x4f4   :  { %3518 = vmatpush1.bf16.msra.mxu0 %v4540_v21  ;;  %3550 = vmatpush1.bf16.msra.mxu1 %v4646_v13 }
 0x4f5   :  { %3520 = vmatprep.subr.bf16.mxu0 %v4544_v23  ;;  %3552 = vmatprep.subr.bf16.mxu1 %v4649_v17 }
 0x4f8   :  { %3522 = vmatpush1.bf16.msra.mxu0 %v4554_v35  ;;  %3554 = vmatpush1.bf16.msra.mxu1 %v4660_v26 }
 0x4f9   :  { %3524 = vmatprep.subr.bf16.mxu0 %v4558_v37  ;;  %3556 = vmatprep.subr.bf16.mxu1 %v4664_v27 }
 0x4fc   :  { %3526 = vmatpush1.bf16.msra.mxu0 %v4568_v49  ;;  %3558 = vmatpush1.bf16.msra.mxu1 %v4672_v16 }
 0x4fd   :  { %3528 = vmatprep.subr.bf16.mxu0 %v4572_v51  ;;  %3560 = vmatprep.subr.bf16.mxu1 %v4675_v38 }
 0x500   :  { %3530 = vmatpush1.bf16.msra.mxu0 %v4582_v3  ;;  %3562 = vmatpush1.bf16.msra.mxu1 %v4682_v30 }
 0x501   :  { %3532 = vmatprep.subr.bf16.mxu0 %v4586_v5  ;;  %3564 = vmatprep.subr.bf16.mxu1 %v4685_v47 }
 0x504   :  { %3534 = vmatpush1.bf16.msra.mxu0 %v4596_v22  ;;  %3566 = vmatpush1.bf16.msra.mxu1 %v4692_v44 }
 0x505   :  { %3536 = vmatprep.subr.bf16.mxu0 %v4600_v25  ;;  %3568 = vmatprep.subr.bf16.mxu1 %v4695_v61 }
 0x508   :  { %3538 = vmatpush1.bf16.msra.mxu0 %v4610_v41  ;;  %3570 = vmatpush1.bf16.msra.mxu1 %v4702_v59 }
 0x509   :  { %3540 = vmatprep.subr.bf16.mxu0 %v4614_v45  ;;  %3572 = vmatprep.subr.bf16.mxu1 %v4705_v18 }
 0x50c   :  { %3542 = vmatpush1.bf16.msra.mxu0 %v4626_v58  ;;  %3574 = vmatpush1.bf16.msra.mxu1 %v4712_v15 }
 0x50d   :  { %3576 = vmatprep.subr.bf16.mxu0 %v4521_v57  ;;  %3608 = vmatprep.subr.bf16.mxu1 %v4623_v53 }
 0x5c1   :  { %v1643_v10 = vpop.f32.mrb[16].mxu0  ;;  %v1720_v36 = vpop.f32.mrb[32].mxu1 }
 0x5c2   :  { %v1731_v43 = vadd.f32 %v1643_v10, %v343_v54  ;;  %v1645_v11 = vpop.f32.mrb[17].mxu0  ;;  %v1722_v48 = vpop.f32.mrb[33].mxu1 }
 0x5c3   :  { %v1732_v60 = vadd.f32 %v1645_v11, %v345_v24  ;;  %v3815_v24 = vadd.f32 %v1720_v36, %v4805_v2  ;;  %v3816_v28 = vadd.f32 %v1722_v48, %v4807_v8 }
 0x5c4   :  { %v3014_v46 = vmul.f32 -1.442695, %v1731_v43 }
 0x5c5   :  { %v3015_v50 = vmul.f32 -1.442695, %v1732_v60  ;;  %v1649_v33 = vpop.f32.mrb[18].mxu0  ;;  %v1726_v20 = vpop.f32.mrb[34].mxu1  ;;  %v3016_v43 = vmul.f32 -1.442695, %v3815_v24 }
 0x5c6   :  { %4023 = vpow2.f32 %v3014_v46  ;;  %v1735_v63 = vadd.f32 %v1649_v33, %v349_v31  ;;  %v1651_v55 = vpop.f32.mrb[19].mxu0  ;;  %v1728_v14 = vpop.f32.mrb[35].mxu1  ;;  %v3817_v42 = vadd.f32 %v1726_v20, %v4805_v2 }
 0x5c7   :  { %v1736_v39 = vadd.f32 %v1651_v55, %v351_v40  ;;  %4025 = vpow2.f32 %v3015_v50  ;;  %v3818_v60 = vadd.f32 %v1728_v14, %v4807_v8 }
 0x5c8   :  { %v3017_v54 = vmul.f32 -1.442695, %v1735_v63  ;;  %v3019_v40 = vmul.f32 -1.442695, %v3817_v42 }
 0x5c9   :  { %v3018_v10 = vmul.f32 -1.442695, %v1736_v39 }
 0x5ca   :  { %4027 = vpow2.f32 %v3017_v54 }
 0x5cb   :  { %4029 = vpow2.f32 %v3018_v10 }
 0x5cc   :  { %4031 = vtanh.f32 %v3816_v28 }
 0x5cd   :  { %4033 = vpow2.f32 %v3016_v43 }
 0x5d0   :  { %v4024_v11 = vpop.eup %4023 }
 0x5d1   :  { %v1757_v46 = vadd.f32 1.0, %v4024_v11  ;;  %v4026_v31 = vpop.eup %4025 }
 0x5d2   :  { %v1758_v50 = vadd.f32 1.0, %v4026_v31 }
 0x5d3   :  { %4035 = vrcp.f32 %v1757_v46 }
 0x5d4   :  { %v4028_v33 = vpop.eup %4027  ;;  %4037 = vtanh.f32 %v3818_v60 }
 0x5d5   :  { %4039 = vrcp.f32 %v1758_v50  ;;  %v1760_v36 = vadd.f32 1.0, %v4028_v33  ;;  %v4030_v63 = vpop.eup %4029 }
 0x5d6   :  { %4041 = vpow2.f32 %v3019_v40  ;;  %v1761_v48 = vadd.f32 1.0, %v4030_v63  ;;  %v4032_v20 = vpop.eup %4031 }
 0x5d7   :  { %4043 = vrcp.f32 %v1760_v36  ;;  %v4034_v55 = vpop.eup %4033 }
 0x5d8   :  { %4045 = vrcp.f32 %v1761_v48  ;;  %v1759_v24 = vadd.f32 1.0, %v4034_v55  ;;  %v357_v55 = vadd.f32 %v4769_v12, %v4795_v4 }
 0x5da   :  { %4047 = vrcp.f32 %v1759_v24 }
 0x5dd   :  { %v4036_v39 = vpop.eup %4035 }
 0x5de   :  { %v4038_v14 = vpop.eup %4037  ;;  %v1779_v54 = vmul.f32 %v4036_v39, %v4032_v20  ;;  %v355_v20 = vadd.f32 %v4767_v56, %v4797_v6 }
 0x5df   :  { %v4040_v10 = vpop.eup %4039 }
 0x5e0   :  { %v4042_v28 = vpop.eup %4041  ;;  %v1777_v43 = vmul.f32 %v4040_v10, %v4998_v29 }
 0x5e1   :  { %v4044_v42 = vpop.eup %4043  ;;  %v1762_v31 = vadd.f32 1.0, %v4042_v28 }
 0x5e2   :  { %v5062_v11 = vadd.f32 %v1779_v54, %v1777_v43  ;;  %v1780_v60 = vmul.f32 %v4044_v42, %v4038_v14  ;;  %v4046_v46 = vpop.eup %4045  ;;  %v361_v43 = vadd.f32 %v4771_v32, %v4797_v6 }
 0x5e3   :  { %v1778_v40 = vmul.f32 %v4046_v46, %v5002_v52 }
 0x5e4   :  { %4049 = vtanh.f32 %v5062_v11  ;;  %v4048_v33 = vpop.eup %4047 }
 0x5e5   :  { %v5066_v50 = vadd.f32 %v1780_v60, %v1778_v40  ;;  %4051 = vrcp.f32 %v1762_v31 }
 0x5e7   :  { %4053 = vtanh.f32 %v5066_v50 }
 0x5ee   :  { %v4050_v36 = vpop.eup %4049 }
 0x5ef   :  { %v5069_v63 = vmul.f32 %v4050_v36, %v4048_v33  ;;  %v4052_v29 = vpop.eup %4051 }
 0x5f1   :  { %1864 = vmatmul.mubr.f32.vlgmr.msra.gmra.mrb[20].mxu0 %v5069_v63  ;;  %1941 = vmatmul.mubr.f32.vlgmr.msra.gmra.mrb[36].mxu1 %v5069_v63  ;;  %v4054_v48 = vpop.eup %4053 }
 0x5f2   :  { %1869 = vmatprep.mubr.f32.mxu0 %v5405_v0  ;;  %1946 = vmatprep.mubr.f32.mxu1 %v5405_v0  ;;  %v5075_v52 = vmul.f32 %v4054_v48, %v4052_v29 }
 0x5f3   :  { %3578 = vmatpush1.bf16.msra.mxu0 %v4528_v7  ;;  %3610 = vmatpush1.bf16.msra.mxu1 %v4633_v62 }
 0x5f4   :  { %3580 = vmatprep.subr.bf16.mxu0 %v4530_v9  ;;  %3612 = vmatprep.subr.bf16.mxu1 %v4636_v1 }
 0x5f5   :  { %1870 = vmatmul.mubr.f32.gmra.mrb[22].mxu0 %v5075_v52  ;;  %1947 = vmatmul.mubr.f32.gmra.mrb[38].mxu1 %v5075_v52 }
 0x5f6   :  { %2085 = vmatprep.mubr.f32.mxu0 %v5405_v0  ;;  %2162 = vmatprep.mubr.f32.mxu1 %v5405_v0 }
 0x5f7   :  { %3582 = vmatpush1.bf16.msra.mxu0 %v4540_v21  ;;  %3614 = vmatpush1.bf16.msra.mxu1 %v4646_v13 }
 0x5f8   :  { %3584 = vmatprep.subr.bf16.mxu0 %v4544_v23  ;;  %3616 = vmatprep.subr.bf16.mxu1 %v4649_v17 }
 0x5fb   :  { %3586 = vmatpush1.bf16.msra.mxu0 %v4554_v35  ;;  %3618 = vmatpush1.bf16.msra.mxu1 %v4660_v26 }
 0x5fc   :  { %3588 = vmatprep.subr.bf16.mxu0 %v4558_v37  ;;  %3620 = vmatprep.subr.bf16.mxu1 %v4664_v27 }
 0x5ff   :  { %3590 = vmatpush1.bf16.msra.mxu0 %v4568_v49  ;;  %3622 = vmatpush1.bf16.msra.mxu1 %v4672_v16 }
 0x600   :  { %3592 = vmatprep.subr.bf16.mxu0 %v4572_v51  ;;  %3624 = vmatprep.subr.bf16.mxu1 %v4675_v38 }
 0x603   :  { %3594 = vmatpush1.bf16.msra.mxu0 %v4582_v3  ;;  %3626 = vmatpush1.bf16.msra.mxu1 %v4682_v30 }
 0x604   :  { %3596 = vmatprep.subr.bf16.mxu0 %v4586_v5  ;;  %3628 = vmatprep.subr.bf16.mxu1 %v4685_v47 }
 0x607   :  { %3598 = vmatpush1.bf16.msra.mxu0 %v4596_v22  ;;  %3630 = vmatpush1.bf16.msra.mxu1 %v4692_v44 }
 0x608   :  { %3600 = vmatprep.subr.bf16.mxu0 %v4600_v25  ;;  %3632 = vmatprep.subr.bf16.mxu1 %v4695_v61 }
 0x60b   :  { %3602 = vmatpush1.bf16.msra.mxu0 %v4610_v41  ;;  %3634 = vmatpush1.bf16.msra.mxu1 %v4702_v59 }
 0x60c   :  { %3604 = vmatprep.subr.bf16.mxu0 %v4614_v45  ;;  %3636 = vmatprep.subr.bf16.mxu1 %v4705_v18 }
 0x60f   :  { %3606 = vmatpush1.bf16.msra.mxu0 %v4626_v58  ;;  %3638 = vmatpush1.bf16.msra.mxu1 %v4712_v15 }
 0x610   :  { %3640 = vmatprep.subr.bf16.mxu0 %v4521_v57  ;;  %3672 = vmatprep.subr.bf16.mxu1 %v4623_v53  ;;  %v5411_v57 = vld [vmem:[#allocation27_spill] sm:$0xff] }
 0x611   :  { %v363_v60 = vadd.f32 %v5411_v57, %v4795_v4 }
 0x6c4   :  { %v1865_v39 = vpop.f32.mrb[20].mxu0  ;;  %v1942_v14 = vpop.f32.mrb[36].mxu1 }
 0x6c5   :  { %v1953_v54 = vadd.f32 %v1865_v39, %v355_v20  ;;  %v1867_v10 = vpop.f32.mrb[21].mxu0  ;;  %v1944_v24 = vpop.f32.mrb[37].mxu1  ;;  %v3819_v48 = vadd.f32 %v1942_v14, %v4805_v2 }
 0x6c6   :  { %v1954_v28 = vadd.f32 %v1867_v10, %v357_v55  ;;  %v3820_v32 = vadd.f32 %v1944_v24, %v4807_v8 }
 0x6c7   :  { %v3020_v42 = vmul.f32 -1.442695, %v1953_v54  ;;  %v3022_v20 = vmul.f32 -1.442695, %v3819_v48 }
 0x6c8   :  { %v3021_v53 = vmul.f32 -1.442695, %v1954_v28  ;;  %v1871_v46 = vpop.f32.mrb[22].mxu0  ;;  %v1948_v31 = vpop.f32.mrb[38].mxu1 }
 0x6c9   :  { %4055 = vpow2.f32 %v3020_v42  ;;  %v1957_v56 = vadd.f32 %v1871_v46, %v361_v43  ;;  %v1873_v40 = vpop.f32.mrb[23].mxu0  ;;  %v1950_v12 = vpop.f32.mrb[39].mxu1  ;;  %v3821_v55 = vadd.f32 %v1948_v31, %v4805_v2 }
 0x6ca   :  { %v1958_v33 = vadd.f32 %v1873_v40, %v363_v60  ;;  %4057 = vpow2.f32 %v3021_v53  ;;  %v3822_v54 = vadd.f32 %v1950_v12, %v4807_v8 }
 0x6cb   :  { %v3023_v36 = vmul.f32 -1.442695, %v1957_v56  ;;  %v3025_v43 = vmul.f32 -1.442695, %v3821_v55 }
 0x6cc   :  { %v3024_v29 = vmul.f32 -1.442695, %v1958_v33 }
 0x6cd   :  { %4059 = vpow2.f32 %v3023_v36 }
 0x6ce   :  { %4061 = vpow2.f32 %v3024_v29 }
 0x6cf   :  { %4063 = vtanh.f32 %v3820_v32 }
 0x6d0   :  { %4065 = vpow2.f32 %v3022_v20 }
 0x6d3   :  { %v4056_v39 = vpop.eup %4055 }
 0x6d4   :  { %v1979_v10 = vadd.f32 1.0, %v4056_v39  ;;  %v4058_v28 = vpop.eup %4057 }
 0x6d5   :  { %v1980_v42 = vadd.f32 1.0, %v4058_v28 }
 0x6d6   :  { %4067 = vrcp.f32 %v1979_v10 }
 0x6d7   :  { %v4060_v57 = vpop.eup %4059  ;;  %4069 = vtanh.f32 %v3822_v54 }
 0x6d8   :  { %4071 = vrcp.f32 %v1980_v42  ;;  %v1982_v14 = vadd.f32 1.0, %v4060_v57  ;;  %v4062_v60 = vpop.eup %4061 }
 0x6d9   :  { %4073 = vpow2.f32 %v3025_v43  ;;  %v1983_v24 = vadd.f32 1.0, %v4062_v60  ;;  %v4064_v53 = vpop.eup %4063 }
 0x6da   :  { %4075 = vrcp.f32 %v1982_v14  ;;  %v4066_v46 = vpop.eup %4065 }
 0x6db   :  { %4077 = vrcp.f32 %v1983_v24  ;;  %v1981_v33 = vadd.f32 1.0, %v4066_v46 }
 0x6dd   :  { %4079 = vrcp.f32 %v1981_v33 }
 0x6e0   :  { %v4068_v31 = vpop.eup %4067 }
 0x6e1   :  { %v4070_v56 = vpop.eup %4069  ;;  %v2001_v40 = vmul.f32 %v4068_v31, %v4064_v53 }
 0x6e2   :  { %v4072_v12 = vpop.eup %4071 }
 0x6e3   :  { %v4074_v36 = vpop.eup %4073  ;;  %v1999_v29 = vmul.f32 %v4072_v12, %v5062_v11 }
 0x6e4   :  { %v4076_v48 = vpop.eup %4075  ;;  %v1984_v39 = vadd.f32 1.0, %v4074_v36 }
 0x6e5   :  { %v5126_v32 = vadd.f32 %v2001_v40, %v1999_v29  ;;  %v2002_v20 = vmul.f32 %v4076_v48, %v4070_v56  ;;  %v4078_v55 = vpop.eup %4077 }
 0x6e6   :  { %v2000_v54 = vmul.f32 %v4078_v55, %v5066_v50 }
 0x6e7   :  { %4081 = vtanh.f32 %v5126_v32  ;;  %v4080_v28 = vpop.eup %4079 }
 0x6e8   :  { %v5130_v10 = vadd.f32 %v2002_v20, %v2000_v54  ;;  %4083 = vrcp.f32 %v1984_v39 }
 0x6ea   :  { %4085 = vtanh.f32 %v5130_v10 }
 0x6f1   :  { %v4082_v43 = vpop.eup %4081 }
 0x6f2   :  { %v5133_v42 = vmul.f32 %v4082_v43, %v4080_v28  ;;  %v4084_v11 = vpop.eup %4083 }
 0x6f4   :  { %2086 = vmatmul.mubr.f32.vlgmr.msra.gmra.mrb[24].mxu0 %v5133_v42  ;;  %2163 = vmatmul.mubr.f32.vlgmr.msra.gmra.mrb[40].mxu1 %v5133_v42  ;;  %v4086_v57 = vpop.eup %4085 }
 0x6f5   :  { %2091 = vmatprep.mubr.f32.mxu0 %v5405_v0  ;;  %2168 = vmatprep.mubr.f32.mxu1 %v5405_v0  ;;  %v5139_v50 = vmul.f32 %v4086_v57, %v4084_v11 }
 0x6f6   :  { %3642 = vmatpush1.bf16.msra.mxu0 %v4528_v7  ;;  %3674 = vmatpush1.bf16.msra.mxu1 %v4633_v62  ;;  %v2460_v7 = vld [vmem:[#allocation15] sm:$0xff] }
 0x6f7   :  { %3644 = vmatprep.subr.bf16.mxu0 %v4530_v9  ;;  %3676 = vmatprep.subr.bf16.mxu1 %v4636_v1  ;;  %v2461_v9 = vld [vmem:[#allocation15 + $0x8] sm:$0xff]  ;;  %v5415_v1 = vld [vmem:[#allocation31_spill] sm:$0xff] }
 0x6f8   :  { %2092 = vmatmul.mubr.f32.gmra.mrb[26].mxu0 %v5139_v50  ;;  %2169 = vmatmul.mubr.f32.gmra.mrb[42].mxu1 %v5139_v50 }
 0x6f9   :  { %2307 = vmatprep.mubr.f32.mxu0 %v5405_v0  ;;  %2384 = vmatprep.mubr.f32.mxu1 %v5405_v0 }
 0x6fa   :  { %3646 = vmatpush1.bf16.msra.mxu0 %v4540_v21  ;;  %3678 = vmatpush1.bf16.msra.mxu1 %v4646_v13  ;;  %v5175_v21 = vpack.c.bf16 %v2461_v9, %v2460_v7  ;;  %v375_v13 = vadd.f32 %v5415_v1, %v4795_v4 }
 0x6fb   :  { %3648 = vmatprep.subr.bf16.mxu0 %v4544_v23  ;;  %3680 = vmatprep.subr.bf16.mxu1 %v4649_v17  ;;  %v5412_v23 = vld [vmem:[#allocation28_spill] sm:$0xff] }
 0x6fe   :  { %3650 = vmatpush1.bf16.msra.mxu0 %v4554_v35  ;;  %3682 = vmatpush1.bf16.msra.mxu1 %v4660_v26  ;;  %v367_v35 = vadd.f32 %v5412_v23, %v4797_v6 }
 0x6ff   :  { %3652 = vmatprep.subr.bf16.mxu0 %v4558_v37  ;;  %3684 = vmatprep.subr.bf16.mxu1 %v4664_v27  ;;  %v5413_v37 = vld [vmem:[#allocation29_spill] sm:$0xff] }
 0x702   :  { %3654 = vmatpush1.bf16.msra.mxu0 %v4568_v49  ;;  %3686 = vmatpush1.bf16.msra.mxu1 %v4672_v16  ;;  %v369_v49 = vadd.f32 %v5413_v37, %v4795_v4 }
 0x703   :  { %3656 = vmatprep.subr.bf16.mxu0 %v4572_v51  ;;  %3688 = vmatprep.subr.bf16.mxu1 %v4675_v38 }
 0x706   :  { %3658 = vmatpush1.bf16.msra.mxu0 %v4582_v3  ;;  %3690 = vmatpush1.bf16.msra.mxu1 %v4682_v30 }
 0x707   :  { %3660 = vmatprep.subr.bf16.mxu0 %v4586_v5  ;;  %3692 = vmatprep.subr.bf16.mxu1 %v4685_v47 }
 0x70a   :  { %3662 = vmatpush1.bf16.msra.mxu0 %v4596_v22  ;;  %3694 = vmatpush1.bf16.msra.mxu1 %v4692_v44 }
 0x70b   :  { %3664 = vmatprep.subr.bf16.mxu0 %v4600_v25  ;;  %3696 = vmatprep.subr.bf16.mxu1 %v4695_v61 }
 0x70e   :  { %3666 = vmatpush1.bf16.msra.mxu0 %v4610_v41  ;;  %3698 = vmatpush1.bf16.msra.mxu1 %v4702_v59 }
 0x70f   :  { %3668 = vmatprep.subr.bf16.mxu0 %v4614_v45  ;;  %3700 = vmatprep.subr.bf16.mxu1 %v4705_v18  ;;  %v5414_v45 = vld [vmem:[#allocation30_spill] sm:$0xff] }
 0x712   :  { %3670 = vmatpush1.bf16.msra.mxu0 %v4626_v58  ;;  %3702 = vmatpush1.bf16.msra.mxu1 %v4712_v15  ;;  %v373_v58 = vadd.f32 %v5414_v45, %v4797_v6  ;;  %v2465_v45 = vld [vmem:[#allocation15 + $0x28] sm:$0xff] }
 0x713   :  { %3704 = vmatprep.subr.bf16.mxu0 %v5175_v21 }
 0x7c7   :  { %v2087_v51 = vpop.f32.mrb[24].mxu0  ;;  %v2164_v3 = vpop.f32.mrb[40].mxu1 }
 0x7c8   :  { %v2175_v5 = vadd.f32 %v2087_v51, %v367_v35  ;;  %v2089_v22 = vpop.f32.mrb[25].mxu0  ;;  %v2166_v25 = vpop.f32.mrb[41].mxu1  ;;  %v3823_v59 = vadd.f32 %v2164_v3, %v4805_v2  ;;  %v2462_v51 = vld [vmem:[#allocation15 + $0x10] sm:$0xff]  ;;  %v2463_v3 = vld [vmem:[#allocation15 + $0x18] sm:$0xff] }
 0x7c9   :  { %v2176_v41 = vadd.f32 %v2089_v22, %v369_v49  ;;  %v3824_v18 = vadd.f32 %v2166_v25, %v4807_v8  ;;  %v3707_v25 = vpack.c.bf16 %v2463_v3, %v2462_v51 }
 0x7ca   :  { %v3026_v62 = vmul.f32 -1.442695, %v2175_v5  ;;  %v3028_v15 = vmul.f32 -1.442695, %v3823_v59 }
 0x7cb   :  { %v3027_v17 = vmul.f32 -1.442695, %v2176_v41  ;;  %v2093_v26 = vpop.f32.mrb[26].mxu0  ;;  %v2170_v27 = vpop.f32.mrb[42].mxu1  ;;  %v2464_v41 = vld [vmem:[#allocation15 + $0x20] sm:$0xff] }
 0x7cc   :  { %4087 = vpow2.f32 %v3026_v62  ;;  %v2179_v16 = vadd.f32 %v2093_v26, %v373_v58  ;;  %v2095_v38 = vpop.f32.mrb[27].mxu0  ;;  %v2172_v30 = vpop.f32.mrb[43].mxu1  ;;  %v3825_v14 = vadd.f32 %v2170_v27, %v4805_v2  ;;  %v3711_v1 = vpack.c.bf16 %v2465_v45, %v2464_v41  ;;  %v5416_v26 = vld [vmem:[#allocation37_spill] sm:$0xff] }
 0x7cd   :  { %v2180_v47 = vadd.f32 %v2095_v38, %v375_v13  ;;  %4089 = vpow2.f32 %v3027_v17  ;;  %v3826_v24 = vadd.f32 %v2172_v30, %v4807_v8  ;;  %v2466_v13 = vld [vmem:[#allocation15 + $0x30] sm:$0xff]  ;;  %v2467_v17 = vld [vmem:[#allocation15 + $0x38] sm:$0xff]  ;;  %v2469_v38 = vld [vmem:[#allocation15 + $0x48] sm:$0xff] }
 0x7ce   :  { %v3029_v44 = vmul.f32 -1.442695, %v2179_v16  ;;  %v3031_v31 = vmul.f32 -1.442695, %v3825_v14  ;;  %v3715_v27 = vpack.c.bf16 %v2467_v17, %v2466_v13  ;;  %v2468_v16 = vld [vmem:[#allocation15 + $0x40] sm:$0xff]  ;;  %v2470_v30 = vld [vmem:[#allocation15 + $0x50] sm:$0xff] }
 0x7cf   :  { %v3030_v61 = vmul.f32 -1.442695, %v2180_v47  ;;  %v2471_v47 = vld [vmem:[#allocation15 + $0x58] sm:$0xff] }
 0x7d0   :  { %4091 = vpow2.f32 %v3029_v44  ;;  %v2472_v44 = vld [vmem:[#allocation15 + $0x60] sm:$0xff] }
 0x7d1   :  { %4093 = vpow2.f32 %v3030_v61  ;;  %v2473_v61 = vld [vmem:[#allocation15 + $0x68] sm:$0xff] }
 0x7d2   :  { %4095 = vtanh.f32 %v3824_v18  ;;  %v3727_v59 = vpack.c.bf16 %v2473_v61, %v2472_v44  ;;  %v2474_v18 = vld [vmem:[#allocation15 + $0x70] sm:$0xff] }
 0x7d3   :  { %4097 = vpow2.f32 %v3028_v15  ;;  %v2475_v15 = vld [vmem:[#allocation15 + $0x78] sm:$0xff] }
 0x7d4   :  { %v3731_v14 = vpack.c.bf16 %v2475_v15, %v2474_v18 }
 0x7d6   :  { %v4088_v60 = vpop.eup %4087 }
 0x7d7   :  { %v2201_v53 = vadd.f32 1.0, %v4088_v60  ;;  %v4090_v46 = vpop.eup %4089  ;;  %v5417_v60 = vld [vmem:[#allocation38_spill] sm:$0xff] }
 0x7d8   :  { %v2202_v56 = vadd.f32 1.0, %v4090_v46  ;;  %v5420_v46 = vld [vmem:[#allocation41_spill] sm:$0xff] }
 0x7d9   :  { %4099 = vrcp.f32 %v2201_v53  ;;  %v5419_v53 = vld [vmem:[#allocation40_spill] sm:$0xff] }
 0x7da   :  { %v4092_v40 = vpop.eup %4091  ;;  %4101 = vtanh.f32 %v3826_v24  ;;  %v5418_v24 = vld [vmem:[#allocation39_spill] sm:$0xff] }
 0x7db   :  { %4103 = vrcp.f32 %v2202_v56  ;;  %v2204_v12 = vadd.f32 1.0, %v4092_v40  ;;  %v4094_v33 = vpop.eup %4093  ;;  %v5422_v56 = vld [vmem:[#allocation32_spill] sm:$0xff] }
 0x7dc   :  { %4105 = vpow2.f32 %v3031_v31  ;;  %v2205_v36 = vadd.f32 1.0, %v4094_v33  ;;  %v4096_v29 = vpop.eup %4095  ;;  %v5421_v31 = vld [vmem:[#allocation42_spill] sm:$0xff]  ;;  %v379_v40 = vadd.f32 %v5422_v56, %v4797_v6 }
 0x7dd   :  { %4107 = vrcp.f32 %v2204_v12  ;;  %v4098_v48 = vpop.eup %4097  ;;  %v5423_v12 = vld [vmem:[#allocation33_spill] sm:$0xff] }
 0x7de   :  { %4109 = vrcp.f32 %v2205_v36  ;;  %v2203_v28 = vadd.f32 1.0, %v4098_v48  ;;  %v381_v33 = vadd.f32 %v5423_v12, %v4795_v4 }
 0x7e0   :  { %4111 = vrcp.f32 %v2203_v28 }
 0x7e3   :  { %v4100_v20 = vpop.eup %4099 }
 0x7e4   :  { %v4102_v55 = vpop.eup %4101  ;;  %v2223_v39 = vmul.f32 %v4100_v20, %v4096_v29 }
 0x7e5   :  { %v4104_v54 = vpop.eup %4103 }
 0x7e6   :  { %v4106_v43 = vpop.eup %4105  ;;  %v2221_v11 = vmul.f32 %v4104_v54, %v5126_v32 }
 0x7e7   :  { %v4108_v57 = vpop.eup %4107  ;;  %v2206_v35 = vadd.f32 1.0, %v4106_v43 }
 0x7e8   :  { %v5191_v7 = vadd.f32 %v2223_v39, %v2221_v11  ;;  %v2224_v9 = vmul.f32 %v4108_v57, %v4102_v55  ;;  %v4110_v23 = vpop.eup %4109 }
 0x7e9   :  { %v2222_v37 = vmul.f32 %v4110_v23, %v5130_v10 }
 0x7ea   :  { %4113 = vtanh.f32 %v5191_v7  ;;  %v4112_v5 = vpop.eup %4111 }
 0x7eb   :  { %v5195_v49 = vadd.f32 %v2224_v9, %v2222_v37  ;;  %4115 = vrcp.f32 %v2206_v35 }
 0x7ed   :  { %4117 = vtanh.f32 %v5195_v49 }
 0x7f4   :  { %v4114_v32 = vpop.eup %4113 }
 0x7f5   :  { %v2229_v22 = vmul.f32 %v4114_v32, %v4112_v5  ;;  %v4116_v58 = vpop.eup %4115 }
 0x7f7   :  { %2308 = vmatmul.mubr.f32.vlgmr.msra.gmra.mrb[28].mxu0 %v2229_v22  ;;  %2385 = vmatmul.mubr.f32.vlgmr.msra.gmra.mrb[44].mxu1 %v2229_v22  ;;  %v4118_v62 = vpop.eup %4117 }
 0x7f8   :  { %3706 = vmatpush3.bf16.msra.mxu0 %v5175_v21  ;;  %2313 = vmatprep.mubr.f32.mxu0 %v5405_v0  ;;  %v2230_v10 = vmul.f32 %v4118_v62, %v4116_v58  ;;  %v3719_v21 = vpack.c.bf16 %v2469_v38, %v2468_v16 }
 0x7f9   :  { %2390 = vmatprep.mubr.f32.mxu1 %v5405_v0  ;;  %3708 = vmatprep.subr.bf16.mxu0 %v3707_v25  ;;  %v3723_v0 = vpack.c.bf16 %v2471_v47, %v2470_v30 }
 0x7fb   :  { %2314 = vmatmul.mubr.f32.gmra.mrb[30].mxu0 %v2230_v10  ;;  %2391 = vmatmul.mubr.f32.gmra.mrb[46].mxu1 %v2230_v10 }
 0x7fc   :  { %3710 = vmatpush3.bf16.msra.mxu0 %v3707_v25  ;;  %3103 = vmatprep.mubr.f32.mxu0 %v5416_v26 }
 0x7fd   :  { %3712 = vmatprep.subr.bf16.mxu0 %v3711_v1 }
 0x800   :  { %3714 = vmatpush3.bf16.msra.mxu0 %v3711_v1 }
 0x801   :  { %3716 = vmatprep.subr.bf16.mxu0 %v3715_v27 }
 0x804   :  { %3718 = vmatpush3.bf16.msra.mxu0 %v3715_v27 }
 0x805   :  { %3720 = vmatprep.subr.bf16.mxu0 %v3719_v21 }
 0x808   :  { %3722 = vmatpush3.bf16.msra.mxu0 %v3719_v21 }
 0x809   :  { %3724 = vmatprep.subr.bf16.mxu0 %v3723_v0 }
 0x80c   :  { %3726 = vmatpush3.bf16.msra.mxu0 %v3723_v0 }
 0x80d   :  { %3728 = vmatprep.subr.bf16.mxu0 %v3727_v59 }
 0x810   :  { %3730 = vmatpush3.bf16.msra.mxu0 %v3727_v59 }
 0x811   :  { %3732 = vmatprep.subr.bf16.mxu0 %v3731_v14 }
 0x814   :  { %3734 = vmatpush3.bf16.msra.mxu0 %v3731_v14  ;;  %v4372_v14 = vmov 1983009808  }
 0x817   :  { %3104 = vmatmul.mubr.f32.vlgmr.msra.gmra.mrb[32].mxu0 %v5417_v60  ;;  %v2647_v60 = vunpack.c.l.s4 %v4372_v14 }
 0x818   :  { %3106 = vmatprep.mubr.f32.mxu0 %v5418_v24 }
 0x81b   :  { %3107 = vmatmul.mubr.f32.gmra.mrb[34].mxu0 %v5419_v53 }
 0x81c   :  { %3109 = vmatprep.mubr.f32.mxu0 %v5420_v46 }
 0x81f   :  { %3110 = vmatmul.mubr.f32.gmra.mrb[36].mxu0 %v5421_v31  ;;  %v2648_v31 = vunpack.c.0.s8 %v2647_v60 }
 0x820   :  { %3112 = vmatprep.mubr.f32.mxu0 %v5005_v34 }
 0x823   :  { %3113 = vmatmul.mubr.f32.gmra.mrb[38].mxu0 %v5011_v19 }
 0x824   :  { %3115 = vmatprep.mubr.f32.mxu0 %v5069_v63 }
 0x827   :  { %3116 = vmatmul.mubr.f32.gmra.mrb[40].mxu0 %v5075_v52  ;;  %v5424_v52 = vld [vmem:[#allocation34_spill] sm:$0xff] }
 0x828   :  { %3118 = vmatprep.mubr.f32.mxu0 %v5133_v42  ;;  %v385_v20 = vadd.f32 %v5424_v52, %v4797_v6 }
 0x82b   :  { %3119 = vmatmul.mubr.f32.gmra.mrb[42].mxu0 %v5139_v50  ;;  %v5425_v50 = vld [vmem:[#allocation35_spill] sm:$0xff] }
 0x82c   :  { %3121 = vmatprep.mubr.f32.mxu0 %v2229_v22  ;;  %v387_v55 = vadd.f32 %v5425_v50, %v4795_v4 }
 0x82f   :  { %3122 = vmatmul.mubr.f32.gmra.mrb[44].mxu0 %v2230_v10 }
 0x8ca   :  { %v2309_v36 = vpop.f32.mrb[28].mxu0  ;;  %v2386_v34 = vpop.f32.mrb[44].mxu1 }
 0x8cb   :  { %v2397_v29 = vadd.f32 %v2309_v36, %v379_v40  ;;  %v2311_v19 = vpop.f32.mrb[29].mxu0  ;;  %v2388_v48 = vpop.f32.mrb[45].mxu1  ;;  %v3827_v37 = vadd.f32 %v2386_v34, %v4805_v2 }
 0x8cc   :  { %v2398_v63 = vadd.f32 %v2311_v19, %v381_v33  ;;  %v3828_v6 = vadd.f32 %v2388_v48, %v4807_v8  ;;  %v5426_v19 = vld [vmem:[#allocation36_spill] sm:$0xff] }
 0x8cd   :  { %v3032_v42 = vmul.f32 -1.442695, %v2397_v29  ;;  %v3034_v51 = vmul.f32 -1.442695, %v3827_v37  ;;  %v5237_v48 = vsub.s32 %v2648_v31, %v5426_v19 }
 0x8ce   :  { %v3033_v39 = vmul.f32 -1.442695, %v2398_v63  ;;  %v2315_v54 = vpop.f32.mrb[30].mxu0  ;;  %v2392_v28 = vpop.f32.mrb[46].mxu1 }
 0x8cf   :  { %4119 = vpow2.f32 %v3032_v42  ;;  %v2401_v43 = vadd.f32 %v2315_v54, %v385_v20  ;;  %v2317_v11 = vpop.f32.mrb[31].mxu0  ;;  %v2394_v57 = vpop.f32.mrb[47].mxu1  ;;  %v3829_v4 = vadd.f32 %v2392_v28, %v4805_v2 }
 0x8d0   :  { %v2402_v9 = vadd.f32 %v2317_v11, %v387_v55  ;;  %4121 = vpow2.f32 %v3033_v39  ;;  %v3830_v5 = vadd.f32 %v2394_v57, %v4807_v8 }
 0x8d1   :  { %v3035_v23 = vmul.f32 -1.442695, %v2401_v43  ;;  %v3037_v25 = vmul.f32 -1.442695, %v3829_v4 }
 0x8d2   :  { %v3036_v35 = vmul.f32 -1.442695, %v2402_v9 }
 0x8d3   :  { %4123 = vpow2.f32 %v3035_v23 }
 0x8d4   :  { %4125 = vpow2.f32 %v3036_v35 }
 0x8d5   :  { %4127 = vtanh.f32 %v3828_v6 }
 0x8d6   :  { %4129 = vpow2.f32 %v3034_v51 }
 0x8d9   :  { %v4120_v3 = vpop.eup %4119 }
 0x8da   :  { %v2423_v32 = vadd.f32 1.0, %v4120_v3  ;;  %v4122_v22 = vpop.eup %4121 }
 0x8db   :  { %v2424_v41 = vadd.f32 1.0, %v4122_v22 }
 0x8dc   :  { %4131 = vrcp.f32 %v2423_v32 }
 0x8dd   :  { %v4124_v45 = vpop.eup %4123  ;;  %4133 = vtanh.f32 %v3830_v5 }
 0x8de   :  { %4135 = vrcp.f32 %v2424_v41  ;;  %v2426_v58 = vadd.f32 1.0, %v4124_v45  ;;  %v4126_v62 = vpop.eup %4125 }
 0x8df   :  { %4137 = vpow2.f32 %v3037_v25  ;;  %v2427_v10 = vadd.f32 1.0, %v4126_v62  ;;  %v4128_v2 = vpop.eup %4127 }
 0x8e0   :  { %4139 = vrcp.f32 %v2426_v58  ;;  %v4130_v1 = vpop.eup %4129 }
 0x8e1   :  { %4141 = vrcp.f32 %v2427_v10  ;;  %v2425_v27 = vadd.f32 1.0, %v4130_v1 }
 0x8e3   :  { %4143 = vrcp.f32 %v2425_v27 }
 0x8e6   :  { %v4132_v13 = vpop.eup %4131 }
 0x8e7   :  { %v4134_v8 = vpop.eup %4133  ;;  %v2445_v17 = vmul.f32 %v4132_v13, %v4128_v2 }
 0x8e8   :  { %v4136_v26 = vpop.eup %4135 }
 0x8e9   :  { %v4138_v16 = vpop.eup %4137  ;;  %v2443_v38 = vmul.f32 %v4136_v26, %v5191_v7  ;;  %v5230_v7 = vld [vmem:[%s5380_s7] ss:$0 sm:$0xff]  ;;  %s4373_s7 = smov [#allocation18]  }
 0x8ea   :  { %v4140_v21 = vpop.eup %4139  ;;  %v3105_v30 = vpop.f32.mrb[32].mxu0  ;;  %v2428_v59 = vadd.f32 1.0, %v4138_v16  ;;  %s2956_s12 = sshll.u32 %s4373_s7, 4  ;;  %s2957_s12 = int_to_ptr.vmem [resolvable:$true] %s2956_s12 }
 0x8eb   :  { %v2447_v47 = vadd.f32 %v2445_v17, %v2443_v38  ;;  %v2446_v0 = vmul.f32 %v4140_v21, %v4134_v8  ;;  %v2565_v44 = vpop.f32.mrb[33].mxu0  ;;  %v4142_v61 = vpop.eup %4141  ;;  %v2571_v56 = vadd.f32 %v3105_v30, %v5230_v7  ;;  %s4283_s13 = scalar_lea.vmem %s2957_s12, 256  ;;  %p4288_p7 = scmp.lt.s32.totalorder %s2957_s12, %s2957_s12 }
 0x8ec   :  { %v2444_v18 = vmul.f32 %v4142_v61, %v5195_v49  ;;  %v2566_v12 = vadd.f32 %v5230_v7, %v2565_v44  ;;  %p4284_p6 = scmp.ne.s32.totalorder %s2957_s12, %s4283_s13  ;;  %p4289_p8 = scmp.lt.s32.totalorder %s4283_s13, %s4283_s13 }
 0x8ed   :  { %2937 = vst [vmem:[#allocation20] sm:$0xff] %v2447_v47  ;;  %4145 = vtanh.f32 %v2447_v47  ;;  %v4144_v29 = vpop.eup %4143 }
 0x8ee   :  { %v3108_v15 = vpop.f32.mrb[34].mxu0  ;;  %v2448_v24 = vadd.f32 %v2446_v0, %v2444_v18  ;;  %4147 = vrcp.f32 %v2428_v59  ;;  %p4290_p9 = por %p4289_p8, %p4288_p7 }
 0x8ef   :  { %v2575_v53 = vpop.f32.mrb[35].mxu0  ;;  %v2581_v50 = vadd.f32 %v3108_v15, %v5230_v7 }
 0x8f0   :  { %2938 = vst [vmem:[#allocation20 + $0x8] sm:$0xff] %v2448_v24  ;;  %4149 = vtanh.f32 %v2448_v24  ;;  %v2576_v54 = vadd.f32 %v5230_v7, %v2575_v53  ;;  %p4291_p10 = pnand %p4290_p9, %p4284_p6 }
 0x8f2   :  { %v3111_v46 = vpop.f32.mrb[36].mxu0 }
 0x8f3   :  { %v2591_v49 = vadd.f32 %v3111_v46, %v5230_v7  ;;  %v2585_v40 = vpop.f32.mrb[37].mxu0 }
 0x8f4   :  { %v2586_v33 = vadd.f32 %v5230_v7, %v2585_v40 }
 0x8f5   :  { %v2780_v36 = vcombine.low %v2571_v56, %v2591_v49  ;;  %v2781_v34 = vcombine.high %v2571_v56, %v2591_v49 }
 0x8f6   :  { %v2644_v63 = vcombine.low %v2566_v12, %v2586_v33  ;;  %v2645_v52 = vcombine.high %v2566_v12, %v2586_v33  ;;  %v3114_v20 = vpop.f32.mrb[38].mxu0 }
 0x8f7   :  { %v4146_v42 = vpop.eup %4145  ;;  %v2601_v55 = vadd.f32 %v3114_v20, %v5230_v7  ;;  %v2595_v39 = vpop.f32.mrb[39].mxu0  ;;  %v5244_v23 = vrot.slane %v2780_v36, %v5237_v48  ;;  %v5247_v4 = vrot.slane %v2781_v34, %v5237_v48 }
 0x8f8   :  { %v2596_v28 = vadd.f32 %v5230_v7, %v2595_v39  ;;  %v2451_v43 = vmul.f32 %v4146_v42, %v4144_v29  ;;  %v4148_v9 = vpop.eup %4147  ;;  %v5250_v3 = vrot.slane %v2644_v63, %v5237_v48  ;;  %v5259_v25 = vrot.slane %v2645_v52, %v5237_v48 }
 0x8f9   :  { %v2796_v11 = vcombine.low %v2581_v50, %v2601_v55  ;;  %v2797_v57 = vcombine.high %v2581_v50, %v2601_v55 }
 0x8fa   :  { %v2660_v35 = vcombine.low %v2576_v54, %v2596_v28  ;;  %v2661_v37 = vcombine.high %v2576_v54, %v2596_v28  ;;  %v3117_v6 = vpop.f32.mrb[40].mxu0  ;;  %3124 = vmatprep.mubr.f32.mxu0 %v2451_v43  ;;  %2935 = vst [vmem:[#allocation18] sm:$0xff] %v2451_v43  ;;  %v4150_v51 = vpop.eup %4149 }
 0x8fb   :  { %v5253_v5 = vrot.slane %v2796_v11, %v5237_v48  ;;  %v5256_v32 = vrot.slane %v2797_v57, %v5237_v48  ;;  %v2605_v22 = vpop.f32.mrb[41].mxu0  ;;  %v2452_v58 = vmul.f32 %v4150_v51, %v4148_v9  ;;  %v5284_v21 = vadd.f32 %v3117_v6, %v5230_v7 }
 0x8fc   :  { %v5262_v41 = vrot.slane %v2660_v35, %v5237_v48  ;;  %v5265_v45 = vrot.slane %v2661_v37, %v5237_v48  ;;  %v5290_v0 = vadd.f32 %v5230_v7, %v2605_v22 }
 0x8fd   :  { %v2844_v62 = vcombine.low %v5244_v23, %v5253_v5  ;;  %v2845_v10 = vcombine.high %v5244_v23, %v5253_v5  ;;  %v2860_v2 = vcombine.low %v5247_v4, %v5256_v32  ;;  %v2861_v1 = vcombine.high %v5247_v4, %v5256_v32  ;;  %3125 = vmatmul.mubr.f32.gmra.mrb[46].mxu0 %v2452_v58 }
 0x8fe   :  { %v2708_v13 = vcombine.low %v5250_v3, %v5262_v41  ;;  %v2709_v8 = vcombine.high %v5250_v3, %v5262_v41  ;;  %v2724_v17 = vcombine.low %v5259_v25, %v5265_v45  ;;  %v2725_v26 = vcombine.high %v5259_v25, %v5265_v45  ;;  %v3120_v27 = vpop.f32.mrb[42].mxu0  ;;  %2936 = vst [vmem:[#allocation18 + $0x8] sm:$0xff] %v2452_v58 }
 0x8ff   :  { %v2615_v16 = vpop.f32.mrb[43].mxu0 }
 0x902   :  { %v3123_v38 = vpop.f32.mrb[44].mxu0 }
 0x903   :  { %v5287_v30 = vadd.f32 %v3123_v38, %v5230_v7  ;;  %v2625_v47 = vpop.f32.mrb[45].mxu0 }
 0x904   :  { %v5293_v44 = vadd.f32 %v5230_v7, %v2625_v47 }
 0x905   :  { %v2812_v61 = vcombine.low %v5284_v21, %v5287_v30  ;;  %v2813_v59 = vcombine.high %v5284_v21, %v5287_v30 }
 0x906   :  { %v2676_v18 = vcombine.low %v5290_v0, %v5293_v44  ;;  %v2677_v15 = vcombine.high %v5290_v0, %v5293_v44 }
 0x907   :  { %4294 = shalt.err (!%p4291_p10)
}
 0x908   :  { %s4295_s1 = scalar_lea.hbm %s5382_s9, 256 }
 0x909   :  { %p4296_p11 = scmp.ne.s32.totalorder %s5382_s9, %s4295_s1  ;;  %p4299_p12 = scmp.lt.u32.totalorder %s4295_s1, %s5382_s9 }
 0x90b   :  { %p4301_p13 = pnand %p4299_p12, %p4296_p11 }
 0x90d   :  { %4304 = shalt.err (!%p4301_p13)
}
 0x90e   :  { %2962 = dma.vmem_to_hbm [thread:$0]  %s2957_s12, 256, %s5382_s9, [#allocation19], %s4366_s3, %s4366_s3, %s4367_s28  }
 0x90f   :  { %s4374_s20 = smov [#allocation20]  }
 0x910   :  { %s2968_s21 = sshll.u32 %s4374_s20, 4  ;;  %s2969_s21 = int_to_ptr.vmem [resolvable:$true] %s2968_s21 }
 0x911   :  { %s4305_s22 = scalar_lea.vmem %s2969_s21, 256  ;;  %p4310_p1 = scmp.lt.s32.totalorder %s2969_s21, %s2969_s21 }
 0x912   :  { %p4306_p0 = scmp.ne.s32.totalorder %s2969_s21, %s4305_s22  ;;  %p4311_p2 = scmp.lt.s32.totalorder %s4305_s22, %s4305_s22 }
 0x914   :  { %p4312_p3 = por %p4311_p2, %p4310_p1 }
 0x916   :  { %p4313_p4 = pnand %p4312_p3, %p4306_p0 }
 0x918   :  { %4316 = shalt.err (!%p4313_p4)
}
 0x919   :  { %s4317_s30 = scalar_lea.hbm %s5383_s10, 256 }
 0x91a   :  { %p4318_p5 = scmp.ne.s32.totalorder %s5383_s10, %s4317_s30  ;;  %p4321_p6 = scmp.lt.u32.totalorder %s4317_s30, %s5383_s10 }
 0x91c   :  { %p4323_p7 = pnand %p4321_p6, %p4318_p5 }
 0x91e   :  { %4326 = shalt.err (!%p4323_p7)
}
 0x91f   :  { %2974 = dma.vmem_to_hbm [thread:$0]  %s2969_s21, 256, %s5383_s10, [#allocation19], %s4366_s3, %s4366_s3, %s4367_s28   ;;  %v4375_v14 = vmov 1934713408   ;;  %v2621_v49 = vadd.f32 %v3120_v27, %v5230_v7  ;;  %v2616_v34 = vadd.f32 %v5230_v7, %v2615_v16  ;;  %v2820_v39 = vrot.slane %v2812_v61, %v5237_v48 }
 0x920   :  { %v2711_v60 = vunpack.c.l.s4 %v4375_v14  ;;  %v2827_v54 = vrot.slane %v2813_v59, %v5237_v48  ;;  %v2684_v11 = vrot.slane %v2676_v18, %v5237_v48  ;;  %v2691_v57 = vrot.slane %v2677_v15, %v5237_v48  ;;  %s4376_s10 = smov [#allocation17]  }
 0x921   :  { %s2944_s29 = sshll.u32 %s4376_s10, 4  ;;  %s2945_s29 = int_to_ptr.vmem [resolvable:$true] %s2944_s29 }
 0x922   :  { %v2712_v24 = vunpack.c.0.s8 %v2711_v60  ;;  %s4327_s5 = scalar_lea.vmem %s2945_s29, 2048  ;;  %p4332_p9 = scmp.lt.s32.totalorder %s2945_s29, %s2945_s29 }
 0x923   :  { %p4328_p8 = scmp.ne.s32.totalorder %s2945_s29, %s4327_s5  ;;  %p4333_p10 = scmp.lt.s32.totalorder %s4327_s5, %s4327_s5 }
 0x924   :  { %v2715_v53 = vsub.s32 %v2712_v24, %v5426_v19 }
 0x925   :  { %p4334_p11 = por %p4333_p10, %p4332_p9 }
 0x926   :  { %v2852_v31 = vrot.slane %v2844_v62, %v2715_v53  ;;  %v2859_v56 = vrot.slane %v2845_v10, %v2715_v53  ;;  %v2868_v33 = vrot.slane %v2860_v2, %v2715_v53  ;;  %v2875_v36 = vrot.slane %v2861_v1, %v2715_v53 }
 0x927   :  { %v2716_v63 = vrot.slane %v2708_v13, %v2715_v53  ;;  %v2723_v19 = vrot.slane %v2709_v8, %v2715_v53  ;;  %v2732_v42 = vrot.slane %v2724_v17, %v2715_v53  ;;  %v2739_v50 = vrot.slane %v2725_v26, %v2715_v53  ;;  %p4335_p12 = pnand %p4334_p11, %p4328_p8 }
 0x9d0   :  { %v3126_v46 = vpop.f32.mrb[46].mxu0 }
 0x9d1   :  { %v2641_v40 = vadd.f32 %v3126_v46, %v5230_v7  ;;  %v2635_v12 = vpop.f32.mrb[47].mxu0 }
 0x9d2   :  { %v2636_v29 = vadd.f32 %v5230_v7, %v2635_v12 }
 0x9d3   :  { %v2828_v52 = vcombine.low %v2621_v49, %v2641_v40  ;;  %v2829_v20 = vcombine.high %v2621_v49, %v2641_v40 }
 0x9d4   :  { %v2692_v55 = vcombine.low %v2616_v34, %v2636_v29  ;;  %v2693_v7 = vcombine.high %v2616_v34, %v2636_v29 }
 0x9d5   :  { %v2836_v28 = vrot.slane %v2828_v52, %v5237_v48  ;;  %v2843_v43 = vrot.slane %v2829_v20, %v5237_v48 }
 0x9d6   :  { %v2700_v9 = vrot.slane %v2692_v55, %v5237_v48  ;;  %v2707_v23 = vrot.slane %v2693_v7, %v5237_v48 }
 0x9d7   :  { %v2876_v35 = vcombine.low %v2820_v39, %v2836_v28  ;;  %v2877_v37 = vcombine.high %v2820_v39, %v2836_v28  ;;  %v2892_v6 = vcombine.low %v2827_v54, %v2843_v43  ;;  %v2893_v51 = vcombine.high %v2827_v54, %v2843_v43 }
 0x9d8   :  { %v2740_v4 = vcombine.low %v2684_v11, %v2700_v9  ;;  %v2741_v3 = vcombine.high %v2684_v11, %v2700_v9  ;;  %v2756_v5 = vcombine.low %v2691_v57, %v2707_v23  ;;  %v2757_v32 = vcombine.high %v2691_v57, %v2707_v23 }
 0x9d9   :  { %v2884_v22 = vrot.slane %v2876_v35, %v2715_v53  ;;  %v2891_v25 = vrot.slane %v2877_v37, %v2715_v53  ;;  %v2900_v41 = vrot.slane %v2892_v6, %v2715_v53  ;;  %v2907_v45 = vrot.slane %v2893_v51, %v2715_v53 }
 0x9da   :  { %v2748_v58 = vrot.slane %v2740_v4, %v2715_v53  ;;  %v2755_v62 = vrot.slane %v2741_v3, %v2715_v53  ;;  %v2764_v10 = vrot.slane %v2756_v5, %v2715_v53  ;;  %v2771_v2 = vrot.slane %v2757_v32, %v2715_v53 }
 0x9db   :  { %v2908_v1 = vcombine.low %v2852_v31, %v2884_v22  ;;  %v2909_v13 = vcombine.high %v2852_v31, %v2884_v22  ;;  %v2910_v8 = vcombine.low %v2859_v56, %v2891_v25  ;;  %v2911_v48 = vcombine.high %v2859_v56, %v2891_v25 }
 0x9dc   :  { %v2912_v17 = vcombine.low %v2868_v33, %v2900_v41  ;;  %v2913_v26 = vcombine.high %v2868_v33, %v2900_v41  ;;  %v2914_v27 = vcombine.low %v2875_v36, %v2907_v45  ;;  %v2915_v16 = vcombine.high %v2875_v36, %v2907_v45 }
 0x9dd   :  { %2924 = vst [vmem:[#allocation17 + $0x40] sm:$0xff] %v2908_v1  ;;  %2925 = vst [vmem:[#allocation17 + $0x48] sm:$0xff] %v2909_v13  ;;  %v2772_v38 = vcombine.low %v2716_v63, %v2748_v58  ;;  %v2773_v21 = vcombine.high %v2716_v63, %v2748_v58  ;;  %v2774_v30 = vcombine.low %v2723_v19, %v2755_v62 }
 0x9de   :  { %2926 = vst [vmem:[#allocation17 + $0x50] sm:$0xff] %v2910_v8  ;;  %2927 = vst [vmem:[#allocation17 + $0x58] sm:$0xff] %v2911_v48  ;;  %v2775_v47 = vcombine.high %v2723_v19, %v2755_v62  ;;  %v2776_v0 = vcombine.low %v2732_v42, %v2764_v10  ;;  %v2777_v44 = vcombine.high %v2732_v42, %v2764_v10 }
 0x9df   :  { %2928 = vst [vmem:[#allocation17 + $0x60] sm:$0xff] %v2912_v17  ;;  %2929 = vst [vmem:[#allocation17 + $0x68] sm:$0xff] %v2913_v26  ;;  %v2778_v61 = vcombine.low %v2739_v50, %v2771_v2  ;;  %v2779_v59 = vcombine.high %v2739_v50, %v2771_v2 }
 0x9e0   :  { %2930 = vst [vmem:[#allocation17 + $0x70] sm:$0xff] %v2914_v27  ;;  %2931 = vst [vmem:[#allocation17 + $0x78] sm:$0xff] %v2915_v16 }
 0x9e1   :  { %2916 = vst [vmem:[#allocation17] sm:$0xff] %v2772_v38  ;;  %2917 = vst [vmem:[#allocation17 + $0x8] sm:$0xff] %v2773_v21 }
 0x9e2   :  { %2918 = vst [vmem:[#allocation17 + $0x10] sm:$0xff] %v2774_v30  ;;  %2919 = vst [vmem:[#allocation17 + $0x18] sm:$0xff] %v2775_v47 }
 0x9e3   :  { %2920 = vst [vmem:[#allocation17 + $0x20] sm:$0xff] %v2776_v0  ;;  %2921 = vst [vmem:[#allocation17 + $0x28] sm:$0xff] %v2777_v44 }
 0x9e4   :  { %2922 = vst [vmem:[#allocation17 + $0x30] sm:$0xff] %v2778_v61  ;;  %2923 = vst [vmem:[#allocation17 + $0x38] sm:$0xff] %v2779_v59 }
 0x9e5   :  { %4338 = shalt.err (!%p4335_p12)
}
 0x9e6   :  { %s4339_s12 = scalar_lea.hbm %s5381_s8, 2048 }
 0x9e7   :  { %p4340_p13 = scmp.ne.s32.totalorder %s5381_s8, %s4339_s12  ;;  %p4343_p0 = scmp.lt.u32.totalorder %s4339_s12, %s5381_s8 }
 0x9e9   :  { %p4345_p1 = pnand %p4343_p0, %p4340_p13 }
 0x9eb   :  { %4348 = shalt.err (!%p4345_p1)
}
 0x9ec   :  { %2950 = dma.vmem_to_hbm [thread:$0]  %s2945_s29, 2048, %s5381_s8, [#allocation8], %s4366_s3, %s4366_s3, %s4367_s28  }
 0x9ed   :  { %4357 = dma.done.wait [#allocation8], 2048  }
 0x9ee   :  { %4358 = vsyncadd [#allocation8], 4294965248 }
 0x9ef   :  { %4359 = dma.done.wait [#allocation19], 512  }
 0x9f0   :  { %4360 = vsyncadd [#allocation19], 4294966784 }
 0x9f1   :  { %2984 = vsyncpa [#allocation7], 1 }
 0x9f2   :  { %2985 = vsyncpa [#allocation10], 1 }
 0x9f3   :  { %2986 = vsyncpa [#allocation13], 1 }
 0x9f4   :  { %2987 = vsyncpa [#allocation16], 1 }
 0x9f5   :  { %2988 = vsyncpa [#allocation8], 1 }
 0x9f6   :  { %2989 = vsyncpa [#allocation19], 1 }

// kernel: tpu_custom_call.1
= control target key start
LH: loop header
LB: loop body
LE: loop exit
PB: predicated region body
PF: predicated region fallthrough
CT: control target
= control target key end

     0   :  { %16 = vsyncpa [#allocation7], 0  ;;  %s5011_s0 = inlined_call_operand.hbm [shape: f32[8,16,128], index: 0, kind: input, shape index: {}]   ;;  %s5012_s1 = inlined_call_operand.hbm [shape: f32[128,512], index: 1, kind: input, shape index: {}]   ;;  %s5013_s2 = inlined_call_operand.hbm [shape: f32[128,512], index: 2, kind: input, shape index: {}]   ;;  %s5014_s3 = inlined_call_operand.hbm [shape: f32[1,512], index: 3, kind: input, shape index: {}]   ;;  %s5015_s4 = inlined_call_operand.hbm [shape: f32[16,128], index: 4, kind: input, shape index: {}]   ;;  %s5016_s5 = inlined_call_operand.vmem [shape: f32[16,128], index: 5, kind: input, shape index: {}]   ;;  %s5017_s6 = inlined_call_operand.hbm [shape: f32[128,128], index: 6, kind: input, shape index: {}]   ;;  %s5018_s7 = inlined_call_operand.vmem [shape: f32[1,128], index: 7, kind: input, shape index: {}]   ;;  %s5019_s8 = inlined_call_operand.hbm [shape: f32[8,16,128], index: 8, kind: output, shape index: {0}]   ;;  %s5020_s9 = inlined_call_operand.hbm [shape: f32[16,128], index: 9, kind: output, shape index: {1}]   ;;  %s5021_s10 = inlined_call_operand.hbm [shape: f32[16,128], index: 10, kind: output, shape index: {2}]  }
   0x1   :  { %17 = vsyncpa [#allocation10], 0 }
   0x2   :  { %18 = vsyncpa [#allocation13], 0 }
   0x3   :  { %19 = vsyncpa [#allocation16], 0 }
   0x4   :  { %20 = vsyncpa [#allocation8], 0 }
   0x5   :  { %21 = vsyncpa [#allocation19], 0  ;;  %s4087_s13 = smov [#allocation9]   ;;  %s3877_s17 = scalar_lea.hbm %s5012_s1, 8192 }
   0x6   :  { %s39_s14 = sshll.u32 %s4087_s13, 4  ;;  %p3878_p0 = scmp.ne.s32.totalorder %s5012_s1, %s3877_s17  ;;  %s40_s14 = int_to_ptr.vmem [resolvable:$true] %s39_s14 }
   0x7   :  { %p3881_p1 = scmp.lt.u32.totalorder %s3877_s17, %s5012_s1 }
   0x9   :  { %p3883_p2 = pnand %p3881_p1, %p3878_p0 }
   0xb   :  { %3886 = shalt.err (!%p3883_p2)
}
   0xc   :  { %s3887_s22 = scalar_lea.vmem %s40_s14, 8192  ;;  %p3892_p4 = scmp.lt.s32.totalorder %s40_s14, %s40_s14 }
   0xd   :  { %p3888_p3 = scmp.ne.s32.totalorder %s40_s14, %s3887_s22  ;;  %p3893_p5 = scmp.lt.s32.totalorder %s3887_s22, %s3887_s22 }
   0xf   :  { %p3894_p6 = por %p3893_p5, %p3892_p4 }
  0x11   :  { %p3895_p7 = pnand %p3894_p6, %p3888_p3 }
  0x13   :  { %3898 = shalt.err (!%p3895_p7)
}
  0x14   :  { %s4088_s23 = smov 512   ;;  %s4089_s24 = smov 32  }
  0x15   :  { %45 = dma.hbm_to_vmem [thread:$0]  %s5012_s1, 8192, %s40_s14, [#allocation10], %s4088_s23, %s4088_s23, %s4089_s24  }
  0x16   :  { %s4090_s27 = smov [#allocation12]   ;;  %s4091_s29 = smov [#allocation6]  }
  0x17   :  { %s64_s28 = sshll.u32 %s4090_s27, 4  ;;  %s27_s30 = sshll.u32 %s4091_s29, 4  ;;  %s65_s28 = int_to_ptr.vmem [resolvable:$true] %s64_s28  ;;  %s28_s30 = int_to_ptr.vmem [resolvable:$true] %s27_s30 }
  0x18   :  { %s3899_s13 = scalar_lea.hbm %s5014_s3, 64 }
  0x19   :  { %p3900_p8 = scmp.ne.s32.totalorder %s5014_s3, %s3899_s13  ;;  %p3903_p9 = scmp.lt.u32.totalorder %s3899_s13, %s5014_s3 }
  0x1b   :  { %p3905_p10 = pnand %p3903_p9, %p3900_p8 }
  0x1d   :  { %3908 = shalt.err (!%p3905_p10)
}
  0x1e   :  { %s3909_s1 = scalar_lea.vmem %s65_s28, 64  ;;  %p3914_p12 = scmp.lt.s32.totalorder %s65_s28, %s65_s28 }
  0x1f   :  { %p3910_p11 = scmp.ne.s32.totalorder %s65_s28, %s3909_s1  ;;  %p3915_p13 = scmp.lt.s32.totalorder %s3909_s1, %s3909_s1 }
  0x21   :  { %p3916_p0 = por %p3915_p13, %p3914_p12 }
  0x23   :  { %p3917_p1 = pnand %p3916_p0, %p3910_p11 }
  0x25   :  { %3920 = shalt.err (!%p3917_p1)
}
  0x26   :  { %67 = dma.hbm_to_vmem [thread:$0]  %s5014_s3, 64, %s65_s28, [#allocation13]  }
  0x27   :  { %s3921_s22 = scalar_lea.hbm %s5011_s0, 2048 }
  0x28   :  { %p3922_p2 = scmp.ne.s32.totalorder %s5011_s0, %s3921_s22  ;;  %p3925_p3 = scmp.lt.u32.totalorder %s3921_s22, %s5011_s0 }
  0x2a   :  { %p3927_p4 = pnand %p3925_p3, %p3922_p2 }
  0x2c   :  { %3930 = shalt.err (!%p3927_p4)
}
  0x2d   :  { %s3931_s11 = scalar_lea.vmem %s28_s30, 2048  ;;  %p3936_p6 = scmp.lt.s32.totalorder %s28_s30, %s28_s30 }
  0x2e   :  { %p3932_p5 = scmp.ne.s32.totalorder %s28_s30, %s3931_s11  ;;  %p3937_p7 = scmp.lt.s32.totalorder %s3931_s11, %s3931_s11 }
  0x30   :  { %p3938_p8 = por %p3937_p7, %p3936_p6 }
  0x32   :  { %p3939_p9 = pnand %p3938_p8, %p3932_p5 }
  0x34   :  { %3942 = shalt.err (!%p3939_p9)
}
  0x35   :  { %s4092_s3 = smov 128   ;;  %s4093_s28 = smov 8  }
  0x36   :  { %33 = dma.hbm_to_vmem [thread:$0]  %s5011_s0, 2048, %s28_s30, [#allocation7], %s4092_s3, %s4092_s3, %s4093_s28  }
  0x37   :  { %s4094_s15 = smov [#allocation11]   ;;  %s4095_s17 = smov [#allocation14]  }
  0x38   :  { %s51_s16 = sshll.u32 %s4094_s15, 4  ;;  %s73_s18 = sshll.u32 %s4095_s17, 4  ;;  %s52_s16 = int_to_ptr.vmem [resolvable:$true] %s51_s16  ;;  %s74_s18 = int_to_ptr.vmem [resolvable:$true] %s73_s18 }
  0x39   :  { %s3943_s19 = scalar_lea.hbm %s5013_s2, 8192 }
  0x3a   :  { %p3944_p10 = scmp.ne.s32.totalorder %s5013_s2, %s3943_s19  ;;  %p3947_p11 = scmp.lt.u32.totalorder %s3943_s19, %s5013_s2 }
  0x3c   :  { %p3949_p12 = pnand %p3947_p11, %p3944_p10 }
  0x3e   :  { %3952 = shalt.err (!%p3949_p12)
}
  0x3f   :  { %s3953_s0 = scalar_lea.vmem %s52_s16, 8192  ;;  %p3958_p0 = scmp.lt.s32.totalorder %s52_s16, %s52_s16 }
  0x40   :  { %p3954_p13 = scmp.ne.s32.totalorder %s52_s16, %s3953_s0  ;;  %p3959_p1 = scmp.lt.s32.totalorder %s3953_s0, %s3953_s0 }
  0x42   :  { %p3960_p2 = por %p3959_p1, %p3958_p0 }
  0x44   :  { %p3961_p3 = pnand %p3960_p2, %p3954_p13 }
  0x46   :  { %3964 = shalt.err (!%p3961_p3)
}
  0x47   :  { %57 = dma.hbm_to_vmem [thread:$0]  %s5013_s2, 8192, %s52_s16, [#allocation10], %s4088_s23, %s4088_s23, %s4089_s24  }
  0x48   :  { %s3965_s11 = scalar_lea.hbm %s5015_s4, 256 }
  0x49   :  { %p3966_p4 = scmp.ne.s32.totalorder %s5015_s4, %s3965_s11  ;;  %p3969_p5 = scmp.lt.u32.totalorder %s3965_s11, %s5015_s4 }
  0x4b   :  { %p3971_p6 = pnand %p3969_p5, %p3966_p4 }
  0x4d   :  { %3974 = shalt.err (!%p3971_p6)
}
  0x4e   :  { %s3975_s1 = scalar_lea.vmem %s74_s18, 256  ;;  %p3980_p8 = scmp.lt.s32.totalorder %s74_s18, %s74_s18 }
  0x4f   :  { %p3976_p7 = scmp.ne.s32.totalorder %s74_s18, %s3975_s1  ;;  %p3981_p9 = scmp.lt.s32.totalorder %s3975_s1, %s3975_s1 }
  0x51   :  { %p3982_p10 = por %p3981_p9, %p3980_p8 }
  0x53   :  { %p3983_p11 = pnand %p3982_p10, %p3976_p7 }
  0x55   :  { %3986 = shalt.err (!%p3983_p11)
}
  0x56   :  { %79 = dma.hbm_to_vmem [thread:$0]  %s5015_s4, 256, %s74_s18, [#allocation13], %s4092_s3, %s4092_s3, %s4093_s28  }
  0x57   :  { %s4096_s24 = smov [#allocation15]   ;;  %s3987_s20 = scalar_lea.hbm %s5017_s6, 2048 }
  0x58   :  { %s87_s16 = sshll.u32 %s4096_s24, 4  ;;  %p3988_p12 = scmp.ne.s32.totalorder %s5017_s6, %s3987_s20  ;;  %s88_s16 = int_to_ptr.vmem [resolvable:$true] %s87_s16 }
  0x59   :  { %p3991_p13 = scmp.lt.u32.totalorder %s3987_s20, %s5017_s6 }
  0x5b   :  { %p3993_p0 = pnand %p3991_p13, %p3988_p12 }
  0x5d   :  { %3996 = shalt.err (!%p3993_p0)
}
  0x5e   :  { %s3997_s30 = scalar_lea.vmem %s88_s16, 2048  ;;  %p4002_p2 = scmp.lt.s32.totalorder %s88_s16, %s88_s16 }
  0x5f   :  { %p3998_p1 = scmp.ne.s32.totalorder %s88_s16, %s3997_s30  ;;  %p4003_p3 = scmp.lt.s32.totalorder %s3997_s30, %s3997_s30 }
  0x61   :  { %p4004_p4 = por %p4003_p3, %p4002_p2 }
  0x63   :  { %p4005_p5 = pnand %p4004_p4, %p3998_p1 }
  0x65   :  { %4008 = shalt.err (!%p4005_p5)
}
  0x66   :  { %93 = dma.hbm_to_vmem [thread:$0]  %s5017_s6, 2048, %s88_s16, [#allocation16], %s4092_s3, %s4092_s3, %s4093_s28  }
  0x67   :  { %4075 = dma.done.wait [#allocation7], 2048  }
  0x68   :  { %4076 = vsyncadd [#allocation7], 4294965248 }
  0x69   :  { %4077 = dma.done.wait [#allocation10], 16384  }
  0x6a   :  { %4078 = vsyncadd [#allocation10], 4294950912 }
  0x6b   :  { %4079 = dma.done.wait [#allocation13], 320  }
  0x6c   :  { %4080 = vsyncadd [#allocation13], 4294966976 }
  0x6d   :  { %4081 = dma.done.wait [#allocation16], 2048  }
  0x6e   :  { %4082 = vsyncadd [#allocation16], 4294965248  ;;  %v5022_v0 = vmov 0.0   ;;  %v143_v1 = vld [vmem:[#allocation9 + $0x8] sm:$0xff]  ;;  %v142_v3 = vld [vmem:[#allocation9] sm:$0xff] }
  0x6f   :  { %340 = vmatprep.mubr.f32.mxu1 %v5022_v0  ;;  %292 = vmatprep.mubr.f32.mxu0 %v5022_v0  ;;  %v147_v2 = vld [vmem:[#allocation9 + $0x28] sm:$0xff]  ;;  %v146_v5 = vld [vmem:[#allocation9 + $0x20] sm:$0xff]  ;;  %v145_v48 = vld [vmem:[#allocation9 + $0x18] sm:$0xff] }
  0x70   :  { %v2855_v4 = vpack.c.bf16 %v147_v2, %v143_v1  ;;  %v151_v6 = vld [vmem:[#allocation9 + $0x48] sm:$0xff]  ;;  %v2857_v8 = vpack.c.bf16 %v146_v5, %v142_v3  ;;  %v150_v10 = vld [vmem:[#allocation9 + $0x40] sm:$0xff]  ;;  %v149_v49 = vld [vmem:[#allocation9 + $0x38] sm:$0xff] }
  0x71   :  { %v155_v7 = vld [vmem:[#allocation9 + $0x68] sm:$0xff]  ;;  %v154_v11 = vld [vmem:[#allocation9 + $0x60] sm:$0xff]  ;;  %v2887_v53 = vpack.c.bf16 %v149_v49, %v145_v48  ;;  %v144_v54 = vld [vmem:[#allocation9 + $0x10] sm:$0xff] }
  0x72   :  { %v2859_v9 = vpack.c.bf16 %v155_v7, %v151_v6  ;;  %v159_v12 = vld [vmem:[#allocation9 + $0x88] sm:$0xff]  ;;  %3463 = vmatprep.subr.bf16.mxu1 %v2855_v4  ;;  %2856 = vmatprep.subr.bf16.mxu0 %v2855_v4  ;;  %v2861_v14 = vpack.c.bf16 %v154_v11, %v150_v10  ;;  %v158_v16 = vld [vmem:[#allocation9 + $0x80] sm:$0xff]  ;;  %v148_v55 = vld [vmem:[#allocation9 + $0x30] sm:$0xff] }
  0x73   :  { %v163_v13 = vld [vmem:[#allocation9 + $0xa8] sm:$0xff]  ;;  %3471 = vmatpush1.bf16.msra.mxu1 %v2857_v8  ;;  %2858 = vmatpush1.bf16.msra.mxu0 %v2857_v8  ;;  %v162_v17 = vld [vmem:[#allocation9 + $0xa0] sm:$0xff]  ;;  %v153_v56 = vld [vmem:[#allocation9 + $0x58] sm:$0xff]  ;;  %v2889_v1 = vpack.c.bf16 %v148_v55, %v144_v54 }
  0x74   :  { %3464 = vmatprep.subr.bf16.mxu1 %v2859_v9  ;;  %v2863_v15 = vpack.c.bf16 %v163_v13, %v159_v12  ;;  %2860 = vmatprep.subr.bf16.mxu0 %v2859_v9  ;;  %v167_v18 = vld [vmem:[#allocation9 + $0xc8] sm:$0xff]  ;;  %v2865_v20 = vpack.c.bf16 %v162_v17, %v158_v16  ;;  %v166_v22 = vld [vmem:[#allocation9 + $0xc0] sm:$0xff]  ;;  %v157_v58 = vld [vmem:[#allocation9 + $0x78] sm:$0xff] }
  0x75   :  { %v171_v19 = vld [vmem:[#allocation9 + $0xe8] sm:$0xff]  ;;  %v170_v23 = vld [vmem:[#allocation9 + $0xe0] sm:$0xff]  ;;  %v2891_v3 = vpack.c.bf16 %v157_v58, %v153_v56  ;;  %v152_v4 = vld [vmem:[#allocation9 + $0x50] sm:$0xff] }
  0x76   :  { %v2867_v21 = vpack.c.bf16 %v171_v19, %v167_v18  ;;  %v175_v24 = vld [vmem:[#allocation9 + $0x108] sm:$0xff]  ;;  %v2869_v26 = vpack.c.bf16 %v170_v23, %v166_v22  ;;  %v174_v28 = vld [vmem:[#allocation9 + $0x100] sm:$0xff]  ;;  %v156_v5 = vld [vmem:[#allocation9 + $0x70] sm:$0xff] }
  0x77   :  { %3472 = vmatpush1.bf16.msra.mxu1 %v2861_v14  ;;  %2862 = vmatpush1.bf16.msra.mxu0 %v2861_v14  ;;  %v179_v25 = vld [vmem:[#allocation9 + $0x128] sm:$0xff]  ;;  %v178_v29 = vld [vmem:[#allocation9 + $0x120] sm:$0xff]  ;;  %v161_v6 = vld [vmem:[#allocation9 + $0x98] sm:$0xff] }
  0x78   :  { %3465 = vmatprep.subr.bf16.mxu1 %v2863_v15  ;;  %2864 = vmatprep.subr.bf16.mxu0 %v2863_v15  ;;  %v2871_v27 = vpack.c.bf16 %v179_v25, %v175_v24  ;;  %v183_v30 = vld [vmem:[#allocation9 + $0x148] sm:$0xff]  ;;  %v2873_v32 = vpack.c.bf16 %v178_v29, %v174_v28  ;;  %v182_v34 = vld [vmem:[#allocation9 + $0x140] sm:$0xff]  ;;  %v165_v8 = vld [vmem:[#allocation9 + $0xb8] sm:$0xff]  ;;  %v2893_v15 = vpack.c.bf16 %v156_v5, %v152_v4 }
  0x79   :  { %v187_v31 = vld [vmem:[#allocation9 + $0x168] sm:$0xff]  ;;  %v186_v35 = vld [vmem:[#allocation9 + $0x160] sm:$0xff]  ;;  %v2895_v17 = vpack.c.bf16 %v165_v8, %v161_v6  ;;  %v160_v18 = vld [vmem:[#allocation9 + $0x90] sm:$0xff] }
  0x7a   :  { %v2875_v33 = vpack.c.bf16 %v187_v31, %v183_v30  ;;  %v191_v36 = vld [vmem:[#allocation9 + $0x188] sm:$0xff]  ;;  %v2877_v38 = vpack.c.bf16 %v186_v35, %v182_v34  ;;  %v190_v40 = vld [vmem:[#allocation9 + $0x180] sm:$0xff]  ;;  %v164_v19 = vld [vmem:[#allocation9 + $0xb0] sm:$0xff] }
  0x7b   :  { %3473 = vmatpush1.bf16.msra.mxu1 %v2865_v20  ;;  %2866 = vmatpush1.bf16.msra.mxu0 %v2865_v20  ;;  %v195_v37 = vld [vmem:[#allocation9 + $0x1a8] sm:$0xff]  ;;  %v194_v41 = vld [vmem:[#allocation9 + $0x1a0] sm:$0xff]  ;;  %v169_v20 = vld [vmem:[#allocation9 + $0xd8] sm:$0xff]  ;;  %v2897_v29 = vpack.c.bf16 %v164_v19, %v160_v18 }
  0x7c   :  { %3466 = vmatprep.subr.bf16.mxu1 %v2867_v21  ;;  %2868 = vmatprep.subr.bf16.mxu0 %v2867_v21  ;;  %v2879_v39 = vpack.c.bf16 %v195_v37, %v191_v36  ;;  %v199_v42 = vld [vmem:[#allocation9 + $0x1c8] sm:$0xff]  ;;  %v2881_v44 = vpack.c.bf16 %v194_v41, %v190_v40  ;;  %v198_v46 = vld [vmem:[#allocation9 + $0x1c0] sm:$0xff]  ;;  %v173_v22 = vld [vmem:[#allocation9 + $0xf8] sm:$0xff] }
  0x7d   :  { %v203_v43 = vld [vmem:[#allocation9 + $0x1e8] sm:$0xff]  ;;  %v202_v47 = vld [vmem:[#allocation9 + $0x1e0] sm:$0xff]  ;;  %v4273_v28 = vld [vmem:[#allocation6 + $0x50] sm:$0xff]  ;;  %v2899_v31 = vpack.c.bf16 %v173_v22, %v169_v20 }
  0x7e   :  { %v2883_v45 = vpack.c.bf16 %v203_v43, %v199_v42  ;;  %v615_v50 = vld [vmem:[#allocation11 + $0x8] sm:$0xff]  ;;  %v2885_v52 = vpack.c.bf16 %v202_v47, %v198_v46  ;;  %v614_v59 = vld [vmem:[#allocation11] sm:$0xff]  ;;  %v4275_v30 = vld [vmem:[#allocation6 + $0x10] sm:$0xff] }
  0x7f   :  { %3474 = vmatpush1.bf16.msra.mxu1 %v2869_v26  ;;  %2870 = vmatpush1.bf16.msra.mxu0 %v2869_v26  ;;  %v619_v51 = vld [vmem:[#allocation11 + $0x28] sm:$0xff]  ;;  %v618_v60 = vld [vmem:[#allocation11 + $0x20] sm:$0xff]  ;;  %v177_v34 = vld [vmem:[#allocation9 + $0x118] sm:$0xff] }
  0x80   :  { %3467 = vmatprep.subr.bf16.mxu1 %v2871_v27  ;;  %2872 = vmatprep.subr.bf16.mxu0 %v2871_v27  ;;  %v4245_v57 = vpack.c.bf16 %v619_v51, %v615_v50  ;;  %v623_v61 = vld [vmem:[#allocation11 + $0x48] sm:$0xff]  ;;  %v4247_v63 = vld [vmem:[#allocation6 + $0x40] sm:$0xff]  ;;  %v4252_v7 = vpack.c.bf16 %v618_v60, %v614_v59  ;;  %v181_v36 = vld [vmem:[#allocation9 + $0x138] sm:$0xff] }
  0x81   :  { %v627_v62 = vld [vmem:[#allocation11 + $0x68] sm:$0xff]  ;;  %v4249_v2 = vld [vmem:[#allocation6] sm:$0xff]  ;;  %v4287_v42 = vld [vmem:[#allocation6 + $0x58] sm:$0xff] }
  0x82   :  { %v4254_v9 = vpack.c.bf16 %v627_v62, %v623_v61  ;;  %v622_v10 = vld [vmem:[#allocation11 + $0x40] sm:$0xff]  ;;  %v631_v12 = vld [vmem:[#allocation11 + $0x88] sm:$0xff]  ;;  %v176_v46 = vld [vmem:[#allocation9 + $0x110] sm:$0xff] }
  0x83   :  { %3475 = vmatpush1.bf16.msra.mxu1 %v2873_v32  ;;  %2874 = vmatpush1.bf16.msra.mxu0 %v2873_v32  ;;  %v626_v11 = vld [vmem:[#allocation11 + $0x60] sm:$0xff]  ;;  %v635_v13 = vld [vmem:[#allocation11 + $0xa8] sm:$0xff]  ;;  %v168_v32 = vld [vmem:[#allocation9 + $0xd0] sm:$0xff] }
  0x84   :  { %3468 = vmatprep.subr.bf16.mxu1 %v2875_v33  ;;  %2876 = vmatprep.subr.bf16.mxu0 %v2875_v33  ;;  %v4259_v14 = vld [vmem:[#allocation6 + $0x48] sm:$0xff]  ;;  %v4264_v21 = vpack.c.bf16 %v626_v11, %v622_v10  ;;  %v4268_v23 = vpack.c.bf16 %v635_v13, %v631_v12  ;;  %v630_v24 = vld [vmem:[#allocation11 + $0x80] sm:$0xff]  ;;  %v172_v33 = vld [vmem:[#allocation9 + $0xf0] sm:$0xff] }
  0x85   :  { %v4261_v16 = vld [vmem:[#allocation6 + $0x8] sm:$0xff]  ;;  %v634_v25 = vld [vmem:[#allocation11 + $0xa0] sm:$0xff]  ;;  %v2901_v43 = vpack.c.bf16 %v172_v33, %v168_v32  ;;  %v180_v47 = vld [vmem:[#allocation9 + $0x130] sm:$0xff] }
  0x86   :  { %v639_v26 = vld [vmem:[#allocation11 + $0xc8] sm:$0xff]  ;;  %v4278_v35 = vpack.c.bf16 %v634_v25, %v630_v24  ;;  %v185_v48 = vld [vmem:[#allocation9 + $0x158] sm:$0xff]  ;;  %v4301_v56 = vld [vmem:[#allocation6 + $0x60] sm:$0xff]  ;;  %v2905_v58 = vpack.c.bf16 %v180_v47, %v176_v46 }
  0x87   :  { %3476 = vmatpush1.bf16.msra.mxu1 %v2877_v38  ;;  %2878 = vmatpush1.bf16.msra.mxu0 %v2877_v38  ;;  %v643_v27 = vld [vmem:[#allocation11 + $0xe8] sm:$0xff]  ;;  %v638_v38 = vld [vmem:[#allocation11 + $0xc0] sm:$0xff]  ;;  %v189_v50 = vld [vmem:[#allocation9 + $0x178] sm:$0xff] }
  0x88   :  { %3469 = vmatprep.subr.bf16.mxu1 %v2879_v39  ;;  %2880 = vmatprep.subr.bf16.mxu0 %v2879_v39  ;;  %v4282_v37 = vpack.c.bf16 %v643_v27, %v639_v26  ;;  %v642_v39 = vld [vmem:[#allocation11 + $0xe0] sm:$0xff]  ;;  %v647_v40 = vld [vmem:[#allocation11 + $0x108] sm:$0xff]  ;;  %v2907_v60 = vpack.c.bf16 %v189_v50, %v185_v48  ;;  %v184_v61 = vld [vmem:[#allocation9 + $0x150] sm:$0xff] }
  0x89   :  { %v651_v41 = vld [vmem:[#allocation11 + $0x128] sm:$0xff]  ;;  %v4292_v49 = vpack.c.bf16 %v642_v39, %v638_v38  ;;  %v4303_v59 = vld [vmem:[#allocation6 + $0x20] sm:$0xff]  ;;  %v188_v62 = vld [vmem:[#allocation9 + $0x170] sm:$0xff] }
  0x8a   :  { %v4296_v51 = vpack.c.bf16 %v651_v41, %v647_v40  ;;  %v655_v54 = vld [vmem:[#allocation11 + $0x148] sm:$0xff]  ;;  %v197_v4 = vld [vmem:[#allocation9 + $0x1b8] sm:$0xff]  ;;  %v654_v6 = vld [vmem:[#allocation11 + $0x140] sm:$0xff]  ;;  %v2909_v13 = vpack.c.bf16 %v188_v62, %v184_v61 }
  0x8b   :  { %3477 = vmatpush1.bf16.msra.mxu1 %v2881_v44  ;;  %2882 = vmatpush1.bf16.msra.mxu0 %v2881_v44  ;;  %v4289_v44 = vld [vmem:[#allocation6 + $0x18] sm:$0xff]  ;;  %v659_v55 = vld [vmem:[#allocation11 + $0x168] sm:$0xff]  ;;  %v658_v8 = vld [vmem:[#allocation11 + $0x160] sm:$0xff] }
  0x8c   :  { %3470 = vmatprep.subr.bf16.mxu1 %v2883_v45  ;;  %2884 = vmatprep.subr.bf16.mxu0 %v2883_v45  ;;  %v2903_v45 = vpack.c.bf16 %v181_v36, %v177_v34  ;;  %v4310_v5 = vpack.c.bf16 %v659_v55, %v655_v54  ;;  %v663_v10 = vld [vmem:[#allocation11 + $0x188] sm:$0xff]  ;;  %v192_v18 = vld [vmem:[#allocation9 + $0x190] sm:$0xff]  ;;  %v201_v20 = vld [vmem:[#allocation9 + $0x1d8] sm:$0xff]  ;;  %v4320_v22 = vpack.c.bf16 %v658_v8, %v654_v6 }
  0x8d   :  { %v667_v11 = vld [vmem:[#allocation11 + $0x1a8] sm:$0xff]  ;;  %v196_v19 = vld [vmem:[#allocation9 + $0x1b0] sm:$0xff]  ;;  %v205_v24 = vld [vmem:[#allocation9 + $0x1f8] sm:$0xff] }
  0x8e   :  { %v4315_v12 = vld [vmem:[#allocation6 + $0x68] sm:$0xff]  ;;  %v4324_v25 = vpack.c.bf16 %v667_v11, %v663_v10  ;;  %v662_v26 = vld [vmem:[#allocation11 + $0x180] sm:$0xff]  ;;  %v4329_v32 = vld [vmem:[#allocation6 + $0x70] sm:$0xff]  ;;  %v2913_v33 = vpack.c.bf16 %v196_v19, %v192_v18  ;;  %v2915_v36 = vpack.c.bf16 %v205_v24, %v201_v20 }
  0x8f   :  { %3478 = vmatpush1.bf16.msra.mxu1 %v2885_v52  ;;  %2886 = vmatpush1.bf16.msra.mxu0 %v2885_v52  ;;  %v646_v52 = vld [vmem:[#allocation11 + $0x100] sm:$0xff]  ;;  %v4331_v34 = vld [vmem:[#allocation6 + $0x30] sm:$0xff]  ;;  %v617_v40 = vld [vmem:[#allocation11 + $0x18] sm:$0xff] }
  0x90   :  { %2888 = vmatprep.subr.bf16.mxu1 %v2887_v53  ;;  %2920 = vmatprep.subr.bf16.mxu0 %v4245_v57  ;;  %v650_v53 = vld [vmem:[#allocation11 + $0x120] sm:$0xff]  ;;  %v200_v38 = vld [vmem:[#allocation9 + $0x1d0] sm:$0xff]  ;;  %v4343_v48 = vld [vmem:[#allocation6 + $0x78] sm:$0xff] }
  0x91   :  { %v666_v27 = vld [vmem:[#allocation11 + $0x1a0] sm:$0xff]  ;;  %v204_v39 = vld [vmem:[#allocation9 + $0x1f0] sm:$0xff]  ;;  %v629_v61 = vld [vmem:[#allocation11 + $0x78] sm:$0xff] }
  0x92   :  { %341 = vmatmul.mubr.f32.vlgmr.msra.gmra.mrb[0].mxu1 %v4247_v63  ;;  %293 = vmatmul.mubr.f32.vlgmr.msra.gmra.mrb[0].mxu0 %v4249_v2  ;;  %v4334_v41 = vpack.c.bf16 %v666_v27, %v662_v26  ;;  %v670_v46 = vld [vmem:[#allocation11 + $0x1c0] sm:$0xff]  ;;  %v2917_v50 = vpack.c.bf16 %v204_v39, %v200_v38  ;;  %v616_v54 = vld [vmem:[#allocation11 + $0x10] sm:$0xff]  ;;  %v633_v8 = vld [vmem:[#allocation11 + $0x98] sm:$0xff] }
  0x93   :  { %2890 = vmatpush1.bf16.msra.mxu1 %v2889_v1  ;;  %346 = vmatprep.mubr.f32.mxu1 %v5022_v0  ;;  %v193_v1 = vld [vmem:[#allocation9 + $0x198] sm:$0xff]  ;;  %v674_v47 = vld [vmem:[#allocation11 + $0x1e0] sm:$0xff]  ;;  %v620_v55 = vld [vmem:[#allocation11 + $0x30] sm:$0xff] }
  0x94   :  { %2892 = vmatprep.subr.bf16.mxu1 %v2891_v3  ;;  %2922 = vmatpush1.bf16.msra.mxu0 %v4252_v7  ;;  %v4306_v3 = vpack.c.bf16 %v650_v53, %v646_v52  ;;  %v4345_v52 = vld [vmem:[#allocation6 + $0x38] sm:$0xff]  ;;  %v4357_v62 = vpack.c.bf16 %v620_v55, %v616_v54  ;;  %v628_v6 = vld [vmem:[#allocation11 + $0x70] sm:$0xff]  ;;  %v4364_v11 = vld [vmem:[#allocation14] sm:$0xff] }
  0x95   :  { %298 = vmatprep.mubr.f32.mxu0 %v5022_v0  ;;  %2924 = vmatprep.subr.bf16.mxu0 %v4254_v9  ;;  %v637_v10 = vld [vmem:[#allocation11 + $0xb8] sm:$0xff]  ;;  %v632_v18 = vld [vmem:[#allocation11 + $0x90] sm:$0xff] }
  0x96   :  { %347 = vmatmul.mubr.f32.gmra.mrb[2].mxu1 %v4259_v14  ;;  %299 = vmatmul.mubr.f32.gmra.mrb[2].mxu0 %v4261_v16  ;;  %v636_v19 = vld [vmem:[#allocation11 + $0xb0] sm:$0xff]  ;;  %v641_v24 = vld [vmem:[#allocation11 + $0xd8] sm:$0xff] }
  0x97   :  { %2894 = vmatpush1.bf16.msra.mxu1 %v2893_v15  ;;  %352 = vmatprep.mubr.f32.mxu1 %v5022_v0  ;;  %v4317_v15 = vld [vmem:[#allocation6 + $0x28] sm:$0xff]  ;;  %v4384_v26 = vpack.c.bf16 %v636_v19, %v632_v18  ;;  %v648_v39 = vld [vmem:[#allocation11 + $0x110] sm:$0xff]  ;;  %v665_v55 = vld [vmem:[#allocation11 + $0x198] sm:$0xff] }
  0x98   :  { %2896 = vmatprep.subr.bf16.mxu1 %v2895_v17  ;;  %2926 = vmatpush1.bf16.msra.mxu0 %v4264_v21  ;;  %v2911_v17 = vpack.c.bf16 %v197_v4, %v193_v1  ;;  %v624_v4 = vld [vmem:[#allocation11 + $0x50] sm:$0xff] }
  0x99   :  { %304 = vmatprep.mubr.f32.mxu0 %v5022_v0  ;;  %2928 = vmatprep.subr.bf16.mxu0 %v4268_v23  ;;  %v4377_v20 = vld [vmem:[#allocation14 + $0x8] sm:$0xff] }
  0x9a   :  { %353 = vmatmul.mubr.f32.gmra.mrb[4].mxu1 %v4273_v28  ;;  %305 = vmatmul.mubr.f32.gmra.mrb[4].mxu0 %v4275_v30  ;;  %v660_v54 = vld [vmem:[#allocation11 + $0x170] sm:$0xff] }
  0x9b   :  { %2898 = vmatpush1.bf16.msra.mxu1 %v2897_v29  ;;  %358 = vmatprep.mubr.f32.mxu1 %v5022_v0  ;;  %v671_v29 = vld [vmem:[#allocation11 + $0x1c8] sm:$0xff]  ;;  %v672_v19 = vld [vmem:[#allocation11 + $0x1d0] sm:$0xff] }
  0x9c   :  { %2900 = vmatprep.subr.bf16.mxu1 %v2899_v31  ;;  %2930 = vmatpush1.bf16.msra.mxu0 %v4278_v35  ;;  %v675_v31 = vld [vmem:[#allocation11 + $0x1e8] sm:$0xff] }
  0x9d   :  { %310 = vmatprep.mubr.f32.mxu0 %v5022_v0  ;;  %2932 = vmatprep.subr.bf16.mxu0 %v4282_v37 }
  0x9e   :  { %359 = vmatmul.mubr.f32.gmra.mrb[6].mxu1 %v4287_v42  ;;  %311 = vmatmul.mubr.f32.gmra.mrb[6].mxu0 %v4289_v44 }
  0x9f   :  { %2902 = vmatpush1.bf16.msra.mxu1 %v2901_v43  ;;  %364 = vmatprep.mubr.f32.mxu1 %v5022_v0  ;;  %v621_v43 = vld [vmem:[#allocation11 + $0x38] sm:$0xff] }
  0xa0   :  { %2904 = vmatprep.subr.bf16.mxu1 %v2903_v45  ;;  %2934 = vmatpush1.bf16.msra.mxu0 %v4292_v49  ;;  %v4338_v45 = vpack.c.bf16 %v675_v31, %v671_v29  ;;  %v4347_v53 = vpack.c.bf16 %v621_v43, %v617_v40  ;;  %v640_v29 = vld [vmem:[#allocation11 + $0xd0] sm:$0xff]  ;;  %v657_v43 = vld [vmem:[#allocation11 + $0x158] sm:$0xff] }
  0xa1   :  { %316 = vmatprep.mubr.f32.mxu0 %v5022_v0  ;;  %2936 = vmatprep.subr.bf16.mxu0 %v4296_v51  ;;  %v644_v31 = vld [vmem:[#allocation11 + $0xf0] sm:$0xff] }
  0xa2   :  { %365 = vmatmul.mubr.f32.gmra.mrb[8].mxu1 %v4301_v56  ;;  %317 = vmatmul.mubr.f32.gmra.mrb[8].mxu0 %v4303_v59  ;;  %v652_v40 = vld [vmem:[#allocation11 + $0x130] sm:$0xff] }
  0xa3   :  { %2906 = vmatpush1.bf16.msra.mxu1 %v2905_v58  ;;  %370 = vmatprep.mubr.f32.mxu1 %v5022_v0  ;;  %v4350_v58 = vpack.c.bf16 %v674_v47, %v670_v46  ;;  %v661_v46 = vld [vmem:[#allocation11 + $0x178] sm:$0xff] }
  0xa4   :  { %2908 = vmatprep.subr.bf16.mxu1 %v2907_v60  ;;  %2938 = vmatpush1.bf16.msra.mxu0 %v4306_v3  ;;  %v625_v60 = vld [vmem:[#allocation11 + $0x58] sm:$0xff]  ;;  %v4409_v47 = vpack.c.bf16 %v661_v46, %v657_v43  ;;  %v208_v46 = vlaneseq }
  0xa5   :  { %322 = vmatprep.mubr.f32.mxu0 %v5022_v0  ;;  %2940 = vmatprep.subr.bf16.mxu0 %v4310_v5  ;;  %v4360_v1 = vpack.c.bf16 %v629_v61, %v625_v60  ;;  %v669_v60 = vld [vmem:[#allocation11 + $0x1b8] sm:$0xff] }
  0xa6   :  { %371 = vmatmul.mubr.f32.gmra.mrb[10].mxu1 %v4315_v12  ;;  %323 = vmatmul.mubr.f32.gmra.mrb[10].mxu0 %v4317_v15  ;;  %v4419_v61 = vpack.c.bf16 %v669_v60, %v665_v55  ;;  %v206_v55 = vld [vmem:[#allocation12] sm:$0xf] }
  0xa7   :  { %2910 = vmatpush1.bf16.msra.mxu1 %v2909_v13  ;;  %376 = vmatprep.mubr.f32.mxu1 %v5022_v0  ;;  %v4370_v13 = vpack.c.bf16 %v628_v6, %v624_v4  ;;  %v664_v4 = vld [vmem:[#allocation11 + $0x190] sm:$0xff] }
  0xa8   :  { %2912 = vmatprep.subr.bf16.mxu1 %v2911_v17  ;;  %2942 = vmatpush1.bf16.msra.mxu0 %v4320_v22  ;;  %v4373_v17 = vpack.c.bf16 %v637_v10, %v633_v8  ;;  %v668_v6 = vld [vmem:[#allocation11 + $0x1b0] sm:$0xff]  ;;  %v673_v8 = vld [vmem:[#allocation11 + $0x1d8] sm:$0xff] }
  0xa9   :  { %328 = vmatprep.mubr.f32.mxu0 %v5022_v0  ;;  %2944 = vmatprep.subr.bf16.mxu0 %v4324_v25  ;;  %v677_v10 = vld [vmem:[#allocation11 + $0x1f8] sm:$0xff] }
  0xaa   :  { %377 = vmatmul.mubr.f32.gmra.mrb[12].mxu1 %v4329_v32  ;;  %329 = vmatmul.mubr.f32.gmra.mrb[12].mxu0 %v4331_v34  ;;  %v4429_v18 = vpack.c.bf16 %v677_v10, %v673_v8 }
  0xab   :  { %2914 = vmatpush1.bf16.msra.mxu1 %v2913_v33  ;;  %382 = vmatprep.mubr.f32.mxu1 %v5022_v0  ;;  %v649_v33 = vld [vmem:[#allocation11 + $0x118] sm:$0xff] }
  0xac   :  { %2916 = vmatprep.subr.bf16.mxu1 %v2915_v36  ;;  %2946 = vmatpush1.bf16.msra.mxu0 %v4334_v41  ;;  %v653_v36 = vld [vmem:[#allocation11 + $0x138] sm:$0xff] }
  0xad   :  { %334 = vmatprep.mubr.f32.mxu0 %v5022_v0  ;;  %2948 = vmatprep.subr.bf16.mxu0 %v4338_v45  ;;  %v4399_v38 = vpack.c.bf16 %v653_v36, %v649_v33 }
  0xae   :  { %383 = vmatmul.mubr.f32.gmra.mrb[14].mxu1 %v4343_v48  ;;  %335 = vmatmul.mubr.f32.gmra.mrb[14].mxu0 %v4345_v52 }
  0xaf   :  { %2918 = vmatpush1.bf16.msra.mxu1 %v2917_v50  ;;  %453 = vmatprep.mubr.f32.mxu1 %v5022_v0  ;;  %v656_v50 = vld [vmem:[#allocation11 + $0x150] sm:$0xff] }
  0xb0   :  { %2952 = vmatprep.subr.bf16.mxu1 %v4347_v53  ;;  %2950 = vmatpush1.bf16.msra.mxu0 %v4350_v58 }
  0xb1   :  { %754 = vmatprep.mubr.f32.mxu0 %v5022_v0  ;;  %2984 = vmatprep.subr.bf16.mxu0 %v4245_v57 }
  0xb2   :  { %454 = vmatmul.mubr.f32.vlgmr.msra.gmra.mrb[16].mxu1 %v4249_v2  ;;  %v645_v2 = vld [vmem:[#allocation11 + $0xf8] sm:$0xff] }
  0xb3   :  { %2954 = vmatpush1.bf16.msra.mxu1 %v4357_v62  ;;  %459 = vmatprep.mubr.f32.mxu1 %v5022_v0  ;;  %v4388_v27 = vpack.c.bf16 %v645_v2, %v641_v24  ;;  %v676_v24 = vld [vmem:[#allocation11 + $0x1f0] sm:$0xff] }
  0xb4   :  { %2956 = vmatprep.subr.bf16.mxu1 %v4360_v1  ;;  %755 = vmatmul.mubr.f32.vlgmr.msra.gmra.mrb[0].mxu0 %v4364_v11 }
  0xb5   :  { %760 = vmatprep.mubr.f32.mxu0 %v5022_v0  ;;  %2986 = vmatpush1.bf16.msra.mxu0 %v4252_v7 }
  0xb6   :  { %460 = vmatmul.mubr.f32.gmra.mrb[18].mxu1 %v4261_v16  ;;  %2988 = vmatprep.subr.bf16.mxu0 %v4254_v9  ;;  %v4396_v16 = vpack.c.bf16 %v644_v31, %v640_v29 }
  0xb7   :  { %465 = vmatprep.mubr.f32.mxu1 %v5022_v0  ;;  %2958 = vmatpush1.bf16.msra.mxu1 %v4370_v13 }
  0xb8   :  { %2960 = vmatprep.subr.bf16.mxu1 %v4373_v17  ;;  %761 = vmatmul.mubr.f32.gmra.mrb[2].mxu0 %v4377_v20 }
  0xb9   :  { %2990 = vmatpush1.bf16.msra.mxu0 %v4264_v21  ;;  %975 = vmatprep.mubr.f32.mxu0 %v5022_v0 }
  0xba   :  { %466 = vmatmul.mubr.f32.gmra.mrb[20].mxu1 %v4275_v30  ;;  %2992 = vmatprep.subr.bf16.mxu0 %v4268_v23  ;;  %v4406_v30 = vpack.c.bf16 %v652_v40, %v648_v39 }
  0xbb   :  { %471 = vmatprep.mubr.f32.mxu1 %v5022_v0  ;;  %2962 = vmatpush1.bf16.msra.mxu1 %v4384_v26 }
  0xbc   :  { %2964 = vmatprep.subr.bf16.mxu1 %v4388_v27 }
  0xbd   :  { %2994 = vmatpush1.bf16.msra.mxu0 %v4278_v35 }
  0xbe   :  { %472 = vmatmul.mubr.f32.gmra.mrb[22].mxu1 %v4289_v44  ;;  %2996 = vmatprep.subr.bf16.mxu0 %v4282_v37  ;;  %v4416_v44 = vpack.c.bf16 %v660_v54, %v656_v50  ;;  %v209_v50 = vshrl.u32 %v208_v46, 7 }
  0xbf   :  { %477 = vmatprep.mubr.f32.mxu1 %v5022_v0  ;;  %2966 = vmatpush1.bf16.msra.mxu1 %v4396_v16 }
  0xc0   :  { %2968 = vmatprep.subr.bf16.mxu1 %v4399_v38  ;;  %v214_v54 = vsub.s32 1, %v209_v50  ;;  %v210_v60 = vsub.s32 0, %v209_v50 }
  0xc1   :  { %2998 = vmatpush1.bf16.msra.mxu0 %v4292_v49 }
  0xc2   :  { %478 = vmatmul.mubr.f32.gmra.mrb[24].mxu1 %v4303_v59  ;;  %3000 = vmatprep.subr.bf16.mxu0 %v4296_v51  ;;  %v4426_v59 = vpack.c.bf16 %v668_v6, %v664_v4  ;;  %v4515_v4 = vrot.slane %v206_v55, %v214_v54  ;;  %v4517_v6 = vrot.slane %v206_v55, %v210_v60  ;;  %v218_v54 = vsub.s32 2, %v209_v50 }
  0xc3   :  { %483 = vmatprep.mubr.f32.mxu1 %v5022_v0  ;;  %2970 = vmatpush1.bf16.msra.mxu1 %v4406_v30 }
  0xc4   :  { %2972 = vmatprep.subr.bf16.mxu1 %v4409_v47 }
  0xc5   :  { %3002 = vmatpush1.bf16.msra.mxu0 %v4306_v3 }
  0xc6   :  { %484 = vmatmul.mubr.f32.gmra.mrb[26].mxu1 %v4317_v15  ;;  %3004 = vmatprep.subr.bf16.mxu0 %v4310_v5  ;;  %v4436_v15 = vpack.c.bf16 %v676_v24, %v672_v19 }
  0xc7   :  { %489 = vmatprep.mubr.f32.mxu1 %v5022_v0  ;;  %2974 = vmatpush1.bf16.msra.mxu1 %v4416_v44 }
  0xc8   :  { %2976 = vmatprep.subr.bf16.mxu1 %v4419_v61 }
  0xc9   :  { %3006 = vmatpush1.bf16.msra.mxu0 %v4320_v22 }
  0xca   :  { %490 = vmatmul.mubr.f32.gmra.mrb[28].mxu1 %v4331_v34  ;;  %3008 = vmatprep.subr.bf16.mxu0 %v4324_v25 }
  0xcb   :  { %495 = vmatprep.mubr.f32.mxu1 %v5022_v0  ;;  %2978 = vmatpush1.bf16.msra.mxu1 %v4426_v59 }
  0xcc   :  { %2980 = vmatprep.subr.bf16.mxu1 %v4429_v18 }
  0xcd   :  { %3010 = vmatpush1.bf16.msra.mxu0 %v4334_v41 }
  0xce   :  { %496 = vmatmul.mubr.f32.gmra.mrb[30].mxu1 %v4345_v52  ;;  %3012 = vmatprep.subr.bf16.mxu0 %v4338_v45 }
  0xcf   :  { %501 = vmatprep.mubr.f32.mxu1 %v5022_v0  ;;  %2982 = vmatpush1.bf16.msra.mxu1 %v4436_v15 }
  0xd0   :  { %3016 = vmatprep.subr.bf16.mxu1 %v4347_v53 }
  0xd1   :  { %3014 = vmatpush1.bf16.msra.mxu0 %v4350_v58 }
  0xd2   :  { %502 = vmatmul.mubr.f32.gmra.mrb[32].mxu1 %v4247_v63  ;;  %3048 = vmatprep.subr.bf16.mxu0 %v4245_v57 }
  0xd3   :  { %507 = vmatprep.mubr.f32.mxu1 %v5022_v0 }
  0xd6   :  { %508 = vmatmul.mubr.f32.gmra.mrb[34].mxu1 %v4259_v14 }
  0xd7   :  { %513 = vmatprep.mubr.f32.mxu1 %v5022_v0 }
  0xda   :  { %514 = vmatmul.mubr.f32.gmra.mrb[36].mxu1 %v4273_v28 }
  0xdb   :  { %519 = vmatprep.mubr.f32.mxu1 %v5022_v0 }
  0xde   :  { %520 = vmatmul.mubr.f32.gmra.mrb[38].mxu1 %v4287_v42 }
  0xdf   :  { %525 = vmatprep.mubr.f32.mxu1 %v5022_v0 }
  0xe2   :  { %526 = vmatmul.mubr.f32.gmra.mrb[40].mxu1 %v4301_v56 }
  0xe3   :  { %531 = vmatprep.mubr.f32.mxu1 %v5022_v0 }
  0xe6   :  { %532 = vmatmul.mubr.f32.gmra.mrb[42].mxu1 %v4315_v12 }
  0xe7   :  { %537 = vmatprep.mubr.f32.mxu1 %v5022_v0 }
  0xea   :  { %538 = vmatmul.mubr.f32.gmra.mrb[44].mxu1 %v4329_v32 }
  0xeb   :  { %543 = vmatprep.mubr.f32.mxu1 %v5022_v0 }
  0xee   :  { %544 = vmatmul.mubr.f32.gmra.mrb[46].mxu1 %v4343_v48 }
  0xef   :  { %831 = vmatprep.mubr.f32.mxu1 %v5022_v0 }
  0xf2   :  { %832 = vmatmul.mubr.f32.vlgmr.msra.gmra.mrb[16].mxu1 %v4364_v11 }
  0xf3   :  { %837 = vmatprep.mubr.f32.mxu1 %v5022_v0  ;;  %3018 = vmatpush1.bf16.msra.mxu1 %v4357_v62 }
  0xf4   :  { %3020 = vmatprep.subr.bf16.mxu1 %v4360_v1 }
  0xf6   :  { %838 = vmatmul.mubr.f32.gmra.mrb[18].mxu1 %v4377_v20 }
  0xf7   :  { %3022 = vmatpush1.bf16.msra.mxu1 %v4370_v13  ;;  %1052 = vmatprep.mubr.f32.mxu1 %v5022_v0 }
  0xf8   :  { %3024 = vmatprep.subr.bf16.mxu1 %v4373_v17 }
  0xfb   :  { %3026 = vmatpush1.bf16.msra.mxu1 %v4384_v26 }
  0xfc   :  { %3028 = vmatprep.subr.bf16.mxu1 %v4388_v27 }
  0xff   :  { %3030 = vmatpush1.bf16.msra.mxu1 %v4396_v16 }
 0x100   :  { %3032 = vmatprep.subr.bf16.mxu1 %v4399_v38 }
 0x103   :  { %3034 = vmatpush1.bf16.msra.mxu1 %v4406_v30 }
 0x104   :  { %3036 = vmatprep.subr.bf16.mxu1 %v4409_v47 }
 0x107   :  { %3038 = vmatpush1.bf16.msra.mxu1 %v4416_v44 }
 0x108   :  { %3040 = vmatprep.subr.bf16.mxu1 %v4419_v61 }
 0x10b   :  { %3042 = vmatpush1.bf16.msra.mxu1 %v4426_v59 }
 0x10c   :  { %3044 = vmatprep.subr.bf16.mxu1 %v4429_v18 }
 0x10f   :  { %3046 = vmatpush1.bf16.msra.mxu1 %v4436_v15 }
 0x110   :  { %3080 = vmatprep.subr.bf16.mxu1 %v4347_v53 }
 0x165   :  { %v4483_v63 = vpop.f32.mrb[0].mxu1 }
 0x166   :  { %v4485_v14 = vpop.f32.mrb[1].mxu1 }
 0x169   :  { %v4487_v28 = vpop.f32.mrb[2].mxu1 }
 0x16a   :  { %v4489_v42 = vpop.f32.mrb[3].mxu1 }
 0x16d   :  { %v4491_v56 = vpop.f32.mrb[4].mxu1 }
 0x16e   :  { %v4493_v12 = vpop.f32.mrb[5].mxu1 }
 0x171   :  { %v4495_v32 = vpop.f32.mrb[6].mxu1 }
 0x172   :  { %v4497_v34 = vpop.f32.mrb[7].mxu1 }
 0x173   :  { %5030 = vst [vmem:[#allocation27_spill] sm:$0xff] %v4497_v34 }
 0x175   :  { %v4499_v48 = vpop.f32.mrb[8].mxu1 }
 0x176   :  { %5031 = vst [vmem:[#allocation28_spill] sm:$0xff] %v4499_v48  ;;  %v4501_v52 = vpop.f32.mrb[9].mxu1 }
 0x177   :  { %5032 = vst [vmem:[#allocation29_spill] sm:$0xff] %v4501_v52 }
 0x179   :  { %v4503_v11 = vpop.f32.mrb[10].mxu1 }
 0x17a   :  { %5033 = vst [vmem:[#allocation30_spill] sm:$0xff] %v4503_v11  ;;  %v4505_v20 = vpop.f32.mrb[11].mxu1 }
 0x17b   :  { %5034 = vst [vmem:[#allocation31_spill] sm:$0xff] %v4505_v20  ;;  %v4523_v20 = vrot.slane %v206_v55, %v218_v54  ;;  %v122_v54 = vld [vmem:[%s5016_s5] sm:$0xff] }
 0x17d   :  { %v4507_v2 = vpop.f32.mrb[12].mxu1 }
 0x17e   :  { %5035 = vst [vmem:[#allocation32_spill] sm:$0xff] %v4507_v2  ;;  %v4509_v29 = vpop.f32.mrb[13].mxu1 }
 0x17f   :  { %5036 = vst [vmem:[#allocation33_spill] sm:$0xff] %v4509_v29  ;;  %v222_v29 = vsub.s32 3, %v209_v50 }
 0x181   :  { %v4511_v31 = vpop.f32.mrb[14].mxu1 }
 0x182   :  { %5037 = vst [vmem:[#allocation34_spill] sm:$0xff] %v4511_v31  ;;  %v4513_v33 = vpop.f32.mrb[15].mxu1 }
 0x183   :  { %5038 = vst [vmem:[#allocation35_spill] sm:$0xff] %v4513_v33 }
 0x187   :  { %v756_v36 = vpop.f32.mrb[0].mxu0 }
 0x188   :  { %v758_v39 = vpop.f32.mrb[1].mxu0  ;;  %v3479_v10 = vadd.f32 %v756_v36, %v4517_v6  ;;  %v4525_v36 = vrot.slane %v206_v55, %v222_v29 }
 0x189   :  { %v3480_v8 = vadd.f32 %v758_v39, %v4515_v4 }
 0x18a   :  { %v2718_v0 = vmul.f32 -1.442695, %v3479_v10 }
 0x18b   :  { %v762_v40 = vpop.f32.mrb[2].mxu0  ;;  %v2719_v19 = vmul.f32 -1.442695, %v3480_v8 }
 0x18c   :  { %v764_v43 = vpop.f32.mrb[3].mxu0  ;;  %v3481_v33 = vadd.f32 %v762_v40, %v4517_v6 }
 0x18d   :  { %v3482_v24 = vadd.f32 %v764_v43, %v4515_v4  ;;  %3621 = vpow2.f32 %v2719_v19 }
 0x18e   :  { %3623 = vpow2.f32 %v2718_v0  ;;  %v2721_v46 = vmul.f32 -1.442695, %v3481_v33 }
 0x18f   :  { %v2722_v31 = vmul.f32 -1.442695, %v3482_v24 }
 0x191   :  { %3625 = vpow2.f32 %v2722_v31 }
 0x192   :  { %3627 = vpow2.f32 %v2721_v46 }
 0x197   :  { %v3622_v60 = vpop.eup %3621 }
 0x198   :  { %v3624_v2 = vpop.eup %3623  ;;  %v871_v39 = vadd.f32 1.0, %v3622_v60 }
 0x199   :  { %v870_v43 = vadd.f32 1.0, %v3624_v2 }
 0x19a   :  { %3629 = vrcp.f32 %v871_v39 }
 0x19b   :  { %v3626_v8 = vpop.eup %3625  ;;  %3631 = vrcp.f32 %v870_v43 }
 0x19c   :  { %v3628_v10 = vpop.eup %3627  ;;  %v874_v0 = vadd.f32 1.0, %v3626_v8 }
 0x19d   :  { %v873_v33 = vadd.f32 1.0, %v3628_v10 }
 0x1c5   :  { %v833_v11 = vpop.f32.mrb[16].mxu1 }
 0x1c6   :  { %v3527_v40 = vadd.f32 %v833_v11, %v4523_v20  ;;  %v835_v19 = vpop.f32.mrb[17].mxu1  ;;  %v3630_v11 = vpop.eup %3629 }
 0x1c7   :  { %v3528_v31 = vadd.f32 %v835_v19, %v4525_v36  ;;  %v3632_v60 = vpop.eup %3631  ;;  %v890_v43 = vmul.f32 %v3630_v11, %v122_v54  ;;  %v123_v19 = vld [vmem:[%s5016_s5 + $0x8] sm:$0xff] }
 0x1c8   :  { %v2720_v50 = vmul.f32 -1.442695, %v3527_v40 }
 0x1c9   :  { %3633 = vtanh.f32 %v3528_v31  ;;  %v839_v24 = vpop.f32.mrb[18].mxu1 }
 0x1ca   :  { %3635 = vpow2.f32 %v2720_v50  ;;  %v3529_v29 = vadd.f32 %v839_v24, %v4523_v20  ;;  %v841_v55 = vpop.f32.mrb[19].mxu1 }
 0x1cb   :  { %3637 = vrcp.f32 %v874_v0  ;;  %v3530_v2 = vadd.f32 %v841_v55, %v4525_v36 }
 0x1cc   :  { %3639 = vrcp.f32 %v873_v33  ;;  %v2723_v46 = vmul.f32 -1.442695, %v3529_v29 }
 0x1cd   :  { %3641 = vtanh.f32 %v3530_v2 }
 0x1ce   :  { %3643 = vpow2.f32 %v2723_v46 }
 0x1d3   :  { %v3634_v39 = vpop.eup %3633 }
 0x1d4   :  { %v3636_v8 = vpop.eup %3635  ;;  %v892_v10 = vmul.f32 %v3634_v39, %v3632_v60 }
 0x1d5   :  { %v3638_v40 = vpop.eup %3637  ;;  %v872_v0 = vadd.f32 1.0, %v3636_v8 }
 0x1d6   :  { %v3640_v31 = vpop.eup %3639  ;;  %v4537_v33 = vadd.f32 %v892_v10, %v890_v43  ;;  %v891_v29 = vmul.f32 %v3638_v40, %v123_v19  ;;  %v5040_v43 = vmov 0.0  }
 0x1d7   :  { %v3642_v50 = vpop.eup %3641  ;;  %3645 = vrcp.f32 %v872_v0 }
 0x1d8   :  { %v3644_v24 = vpop.eup %3643  ;;  %3647 = vtanh.f32 %v4537_v33  ;;  %v893_v55 = vmul.f32 %v3642_v50, %v3640_v31 }
 0x1d9   :  { %v875_v2 = vadd.f32 1.0, %v3644_v24 }
 0x1da   :  { %v4540_v46 = vadd.f32 %v893_v55, %v891_v29 }
 0x1db   :  { %3649 = vrcp.f32 %v875_v2 }
 0x1dc   :  { %3651 = vtanh.f32 %v4540_v46 }
 0x1e1   :  { %v3646_v11 = vpop.eup %3645 }
 0x1e2   :  { %v3648_v54 = vpop.eup %3647 }
 0x1e3   :  { %v4543_v60 = vmul.f32 %v3648_v54, %v3646_v11 }
 0x1e5   :  { %5039 = vst [vmem:[#allocation36_spill] sm:$0xff] %v4543_v60  ;;  %v3650_v39 = vpop.eup %3649  ;;  %976 = vmatmul.mubr.f32.vlgmr.msra.gmra.mrb[4].mxu0 %v4543_v60  ;;  %1053 = vmatmul.mubr.f32.vlgmr.msra.gmra.mrb[20].mxu1 %v4543_v60 }
 0x1e6   :  { %v3652_v8 = vpop.eup %3651  ;;  %981 = vmatprep.mubr.f32.mxu0 %v5040_v43  ;;  %1058 = vmatprep.mubr.f32.mxu1 %v5040_v43 }
 0x1e7   :  { %v4549_v10 = vmul.f32 %v3652_v8, %v3650_v39  ;;  %3050 = vmatpush1.bf16.msra.mxu0 %v4252_v7  ;;  %3082 = vmatpush1.bf16.msra.mxu1 %v4357_v62 }
 0x1e8   :  { %3052 = vmatprep.subr.bf16.mxu0 %v4254_v9  ;;  %3084 = vmatprep.subr.bf16.mxu1 %v4360_v1 }
 0x1e9   :  { %5041 = vst [vmem:[#allocation37_spill] sm:$0xff] %v4549_v10  ;;  %982 = vmatmul.mubr.f32.gmra.mrb[6].mxu0 %v4549_v10  ;;  %1059 = vmatmul.mubr.f32.gmra.mrb[22].mxu1 %v4549_v10 }
 0x1ea   :  { %1197 = vmatprep.mubr.f32.mxu0 %v5040_v43  ;;  %1274 = vmatprep.mubr.f32.mxu1 %v5040_v43 }
 0x1eb   :  { %3054 = vmatpush1.bf16.msra.mxu0 %v4264_v21  ;;  %3086 = vmatpush1.bf16.msra.mxu1 %v4370_v13 }
 0x1ec   :  { %3056 = vmatprep.subr.bf16.mxu0 %v4268_v23  ;;  %3088 = vmatprep.subr.bf16.mxu1 %v4373_v17 }
 0x1ef   :  { %3058 = vmatpush1.bf16.msra.mxu0 %v4278_v35  ;;  %3090 = vmatpush1.bf16.msra.mxu1 %v4384_v26 }
 0x1f0   :  { %3060 = vmatprep.subr.bf16.mxu0 %v4282_v37  ;;  %3092 = vmatprep.subr.bf16.mxu1 %v4388_v27 }
 0x1f3   :  { %3062 = vmatpush1.bf16.msra.mxu0 %v4292_v49  ;;  %3094 = vmatpush1.bf16.msra.mxu1 %v4396_v16 }
 0x1f4   :  { %3064 = vmatprep.subr.bf16.mxu0 %v4296_v51  ;;  %3096 = vmatprep.subr.bf16.mxu1 %v4399_v38 }
 0x1f7   :  { %3066 = vmatpush1.bf16.msra.mxu0 %v4306_v3  ;;  %3098 = vmatpush1.bf16.msra.mxu1 %v4406_v30 }
 0x1f8   :  { %3068 = vmatprep.subr.bf16.mxu0 %v4310_v5  ;;  %3100 = vmatprep.subr.bf16.mxu1 %v4409_v47 }
 0x1fb   :  { %3070 = vmatpush1.bf16.msra.mxu0 %v4320_v22  ;;  %3102 = vmatpush1.bf16.msra.mxu1 %v4416_v44 }
 0x1fc   :  { %3072 = vmatprep.subr.bf16.mxu0 %v4324_v25  ;;  %3104 = vmatprep.subr.bf16.mxu1 %v4419_v61 }
 0x1ff   :  { %3074 = vmatpush1.bf16.msra.mxu0 %v4334_v41  ;;  %3106 = vmatpush1.bf16.msra.mxu1 %v4426_v59 }
 0x200   :  { %3076 = vmatprep.subr.bf16.mxu0 %v4338_v45  ;;  %3108 = vmatprep.subr.bf16.mxu1 %v4429_v18 }
 0x203   :  { %3078 = vmatpush1.bf16.msra.mxu0 %v4350_v58  ;;  %3110 = vmatpush1.bf16.msra.mxu1 %v4436_v15 }
 0x204   :  { %3112 = vmatprep.subr.bf16.mxu0 %v4245_v57  ;;  %3144 = vmatprep.subr.bf16.mxu1 %v4347_v53 }
 0x2b8   :  { %v977_v40 = vpop.f32.mrb[4].mxu0  ;;  %v1054_v19 = vpop.f32.mrb[20].mxu1 }
 0x2b9   :  { %v3483_v0 = vadd.f32 %v977_v40, %v4517_v6  ;;  %v979_v31 = vpop.f32.mrb[5].mxu0  ;;  %v1056_v50 = vpop.f32.mrb[21].mxu1  ;;  %v3531_v40 = vadd.f32 %v1054_v19, %v4523_v20 }
 0x2ba   :  { %v3484_v24 = vadd.f32 %v979_v31, %v4515_v4  ;;  %v3532_v31 = vadd.f32 %v1056_v50, %v4525_v36 }
 0x2bb   :  { %v2724_v29 = vmul.f32 -1.442695, %v3483_v0  ;;  %v2726_v0 = vmul.f32 -1.442695, %v3531_v40 }
 0x2bc   :  { %v2725_v55 = vmul.f32 -1.442695, %v3484_v24  ;;  %v983_v2 = vpop.f32.mrb[6].mxu0  ;;  %v1060_v11 = vpop.f32.mrb[22].mxu1 }
 0x2bd   :  { %3653 = vpow2.f32 %v2724_v29  ;;  %v3485_v54 = vadd.f32 %v983_v2, %v4517_v6  ;;  %v985_v39 = vpop.f32.mrb[7].mxu0  ;;  %v1062_v8 = vpop.f32.mrb[23].mxu1  ;;  %v3533_v24 = vadd.f32 %v1060_v11, %v4523_v20 }
 0x2be   :  { %v3486_v10 = vadd.f32 %v985_v39, %v4515_v4  ;;  %3655 = vpow2.f32 %v2725_v55  ;;  %v3534_v29 = vadd.f32 %v1062_v8, %v4525_v36 }
 0x2bf   :  { %v2727_v60 = vmul.f32 -1.442695, %v3485_v54  ;;  %v2729_v39 = vmul.f32 -1.442695, %v3533_v24 }
 0x2c0   :  { %v2728_v52 = vmul.f32 -1.442695, %v3486_v10 }
 0x2c1   :  { %3657 = vpow2.f32 %v2727_v60 }
 0x2c2   :  { %3659 = vpow2.f32 %v2728_v52 }
 0x2c3   :  { %3661 = vtanh.f32 %v3532_v31 }
 0x2c4   :  { %3663 = vpow2.f32 %v2726_v0 }
 0x2c7   :  { %v3654_v48 = vpop.eup %3653 }
 0x2c8   :  { %v1091_v2 = vadd.f32 1.0, %v3654_v48  ;;  %v3656_v34 = vpop.eup %3655 }
 0x2c9   :  { %v1092_v55 = vadd.f32 1.0, %v3656_v34 }
 0x2ca   :  { %3665 = vrcp.f32 %v1091_v2 }
 0x2cb   :  { %v3658_v10 = vpop.eup %3657  ;;  %3667 = vtanh.f32 %v3534_v29 }
 0x2cc   :  { %3669 = vrcp.f32 %v1092_v55  ;;  %v1094_v60 = vadd.f32 1.0, %v3658_v10  ;;  %v3660_v52 = vpop.eup %3659 }
 0x2cd   :  { %3671 = vpow2.f32 %v2729_v39  ;;  %v1095_v19 = vadd.f32 1.0, %v3660_v52  ;;  %v3662_v50 = vpop.eup %3661 }
 0x2ce   :  { %3673 = vrcp.f32 %v1094_v60  ;;  %v3664_v11 = vpop.eup %3663 }
 0x2cf   :  { %3675 = vrcp.f32 %v1095_v19  ;;  %v1093_v31 = vadd.f32 1.0, %v3664_v11 }
 0x2d1   :  { %3677 = vrcp.f32 %v1093_v31 }
 0x2d4   :  { %v3666_v54 = vpop.eup %3665 }
 0x2d5   :  { %v3668_v8 = vpop.eup %3667  ;;  %v1113_v48 = vmul.f32 %v3666_v54, %v3662_v50 }
 0x2d6   :  { %v3670_v40 = vpop.eup %3669 }
 0x2d7   :  { %v3672_v0 = vpop.eup %3671  ;;  %v1111_v24 = vmul.f32 %v3670_v40, %v4537_v33 }
 0x2d8   :  { %v3674_v34 = vpop.eup %3673  ;;  %v1096_v39 = vadd.f32 1.0, %v3672_v0 }
 0x2d9   :  { %v4596_v2 = vadd.f32 %v1113_v48, %v1111_v24  ;;  %v1114_v29 = vmul.f32 %v3674_v34, %v3668_v8  ;;  %v3676_v55 = vpop.eup %3675 }
 0x2da   :  { %v1112_v10 = vmul.f32 %v3676_v55, %v4540_v46 }
 0x2db   :  { %3679 = vtanh.f32 %v4596_v2  ;;  %v3678_v52 = vpop.eup %3677 }
 0x2dc   :  { %v4600_v60 = vadd.f32 %v1114_v29, %v1112_v10  ;;  %3681 = vrcp.f32 %v1096_v39 }
 0x2de   :  { %3683 = vtanh.f32 %v4600_v60 }
 0x2e5   :  { %v3680_v19 = vpop.eup %3679 }
 0x2e6   :  { %v4603_v50 = vmul.f32 %v3680_v19, %v3678_v52  ;;  %v3682_v33 = vpop.eup %3681 }
 0x2e8   :  { %5042 = vst [vmem:[#allocation38_spill] sm:$0xff] %v4603_v50  ;;  %1198 = vmatmul.mubr.f32.vlgmr.msra.gmra.mrb[8].mxu0 %v4603_v50  ;;  %1275 = vmatmul.mubr.f32.vlgmr.msra.gmra.mrb[24].mxu1 %v4603_v50  ;;  %v3684_v11 = vpop.eup %3683 }
 0x2e9   :  { %1203 = vmatprep.mubr.f32.mxu0 %v5040_v43  ;;  %1280 = vmatprep.mubr.f32.mxu1 %v5040_v43  ;;  %v4609_v46 = vmul.f32 %v3684_v11, %v3682_v33 }
 0x2ea   :  { %3114 = vmatpush1.bf16.msra.mxu0 %v4252_v7  ;;  %3146 = vmatpush1.bf16.msra.mxu1 %v4357_v62 }
 0x2eb   :  { %5043 = vst [vmem:[#allocation39_spill] sm:$0xff] %v4609_v46  ;;  %3116 = vmatprep.subr.bf16.mxu0 %v4254_v9  ;;  %3148 = vmatprep.subr.bf16.mxu1 %v4360_v1 }
 0x2ec   :  { %1204 = vmatmul.mubr.f32.gmra.mrb[10].mxu0 %v4609_v46  ;;  %1281 = vmatmul.mubr.f32.gmra.mrb[26].mxu1 %v4609_v46 }
 0x2ed   :  { %1419 = vmatprep.mubr.f32.mxu0 %v5040_v43  ;;  %1496 = vmatprep.mubr.f32.mxu1 %v5040_v43 }
 0x2ee   :  { %3118 = vmatpush1.bf16.msra.mxu0 %v4264_v21  ;;  %3150 = vmatpush1.bf16.msra.mxu1 %v4370_v13 }
 0x2ef   :  { %3120 = vmatprep.subr.bf16.mxu0 %v4268_v23  ;;  %3152 = vmatprep.subr.bf16.mxu1 %v4373_v17 }
 0x2f2   :  { %3122 = vmatpush1.bf16.msra.mxu0 %v4278_v35  ;;  %3154 = vmatpush1.bf16.msra.mxu1 %v4384_v26 }
 0x2f3   :  { %3124 = vmatprep.subr.bf16.mxu0 %v4282_v37  ;;  %3156 = vmatprep.subr.bf16.mxu1 %v4388_v27 }
 0x2f6   :  { %3126 = vmatpush1.bf16.msra.mxu0 %v4292_v49  ;;  %3158 = vmatpush1.bf16.msra.mxu1 %v4396_v16 }
 0x2f7   :  { %3128 = vmatprep.subr.bf16.mxu0 %v4296_v51  ;;  %3160 = vmatprep.subr.bf16.mxu1 %v4399_v38 }
 0x2fa   :  { %3130 = vmatpush1.bf16.msra.mxu0 %v4306_v3  ;;  %3162 = vmatpush1.bf16.msra.mxu1 %v4406_v30 }
 0x2fb   :  { %3132 = vmatprep.subr.bf16.mxu0 %v4310_v5  ;;  %3164 = vmatprep.subr.bf16.mxu1 %v4409_v47 }
 0x2fe   :  { %3134 = vmatpush1.bf16.msra.mxu0 %v4320_v22  ;;  %3166 = vmatpush1.bf16.msra.mxu1 %v4416_v44 }
 0x2ff   :  { %3136 = vmatprep.subr.bf16.mxu0 %v4324_v25  ;;  %3168 = vmatprep.subr.bf16.mxu1 %v4419_v61 }
 0x302   :  { %3138 = vmatpush1.bf16.msra.mxu0 %v4334_v41  ;;  %3170 = vmatpush1.bf16.msra.mxu1 %v4426_v59 }
 0x303   :  { %3140 = vmatprep.subr.bf16.mxu0 %v4338_v45  ;;  %3172 = vmatprep.subr.bf16.mxu1 %v4429_v18 }
 0x306   :  { %3142 = vmatpush1.bf16.msra.mxu0 %v4350_v58  ;;  %3174 = vmatpush1.bf16.msra.mxu1 %v4436_v15 }
 0x307   :  { %3176 = vmatprep.subr.bf16.mxu0 %v4245_v57  ;;  %3208 = vmatprep.subr.bf16.mxu1 %v4347_v53 }
 0x3bb   :  { %v1199_v54 = vpop.f32.mrb[8].mxu0  ;;  %v1276_v8 = vpop.f32.mrb[24].mxu1 }
 0x3bc   :  { %v3487_v48 = vadd.f32 %v1199_v54, %v4517_v6  ;;  %v1201_v40 = vpop.f32.mrb[9].mxu0  ;;  %v1278_v31 = vpop.f32.mrb[25].mxu1  ;;  %v3535_v54 = vadd.f32 %v1276_v8, %v4523_v20 }
 0x3bd   :  { %v3488_v0 = vadd.f32 %v1201_v40, %v4515_v4  ;;  %v3536_v40 = vadd.f32 %v1278_v31, %v4525_v36 }
 0x3be   :  { %v2730_v24 = vmul.f32 -1.442695, %v3487_v48  ;;  %v2732_v48 = vmul.f32 -1.442695, %v3535_v54 }
 0x3bf   :  { %v2731_v34 = vmul.f32 -1.442695, %v3488_v0  ;;  %v1205_v29 = vpop.f32.mrb[10].mxu0  ;;  %v1282_v55 = vpop.f32.mrb[26].mxu1 }
 0x3c0   :  { %3685 = vpow2.f32 %v2730_v24  ;;  %v3489_v39 = vadd.f32 %v1205_v29, %v4517_v6  ;;  %v1207_v10 = vpop.f32.mrb[11].mxu0  ;;  %v1284_v52 = vpop.f32.mrb[27].mxu1  ;;  %v3537_v0 = vadd.f32 %v1282_v55, %v4523_v20 }
 0x3c1   :  { %v3490_v19 = vadd.f32 %v1207_v10, %v4515_v4  ;;  %3687 = vpow2.f32 %v2731_v34  ;;  %v3538_v24 = vadd.f32 %v1284_v52, %v4525_v36 }
 0x3c2   :  { %v2733_v33 = vmul.f32 -1.442695, %v3489_v39  ;;  %v2735_v10 = vmul.f32 -1.442695, %v3537_v0 }
 0x3c3   :  { %v2734_v11 = vmul.f32 -1.442695, %v3490_v19 }
 0x3c4   :  { %3689 = vpow2.f32 %v2733_v33 }
 0x3c5   :  { %3691 = vpow2.f32 %v2734_v11 }
 0x3c6   :  { %3693 = vtanh.f32 %v3536_v40 }
 0x3c7   :  { %3695 = vpow2.f32 %v2732_v48 }
 0x3ca   :  { %v3686_v46 = vpop.eup %3685 }
 0x3cb   :  { %v1313_v29 = vadd.f32 1.0, %v3686_v46  ;;  %v3688_v50 = vpop.eup %3687 }
 0x3cc   :  { %v1314_v34 = vadd.f32 1.0, %v3688_v50 }
 0x3cd   :  { %3697 = vrcp.f32 %v1313_v29 }
 0x3ce   :  { %v3690_v39 = vpop.eup %3689  ;;  %3699 = vtanh.f32 %v3538_v24 }
 0x3cf   :  { %3701 = vrcp.f32 %v1314_v34  ;;  %v1316_v8 = vadd.f32 1.0, %v3690_v39  ;;  %v3692_v19 = vpop.eup %3691 }
 0x3d0   :  { %3703 = vpow2.f32 %v2735_v10  ;;  %v1317_v31 = vadd.f32 1.0, %v3692_v19  ;;  %v3694_v55 = vpop.eup %3693 }
 0x3d1   :  { %3705 = vrcp.f32 %v1316_v8  ;;  %v3696_v33 = vpop.eup %3695 }
 0x3d2   :  { %3707 = vrcp.f32 %v1317_v31  ;;  %v1315_v40 = vadd.f32 1.0, %v3696_v33 }
 0x3d4   :  { %3709 = vrcp.f32 %v1315_v40 }
 0x3d7   :  { %v3698_v11 = vpop.eup %3697 }
 0x3d8   :  { %v3700_v52 = vpop.eup %3699  ;;  %v1335_v46 = vmul.f32 %v3698_v11, %v3694_v55 }
 0x3d9   :  { %v3702_v54 = vpop.eup %3701 }
 0x3da   :  { %v3704_v48 = vpop.eup %3703  ;;  %v1333_v0 = vmul.f32 %v3702_v54, %v4596_v2 }
 0x3db   :  { %v3706_v50 = vpop.eup %3705  ;;  %v1318_v10 = vadd.f32 1.0, %v3704_v48 }
 0x3dc   :  { %v4656_v29 = vadd.f32 %v1335_v46, %v1333_v0  ;;  %v1336_v24 = vmul.f32 %v3706_v50, %v3700_v52  ;;  %v3708_v34 = vpop.eup %3707 }
 0x3dd   :  { %v1334_v39 = vmul.f32 %v3708_v34, %v4600_v60 }
 0x3de   :  { %3711 = vtanh.f32 %v4656_v29  ;;  %v3710_v19 = vpop.eup %3709 }
 0x3df   :  { %v4660_v8 = vadd.f32 %v1336_v24, %v1334_v39  ;;  %3713 = vrcp.f32 %v1318_v10 }
 0x3e1   :  { %3715 = vtanh.f32 %v4660_v8 }
 0x3e8   :  { %v3712_v31 = vpop.eup %3711 }
 0x3e9   :  { %v4663_v55 = vmul.f32 %v3712_v31, %v3710_v19  ;;  %v3714_v2 = vpop.eup %3713 }
 0x3eb   :  { %5044 = vst [vmem:[#allocation40_spill] sm:$0xff] %v4663_v55  ;;  %1420 = vmatmul.mubr.f32.vlgmr.msra.gmra.mrb[12].mxu0 %v4663_v55  ;;  %1497 = vmatmul.mubr.f32.vlgmr.msra.gmra.mrb[28].mxu1 %v4663_v55  ;;  %v3716_v33 = vpop.eup %3715 }
 0x3ec   :  { %1425 = vmatprep.mubr.f32.mxu0 %v5040_v43  ;;  %1502 = vmatprep.mubr.f32.mxu1 %v5040_v43  ;;  %v4669_v60 = vmul.f32 %v3716_v33, %v3714_v2 }
 0x3ed   :  { %3178 = vmatpush1.bf16.msra.mxu0 %v4252_v7  ;;  %3210 = vmatpush1.bf16.msra.mxu1 %v4357_v62 }
 0x3ee   :  { %5045 = vst [vmem:[#allocation41_spill] sm:$0xff] %v4669_v60  ;;  %3180 = vmatprep.subr.bf16.mxu0 %v4254_v9  ;;  %3212 = vmatprep.subr.bf16.mxu1 %v4360_v1 }
 0x3ef   :  { %1426 = vmatmul.mubr.f32.gmra.mrb[14].mxu0 %v4669_v60  ;;  %1503 = vmatmul.mubr.f32.gmra.mrb[30].mxu1 %v4669_v60 }
 0x3f0   :  { %1641 = vmatprep.mubr.f32.mxu0 %v5040_v43  ;;  %1718 = vmatprep.mubr.f32.mxu1 %v5040_v43 }
 0x3f1   :  { %3182 = vmatpush1.bf16.msra.mxu0 %v4264_v21  ;;  %3214 = vmatpush1.bf16.msra.mxu1 %v4370_v13 }
 0x3f2   :  { %3184 = vmatprep.subr.bf16.mxu0 %v4268_v23  ;;  %3216 = vmatprep.subr.bf16.mxu1 %v4373_v17 }
 0x3f5   :  { %3186 = vmatpush1.bf16.msra.mxu0 %v4278_v35  ;;  %3218 = vmatpush1.bf16.msra.mxu1 %v4384_v26 }
 0x3f6   :  { %3188 = vmatprep.subr.bf16.mxu0 %v4282_v37  ;;  %3220 = vmatprep.subr.bf16.mxu1 %v4388_v27 }
 0x3f9   :  { %3190 = vmatpush1.bf16.msra.mxu0 %v4292_v49  ;;  %3222 = vmatpush1.bf16.msra.mxu1 %v4396_v16 }
 0x3fa   :  { %3192 = vmatprep.subr.bf16.mxu0 %v4296_v51  ;;  %3224 = vmatprep.subr.bf16.mxu1 %v4399_v38 }
 0x3fd   :  { %3194 = vmatpush1.bf16.msra.mxu0 %v4306_v3  ;;  %3226 = vmatpush1.bf16.msra.mxu1 %v4406_v30 }
 0x3fe   :  { %3196 = vmatprep.subr.bf16.mxu0 %v4310_v5  ;;  %3228 = vmatprep.subr.bf16.mxu1 %v4409_v47 }
 0x401   :  { %3198 = vmatpush1.bf16.msra.mxu0 %v4320_v22  ;;  %3230 = vmatpush1.bf16.msra.mxu1 %v4416_v44 }
 0x402   :  { %3200 = vmatprep.subr.bf16.mxu0 %v4324_v25  ;;  %3232 = vmatprep.subr.bf16.mxu1 %v4419_v61 }
 0x405   :  { %3202 = vmatpush1.bf16.msra.mxu0 %v4334_v41  ;;  %3234 = vmatpush1.bf16.msra.mxu1 %v4426_v59 }
 0x406   :  { %3204 = vmatprep.subr.bf16.mxu0 %v4338_v45  ;;  %3236 = vmatprep.subr.bf16.mxu1 %v4429_v18 }
 0x409   :  { %3206 = vmatpush1.bf16.msra.mxu0 %v4350_v58  ;;  %3238 = vmatpush1.bf16.msra.mxu1 %v4436_v15 }
 0x40a   :  { %3240 = vmatprep.subr.bf16.mxu0 %v4245_v57  ;;  %3272 = vmatprep.subr.bf16.mxu1 %v4347_v53 }
 0x4be   :  { %v1421_v11 = vpop.f32.mrb[12].mxu0  ;;  %v1498_v52 = vpop.f32.mrb[28].mxu1 }
 0x4bf   :  { %v3491_v46 = vadd.f32 %v1421_v11, %v4517_v6  ;;  %v1423_v54 = vpop.f32.mrb[13].mxu0  ;;  %v1500_v40 = vpop.f32.mrb[29].mxu1  ;;  %v3539_v11 = vadd.f32 %v1498_v52, %v4523_v20 }
 0x4c0   :  { %v3492_v48 = vadd.f32 %v1423_v54, %v4515_v4  ;;  %v3540_v54 = vadd.f32 %v1500_v40, %v4525_v36 }
 0x4c1   :  { %v2736_v0 = vmul.f32 -1.442695, %v3491_v46  ;;  %v2738_v46 = vmul.f32 -1.442695, %v3539_v11 }
 0x4c2   :  { %v2737_v50 = vmul.f32 -1.442695, %v3492_v48  ;;  %v1427_v24 = vpop.f32.mrb[14].mxu0  ;;  %v1504_v34 = vpop.f32.mrb[30].mxu1 }
 0x4c3   :  { %3717 = vpow2.f32 %v2736_v0  ;;  %v3493_v10 = vadd.f32 %v1427_v24, %v4517_v6  ;;  %v1429_v39 = vpop.f32.mrb[15].mxu0  ;;  %v1506_v19 = vpop.f32.mrb[31].mxu1  ;;  %v3541_v48 = vadd.f32 %v1504_v34, %v4523_v20 }
 0x4c4   :  { %v3494_v31 = vadd.f32 %v1429_v39, %v4515_v4  ;;  %3719 = vpow2.f32 %v2737_v50  ;;  %v3542_v0 = vadd.f32 %v1506_v19, %v4525_v36 }
 0x4c5   :  { %v2739_v2 = vmul.f32 -1.442695, %v3493_v10  ;;  %v2741_v39 = vmul.f32 -1.442695, %v3541_v48 }
 0x4c6   :  { %v2740_v33 = vmul.f32 -1.442695, %v3494_v31 }
 0x4c7   :  { %3721 = vpow2.f32 %v2739_v2 }
 0x4c8   :  { %3723 = vpow2.f32 %v2740_v33 }
 0x4c9   :  { %3725 = vtanh.f32 %v3540_v54 }
 0x4ca   :  { %3727 = vpow2.f32 %v2738_v46 }
 0x4cd   :  { %v3718_v60 = vpop.eup %3717 }
 0x4ce   :  { %v1535_v24 = vadd.f32 1.0, %v3718_v60  ;;  %v3720_v55 = vpop.eup %3719 }
 0x4cf   :  { %v1536_v50 = vadd.f32 1.0, %v3720_v55 }
 0x4d0   :  { %3729 = vrcp.f32 %v1535_v24 }
 0x4d1   :  { %v3722_v10 = vpop.eup %3721  ;;  %3731 = vtanh.f32 %v3542_v0 }
 0x4d2   :  { %3733 = vrcp.f32 %v1536_v50  ;;  %v1538_v52 = vadd.f32 1.0, %v3722_v10  ;;  %v3724_v31 = vpop.eup %3723 }
 0x4d3   :  { %3735 = vpow2.f32 %v2741_v39  ;;  %v1539_v40 = vadd.f32 1.0, %v3724_v31  ;;  %v3726_v34 = vpop.eup %3725 }
 0x4d4   :  { %3737 = vrcp.f32 %v1538_v52  ;;  %v3728_v2 = vpop.eup %3727 }
 0x4d5   :  { %3739 = vrcp.f32 %v1539_v40  ;;  %v1537_v54 = vadd.f32 1.0, %v3728_v2 }
 0x4d7   :  { %3741 = vrcp.f32 %v1537_v54 }
 0x4da   :  { %v3730_v33 = vpop.eup %3729 }
 0x4db   :  { %v3732_v19 = vpop.eup %3731  ;;  %v1557_v60 = vmul.f32 %v3730_v33, %v3726_v34  ;;  %v343_v33 = vadd.f32 %v4483_v63, %v4517_v6 }
 0x4dc   :  { %v3734_v11 = vpop.eup %3733 }
 0x4dd   :  { %v3736_v46 = vpop.eup %3735  ;;  %v1555_v48 = vmul.f32 %v3734_v11, %v4656_v29 }
 0x4de   :  { %v3738_v55 = vpop.eup %3737  ;;  %v1540_v39 = vadd.f32 1.0, %v3736_v46 }
 0x4df   :  { %v4716_v24 = vadd.f32 %v1557_v60, %v1555_v48  ;;  %v1558_v0 = vmul.f32 %v3738_v55, %v3732_v19  ;;  %v3740_v50 = vpop.eup %3739  ;;  %v345_v19 = vadd.f32 %v4485_v14, %v4515_v4 }
 0x4e0   :  { %v1556_v10 = vmul.f32 %v3740_v50, %v4660_v8 }
 0x4e1   :  { %3743 = vtanh.f32 %v4716_v24  ;;  %v3742_v31 = vpop.eup %3741 }
 0x4e2   :  { %v4720_v52 = vadd.f32 %v1558_v0, %v1556_v10  ;;  %3745 = vrcp.f32 %v1540_v39  ;;  %v349_v0 = vadd.f32 %v4487_v28, %v4517_v6  ;;  %v351_v39 = vadd.f32 %v4489_v42, %v4515_v4 }
 0x4e4   :  { %3747 = vtanh.f32 %v4720_v52 }
 0x4eb   :  { %v3744_v40 = vpop.eup %3743 }
 0x4ec   :  { %v4723_v34 = vmul.f32 %v3744_v40, %v3742_v31  ;;  %v3746_v29 = vpop.eup %3745 }
 0x4ee   :  { %1642 = vmatmul.mubr.f32.vlgmr.msra.gmra.mrb[16].mxu0 %v4723_v34  ;;  %1719 = vmatmul.mubr.f32.vlgmr.msra.gmra.mrb[32].mxu1 %v4723_v34  ;;  %v3748_v2 = vpop.eup %3747 }
 0x4ef   :  { %1647 = vmatprep.mubr.f32.mxu0 %v5040_v43  ;;  %1724 = vmatprep.mubr.f32.mxu1 %v5040_v43  ;;  %v4729_v8 = vmul.f32 %v3748_v2, %v3746_v29 }
 0x4f0   :  { %3242 = vmatpush1.bf16.msra.mxu0 %v4252_v7  ;;  %3274 = vmatpush1.bf16.msra.mxu1 %v4357_v62 }
 0x4f1   :  { %3244 = vmatprep.subr.bf16.mxu0 %v4254_v9  ;;  %3276 = vmatprep.subr.bf16.mxu1 %v4360_v1 }
 0x4f2   :  { %1648 = vmatmul.mubr.f32.gmra.mrb[18].mxu0 %v4729_v8  ;;  %1725 = vmatmul.mubr.f32.gmra.mrb[34].mxu1 %v4729_v8 }
 0x4f3   :  { %1863 = vmatprep.mubr.f32.mxu0 %v5040_v43  ;;  %1940 = vmatprep.mubr.f32.mxu1 %v5040_v43 }
 0x4f4   :  { %3246 = vmatpush1.bf16.msra.mxu0 %v4264_v21  ;;  %3278 = vmatpush1.bf16.msra.mxu1 %v4370_v13 }
 0x4f5   :  { %3248 = vmatprep.subr.bf16.mxu0 %v4268_v23  ;;  %3280 = vmatprep.subr.bf16.mxu1 %v4373_v17 }
 0x4f8   :  { %3250 = vmatpush1.bf16.msra.mxu0 %v4278_v35  ;;  %3282 = vmatpush1.bf16.msra.mxu1 %v4384_v26 }
 0x4f9   :  { %3252 = vmatprep.subr.bf16.mxu0 %v4282_v37  ;;  %3284 = vmatprep.subr.bf16.mxu1 %v4388_v27 }
 0x4fc   :  { %3254 = vmatpush1.bf16.msra.mxu0 %v4292_v49  ;;  %3286 = vmatpush1.bf16.msra.mxu1 %v4396_v16 }
 0x4fd   :  { %3256 = vmatprep.subr.bf16.mxu0 %v4296_v51  ;;  %3288 = vmatprep.subr.bf16.mxu1 %v4399_v38 }
 0x500   :  { %3258 = vmatpush1.bf16.msra.mxu0 %v4306_v3  ;;  %3290 = vmatpush1.bf16.msra.mxu1 %v4406_v30 }
 0x501   :  { %3260 = vmatprep.subr.bf16.mxu0 %v4310_v5  ;;  %3292 = vmatprep.subr.bf16.mxu1 %v4409_v47 }
 0x504   :  { %3262 = vmatpush1.bf16.msra.mxu0 %v4320_v22  ;;  %3294 = vmatpush1.bf16.msra.mxu1 %v4416_v44 }
 0x505   :  { %3264 = vmatprep.subr.bf16.mxu0 %v4324_v25  ;;  %3296 = vmatprep.subr.bf16.mxu1 %v4419_v61 }
 0x508   :  { %3266 = vmatpush1.bf16.msra.mxu0 %v4334_v41  ;;  %3298 = vmatpush1.bf16.msra.mxu1 %v4426_v59 }
 0x509   :  { %3268 = vmatprep.subr.bf16.mxu0 %v4338_v45  ;;  %3300 = vmatprep.subr.bf16.mxu1 %v4429_v18 }
 0x50c   :  { %3270 = vmatpush1.bf16.msra.mxu0 %v4350_v58  ;;  %3302 = vmatpush1.bf16.msra.mxu1 %v4436_v15 }
 0x50d   :  { %3304 = vmatprep.subr.bf16.mxu0 %v4245_v57  ;;  %3336 = vmatprep.subr.bf16.mxu1 %v4347_v53 }
 0x5c1   :  { %v1643_v60 = vpop.f32.mrb[16].mxu0  ;;  %v1720_v11 = vpop.f32.mrb[32].mxu1 }
 0x5c2   :  { %v1731_v54 = vadd.f32 %v1643_v60, %v343_v33  ;;  %v1645_v46 = vpop.f32.mrb[17].mxu0  ;;  %v1722_v48 = vpop.f32.mrb[33].mxu1 }
 0x5c3   :  { %v1732_v55 = vadd.f32 %v1645_v46, %v345_v19  ;;  %v3543_v19 = vadd.f32 %v1720_v11, %v4523_v20  ;;  %v3544_v28 = vadd.f32 %v1722_v48, %v4525_v36 }
 0x5c4   :  { %v2742_v50 = vmul.f32 -1.442695, %v1731_v54 }
 0x5c5   :  { %v2743_v10 = vmul.f32 -1.442695, %v1732_v55  ;;  %v1649_v31 = vpop.f32.mrb[18].mxu0  ;;  %v1726_v40 = vpop.f32.mrb[34].mxu1  ;;  %v2744_v54 = vmul.f32 -1.442695, %v3543_v19 }
 0x5c6   :  { %3749 = vpow2.f32 %v2742_v50  ;;  %v1735_v63 = vadd.f32 %v1649_v31, %v349_v0  ;;  %v1651_v29 = vpop.f32.mrb[19].mxu0  ;;  %v1728_v14 = vpop.f32.mrb[35].mxu1  ;;  %v3545_v42 = vadd.f32 %v1726_v40, %v4523_v20 }
 0x5c7   :  { %v1736_v2 = vadd.f32 %v1651_v29, %v351_v39  ;;  %3751 = vpow2.f32 %v2743_v10  ;;  %v3546_v55 = vadd.f32 %v1728_v14, %v4525_v36 }
 0x5c8   :  { %v2745_v33 = vmul.f32 -1.442695, %v1735_v63  ;;  %v2747_v39 = vmul.f32 -1.442695, %v3545_v42 }
 0x5c9   :  { %v2746_v60 = vmul.f32 -1.442695, %v1736_v2 }
 0x5ca   :  { %3753 = vpow2.f32 %v2745_v33 }
 0x5cb   :  { %3755 = vpow2.f32 %v2746_v60 }
 0x5cc   :  { %3757 = vtanh.f32 %v3544_v28 }
 0x5cd   :  { %3759 = vpow2.f32 %v2744_v54 }
 0x5d0   :  { %v3750_v46 = vpop.eup %3749 }
 0x5d1   :  { %v1757_v50 = vadd.f32 1.0, %v3750_v46  ;;  %v3752_v0 = vpop.eup %3751 }
 0x5d2   :  { %v1758_v10 = vadd.f32 1.0, %v3752_v0 }
 0x5d3   :  { %3761 = vrcp.f32 %v1757_v50 }
 0x5d4   :  { %v3754_v31 = vpop.eup %3753  ;;  %3763 = vtanh.f32 %v3546_v55 }
 0x5d5   :  { %3765 = vrcp.f32 %v1758_v10  ;;  %v1760_v11 = vadd.f32 1.0, %v3754_v31  ;;  %v3756_v63 = vpop.eup %3755 }
 0x5d6   :  { %3767 = vpow2.f32 %v2747_v39  ;;  %v1761_v48 = vadd.f32 1.0, %v3756_v63  ;;  %v3758_v40 = vpop.eup %3757 }
 0x5d7   :  { %3769 = vrcp.f32 %v1760_v11  ;;  %v3760_v29 = vpop.eup %3759 }
 0x5d8   :  { %3771 = vrcp.f32 %v1761_v48  ;;  %v1759_v19 = vadd.f32 1.0, %v3760_v29  ;;  %v357_v29 = vadd.f32 %v4493_v12, %v4515_v4 }
 0x5da   :  { %3773 = vrcp.f32 %v1759_v19 }
 0x5dd   :  { %v3762_v2 = vpop.eup %3761 }
 0x5de   :  { %v3764_v14 = vpop.eup %3763  ;;  %v1779_v33 = vmul.f32 %v3762_v2, %v3758_v40  ;;  %v355_v40 = vadd.f32 %v4491_v56, %v4517_v6 }
 0x5df   :  { %v3766_v60 = vpop.eup %3765 }
 0x5e0   :  { %v3768_v28 = vpop.eup %3767  ;;  %v1777_v54 = vmul.f32 %v3766_v60, %v4716_v24 }
 0x5e1   :  { %v3770_v42 = vpop.eup %3769  ;;  %v1762_v0 = vadd.f32 1.0, %v3768_v28 }
 0x5e2   :  { %v4780_v46 = vadd.f32 %v1779_v33, %v1777_v54  ;;  %v1780_v55 = vmul.f32 %v3770_v42, %v3764_v14  ;;  %v3772_v50 = vpop.eup %3771  ;;  %v361_v54 = vadd.f32 %v4495_v32, %v4517_v6 }
 0x5e3   :  { %v1778_v39 = vmul.f32 %v3772_v50, %v4720_v52 }
 0x5e4   :  { %3775 = vtanh.f32 %v4780_v46  ;;  %v3774_v31 = vpop.eup %3773 }
 0x5e5   :  { %v4784_v10 = vadd.f32 %v1780_v55, %v1778_v39  ;;  %3777 = vrcp.f32 %v1762_v0 }
 0x5e7   :  { %3779 = vtanh.f32 %v4784_v10 }
 0x5ee   :  { %v3776_v11 = vpop.eup %3775 }
 0x5ef   :  { %v4787_v63 = vmul.f32 %v3776_v11, %v3774_v31  ;;  %v3778_v24 = vpop.eup %3777 }
 0x5f1   :  { %1864 = vmatmul.mubr.f32.vlgmr.msra.gmra.mrb[20].mxu0 %v4787_v63  ;;  %1941 = vmatmul.mubr.f32.vlgmr.msra.gmra.mrb[36].mxu1 %v4787_v63  ;;  %v3780_v48 = vpop.eup %3779 }
 0x5f2   :  { %1869 = vmatprep.mubr.f32.mxu0 %v5040_v43  ;;  %1946 = vmatprep.mubr.f32.mxu1 %v5040_v43  ;;  %v4793_v52 = vmul.f32 %v3780_v48, %v3778_v24 }
 0x5f3   :  { %3306 = vmatpush1.bf16.msra.mxu0 %v4252_v7  ;;  %3338 = vmatpush1.bf16.msra.mxu1 %v4357_v62 }
 0x5f4   :  { %3308 = vmatprep.subr.bf16.mxu0 %v4254_v9  ;;  %3340 = vmatprep.subr.bf16.mxu1 %v4360_v1 }
 0x5f5   :  { %1870 = vmatmul.mubr.f32.gmra.mrb[22].mxu0 %v4793_v52  ;;  %1947 = vmatmul.mubr.f32.gmra.mrb[38].mxu1 %v4793_v52 }
 0x5f6   :  { %2085 = vmatprep.mubr.f32.mxu0 %v5040_v43  ;;  %2162 = vmatprep.mubr.f32.mxu1 %v5040_v43 }
 0x5f7   :  { %3310 = vmatpush1.bf16.msra.mxu0 %v4264_v21  ;;  %3342 = vmatpush1.bf16.msra.mxu1 %v4370_v13 }
 0x5f8   :  { %3312 = vmatprep.subr.bf16.mxu0 %v4268_v23  ;;  %3344 = vmatprep.subr.bf16.mxu1 %v4373_v17 }
 0x5fb   :  { %3314 = vmatpush1.bf16.msra.mxu0 %v4278_v35  ;;  %3346 = vmatpush1.bf16.msra.mxu1 %v4384_v26 }
 0x5fc   :  { %3316 = vmatprep.subr.bf16.mxu0 %v4282_v37  ;;  %3348 = vmatprep.subr.bf16.mxu1 %v4388_v27 }
 0x5ff   :  { %3318 = vmatpush1.bf16.msra.mxu0 %v4292_v49  ;;  %3350 = vmatpush1.bf16.msra.mxu1 %v4396_v16 }
 0x600   :  { %3320 = vmatprep.subr.bf16.mxu0 %v4296_v51  ;;  %3352 = vmatprep.subr.bf16.mxu1 %v4399_v38 }
 0x603   :  { %3322 = vmatpush1.bf16.msra.mxu0 %v4306_v3  ;;  %3354 = vmatpush1.bf16.msra.mxu1 %v4406_v30 }
 0x604   :  { %3324 = vmatprep.subr.bf16.mxu0 %v4310_v5  ;;  %3356 = vmatprep.subr.bf16.mxu1 %v4409_v47 }
 0x607   :  { %3326 = vmatpush1.bf16.msra.mxu0 %v4320_v22  ;;  %3358 = vmatpush1.bf16.msra.mxu1 %v4416_v44 }
 0x608   :  { %3328 = vmatprep.subr.bf16.mxu0 %v4324_v25  ;;  %3360 = vmatprep.subr.bf16.mxu1 %v4419_v61 }
 0x60b   :  { %3330 = vmatpush1.bf16.msra.mxu0 %v4334_v41  ;;  %3362 = vmatpush1.bf16.msra.mxu1 %v4426_v59 }
 0x60c   :  { %3332 = vmatprep.subr.bf16.mxu0 %v4338_v45  ;;  %3364 = vmatprep.subr.bf16.mxu1 %v4429_v18 }
 0x60f   :  { %3334 = vmatpush1.bf16.msra.mxu0 %v4350_v58  ;;  %3366 = vmatpush1.bf16.msra.mxu1 %v4436_v15 }
 0x610   :  { %3368 = vmatprep.subr.bf16.mxu0 %v4245_v57  ;;  %3400 = vmatprep.subr.bf16.mxu1 %v4347_v53  ;;  %v5046_v57 = vld [vmem:[#allocation27_spill] sm:$0xff] }
 0x611   :  { %v363_v55 = vadd.f32 %v5046_v57, %v4515_v4 }
 0x6c4   :  { %v1865_v2 = vpop.f32.mrb[20].mxu0  ;;  %v1942_v14 = vpop.f32.mrb[36].mxu1 }
 0x6c5   :  { %v1953_v33 = vadd.f32 %v1865_v2, %v355_v40  ;;  %v1867_v60 = vpop.f32.mrb[21].mxu0  ;;  %v1944_v19 = vpop.f32.mrb[37].mxu1  ;;  %v3547_v48 = vadd.f32 %v1942_v14, %v4523_v20 }
 0x6c6   :  { %v1954_v28 = vadd.f32 %v1867_v60, %v357_v29  ;;  %v3548_v32 = vadd.f32 %v1944_v19, %v4525_v36 }
 0x6c7   :  { %v2748_v42 = vmul.f32 -1.442695, %v1953_v33  ;;  %v2750_v40 = vmul.f32 -1.442695, %v3547_v48 }
 0x6c8   :  { %v2749_v53 = vmul.f32 -1.442695, %v1954_v28  ;;  %v1871_v50 = vpop.f32.mrb[22].mxu0  ;;  %v1948_v0 = vpop.f32.mrb[38].mxu1 }
 0x6c9   :  { %3781 = vpow2.f32 %v2748_v42  ;;  %v1957_v56 = vadd.f32 %v1871_v50, %v361_v54  ;;  %v1873_v39 = vpop.f32.mrb[23].mxu0  ;;  %v1950_v12 = vpop.f32.mrb[39].mxu1  ;;  %v3549_v29 = vadd.f32 %v1948_v0, %v4523_v20 }
 0x6ca   :  { %v1958_v31 = vadd.f32 %v1873_v39, %v363_v55  ;;  %3783 = vpow2.f32 %v2749_v53  ;;  %v3550_v33 = vadd.f32 %v1950_v12, %v4525_v36 }
 0x6cb   :  { %v2751_v11 = vmul.f32 -1.442695, %v1957_v56  ;;  %v2753_v54 = vmul.f32 -1.442695, %v3549_v29 }
 0x6cc   :  { %v2752_v24 = vmul.f32 -1.442695, %v1958_v31 }
 0x6cd   :  { %3785 = vpow2.f32 %v2751_v11 }
 0x6ce   :  { %3787 = vpow2.f32 %v2752_v24 }
 0x6cf   :  { %3789 = vtanh.f32 %v3548_v32 }
 0x6d0   :  { %3791 = vpow2.f32 %v2750_v40 }
 0x6d3   :  { %v3782_v2 = vpop.eup %3781 }
 0x6d4   :  { %v1979_v60 = vadd.f32 1.0, %v3782_v2  ;;  %v3784_v28 = vpop.eup %3783 }
 0x6d5   :  { %v1980_v42 = vadd.f32 1.0, %v3784_v28 }
 0x6d6   :  { %3793 = vrcp.f32 %v1979_v60 }
 0x6d7   :  { %v3786_v57 = vpop.eup %3785  ;;  %3795 = vtanh.f32 %v3550_v33 }
 0x6d8   :  { %3797 = vrcp.f32 %v1980_v42  ;;  %v1982_v14 = vadd.f32 1.0, %v3786_v57  ;;  %v3788_v55 = vpop.eup %3787 }
 0x6d9   :  { %3799 = vpow2.f32 %v2753_v54  ;;  %v1983_v19 = vadd.f32 1.0, %v3788_v55  ;;  %v3790_v53 = vpop.eup %3789 }
 0x6da   :  { %3801 = vrcp.f32 %v1982_v14  ;;  %v3792_v50 = vpop.eup %3791 }
 0x6db   :  { %3803 = vrcp.f32 %v1983_v19  ;;  %v1981_v31 = vadd.f32 1.0, %v3792_v50 }
 0x6dd   :  { %3805 = vrcp.f32 %v1981_v31 }
 0x6e0   :  { %v3794_v0 = vpop.eup %3793 }
 0x6e1   :  { %v3796_v56 = vpop.eup %3795  ;;  %v2001_v39 = vmul.f32 %v3794_v0, %v3790_v53 }
 0x6e2   :  { %v3798_v12 = vpop.eup %3797 }
 0x6e3   :  { %v3800_v11 = vpop.eup %3799  ;;  %v1999_v24 = vmul.f32 %v3798_v12, %v4780_v46 }
 0x6e4   :  { %v3802_v48 = vpop.eup %3801  ;;  %v1984_v2 = vadd.f32 1.0, %v3800_v11 }
 0x6e5   :  { %v4844_v32 = vadd.f32 %v2001_v39, %v1999_v24  ;;  %v2002_v40 = vmul.f32 %v3802_v48, %v3796_v56  ;;  %v3804_v29 = vpop.eup %3803 }
 0x6e6   :  { %v2000_v33 = vmul.f32 %v3804_v29, %v4784_v10 }
 0x6e7   :  { %3807 = vtanh.f32 %v4844_v32  ;;  %v3806_v28 = vpop.eup %3805 }
 0x6e8   :  { %v4848_v60 = vadd.f32 %v2002_v40, %v2000_v33  ;;  %3809 = vrcp.f32 %v1984_v2 }
 0x6ea   :  { %3811 = vtanh.f32 %v4848_v60 }
 0x6f1   :  { %v3808_v54 = vpop.eup %3807 }
 0x6f2   :  { %v4851_v42 = vmul.f32 %v3808_v54, %v3806_v28  ;;  %v3810_v46 = vpop.eup %3809 }
 0x6f4   :  { %2086 = vmatmul.mubr.f32.vlgmr.msra.gmra.mrb[24].mxu0 %v4851_v42  ;;  %2163 = vmatmul.mubr.f32.vlgmr.msra.gmra.mrb[40].mxu1 %v4851_v42  ;;  %v3812_v57 = vpop.eup %3811 }
 0x6f5   :  { %2091 = vmatprep.mubr.f32.mxu0 %v5040_v43  ;;  %2168 = vmatprep.mubr.f32.mxu1 %v5040_v43  ;;  %v4857_v10 = vmul.f32 %v3812_v57, %v3810_v46 }
 0x6f6   :  { %3370 = vmatpush1.bf16.msra.mxu0 %v4252_v7  ;;  %3402 = vmatpush1.bf16.msra.mxu1 %v4357_v62  ;;  %v2460_v7 = vld [vmem:[#allocation15] sm:$0xff] }
 0x6f7   :  { %3372 = vmatprep.subr.bf16.mxu0 %v4254_v9  ;;  %3404 = vmatprep.subr.bf16.mxu1 %v4360_v1  ;;  %v2461_v9 = vld [vmem:[#allocation15 + $0x8] sm:$0xff]  ;;  %v5050_v1 = vld [vmem:[#allocation31_spill] sm:$0xff] }
 0x6f8   :  { %2092 = vmatmul.mubr.f32.gmra.mrb[26].mxu0 %v4857_v10  ;;  %2169 = vmatmul.mubr.f32.gmra.mrb[42].mxu1 %v4857_v10 }
 0x6f9   :  { %2307 = vmatprep.mubr.f32.mxu0 %v5040_v43  ;;  %2384 = vmatprep.mubr.f32.mxu1 %v5040_v43 }
 0x6fa   :  { %3374 = vmatpush1.bf16.msra.mxu0 %v4264_v21  ;;  %3406 = vmatpush1.bf16.msra.mxu1 %v4370_v13  ;;  %v4893_v21 = vpack.c.bf16 %v2461_v9, %v2460_v7  ;;  %v375_v13 = vadd.f32 %v5050_v1, %v4515_v4 }
 0x6fb   :  { %3376 = vmatprep.subr.bf16.mxu0 %v4268_v23  ;;  %3408 = vmatprep.subr.bf16.mxu1 %v4373_v17  ;;  %v5047_v23 = vld [vmem:[#allocation28_spill] sm:$0xff] }
 0x6fe   :  { %3378 = vmatpush1.bf16.msra.mxu0 %v4278_v35  ;;  %3410 = vmatpush1.bf16.msra.mxu1 %v4384_v26  ;;  %v367_v35 = vadd.f32 %v5047_v23, %v4517_v6 }
 0x6ff   :  { %3380 = vmatprep.subr.bf16.mxu0 %v4282_v37  ;;  %3412 = vmatprep.subr.bf16.mxu1 %v4388_v27  ;;  %v5048_v37 = vld [vmem:[#allocation29_spill] sm:$0xff] }
 0x702   :  { %3382 = vmatpush1.bf16.msra.mxu0 %v4292_v49  ;;  %3414 = vmatpush1.bf16.msra.mxu1 %v4396_v16  ;;  %v369_v49 = vadd.f32 %v5048_v37, %v4515_v4 }
 0x703   :  { %3384 = vmatprep.subr.bf16.mxu0 %v4296_v51  ;;  %3416 = vmatprep.subr.bf16.mxu1 %v4399_v38 }
 0x706   :  { %3386 = vmatpush1.bf16.msra.mxu0 %v4306_v3  ;;  %3418 = vmatpush1.bf16.msra.mxu1 %v4406_v30 }
 0x707   :  { %3388 = vmatprep.subr.bf16.mxu0 %v4310_v5  ;;  %3420 = vmatprep.subr.bf16.mxu1 %v4409_v47 }
 0x70a   :  { %3390 = vmatpush1.bf16.msra.mxu0 %v4320_v22  ;;  %3422 = vmatpush1.bf16.msra.mxu1 %v4416_v44 }
 0x70b   :  { %3392 = vmatprep.subr.bf16.mxu0 %v4324_v25  ;;  %3424 = vmatprep.subr.bf16.mxu1 %v4419_v61 }
 0x70e   :  { %3394 = vmatpush1.bf16.msra.mxu0 %v4334_v41  ;;  %3426 = vmatpush1.bf16.msra.mxu1 %v4426_v59 }
 0x70f   :  { %3396 = vmatprep.subr.bf16.mxu0 %v4338_v45  ;;  %3428 = vmatprep.subr.bf16.mxu1 %v4429_v18  ;;  %v5049_v45 = vld [vmem:[#allocation30_spill] sm:$0xff] }
 0x712   :  { %3398 = vmatpush1.bf16.msra.mxu0 %v4350_v58  ;;  %3430 = vmatpush1.bf16.msra.mxu1 %v4436_v15  ;;  %v373_v58 = vadd.f32 %v5049_v45, %v4517_v6  ;;  %v2465_v45 = vld [vmem:[#allocation15 + $0x28] sm:$0xff] }
 0x713   :  { %3432 = vmatprep.subr.bf16.mxu0 %v4893_v21 }
 0x7c7   :  { %v2087_v51 = vpop.f32.mrb[24].mxu0  ;;  %v2164_v3 = vpop.f32.mrb[40].mxu1 }
 0x7c8   :  { %v2175_v5 = vadd.f32 %v2087_v51, %v367_v35  ;;  %v2089_v22 = vpop.f32.mrb[25].mxu0  ;;  %v2166_v25 = vpop.f32.mrb[41].mxu1  ;;  %v3551_v59 = vadd.f32 %v2164_v3, %v4523_v20  ;;  %v2462_v51 = vld [vmem:[#allocation15 + $0x10] sm:$0xff]  ;;  %v2463_v3 = vld [vmem:[#allocation15 + $0x18] sm:$0xff] }
 0x7c9   :  { %v2176_v41 = vadd.f32 %v2089_v22, %v369_v49  ;;  %v3552_v18 = vadd.f32 %v2166_v25, %v4525_v36  ;;  %v3435_v25 = vpack.c.bf16 %v2463_v3, %v2462_v51 }
 0x7ca   :  { %v2754_v62 = vmul.f32 -1.442695, %v2175_v5  ;;  %v2756_v15 = vmul.f32 -1.442695, %v3551_v59 }
 0x7cb   :  { %v2755_v17 = vmul.f32 -1.442695, %v2176_v41  ;;  %v2093_v26 = vpop.f32.mrb[26].mxu0  ;;  %v2170_v27 = vpop.f32.mrb[42].mxu1  ;;  %v2464_v41 = vld [vmem:[#allocation15 + $0x20] sm:$0xff] }
 0x7cc   :  { %3813 = vpow2.f32 %v2754_v62  ;;  %v2179_v16 = vadd.f32 %v2093_v26, %v373_v58  ;;  %v2095_v38 = vpop.f32.mrb[27].mxu0  ;;  %v2172_v30 = vpop.f32.mrb[43].mxu1  ;;  %v3553_v14 = vadd.f32 %v2170_v27, %v4523_v20  ;;  %v3439_v1 = vpack.c.bf16 %v2465_v45, %v2464_v41  ;;  %v5051_v26 = vld [vmem:[#allocation36_spill] sm:$0xff] }
 0x7cd   :  { %v2180_v47 = vadd.f32 %v2095_v38, %v375_v13  ;;  %3815 = vpow2.f32 %v2755_v17  ;;  %v3554_v19 = vadd.f32 %v2172_v30, %v4525_v36  ;;  %v2466_v13 = vld [vmem:[#allocation15 + $0x30] sm:$0xff]  ;;  %v2467_v17 = vld [vmem:[#allocation15 + $0x38] sm:$0xff]  ;;  %v2469_v38 = vld [vmem:[#allocation15 + $0x48] sm:$0xff] }
 0x7ce   :  { %v2757_v44 = vmul.f32 -1.442695, %v2179_v16  ;;  %v2759_v0 = vmul.f32 -1.442695, %v3553_v14  ;;  %v3443_v27 = vpack.c.bf16 %v2467_v17, %v2466_v13  ;;  %v2468_v16 = vld [vmem:[#allocation15 + $0x40] sm:$0xff]  ;;  %v2470_v30 = vld [vmem:[#allocation15 + $0x50] sm:$0xff] }
 0x7cf   :  { %v2758_v61 = vmul.f32 -1.442695, %v2180_v47  ;;  %v2471_v47 = vld [vmem:[#allocation15 + $0x58] sm:$0xff] }
 0x7d0   :  { %3817 = vpow2.f32 %v2757_v44  ;;  %v2472_v44 = vld [vmem:[#allocation15 + $0x60] sm:$0xff] }
 0x7d1   :  { %3819 = vpow2.f32 %v2758_v61  ;;  %v2473_v61 = vld [vmem:[#allocation15 + $0x68] sm:$0xff] }
 0x7d2   :  { %3821 = vtanh.f32 %v3552_v18  ;;  %v3455_v59 = vpack.c.bf16 %v2473_v61, %v2472_v44  ;;  %v2474_v18 = vld [vmem:[#allocation15 + $0x70] sm:$0xff] }
 0x7d3   :  { %3823 = vpow2.f32 %v2756_v15  ;;  %v2475_v15 = vld [vmem:[#allocation15 + $0x78] sm:$0xff] }
 0x7d4   :  { %v3459_v14 = vpack.c.bf16 %v2475_v15, %v2474_v18 }
 0x7d6   :  { %v3814_v55 = vpop.eup %3813 }
 0x7d7   :  { %v2201_v53 = vadd.f32 1.0, %v3814_v55  ;;  %v3816_v50 = vpop.eup %3815  ;;  %v5052_v55 = vld [vmem:[#allocation37_spill] sm:$0xff] }
 0x7d8   :  { %v2202_v56 = vadd.f32 1.0, %v3816_v50  ;;  %v5055_v50 = vld [vmem:[#allocation40_spill] sm:$0xff] }
 0x7d9   :  { %3825 = vrcp.f32 %v2201_v53  ;;  %v5054_v53 = vld [vmem:[#allocation39_spill] sm:$0xff] }
 0x7da   :  { %v3818_v39 = vpop.eup %3817  ;;  %3827 = vtanh.f32 %v3554_v19  ;;  %v5053_v19 = vld [vmem:[#allocation38_spill] sm:$0xff] }
 0x7db   :  { %3829 = vrcp.f32 %v2202_v56  ;;  %v2204_v12 = vadd.f32 1.0, %v3818_v39  ;;  %v3820_v31 = vpop.eup %3819  ;;  %v5057_v56 = vld [vmem:[#allocation32_spill] sm:$0xff] }
 0x7dc   :  { %3831 = vpow2.f32 %v2759_v0  ;;  %v2205_v11 = vadd.f32 1.0, %v3820_v31  ;;  %v3822_v24 = vpop.eup %3821  ;;  %v5056_v0 = vld [vmem:[#allocation41_spill] sm:$0xff]  ;;  %v379_v39 = vadd.f32 %v5057_v56, %v4517_v6 }
 0x7dd   :  { %3833 = vrcp.f32 %v2204_v12  ;;  %v3824_v48 = vpop.eup %3823  ;;  %v5058_v12 = vld [vmem:[#allocation33_spill] sm:$0xff] }
 0x7de   :  { %3835 = vrcp.f32 %v2205_v11  ;;  %v2203_v28 = vadd.f32 1.0, %v3824_v48  ;;  %v381_v31 = vadd.f32 %v5058_v12, %v4515_v4 }
 0x7e0   :  { %3837 = vrcp.f32 %v2203_v28 }
 0x7e3   :  { %v3826_v40 = vpop.eup %3825 }
 0x7e4   :  { %v3828_v29 = vpop.eup %3827  ;;  %v2223_v2 = vmul.f32 %v3826_v40, %v3822_v24 }
 0x7e5   :  { %v3830_v33 = vpop.eup %3829 }
 0x7e6   :  { %v3832_v54 = vpop.eup %3831  ;;  %v2221_v46 = vmul.f32 %v3830_v33, %v4844_v32 }
 0x7e7   :  { %v3834_v57 = vpop.eup %3833  ;;  %v2206_v35 = vadd.f32 1.0, %v3832_v54 }
 0x7e8   :  { %v4909_v7 = vadd.f32 %v2223_v2, %v2221_v46  ;;  %v2224_v9 = vmul.f32 %v3834_v57, %v3828_v29  ;;  %v3836_v23 = vpop.eup %3835 }
 0x7e9   :  { %v2222_v37 = vmul.f32 %v3836_v23, %v4848_v60 }
 0x7ea   :  { %3839 = vtanh.f32 %v4909_v7  ;;  %v3838_v5 = vpop.eup %3837 }
 0x7eb   :  { %v4913_v49 = vadd.f32 %v2224_v9, %v2222_v37  ;;  %3841 = vrcp.f32 %v2206_v35 }
 0x7ed   :  { %3843 = vtanh.f32 %v4913_v49 }
 0x7f4   :  { %v3840_v32 = vpop.eup %3839 }
 0x7f5   :  { %v2229_v22 = vmul.f32 %v3840_v32, %v3838_v5  ;;  %v3842_v58 = vpop.eup %3841 }
 0x7f7   :  { %2308 = vmatmul.mubr.f32.vlgmr.msra.gmra.mrb[28].mxu0 %v2229_v22  ;;  %2385 = vmatmul.mubr.f32.vlgmr.msra.gmra.mrb[44].mxu1 %v2229_v22  ;;  %v3844_v62 = vpop.eup %3843 }
 0x7f8   :  { %3434 = vmatpush3.bf16.msra.mxu0 %v4893_v21  ;;  %2313 = vmatprep.mubr.f32.mxu0 %v5040_v43  ;;  %v2230_v60 = vmul.f32 %v3844_v62, %v3842_v58  ;;  %v3447_v21 = vpack.c.bf16 %v2469_v38, %v2468_v16  ;;  %v4946_v16 = vld [vmem:[%s5018_s7] ss:$0 sm:$0xff]  ;;  %s4098_s7 = smov [#allocation18]  }
 0x7f9   :  { %2390 = vmatprep.mubr.f32.mxu1 %v5040_v43  ;;  %3436 = vmatprep.subr.bf16.mxu0 %v3435_v25  ;;  %v3451_v43 = vpack.c.bf16 %v2471_v47, %v2470_v30  ;;  %s2684_s12 = sshll.u32 %s4098_s7, 4  ;;  %s2685_s12 = int_to_ptr.vmem [resolvable:$true] %s2684_s12 }
 0x7fa   :  { %s4009_s13 = scalar_lea.vmem %s2685_s12, 256  ;;  %p4014_p7 = scmp.lt.s32.totalorder %s2685_s12, %s2685_s12 }
 0x7fb   :  { %2314 = vmatmul.mubr.f32.gmra.mrb[30].mxu0 %v2230_v60  ;;  %2391 = vmatmul.mubr.f32.gmra.mrb[46].mxu1 %v2230_v60  ;;  %p4010_p6 = scmp.ne.s32.totalorder %s2685_s12, %s4009_s13  ;;  %p4015_p8 = scmp.lt.s32.totalorder %s4009_s13, %s4009_s13 }
 0x7fc   :  { %3438 = vmatpush3.bf16.msra.mxu0 %v3435_v25  ;;  %2831 = vmatprep.mubr.f32.mxu0 %v5051_v26 }
 0x7fd   :  { %3440 = vmatprep.subr.bf16.mxu0 %v3439_v1  ;;  %p4016_p9 = por %p4015_p8, %p4014_p7 }
 0x7ff   :  { %p4017_p10 = pnand %p4016_p9, %p4010_p6 }
 0x800   :  { %3442 = vmatpush3.bf16.msra.mxu0 %v3439_v1 }
 0x801   :  { %3444 = vmatprep.subr.bf16.mxu0 %v3443_v27 }
 0x804   :  { %3446 = vmatpush3.bf16.msra.mxu0 %v3443_v27 }
 0x805   :  { %3448 = vmatprep.subr.bf16.mxu0 %v3447_v21 }
 0x808   :  { %3450 = vmatpush3.bf16.msra.mxu0 %v3447_v21 }
 0x809   :  { %3452 = vmatprep.subr.bf16.mxu0 %v3451_v43 }
 0x80c   :  { %3454 = vmatpush3.bf16.msra.mxu0 %v3451_v43 }
 0x80d   :  { %3456 = vmatprep.subr.bf16.mxu0 %v3455_v59 }
 0x810   :  { %3458 = vmatpush3.bf16.msra.mxu0 %v3455_v59 }
 0x811   :  { %3460 = vmatprep.subr.bf16.mxu0 %v3459_v14 }
 0x814   :  { %3462 = vmatpush3.bf16.msra.mxu0 %v3459_v14 }
 0x817   :  { %2832 = vmatmul.mubr.f32.vlgmr.msra.gmra.mrb[32].mxu0 %v5052_v55 }
 0x818   :  { %2834 = vmatprep.mubr.f32.mxu0 %v5053_v19 }
 0x81b   :  { %2835 = vmatmul.mubr.f32.gmra.mrb[34].mxu0 %v5054_v53 }
 0x81c   :  { %2837 = vmatprep.mubr.f32.mxu0 %v5055_v50 }
 0x81f   :  { %2838 = vmatmul.mubr.f32.gmra.mrb[36].mxu0 %v5056_v0 }
 0x820   :  { %2840 = vmatprep.mubr.f32.mxu0 %v4723_v34 }
 0x823   :  { %2841 = vmatmul.mubr.f32.gmra.mrb[38].mxu0 %v4729_v8 }
 0x824   :  { %2843 = vmatprep.mubr.f32.mxu0 %v4787_v63 }
 0x827   :  { %2844 = vmatmul.mubr.f32.gmra.mrb[40].mxu0 %v4793_v52  ;;  %v5059_v52 = vld [vmem:[#allocation34_spill] sm:$0xff] }
 0x828   :  { %2846 = vmatprep.mubr.f32.mxu0 %v4851_v42  ;;  %v385_v40 = vadd.f32 %v5059_v52, %v4517_v6 }
 0x82b   :  { %2847 = vmatmul.mubr.f32.gmra.mrb[42].mxu0 %v4857_v10  ;;  %v5060_v10 = vld [vmem:[#allocation35_spill] sm:$0xff] }
 0x82c   :  { %2849 = vmatprep.mubr.f32.mxu0 %v2229_v22  ;;  %v387_v29 = vadd.f32 %v5060_v10, %v4515_v4 }
 0x82f   :  { %2850 = vmatmul.mubr.f32.gmra.mrb[44].mxu0 %v2230_v60 }
 0x8ca   :  { %v2309_v11 = vpop.f32.mrb[28].mxu0  ;;  %v2386_v34 = vpop.f32.mrb[44].mxu1 }
 0x8cb   :  { %v2397_v24 = vadd.f32 %v2309_v11, %v379_v39  ;;  %v2311_v8 = vpop.f32.mrb[29].mxu0  ;;  %v2388_v48 = vpop.f32.mrb[45].mxu1  ;;  %v3555_v37 = vadd.f32 %v2386_v34, %v4523_v20 }
 0x8cc   :  { %v2398_v63 = vadd.f32 %v2311_v8, %v381_v31  ;;  %v3556_v6 = vadd.f32 %v2388_v48, %v4525_v36 }
 0x8cd   :  { %v2760_v42 = vmul.f32 -1.442695, %v2397_v24  ;;  %v2762_v51 = vmul.f32 -1.442695, %v3555_v37 }
 0x8ce   :  { %v2761_v2 = vmul.f32 -1.442695, %v2398_v63  ;;  %v2315_v33 = vpop.f32.mrb[30].mxu0  ;;  %v2392_v28 = vpop.f32.mrb[46].mxu1 }
 0x8cf   :  { %3845 = vpow2.f32 %v2760_v42  ;;  %v2401_v54 = vadd.f32 %v2315_v33, %v385_v40  ;;  %v2317_v46 = vpop.f32.mrb[31].mxu0  ;;  %v2394_v57 = vpop.f32.mrb[47].mxu1  ;;  %v3557_v4 = vadd.f32 %v2392_v28, %v4523_v20 }
 0x8d0   :  { %v2402_v9 = vadd.f32 %v2317_v46, %v387_v29  ;;  %3847 = vpow2.f32 %v2761_v2  ;;  %v3558_v5 = vadd.f32 %v2394_v57, %v4525_v36 }
 0x8d1   :  { %v2763_v23 = vmul.f32 -1.442695, %v2401_v54  ;;  %v2765_v25 = vmul.f32 -1.442695, %v3557_v4 }
 0x8d2   :  { %v2764_v35 = vmul.f32 -1.442695, %v2402_v9 }
 0x8d3   :  { %3849 = vpow2.f32 %v2763_v23 }
 0x8d4   :  { %3851 = vpow2.f32 %v2764_v35 }
 0x8d5   :  { %3853 = vtanh.f32 %v3556_v6 }
 0x8d6   :  { %3855 = vpow2.f32 %v2762_v51 }
 0x8d9   :  { %v3846_v3 = vpop.eup %3845 }
 0x8da   :  { %v2423_v32 = vadd.f32 1.0, %v3846_v3  ;;  %v3848_v22 = vpop.eup %3847 }
 0x8db   :  { %v2424_v41 = vadd.f32 1.0, %v3848_v22 }
 0x8dc   :  { %3857 = vrcp.f32 %v2423_v32 }
 0x8dd   :  { %v3850_v45 = vpop.eup %3849  ;;  %3859 = vtanh.f32 %v3558_v5 }
 0x8de   :  { %3861 = vrcp.f32 %v2424_v41  ;;  %v2426_v58 = vadd.f32 1.0, %v3850_v45  ;;  %v3852_v62 = vpop.eup %3851 }
 0x8df   :  { %3863 = vpow2.f32 %v2765_v25  ;;  %v2427_v60 = vadd.f32 1.0, %v3852_v62  ;;  %v3854_v20 = vpop.eup %3853 }
 0x8e0   :  { %3865 = vrcp.f32 %v2426_v58  ;;  %v3856_v1 = vpop.eup %3855 }
 0x8e1   :  { %3867 = vrcp.f32 %v2427_v60  ;;  %v2425_v27 = vadd.f32 1.0, %v3856_v1 }
 0x8e3   :  { %3869 = vrcp.f32 %v2425_v27 }
 0x8e6   :  { %v3858_v13 = vpop.eup %3857 }
 0x8e7   :  { %v3860_v36 = vpop.eup %3859  ;;  %v2445_v17 = vmul.f32 %v3858_v13, %v3854_v20 }
 0x8e8   :  { %v3862_v26 = vpop.eup %3861 }
 0x8e9   :  { %v3864_v38 = vpop.eup %3863  ;;  %v2443_v21 = vmul.f32 %v3862_v26, %v4909_v7 }
 0x8ea   :  { %v3866_v30 = vpop.eup %3865  ;;  %v2833_v47 = vpop.f32.mrb[32].mxu0  ;;  %v2428_v15 = vadd.f32 1.0, %v3864_v38 }
 0x8eb   :  { %v2447_v43 = vadd.f32 %v2445_v17, %v2443_v21  ;;  %v2446_v44 = vmul.f32 %v3866_v30, %v3860_v36  ;;  %v2571_v61 = vadd.f32 %v2833_v47, %v4946_v16  ;;  %v2565_v59 = vpop.f32.mrb[33].mxu0  ;;  %v3868_v18 = vpop.eup %3867 }
 0x8ec   :  { %v2566_v14 = vadd.f32 %v4946_v16, %v2565_v59  ;;  %v2444_v55 = vmul.f32 %v3868_v18, %v4913_v49 }
 0x8ed   :  { %2665 = vst [vmem:[#allocation20] sm:$0xff] %v2447_v43  ;;  %2645 = vst [vmem:[#allocation17 + $0x8] sm:$0xff] %v2571_v61  ;;  %3871 = vtanh.f32 %v2447_v43  ;;  %v3870_v31 = vpop.eup %3869 }
 0x8ee   :  { %2644 = vst [vmem:[#allocation17] sm:$0xff] %v2566_v14  ;;  %v2836_v19 = vpop.f32.mrb[34].mxu0  ;;  %v2448_v7 = vadd.f32 %v2446_v44, %v2444_v55  ;;  %3873 = vrcp.f32 %v2428_v15 }
 0x8ef   :  { %v2581_v53 = vadd.f32 %v2836_v19, %v4946_v16  ;;  %v2575_v50 = vpop.f32.mrb[35].mxu0 }
 0x8f0   :  { %v2576_v0 = vadd.f32 %v4946_v16, %v2575_v50  ;;  %2666 = vst [vmem:[#allocation20 + $0x8] sm:$0xff] %v2448_v7  ;;  %3875 = vtanh.f32 %v2448_v7 }
 0x8f1   :  { %2647 = vst [vmem:[#allocation17 + $0x18] sm:$0xff] %v2581_v53 }
 0x8f2   :  { %2646 = vst [vmem:[#allocation17 + $0x10] sm:$0xff] %v2576_v0  ;;  %v2839_v56 = vpop.f32.mrb[36].mxu0 }
 0x8f3   :  { %v2591_v39 = vadd.f32 %v2839_v56, %v4946_v16  ;;  %v2585_v12 = vpop.f32.mrb[37].mxu0 }
 0x8f4   :  { %v2586_v49 = vadd.f32 %v4946_v16, %v2585_v12 }
 0x8f5   :  { %2649 = vst [vmem:[#allocation17 + $0x28] sm:$0xff] %v2591_v39 }
 0x8f6   :  { %2648 = vst [vmem:[#allocation17 + $0x20] sm:$0xff] %v2586_v49  ;;  %v2842_v11 = vpop.f32.mrb[38].mxu0 }
 0x8f7   :  { %v3872_v34 = vpop.eup %3871  ;;  %v2601_v24 = vadd.f32 %v2842_v11, %v4946_v16  ;;  %v2595_v8 = vpop.f32.mrb[39].mxu0 }
 0x8f8   :  { %v2596_v48 = vadd.f32 %v4946_v16, %v2595_v8  ;;  %v2451_v63 = vmul.f32 %v3872_v34, %v3870_v31  ;;  %v3874_v52 = vpop.eup %3873 }
 0x8f9   :  { %2651 = vst [vmem:[#allocation17 + $0x38] sm:$0xff] %v2601_v24 }
 0x8fa   :  { %2650 = vst [vmem:[#allocation17 + $0x30] sm:$0xff] %v2596_v48  ;;  %v2845_v40 = vpop.f32.mrb[40].mxu0  ;;  %2852 = vmatprep.mubr.f32.mxu0 %v2451_v63  ;;  %2663 = vst [vmem:[#allocation18] sm:$0xff] %v2451_v63  ;;  %v3876_v42 = vpop.eup %3875 }
 0x8fb   :  { %v2611_v10 = vadd.f32 %v2845_v40, %v4946_v16  ;;  %v2605_v29 = vpop.f32.mrb[41].mxu0  ;;  %v2452_v33 = vmul.f32 %v3876_v42, %v3874_v52 }
 0x8fc   :  { %v2606_v2 = vadd.f32 %v4946_v16, %v2605_v29 }
 0x8fd   :  { %2653 = vst [vmem:[#allocation17 + $0x48] sm:$0xff] %v2611_v10  ;;  %2853 = vmatmul.mubr.f32.gmra.mrb[46].mxu0 %v2452_v33  ;;  %2664 = vst [vmem:[#allocation18 + $0x8] sm:$0xff] %v2452_v33 }
 0x8fe   :  { %2652 = vst [vmem:[#allocation17 + $0x40] sm:$0xff] %v2606_v2  ;;  %v2848_v28 = vpop.f32.mrb[42].mxu0 }
 0x8ff   :  { %v2621_v54 = vadd.f32 %v2848_v28, %v4946_v16  ;;  %v2615_v46 = vpop.f32.mrb[43].mxu0 }
 0x900   :  { %v2616_v57 = vadd.f32 %v4946_v16, %v2615_v46 }
 0x901   :  { %2655 = vst [vmem:[#allocation17 + $0x58] sm:$0xff] %v2621_v54 }
 0x902   :  { %2654 = vst [vmem:[#allocation17 + $0x50] sm:$0xff] %v2616_v57  ;;  %v2851_v9 = vpop.f32.mrb[44].mxu0 }
 0x903   :  { %v2631_v23 = vadd.f32 %v2851_v9, %v4946_v16  ;;  %v2625_v35 = vpop.f32.mrb[45].mxu0 }
 0x904   :  { %v2626_v37 = vadd.f32 %v4946_v16, %v2625_v35 }
 0x905   :  { %2657 = vst [vmem:[#allocation17 + $0x68] sm:$0xff] %v2631_v23 }
 0x906   :  { %2656 = vst [vmem:[#allocation17 + $0x60] sm:$0xff] %v2626_v37 }
 0x907   :  { %4020 = shalt.err (!%p4017_p10)
}
 0x908   :  { %s4021_s1 = scalar_lea.hbm %s5020_s9, 256 }
 0x909   :  { %p4022_p11 = scmp.ne.s32.totalorder %s5020_s9, %s4021_s1  ;;  %p4025_p12 = scmp.lt.u32.totalorder %s4021_s1, %s5020_s9 }
 0x90b   :  { %p4027_p13 = pnand %p4025_p12, %p4022_p11 }
 0x90d   :  { %4030 = shalt.err (!%p4027_p13)
}
 0x90e   :  { %2690 = dma.vmem_to_hbm [thread:$0]  %s2685_s12, 256, %s5020_s9, [#allocation19], %s4092_s3, %s4092_s3, %s4093_s28  }
 0x90f   :  { %s4099_s20 = smov [#allocation20]  }
 0x910   :  { %s2696_s21 = sshll.u32 %s4099_s20, 4  ;;  %s2697_s21 = int_to_ptr.vmem [resolvable:$true] %s2696_s21 }
 0x911   :  { %s4031_s22 = scalar_lea.vmem %s2697_s21, 256  ;;  %p4036_p1 = scmp.lt.s32.totalorder %s2697_s21, %s2697_s21 }
 0x912   :  { %p4032_p0 = scmp.ne.s32.totalorder %s2697_s21, %s4031_s22  ;;  %p4037_p2 = scmp.lt.s32.totalorder %s4031_s22, %s4031_s22 }
 0x914   :  { %p4038_p3 = por %p4037_p2, %p4036_p1 }
 0x916   :  { %p4039_p4 = pnand %p4038_p3, %p4032_p0 }
 0x918   :  { %4042 = shalt.err (!%p4039_p4)
}
 0x919   :  { %s4043_s30 = scalar_lea.hbm %s5021_s10, 256 }
 0x91a   :  { %p4044_p5 = scmp.ne.s32.totalorder %s5021_s10, %s4043_s30  ;;  %p4047_p6 = scmp.lt.u32.totalorder %s4043_s30, %s5021_s10 }
 0x91c   :  { %p4049_p7 = pnand %p4047_p6, %p4044_p5 }
 0x91e   :  { %4052 = shalt.err (!%p4049_p7)
}
 0x91f   :  { %2702 = dma.vmem_to_hbm [thread:$0]  %s2697_s21, 256, %s5021_s10, [#allocation19], %s4092_s3, %s4092_s3, %s4093_s28  }
 0x920   :  { %s4100_s29 = smov [#allocation17]  }
 0x921   :  { %s2672_s5 = sshll.u32 %s4100_s29, 4  ;;  %s2673_s5 = int_to_ptr.vmem [resolvable:$true] %s2672_s5 }
 0x922   :  { %s4053_s11 = scalar_lea.vmem %s2673_s5, 2048  ;;  %p4058_p9 = scmp.lt.s32.totalorder %s2673_s5, %s2673_s5 }
 0x923   :  { %p4054_p8 = scmp.ne.s32.totalorder %s2673_s5, %s4053_s11  ;;  %p4059_p10 = scmp.lt.s32.totalorder %s4053_s11, %s4053_s11 }
 0x925   :  { %p4060_p11 = por %p4059_p10, %p4058_p9 }
 0x927   :  { %p4061_p12 = pnand %p4060_p11, %p4054_p8 }
 0x9d0   :  { %v2854_v6 = vpop.f32.mrb[46].mxu0 }
 0x9d1   :  { %v2641_v51 = vadd.f32 %v2854_v6, %v4946_v16  ;;  %v2635_v4 = vpop.f32.mrb[47].mxu0 }
 0x9d2   :  { %v2636_v3 = vadd.f32 %v4946_v16, %v2635_v4 }
 0x9d3   :  { %2659 = vst [vmem:[#allocation17 + $0x78] sm:$0xff] %v2641_v51 }
 0x9d4   :  { %2658 = vst [vmem:[#allocation17 + $0x70] sm:$0xff] %v2636_v3 }
 0x9d5   :  { %4064 = shalt.err (!%p4061_p12)
}
 0x9d6   :  { %s4065_s12 = scalar_lea.hbm %s5019_s8, 2048 }
 0x9d7   :  { %p4066_p13 = scmp.ne.s32.totalorder %s5019_s8, %s4065_s12  ;;  %p4069_p0 = scmp.lt.u32.totalorder %s4065_s12, %s5019_s8 }
 0x9d9   :  { %p4071_p1 = pnand %p4069_p0, %p4066_p13 }
 0x9db   :  { %4074 = shalt.err (!%p4071_p1)
}
 0x9dc   :  { %2678 = dma.vmem_to_hbm [thread:$0]  %s2673_s5, 2048, %s5019_s8, [#allocation8], %s4092_s3, %s4092_s3, %s4093_s28  }
 0x9dd   :  { %4083 = dma.done.wait [#allocation8], 2048  }
 0x9de   :  { %4084 = vsyncadd [#allocation8], 4294965248 }
 0x9df   :  { %4085 = dma.done.wait [#allocation19], 512  }
 0x9e0   :  { %4086 = vsyncadd [#allocation19], 4294966784 }
 0x9e1   :  { %2712 = vsyncpa [#allocation7], 1 }
 0x9e2   :  { %2713 = vsyncpa [#allocation10], 1 }
 0x9e3   :  { %2714 = vsyncpa [#allocation13], 1 }
 0x9e4   :  { %2715 = vsyncpa [#allocation16], 1 }
 0x9e5   :  { %2716 = vsyncpa [#allocation8], 1 }
 0x9e6   :  { %2717 = vsyncpa [#allocation19], 1 }

</bundles_post_ra>
